<compile_context>
chip_gen: v7x
topology: tpu7x:2x2x1
jax: 0.10.0
libtpu: 0.0.40
codegen_flags: <defaults>
</compile_context>

<pallas_src>
import jax
import jax.numpy as jnp
from jax import lax
from jax.experimental import pallas as pl
from jax.experimental.pallas import tpu as pltpu

BN_EPS = 1e-5

_VMEM = pl.BlockSpec(memory_space=pltpu.MemorySpace.VMEM)


# ---------------------------------------------------------------------------
# In-kernel conv_block: Conv3x3(pad=1) -> BN(train) -> ReLU -> MaxPool2x2
# on a lane-dense (N*H, W*Cin) activation -> (N*H/2, (W/2)*Cout)
# ---------------------------------------------------------------------------
def _conv_bn_relu_pool(x, gwb_ref, rows_ref, pools_ref, gb_ref, n, h, w, ci, co):
    f32 = jnp.float32
    nh, wc_in, wc_out = n * h, w * ci, w * co
    wc_half = wc_out // 2

    # ---- unpack the per-layer constant packs (static ref slices) ----
    g_m1 = gwb_ref[0 * wc_in:1 * wc_in, :]                       # (wc_in, wc_out) bf16
    g_0 = gwb_ref[1 * wc_in:2 * wc_in, :]
    g_p1 = gwb_ref[2 * wc_in:3 * wc_in, :]
    bbc = gwb_ref[3 * wc_in:3 * wc_in + co, :].astype(f32)       # (co, wc_out) 0/1 broadcast
    s_m1 = rows_ref[0:nh, :]                                     # (nh, nh) row r <- r-1
    s_p1 = rows_ref[nh:2 * nh, :]                                # (nh, nh) row r <- r+1
    rsel_e = rows_ref[2 * nh:2 * nh + nh // 2, :]                # (nh/2, nh) even rows
    rsel_o = rows_ref[2 * nh + nh // 2:3 * nh, :]                # (nh/2, nh) odd rows
    psel_e = pools_ref[:, 0:wc_half]                             # (wc_out, wc_out/2) even w
    psel_o = pools_ref[:, wc_half:wc_out]                        # (wc_out, wc_out/2) odd w
    pavg = pools_ref[:, wc_out:wc_out + co].astype(f32)          # (wc_out, co) 0/1 channel fold
    gamma = gb_ref[0:1, :]                                       # (1, co) f32
    beta = gb_ref[1:2, :]                                        # (1, co) f32

    # ---- 3x3 conv, padding=1 (bias exactly cancelled by train-mode BN) ----
    xb = x.astype(jnp.bfloat16)
    x_up = jnp.dot(s_m1, xb, preferred_element_type=f32).astype(jnp.bfloat16)
    x_dn = jnp.dot(s_p1, xb, preferred_element_type=f32).astype(jnp.bfloat16)
    z = (jnp.dot(xb, g_0, preferred_element_type=f32)
         + jnp.dot(x_up, g_m1, preferred_element_type=f32)
         + jnp.dot(x_dn, g_p1, preferred_element_type=f32))      # (nh, wc_out) f32

    # ---- BatchNorm2d, training batch statistics (two-pass, all f32) + ReLU ----
    inv_cnt = 1.0 / float(nh * w)
    mean_c = jnp.dot(jnp.sum(z, axis=0, keepdims=True), pavg,
                     preferred_element_type=f32) * inv_cnt       # (1, co)
    zc = z - jnp.dot(mean_c, bbc, preferred_element_type=f32)    # subtract per-channel mean
    var_c = jnp.dot(jnp.sum(zc * zc, axis=0, keepdims=True), pavg,
                    preferred_element_type=f32) * inv_cnt        # (1, co), >= 0 by construction
    scale_c = gamma * lax.rsqrt(var_c + BN_EPS)                  # (1, co)
    y = jnp.maximum(zc * jnp.dot(scale_c, bbc, preferred_element_type=f32)
                    + jnp.dot(beta, bbc, preferred_element_type=f32), 0.0)

    # ---- MaxPool2d(2): pairwise max of exact 0/1 lane / row selections ----
    yb = y.astype(jnp.bfloat16)
    yl = jnp.maximum(jnp.dot(yb, psel_e, preferred_element_type=f32),
                     jnp.dot(yb, psel_o, preferred_element_type=f32))   # (nh, wc_out/2)
    ylb = yl.astype(jnp.bfloat16)
    return jnp.maximum(jnp.dot(rsel_e, ylb, preferred_element_type=f32),
                       jnp.dot(rsel_o, ylb, preferred_element_type=f32))  # (nh/2, wc_out/2)


def _make_kernel(layer_cfg):
    def kernel(*refs):
        x_ref, out_ref = refs[0], refs[-1]
        x = x_ref[...]
        for li, cfg in enumerate(layer_cfg):
            gwb, rows, pools, gb = refs[1 + 4 * li:1 + 4 * (li + 1)]
            x = _conv_bn_relu_pool(x, gwb, rows, pools, gb, *cfg)
        out_ref[...] = x                                         # (N, z_dim)
    return kernel


# ---------------------------------------------------------------------------
# Host-side per-layer constant packing (all heavy per-pixel work stays in-kernel)
# ---------------------------------------------------------------------------
def _layer_constants(wt, gamma, beta, n, h, w):
    """wt: (Co, Ci, 3, 3) PyTorch-layout conv weight.  Returns 4 packed buffers:
       gwb   bf16 (3*w*Ci + Co, w*Co): [G_-1; G_0; G_+1; Bbc]
       rows  bf16 (3*n*h, n*h)       : [S_-1; S_+1; Rsel_even; Rsel_odd]
       pools bf16 (w*Co, w*Co + Co)  : [Psel_even | Psel_odd | Pavg01]
       gb    f32  (2, Co)            : [gamma; beta]
    """
    f32 = jnp.float32
    co, ci = int(wt.shape[0]), int(wt.shape[1])
    nh, wc_in, wc_out = n * h, w * ci, w * co
    wc_half = wc_out // 2

    # Banded conv weights: conv(x) = sum_oi shift_oi(x) @ G_oi on the (W*C) lanes.
    gs = []
    for oi in (-1, 0, 1):
        g = jnp.zeros((wc_in, wc_out), f32)
        for oj in (-1, 0, 1):
            band = jnp.eye(w, k=-oj, dtype=f32)     # band[w_in, w_out] = [w_in == w_out+oj]
            g = g + jnp.kron(band, jnp.transpose(wt[:, :, oi + 1, oj + 1]).astype(f32))
        gs.append(g)
    lane_ch = jnp.arange(wc_out) % co                              # channel of each lane
    bbc = (jnp.arange(co)[:, None] == lane_ch[None, :]).astype(f32)        # (co, wc_out)
    gwb = jnp.concatenate(gs + [bbc], axis=0).astype(jnp.bfloat16)

    # Row-shift (+/-1 within each image, zero at the image boundary) and row-pool.
    r = jnp.arange(nh)[:, None]
    rp = jnp.arange(nh)[None, :]
    s_m1 = ((rp == r - 1) & (r % h != 0)).astype(f32)
    s_p1 = ((rp == r + 1) & (r % h != h - 1)).astype(f32)
    ro = jnp.arange(nh // 2)[:, None]
    rsel_e = (rp == 2 * ro).astype(f32)
    rsel_o = (rp == 2 * ro + 1).astype(f32)
    rows = jnp.concatenate([s_m1, s_p1, rsel_e, rsel_o], axis=0).astype(jnp.bfloat16)

    # Lane-pool selections (even / odd W positions) and 0/1 channel-fold matrix.
    p = jnp.arange(wc_out)[:, None]
    q = jnp.arange(wc_half)[None, :]
    psel_e = (p == 2 * (q // co) * co + q % co).astype(f32)
    psel_o = (p == (2 * (q // co) + 1) * co + q % co).astype(f32)
    pools = jnp.concatenate([psel_e, psel_o, jnp.transpose(bbc)],
                            axis=1).astype(jnp.bfloat16)

    gb = jnp.stack([gamma.astype(f32), beta.astype(f32)], axis=0)  # (2, co)
    return gwb, rows, pools, gb


@jax.jit
def protonet_forward(x_nchw, params):
    """ProtoNet.forward: 6 conv blocks then flatten (single fused Pallas kernel)."""
    n, c0, h0, w0 = x_nchw.shape
    # NCHW -> lane-dense (N*H, W*C)
    x2 = jnp.transpose(x_nchw, (0, 2, 3, 1)).reshape(n * h0, w0 * c0).astype(jnp.float32)

    inputs = [x2]
    layer_cfg = []
    h, w, ci = h0, w0, c0
    for (wt, gamma, beta) in params:
        co = int(wt.shape[0])
        inputs.extend(_layer_constants(wt, gamma, beta, n, h, w))
        layer_cfg.append((n, h, w, ci, co))
        h, w, ci = h // 2, w // 2, co

    if h != 1 or w != 1:
        raise ValueError("ProtoNet needs 64x64 input so the final feature map is 1x1")

    z_dim = layer_cfg[-1][-1]
    # Final map is 1x1, so the (N, z_dim) result equals PyTorch's NCHW .view(N, -1).
    return pl.pallas_call(
        _make_kernel(tuple(layer_cfg)),
        out_shape=jax.ShapeDtypeStruct((n, z_dim), jnp.float32),
        in_specs=[_VMEM] * len(inputs),
        out_specs=_VMEM,
    )(*inputs)


# ---------------------------------------------------------------------------
# Deterministic parameter init (shapes follow the PyTorch module)
# ---------------------------------------------------------------------------
def init_params(key, x_dim, hid_dim, z_dim):
    dims = [(x_dim, hid_dim)] + [(hid_dim, hid_dim)] * 4 + [(hid_dim, z_dim)]
    params = []
    for cin, cout in dims:
        key, kw, kg = jax.random.split(key, 3)
        bound = 1.0 / (cin * 9) ** 0.5
        wt = jax.random.uniform(kw, (cout, cin, 3, 3), jnp.float32, -bound, bound)
        gamma = jax.random.uniform(kg, (cout,), jnp.float32, 0.0, 1.0)  # nn.init.uniform_
        beta = jnp.zeros((cout,), jnp.float32)
        # NOTE: Conv2d bias omitted: with train-mode BatchNorm it is exactly
        # cancelled by the batch-mean subtraction, so the forward output is identical.
        params.append((wt, gamma, beta))
    return params


# ---------------------------------------------------------------------------
if __name__ == "__main__":
    # 6 stride-2 pools require spatial 64 (final 1x1 map, matching the flatten).
    N, X_DIM, HID_DIM, Z_DIM, S = 2, 1, 8, 8, 64

    key = jax.random.PRNGKey(0)
    k_x, k_p = jax.random.split(key)
    x = jax.random.normal(k_x, (N, X_DIM, S, S), jnp.float32)   # NCHW, like PyTorch
    params = init_params(k_p, X_DIM, HID_DIM, Z_DIM)

    out = jax.block_until_ready(protonet_forward(x, params))

    assert out.shape == (N, Z_DIM), out.shape
    assert bool(jnp.all(jnp.isfinite(out)))
    print("KERNEL_OK")
</pallas_src>

<mosaic_0001>
module attributes {stable_mosaic.version = 11 : i64} {
  func.func @kernel(%arg0: memref<128x64xf32, #tpu.memory_space<vmem>>, %arg1: memref<200x512xbf16, #tpu.memory_space<vmem>>, %arg2: memref<384x128xbf16, #tpu.memory_space<vmem>>, %arg3: memref<512x520xbf16, #tpu.memory_space<vmem>>, %arg4: memref<2x8xf32, #tpu.memory_space<vmem>>, %arg5: memref<776x256xbf16, #tpu.memory_space<vmem>>, %arg6: memref<192x64xbf16, #tpu.memory_space<vmem>>, %arg7: memref<256x264xbf16, #tpu.memory_space<vmem>>, %arg8: memref<2x8xf32, #tpu.memory_space<vmem>>, %arg9: memref<392x128xbf16, #tpu.memory_space<vmem>>, %arg10: memref<96x32xbf16, #tpu.memory_space<vmem>>, %arg11: memref<128x136xbf16, #tpu.memory_space<vmem>>, %arg12: memref<2x8xf32, #tpu.memory_space<vmem>>, %arg13: memref<200x64xbf16, #tpu.memory_space<vmem>>, %arg14: memref<48x16xbf16, #tpu.memory_space<vmem>>, %arg15: memref<64x72xbf16, #tpu.memory_space<vmem>>, %arg16: memref<2x8xf32, #tpu.memory_space<vmem>>, %arg17: memref<104x32xbf16, #tpu.memory_space<vmem>>, %arg18: memref<24x8xbf16, #tpu.memory_space<vmem>>, %arg19: memref<32x40xbf16, #tpu.memory_space<vmem>>, %arg20: memref<2x8xf32, #tpu.memory_space<vmem>>, %arg21: memref<56x16xbf16, #tpu.memory_space<vmem>>, %arg22: memref<12x4xbf16, #tpu.memory_space<vmem>>, %arg23: memref<16x24xbf16, #tpu.memory_space<vmem>>, %arg24: memref<2x8xf32, #tpu.memory_space<vmem>>, %arg25: memref<2x8xf32, #tpu.memory_space<vmem>>) attributes {dimension_semantics = [], scalar_prefetch = 0 : i64, scratch_operands = 0 : i64, tpu.core_type = #tpu.core_type<tc>} {
    %c0 = arith.constant 0 : index
    %c0_0 = arith.constant 0 : index
    %0 = vector.load %arg0[%c0, %c0_0] : memref<128x64xf32, #tpu.memory_space<vmem>>, vector<128x64xf32>
    %c0_1 = arith.constant 0 : index
    %c0_2 = arith.constant 0 : index
    %1 = vector.load %arg1[%c0_1, %c0_2] : memref<200x512xbf16, #tpu.memory_space<vmem>>, vector<64x512xbf16>
    %c64 = arith.constant 64 : index
    %c0_3 = arith.constant 0 : index
    %2 = vector.load %arg1[%c64, %c0_3] : memref<200x512xbf16, #tpu.memory_space<vmem>>, vector<64x512xbf16>
    %c128 = arith.constant 128 : index
    %c0_4 = arith.constant 0 : index
    %3 = vector.load %arg1[%c128, %c0_4] : memref<200x512xbf16, #tpu.memory_space<vmem>>, vector<64x512xbf16>
    %c192 = arith.constant 192 : index
    %c0_5 = arith.constant 0 : index
    %4 = vector.load %arg1[%c192, %c0_5] : memref<200x512xbf16, #tpu.memory_space<vmem>>, vector<8x512xbf16>
    %5 = arith.extf %4 : vector<8x512xbf16> to vector<8x512xf32>
    %c0_6 = arith.constant 0 : index
    %c0_7 = arith.constant 0 : index
    %6 = vector.load %arg2[%c0_6, %c0_7] : memref<384x128xbf16, #tpu.memory_space<vmem>>, vector<128x128xbf16>
    %c128_8 = arith.constant 128 : index
    %c0_9 = arith.constant 0 : index
    %7 = vector.load %arg2[%c128_8, %c0_9] : memref<384x128xbf16, #tpu.memory_space<vmem>>, vector<128x128xbf16>
    %c256 = arith.constant 256 : index
    %c0_10 = arith.constant 0 : index
    %8 = vector.load %arg2[%c256, %c0_10] : memref<384x128xbf16, #tpu.memory_space<vmem>>, vector<64x128xbf16>
    %c320 = arith.constant 320 : index
    %c0_11 = arith.constant 0 : index
    %9 = vector.load %arg2[%c320, %c0_11] : memref<384x128xbf16, #tpu.memory_space<vmem>>, vector<64x128xbf16>
    %c0_12 = arith.constant 0 : index
    %c0_13 = arith.constant 0 : index
    %10 = vector.load %arg3[%c0_12, %c0_13] : memref<512x520xbf16, #tpu.memory_space<vmem>>, vector<512x256xbf16>
    %c0_14 = arith.constant 0 : index
    %c256_15 = arith.constant 256 : index
    %11 = vector.load %arg3[%c0_14, %c256_15] : memref<512x520xbf16, #tpu.memory_space<vmem>>, vector<512x256xbf16>
    %c0_16 = arith.constant 0 : index
    %c512 = arith.constant 512 : index
    %12 = vector.load %arg3[%c0_16, %c512] : memref<512x520xbf16, #tpu.memory_space<vmem>>, vector<512x8xbf16>
    %13 = arith.extf %12 : vector<512x8xbf16> to vector<512x8xf32>
    %c0_17 = arith.constant 0 : index
    %c0_18 = arith.constant 0 : index
    %14 = vector.load %arg4[%c0_17, %c0_18] : memref<2x8xf32, #tpu.memory_space<vmem>>, vector<1x8xf32>
    %c1 = arith.constant 1 : index
    %c0_19 = arith.constant 0 : index
    %15 = vector.load %arg4[%c1, %c0_19] : memref<2x8xf32, #tpu.memory_space<vmem>>, vector<1x8xf32>
    %16 = arith.truncf %0 : vector<128x64xf32> to vector<128x64xbf16>
    %cst = arith.constant dense<0.000000e+00> : vector<128x64xf32>
    %17 = tpu.matmul %6, %16, %cst {dimension_numbers = #tpu.dot_dimension_numbers<[1], [0], [0], [1], [0, 0, 1, 1], [], []>} : vector<128x128xbf16>, vector<128x64xbf16>, vector<128x64xf32> -> vector<128x64xf32>
    %18 = arith.truncf %17 : vector<128x64xf32> to vector<128x64xbf16>
    %cst_20 = arith.constant dense<0.000000e+00> : vector<128x64xf32>
    %19 = tpu.matmul %7, %16, %cst_20 {dimension_numbers = #tpu.dot_dimension_numbers<[1], [0], [0], [1], [0, 0, 1, 1], [], []>} : vector<128x128xbf16>, vector<128x64xbf16>, vector<128x64xf32> -> vector<128x64xf32>
    %20 = arith.truncf %19 : vector<128x64xf32> to vector<128x64xbf16>
    %cst_21 = arith.constant dense<0.000000e+00> : vector<128x512xf32>
    %21 = tpu.matmul %16, %2, %cst_21 {dimension_numbers = #tpu.dot_dimension_numbers<[1], [0], [0], [1], [0, 0, 1, 1], [], []>} : vector<128x64xbf16>, vector<64x512xbf16>, vector<128x512xf32> -> vector<128x512xf32>
    %cst_22 = arith.constant dense<0.000000e+00> : vector<128x512xf32>
    %22 = tpu.matmul %18, %1, %cst_22 {dimension_numbers = #tpu.dot_dimension_numbers<[1], [0], [0], [1], [0, 0, 1, 1], [], []>} : vector<128x64xbf16>, vector<64x512xbf16>, vector<128x512xf32> -> vector<128x512xf32>
    %23 = arith.addf %21, %22 : vector<128x512xf32>
    %cst_23 = arith.constant dense<0.000000e+00> : vector<128x512xf32>
    %24 = tpu.matmul %20, %3, %cst_23 {dimension_numbers = #tpu.dot_dimension_numbers<[1], [0], [0], [1], [0, 0, 1, 1], [], []>} : vector<128x64xbf16>, vector<64x512xbf16>, vector<128x512xf32> -> vector<128x512xf32>
    %25 = arith.addf %23, %24 : vector<128x512xf32>
    %cst_24 = arith.constant dense<0.000000e+00> : vector<512xf32>
    %26 = vector.multi_reduction <add>, %25, %cst_24 [0] : vector<128x512xf32> to vector<512xf32>
    %27 = vector.shape_cast %26 : vector<512xf32> to vector<1x512xf32>
    %cst_25 = arith.constant dense<0.000000e+00> : vector<1x8xf32>
    %28 = tpu.matmul %27, %13, %cst_25 {dimension_numbers = #tpu.dot_dimension_numbers<[1], [0], [0], [1], [0, 0, 1, 1], [], []>} : vector<1x512xf32>, vector<512x8xf32>, vector<1x8xf32> -> vector<1x8xf32>
    %cst_26 = arith.constant 1.22070313E-4 : f32
    %29 = vector.broadcast %cst_26 : f32 to vector<1x8xf32>
    %30 = arith.mulf %28, %29 : vector<1x8xf32>
    %cst_27 = arith.constant dense<0.000000e+00> : vector<1x512xf32>
    %31 = tpu.matmul %30, %5, %cst_27 {dimension_numbers = #tpu.dot_dimension_numbers<[1], [0], [0], [1], [0, 0, 1, 1], [], []>} : vector<1x8xf32>, vector<8x512xf32>, vector<1x512xf32> -> vector<1x512xf32>
    %32 = vector.broadcast %31 : vector<1x512xf32> to vector<128x512xf32>
    %33 = arith.subf %25, %32 : vector<128x512xf32>
    %34 = arith.mulf %33, %33 : vector<128x512xf32>
    %cst_28 = arith.constant dense<0.000000e+00> : vector<512xf32>
    %35 = vector.multi_reduction <add>, %34, %cst_28 [0] : vector<128x512xf32> to vector<512xf32>
    %36 = vector.shape_cast %35 : vector<512xf32> to vector<1x512xf32>
    %cst_29 = arith.constant dense<0.000000e+00> : vector<1x8xf32>
    %37 = tpu.matmul %36, %13, %cst_29 {dimension_numbers = #tpu.dot_dimension_numbers<[1], [0], [0], [1], [0, 0, 1, 1], [], []>} : vector<1x512xf32>, vector<512x8xf32>, vector<1x8xf32> -> vector<1x8xf32>
    %cst_30 = arith.constant 1.22070313E-4 : f32
    %38 = vector.broadcast %cst_30 : f32 to vector<1x8xf32>
    %39 = arith.mulf %37, %38 : vector<1x8xf32>
    %cst_31 = arith.constant 9.99999974E-6 : f32
    %40 = vector.broadcast %cst_31 : f32 to vector<1x8xf32>
    %41 = arith.addf %39, %40 : vector<1x8xf32>
    %42 = math.rsqrt %41 : vector<1x8xf32>
    %43 = arith.mulf %14, %42 : vector<1x8xf32>
    %cst_32 = arith.constant dense<0.000000e+00> : vector<1x512xf32>
    %44 = tpu.matmul %43, %5, %cst_32 {dimension_numbers = #tpu.dot_dimension_numbers<[1], [0], [0], [1], [0, 0, 1, 1], [], []>} : vector<1x8xf32>, vector<8x512xf32>, vector<1x512xf32> -> vector<1x512xf32>
    %45 = vector.broadcast %44 : vector<1x512xf32> to vector<128x512xf32>
    %46 = arith.mulf %33, %45 : vector<128x512xf32>
    %cst_33 = arith.constant dense<0.000000e+00> : vector<1x512xf32>
    %47 = tpu.matmul %15, %5, %cst_33 {dimension_numbers = #tpu.dot_dimension_numbers<[1], [0], [0], [1], [0, 0, 1, 1], [], []>} : vector<1x8xf32>, vector<8x512xf32>, vector<1x512xf32> -> vector<1x512xf32>
    %48 = vector.broadcast %47 : vector<1x512xf32> to vector<128x512xf32>
    %49 = arith.addf %46, %48 : vector<128x512xf32>
    %cst_34 = arith.constant 0.000000e+00 : f32
    %50 = vector.broadcast %cst_34 : f32 to vector<128x512xf32>
    %51 = arith.maximumf %49, %50 : vector<128x512xf32>
    %52 = arith.truncf %51 : vector<128x512xf32> to vector<128x512xbf16>
    %cst_35 = arith.constant dense<0.000000e+00> : vector<128x256xf32>
    %53 = tpu.matmul %52, %10, %cst_35 {dimension_numbers = #tpu.dot_dimension_numbers<[1], [0], [0], [1], [0, 0, 1, 1], [], []>} : vector<128x512xbf16>, vector<512x256xbf16>, vector<128x256xf32> -> vector<128x256xf32>
    %cst_36 = arith.constant dense<0.000000e+00> : vector<128x256xf32>
    %54 = tpu.matmul %52, %11, %cst_36 {dimension_numbers = #tpu.dot_dimension_numbers<[1], [0], [0], [1], [0, 0, 1, 1], [], []>} : vector<128x512xbf16>, vector<512x256xbf16>, vector<128x256xf32> -> vector<128x256xf32>
    %55 = arith.maximumf %53, %54 : vector<128x256xf32>
    %56 = arith.truncf %55 : vector<128x256xf32> to vector<128x256xbf16>
    %cst_37 = arith.constant dense<0.000000e+00> : vector<64x256xf32>
    %57 = tpu.matmul %8, %56, %cst_37 {dimension_numbers = #tpu.dot_dimension_numbers<[1], [0], [0], [1], [0, 0, 1, 1], [], []>} : vector<64x128xbf16>, vector<128x256xbf16>, vector<64x256xf32> -> vector<64x256xf32>
    %cst_38 = arith.constant dense<0.000000e+00> : vector<64x256xf32>
    %58 = tpu.matmul %9, %56, %cst_38 {dimension_numbers = #tpu.dot_dimension_numbers<[1], [0], [0], [1], [0, 0, 1, 1], [], []>} : vector<64x128xbf16>, vector<128x256xbf16>, vector<64x256xf32> -> vector<64x256xf32>
    %59 = arith.maximumf %57, %58 : vector<64x256xf32>
    %c0_39 = arith.constant 0 : index
    %c0_40 = arith.constant 0 : index
    %60 = vector.load %arg5[%c0_39, %c0_40] : memref<776x256xbf16, #tpu.memory_space<vmem>>, vector<256x256xbf16>
    %c256_41 = arith.constant 256 : index
    %c0_42 = arith.constant 0 : index
    %61 = vector.load %arg5[%c256_41, %c0_42] : memref<776x256xbf16, #tpu.memory_space<vmem>>, vector<256x256xbf16>
    %c512_43 = arith.constant 512 : index
    %c0_44 = arith.constant 0 : index
    %62 = vector.load %arg5[%c512_43, %c0_44] : memref<776x256xbf16, #tpu.memory_space<vmem>>, vector<256x256xbf16>
    %c768 = arith.constant 768 : index
    %c0_45 = arith.constant 0 : index
    %63 = vector.load %arg5[%c768, %c0_45] : memref<776x256xbf16, #tpu.memory_space<vmem>>, vector<8x256xbf16>
    %64 = arith.extf %63 : vector<8x256xbf16> to vector<8x256xf32>
    %c0_46 = arith.constant 0 : index
    %c0_47 = arith.constant 0 : index
    %65 = vector.load %arg6[%c0_46, %c0_47] : memref<192x64xbf16, #tpu.memory_space<vmem>>, vector<64x64xbf16>
    %c64_48 = arith.constant 64 : index
    %c0_49 = arith.constant 0 : index
    %66 = vector.load %arg6[%c64_48, %c0_49] : memref<192x64xbf16, #tpu.memory_space<vmem>>, vector<64x64xbf16>
    %c128_50 = arith.constant 128 : index
    %c0_51 = arith.constant 0 : index
    %67 = vector.load %arg6[%c128_50, %c0_51] : memref<192x64xbf16, #tpu.memory_space<vmem>>, vector<32x64xbf16>
    %c160 = arith.constant 160 : index
    %c0_52 = arith.constant 0 : index
    %68 = vector.load %arg6[%c160, %c0_52] : memref<192x64xbf16, #tpu.memory_space<vmem>>, vector<32x64xbf16>
    %c0_53 = arith.constant 0 : index
    %c0_54 = arith.constant 0 : index
    %69 = vector.load %arg7[%c0_53, %c0_54] : memref<256x264xbf16, #tpu.memory_space<vmem>>, vector<256x128xbf16>
    %c0_55 = arith.constant 0 : index
    %c128_56 = arith.constant 128 : index
    %70 = vector.load %arg7[%c0_55, %c128_56] : memref<256x264xbf16, #tpu.memory_space<vmem>>, vector<256x128xbf16>
    %c0_57 = arith.constant 0 : index
    %c256_58 = arith.constant 256 : index
    %71 = vector.load %arg7[%c0_57, %c256_58] : memref<256x264xbf16, #tpu.memory_space<vmem>>, vector<256x8xbf16>
    %72 = arith.extf %71 : vector<256x8xbf16> to vector<256x8xf32>
    %c0_59 = arith.constant 0 : index
    %c0_60 = arith.constant 0 : index
    %73 = vector.load %arg8[%c0_59, %c0_60] : memref<2x8xf32, #tpu.memory_space<vmem>>, vector<1x8xf32>
    %c1_61 = arith.constant 1 : index
    %c0_62 = arith.constant 0 : index
    %74 = vector.load %arg8[%c1_61, %c0_62] : memref<2x8xf32, #tpu.memory_space<vmem>>, vector<1x8xf32>
    %75 = arith.truncf %59 : vector<64x256xf32> to vector<64x256xbf16>
    %cst_63 = arith.constant dense<0.000000e+00> : vector<64x256xf32>
    %76 = tpu.matmul %65, %75, %cst_63 {dimension_numbers = #tpu.dot_dimension_numbers<[1], [0], [0], [1], [0, 0, 1, 1], [], []>} : vector<64x64xbf16>, vector<64x256xbf16>, vector<64x256xf32> -> vector<64x256xf32>
    %77 = arith.truncf %76 : vector<64x256xf32> to vector<64x256xbf16>
    %cst_64 = arith.constant dense<0.000000e+00> : vector<64x256xf32>
    %78 = tpu.matmul %66, %75, %cst_64 {dimension_numbers = #tpu.dot_dimension_numbers<[1], [0], [0], [1], [0, 0, 1, 1], [], []>} : vector<64x64xbf16>, vector<64x256xbf16>, vector<64x256xf32> -> vector<64x256xf32>
    %79 = arith.truncf %78 : vector<64x256xf32> to vector<64x256xbf16>
    %cst_65 = arith.constant dense<0.000000e+00> : vector<64x256xf32>
    %80 = tpu.matmul %75, %61, %cst_65 {dimension_numbers = #tpu.dot_dimension_numbers<[1], [0], [0], [1], [0, 0, 1, 1], [], []>} : vector<64x256xbf16>, vector<256x256xbf16>, vector<64x256xf32> -> vector<64x256xf32>
    %cst_66 = arith.constant dense<0.000000e+00> : vector<64x256xf32>
    %81 = tpu.matmul %77, %60, %cst_66 {dimension_numbers = #tpu.dot_dimension_numbers<[1], [0], [0], [1], [0, 0, 1, 1], [], []>} : vector<64x256xbf16>, vector<256x256xbf16>, vector<64x256xf32> -> vector<64x256xf32>
    %82 = arith.addf %80, %81 : vector<64x256xf32>
    %cst_67 = arith.constant dense<0.000000e+00> : vector<64x256xf32>
    %83 = tpu.matmul %79, %62, %cst_67 {dimension_numbers = #tpu.dot_dimension_numbers<[1], [0], [0], [1], [0, 0, 1, 1], [], []>} : vector<64x256xbf16>, vector<256x256xbf16>, vector<64x256xf32> -> vector<64x256xf32>
    %84 = arith.addf %82, %83 : vector<64x256xf32>
    %cst_68 = arith.constant dense<0.000000e+00> : vector<256xf32>
    %85 = vector.multi_reduction <add>, %84, %cst_68 [0] : vector<64x256xf32> to vector<256xf32>
    %86 = vector.shape_cast %85 : vector<256xf32> to vector<1x256xf32>
    %cst_69 = arith.constant dense<0.000000e+00> : vector<1x8xf32>
    %87 = tpu.matmul %86, %72, %cst_69 {dimension_numbers = #tpu.dot_dimension_numbers<[1], [0], [0], [1], [0, 0, 1, 1], [], []>} : vector<1x256xf32>, vector<256x8xf32>, vector<1x8xf32> -> vector<1x8xf32>
    %cst_70 = arith.constant 4.8828125E-4 : f32
    %88 = vector.broadcast %cst_70 : f32 to vector<1x8xf32>
    %89 = arith.mulf %87, %88 : vector<1x8xf32>
    %cst_71 = arith.constant dense<0.000000e+00> : vector<1x256xf32>
    %90 = tpu.matmul %89, %64, %cst_71 {dimension_numbers = #tpu.dot_dimension_numbers<[1], [0], [0], [1], [0, 0, 1, 1], [], []>} : vector<1x8xf32>, vector<8x256xf32>, vector<1x256xf32> -> vector<1x256xf32>
    %91 = vector.broadcast %90 : vector<1x256xf32> to vector<64x256xf32>
    %92 = arith.subf %84, %91 : vector<64x256xf32>
    %93 = arith.mulf %92, %92 : vector<64x256xf32>
    %cst_72 = arith.constant dense<0.000000e+00> : vector<256xf32>
    %94 = vector.multi_reduction <add>, %93, %cst_72 [0] : vector<64x256xf32> to vector<256xf32>
    %95 = vector.shape_cast %94 : vector<256xf32> to vector<1x256xf32>
    %cst_73 = arith.constant dense<0.000000e+00> : vector<1x8xf32>
    %96 = tpu.matmul %95, %72, %cst_73 {dimension_numbers = #tpu.dot_dimension_numbers<[1], [0], [0], [1], [0, 0, 1, 1], [], []>} : vector<1x256xf32>, vector<256x8xf32>, vector<1x8xf32> -> vector<1x8xf32>
    %cst_74 = arith.constant 4.8828125E-4 : f32
    %97 = vector.broadcast %cst_74 : f32 to vector<1x8xf32>
    %98 = arith.mulf %96, %97 : vector<1x8xf32>
    %cst_75 = arith.constant 9.99999974E-6 : f32
    %99 = vector.broadcast %cst_75 : f32 to vector<1x8xf32>
    %100 = arith.addf %98, %99 : vector<1x8xf32>
    %101 = math.rsqrt %100 : vector<1x8xf32>
    %102 = arith.mulf %73, %101 : vector<1x8xf32>
    %cst_76 = arith.constant dense<0.000000e+00> : vector<1x256xf32>
    %103 = tpu.matmul %102, %64, %cst_76 {dimension_numbers = #tpu.dot_dimension_numbers<[1], [0], [0], [1], [0, 0, 1, 1], [], []>} : vector<1x8xf32>, vector<8x256xf32>, vector<1x256xf32> -> vector<1x256xf32>
    %104 = vector.broadcast %103 : vector<1x256xf32> to vector<64x256xf32>
    %105 = arith.mulf %92, %104 : vector<64x256xf32>
    %cst_77 = arith.constant dense<0.000000e+00> : vector<1x256xf32>
    %106 = tpu.matmul %74, %64, %cst_77 {dimension_numbers = #tpu.dot_dimension_numbers<[1], [0], [0], [1], [0, 0, 1, 1], [], []>} : vector<1x8xf32>, vector<8x256xf32>, vector<1x256xf32> -> vector<1x256xf32>
    %107 = vector.broadcast %106 : vector<1x256xf32> to vector<64x256xf32>
    %108 = arith.addf %105, %107 : vector<64x256xf32>
    %cst_78 = arith.constant 0.000000e+00 : f32
    %109 = vector.broadcast %cst_78 : f32 to vector<64x256xf32>
    %110 = arith.maximumf %108, %109 : vector<64x256xf32>
    %111 = arith.truncf %110 : vector<64x256xf32> to vector<64x256xbf16>
    %cst_79 = arith.constant dense<0.000000e+00> : vector<64x128xf32>
    %112 = tpu.matmul %111, %69, %cst_79 {dimension_numbers = #tpu.dot_dimension_numbers<[1], [0], [0], [1], [0, 0, 1, 1], [], []>} : vector<64x256xbf16>, vector<256x128xbf16>, vector<64x128xf32> -> vector<64x128xf32>
    %cst_80 = arith.constant dense<0.000000e+00> : vector<64x128xf32>
    %113 = tpu.matmul %111, %70, %cst_80 {dimension_numbers = #tpu.dot_dimension_numbers<[1], [0], [0], [1], [0, 0, 1, 1], [], []>} : vector<64x256xbf16>, vector<256x128xbf16>, vector<64x128xf32> -> vector<64x128xf32>
    %114 = arith.maximumf %112, %113 : vector<64x128xf32>
    %115 = arith.truncf %114 : vector<64x128xf32> to vector<64x128xbf16>
    %cst_81 = arith.constant dense<0.000000e+00> : vector<32x128xf32>
    %116 = tpu.matmul %67, %115, %cst_81 {dimension_numbers = #tpu.dot_dimension_numbers<[1], [0], [0], [1], [0, 0, 1, 1], [], []>} : vector<32x64xbf16>, vector<64x128xbf16>, vector<32x128xf32> -> vector<32x128xf32>
    %cst_82 = arith.constant dense<0.000000e+00> : vector<32x128xf32>
    %117 = tpu.matmul %68, %115, %cst_82 {dimension_numbers = #tpu.dot_dimension_numbers<[1], [0], [0], [1], [0, 0, 1, 1], [], []>} : vector<32x64xbf16>, vector<64x128xbf16>, vector<32x128xf32> -> vector<32x128xf32>
    %118 = arith.maximumf %116, %117 : vector<32x128xf32>
    %c0_83 = arith.constant 0 : index
    %c0_84 = arith.constant 0 : index
    %119 = vector.load %arg9[%c0_83, %c0_84] : memref<392x128xbf16, #tpu.memory_space<vmem>>, vector<128x128xbf16>
    %c128_85 = arith.constant 128 : index
    %c0_86 = arith.constant 0 : index
    %120 = vector.load %arg9[%c128_85, %c0_86] : memref<392x128xbf16, #tpu.memory_space<vmem>>, vector<128x128xbf16>
    %c256_87 = arith.constant 256 : index
    %c0_88 = arith.constant 0 : index
    %121 = vector.load %arg9[%c256_87, %c0_88] : memref<392x128xbf16, #tpu.memory_space<vmem>>, vector<128x128xbf16>
    %c384 = arith.constant 384 : index
    %c0_89 = arith.constant 0 : index
    %122 = vector.load %arg9[%c384, %c0_89] : memref<392x128xbf16, #tpu.memory_space<vmem>>, vector<8x128xbf16>
    %123 = arith.extf %122 : vector<8x128xbf16> to vector<8x128xf32>
    %c0_90 = arith.constant 0 : index
    %c0_91 = arith.constant 0 : index
    %124 = vector.load %arg10[%c0_90, %c0_91] : memref<96x32xbf16, #tpu.memory_space<vmem>>, vector<32x32xbf16>
    %c32 = arith.constant 32 : index
    %c0_92 = arith.constant 0 : index
    %125 = vector.load %arg10[%c32, %c0_92] : memref<96x32xbf16, #tpu.memory_space<vmem>>, vector<32x32xbf16>
    %c64_93 = arith.constant 64 : index
    %c0_94 = arith.constant 0 : index
    %126 = vector.load %arg10[%c64_93, %c0_94] : memref<96x32xbf16, #tpu.memory_space<vmem>>, vector<16x32xbf16>
    %c80 = arith.constant 80 : index
    %c0_95 = arith.constant 0 : index
    %127 = vector.load %arg10[%c80, %c0_95] : memref<96x32xbf16, #tpu.memory_space<vmem>>, vector<16x32xbf16>
    %c0_96 = arith.constant 0 : index
    %c0_97 = arith.constant 0 : index
    %128 = vector.load %arg11[%c0_96, %c0_97] : memref<128x136xbf16, #tpu.memory_space<vmem>>, vector<128x64xbf16>
    %c0_98 = arith.constant 0 : index
    %c64_99 = arith.constant 64 : index
    %129 = vector.load %arg11[%c0_98, %c64_99] : memref<128x136xbf16, #tpu.memory_space<vmem>>, vector<128x64xbf16>
    %c0_100 = arith.constant 0 : index
    %c128_101 = arith.constant 128 : index
    %130 = vector.load %arg11[%c0_100, %c128_101] : memref<128x136xbf16, #tpu.memory_space<vmem>>, vector<128x8xbf16>
    %131 = arith.extf %130 : vector<128x8xbf16> to vector<128x8xf32>
    %c0_102 = arith.constant 0 : index
    %c0_103 = arith.constant 0 : index
    %132 = vector.load %arg12[%c0_102, %c0_103] : memref<2x8xf32, #tpu.memory_space<vmem>>, vector<1x8xf32>
    %c1_104 = arith.constant 1 : index
    %c0_105 = arith.constant 0 : index
    %133 = vector.load %arg12[%c1_104, %c0_105] : memref<2x8xf32, #tpu.memory_space<vmem>>, vector<1x8xf32>
    %134 = arith.truncf %118 : vector<32x128xf32> to vector<32x128xbf16>
    %cst_106 = arith.constant dense<0.000000e+00> : vector<32x128xf32>
    %135 = tpu.matmul %124, %134, %cst_106 {dimension_numbers = #tpu.dot_dimension_numbers<[1], [0], [0], [1], [0, 0, 1, 1], [], []>} : vector<32x32xbf16>, vector<32x128xbf16>, vector<32x128xf32> -> vector<32x128xf32>
    %136 = arith.truncf %135 : vector<32x128xf32> to vector<32x128xbf16>
    %cst_107 = arith.constant dense<0.000000e+00> : vector<32x128xf32>
    %137 = tpu.matmul %125, %134, %cst_107 {dimension_numbers = #tpu.dot_dimension_numbers<[1], [0], [0], [1], [0, 0, 1, 1], [], []>} : vector<32x32xbf16>, vector<32x128xbf16>, vector<32x128xf32> -> vector<32x128xf32>
    %138 = arith.truncf %137 : vector<32x128xf32> to vector<32x128xbf16>
    %cst_108 = arith.constant dense<0.000000e+00> : vector<32x128xf32>
    %139 = tpu.matmul %134, %120, %cst_108 {dimension_numbers = #tpu.dot_dimension_numbers<[1], [0], [0], [1], [0, 0, 1, 1], [], []>} : vector<32x128xbf16>, vector<128x128xbf16>, vector<32x128xf32> -> vector<32x128xf32>
    %cst_109 = arith.constant dense<0.000000e+00> : vector<32x128xf32>
    %140 = tpu.matmul %136, %119, %cst_109 {dimension_numbers = #tpu.dot_dimension_numbers<[1], [0], [0], [1], [0, 0, 1, 1], [], []>} : vector<32x128xbf16>, vector<128x128xbf16>, vector<32x128xf32> -> vector<32x128xf32>
    %141 = arith.addf %139, %140 : vector<32x128xf32>
    %cst_110 = arith.constant dense<0.000000e+00> : vector<32x128xf32>
    %142 = tpu.matmul %138, %121, %cst_110 {dimension_numbers = #tpu.dot_dimension_numbers<[1], [0], [0], [1], [0, 0, 1, 1], [], []>} : vector<32x128xbf16>, vector<128x128xbf16>, vector<32x128xf32> -> vector<32x128xf32>
    %143 = arith.addf %141, %142 : vector<32x128xf32>
    %cst_111 = arith.constant dense<0.000000e+00> : vector<128xf32>
    %144 = vector.multi_reduction <add>, %143, %cst_111 [0] : vector<32x128xf32> to vector<128xf32>
    %145 = vector.shape_cast %144 : vector<128xf32> to vector<1x128xf32>
    %cst_112 = arith.constant dense<0.000000e+00> : vector<1x8xf32>
    %146 = tpu.matmul %145, %131, %cst_112 {dimension_numbers = #tpu.dot_dimension_numbers<[1], [0], [0], [1], [0, 0, 1, 1], [], []>} : vector<1x128xf32>, vector<128x8xf32>, vector<1x8xf32> -> vector<1x8xf32>
    %cst_113 = arith.constant 0.001953125 : f32
    %147 = vector.broadcast %cst_113 : f32 to vector<1x8xf32>
    %148 = arith.mulf %146, %147 : vector<1x8xf32>
    %cst_114 = arith.constant dense<0.000000e+00> : vector<1x128xf32>
    %149 = tpu.matmul %148, %123, %cst_114 {dimension_numbers = #tpu.dot_dimension_numbers<[1], [0], [0], [1], [0, 0, 1, 1], [], []>} : vector<1x8xf32>, vector<8x128xf32>, vector<1x128xf32> -> vector<1x128xf32>
    %150 = vector.broadcast %149 : vector<1x128xf32> to vector<32x128xf32>
    %151 = arith.subf %143, %150 : vector<32x128xf32>
    %152 = arith.mulf %151, %151 : vector<32x128xf32>
    %cst_115 = arith.constant dense<0.000000e+00> : vector<128xf32>
    %153 = vector.multi_reduction <add>, %152, %cst_115 [0] : vector<32x128xf32> to vector<128xf32>
    %154 = vector.shape_cast %153 : vector<128xf32> to vector<1x128xf32>
    %cst_116 = arith.constant dense<0.000000e+00> : vector<1x8xf32>
    %155 = tpu.matmul %154, %131, %cst_116 {dimension_numbers = #tpu.dot_dimension_numbers<[1], [0], [0], [1], [0, 0, 1, 1], [], []>} : vector<1x128xf32>, vector<128x8xf32>, vector<1x8xf32> -> vector<1x8xf32>
    %cst_117 = arith.constant 0.001953125 : f32
    %156 = vector.broadcast %cst_117 : f32 to vector<1x8xf32>
    %157 = arith.mulf %155, %156 : vector<1x8xf32>
    %cst_118 = arith.constant 9.99999974E-6 : f32
    %158 = vector.broadcast %cst_118 : f32 to vector<1x8xf32>
    %159 = arith.addf %157, %158 : vector<1x8xf32>
    %160 = math.rsqrt %159 : vector<1x8xf32>
    %161 = arith.mulf %132, %160 : vector<1x8xf32>
    %cst_119 = arith.constant dense<0.000000e+00> : vector<1x128xf32>
    %162 = tpu.matmul %161, %123, %cst_119 {dimension_numbers = #tpu.dot_dimension_numbers<[1], [0], [0], [1], [0, 0, 1, 1], [], []>} : vector<1x8xf32>, vector<8x128xf32>, vector<1x128xf32> -> vector<1x128xf32>
    %163 = vector.broadcast %162 : vector<1x128xf32> to vector<32x128xf32>
    %164 = arith.mulf %151, %163 : vector<32x128xf32>
    %cst_120 = arith.constant dense<0.000000e+00> : vector<1x128xf32>
    %165 = tpu.matmul %133, %123, %cst_120 {dimension_numbers = #tpu.dot_dimension_numbers<[1], [0], [0], [1], [0, 0, 1, 1], [], []>} : vector<1x8xf32>, vector<8x128xf32>, vector<1x128xf32> -> vector<1x128xf32>
    %166 = vector.broadcast %165 : vector<1x128xf32> to vector<32x128xf32>
    %167 = arith.addf %164, %166 : vector<32x128xf32>
    %cst_121 = arith.constant 0.000000e+00 : f32
    %168 = vector.broadcast %cst_121 : f32 to vector<32x128xf32>
    %169 = arith.maximumf %167, %168 : vector<32x128xf32>
    %170 = arith.truncf %169 : vector<32x128xf32> to vector<32x128xbf16>
    %cst_122 = arith.constant dense<0.000000e+00> : vector<32x64xf32>
    %171 = tpu.matmul %170, %128, %cst_122 {dimension_numbers = #tpu.dot_dimension_numbers<[1], [0], [0], [1], [0, 0, 1, 1], [], []>} : vector<32x128xbf16>, vector<128x64xbf16>, vector<32x64xf32> -> vector<32x64xf32>
    %cst_123 = arith.constant dense<0.000000e+00> : vector<32x64xf32>
    %172 = tpu.matmul %170, %129, %cst_123 {dimension_numbers = #tpu.dot_dimension_numbers<[1], [0], [0], [1], [0, 0, 1, 1], [], []>} : vector<32x128xbf16>, vector<128x64xbf16>, vector<32x64xf32> -> vector<32x64xf32>
    %173 = arith.maximumf %171, %172 : vector<32x64xf32>
    %174 = arith.truncf %173 : vector<32x64xf32> to vector<32x64xbf16>
    %cst_124 = arith.constant dense<0.000000e+00> : vector<16x64xf32>
    %175 = tpu.matmul %126, %174, %cst_124 {dimension_numbers = #tpu.dot_dimension_numbers<[1], [0], [0], [1], [0, 0, 1, 1], [], []>} : vector<16x32xbf16>, vector<32x64xbf16>, vector<16x64xf32> -> vector<16x64xf32>
    %cst_125 = arith.constant dense<0.000000e+00> : vector<16x64xf32>
    %176 = tpu.matmul %127, %174, %cst_125 {dimension_numbers = #tpu.dot_dimension_numbers<[1], [0], [0], [1], [0, 0, 1, 1], [], []>} : vector<16x32xbf16>, vector<32x64xbf16>, vector<16x64xf32> -> vector<16x64xf32>
    %177 = arith.maximumf %175, %176 : vector<16x64xf32>
    %c0_126 = arith.constant 0 : index
    %c0_127 = arith.constant 0 : index
    %178 = vector.load %arg13[%c0_126, %c0_127] : memref<200x64xbf16, #tpu.memory_space<vmem>>, vector<64x64xbf16>
    %c64_128 = arith.constant 64 : index
    %c0_129 = arith.constant 0 : index
    %179 = vector.load %arg13[%c64_128, %c0_129] : memref<200x64xbf16, #tpu.memory_space<vmem>>, vector<64x64xbf16>
    %c128_130 = arith.constant 128 : index
    %c0_131 = arith.constant 0 : index
    %180 = vector.load %arg13[%c128_130, %c0_131] : memref<200x64xbf16, #tpu.memory_space<vmem>>, vector<64x64xbf16>
    %c192_132 = arith.constant 192 : index
    %c0_133 = arith.constant 0 : index
    %181 = vector.load %arg13[%c192_132, %c0_133] : memref<200x64xbf16, #tpu.memory_space<vmem>>, vector<8x64xbf16>
    %182 = arith.extf %181 : vector<8x64xbf16> to vector<8x64xf32>
    %c0_134 = arith.constant 0 : index
    %c0_135 = arith.constant 0 : index
    %183 = vector.load %arg14[%c0_134, %c0_135] : memref<48x16xbf16, #tpu.memory_space<vmem>>, vector<16x16xbf16>
    %c16 = arith.constant 16 : index
    %c0_136 = arith.constant 0 : index
    %184 = vector.load %arg14[%c16, %c0_136] : memref<48x16xbf16, #tpu.memory_space<vmem>>, vector<16x16xbf16>
    %c32_137 = arith.constant 32 : index
    %c0_138 = arith.constant 0 : index
    %185 = vector.load %arg14[%c32_137, %c0_138] : memref<48x16xbf16, #tpu.memory_space<vmem>>, vector<8x16xbf16>
    %c40 = arith.constant 40 : index
    %c0_139 = arith.constant 0 : index
    %186 = vector.load %arg14[%c40, %c0_139] : memref<48x16xbf16, #tpu.memory_space<vmem>>, vector<8x16xbf16>
    %c0_140 = arith.constant 0 : index
    %c0_141 = arith.constant 0 : index
    %187 = vector.load %arg15[%c0_140, %c0_141] : memref<64x72xbf16, #tpu.memory_space<vmem>>, vector<64x32xbf16>
    %c0_142 = arith.constant 0 : index
    %c32_143 = arith.constant 32 : index
    %188 = vector.load %arg15[%c0_142, %c32_143] : memref<64x72xbf16, #tpu.memory_space<vmem>>, vector<64x32xbf16>
    %c0_144 = arith.constant 0 : index
    %c64_145 = arith.constant 64 : index
    %189 = vector.load %arg15[%c0_144, %c64_145] : memref<64x72xbf16, #tpu.memory_space<vmem>>, vector<64x8xbf16>
    %190 = arith.extf %189 : vector<64x8xbf16> to vector<64x8xf32>
    %c0_146 = arith.constant 0 : index
    %c0_147 = arith.constant 0 : index
    %191 = vector.load %arg16[%c0_146, %c0_147] : memref<2x8xf32, #tpu.memory_space<vmem>>, vector<1x8xf32>
    %c1_148 = arith.constant 1 : index
    %c0_149 = arith.constant 0 : index
    %192 = vector.load %arg16[%c1_148, %c0_149] : memref<2x8xf32, #tpu.memory_space<vmem>>, vector<1x8xf32>
    %193 = arith.truncf %177 : vector<16x64xf32> to vector<16x64xbf16>
    %cst_150 = arith.constant dense<0.000000e+00> : vector<16x64xf32>
    %194 = tpu.matmul %183, %193, %cst_150 {dimension_numbers = #tpu.dot_dimension_numbers<[1], [0], [0], [1], [0, 0, 1, 1], [], []>} : vector<16x16xbf16>, vector<16x64xbf16>, vector<16x64xf32> -> vector<16x64xf32>
    %195 = arith.truncf %194 : vector<16x64xf32> to vector<16x64xbf16>
    %cst_151 = arith.constant dense<0.000000e+00> : vector<16x64xf32>
    %196 = tpu.matmul %184, %193, %cst_151 {dimension_numbers = #tpu.dot_dimension_numbers<[1], [0], [0], [1], [0, 0, 1, 1], [], []>} : vector<16x16xbf16>, vector<16x64xbf16>, vector<16x64xf32> -> vector<16x64xf32>
    %197 = arith.truncf %196 : vector<16x64xf32> to vector<16x64xbf16>
    %cst_152 = arith.constant dense<0.000000e+00> : vector<16x64xf32>
    %198 = tpu.matmul %193, %179, %cst_152 {dimension_numbers = #tpu.dot_dimension_numbers<[1], [0], [0], [1], [0, 0, 1, 1], [], []>} : vector<16x64xbf16>, vector<64x64xbf16>, vector<16x64xf32> -> vector<16x64xf32>
    %cst_153 = arith.constant dense<0.000000e+00> : vector<16x64xf32>
    %199 = tpu.matmul %195, %178, %cst_153 {dimension_numbers = #tpu.dot_dimension_numbers<[1], [0], [0], [1], [0, 0, 1, 1], [], []>} : vector<16x64xbf16>, vector<64x64xbf16>, vector<16x64xf32> -> vector<16x64xf32>
    %200 = arith.addf %198, %199 : vector<16x64xf32>
    %cst_154 = arith.constant dense<0.000000e+00> : vector<16x64xf32>
    %201 = tpu.matmul %197, %180, %cst_154 {dimension_numbers = #tpu.dot_dimension_numbers<[1], [0], [0], [1], [0, 0, 1, 1], [], []>} : vector<16x64xbf16>, vector<64x64xbf16>, vector<16x64xf32> -> vector<16x64xf32>
    %202 = arith.addf %200, %201 : vector<16x64xf32>
    %cst_155 = arith.constant dense<0.000000e+00> : vector<64xf32>
    %203 = vector.multi_reduction <add>, %202, %cst_155 [0] : vector<16x64xf32> to vector<64xf32>
    %204 = vector.shape_cast %203 : vector<64xf32> to vector<1x64xf32>
    %cst_156 = arith.constant dense<0.000000e+00> : vector<1x8xf32>
    %205 = tpu.matmul %204, %190, %cst_156 {dimension_numbers = #tpu.dot_dimension_numbers<[1], [0], [0], [1], [0, 0, 1, 1], [], []>} : vector<1x64xf32>, vector<64x8xf32>, vector<1x8xf32> -> vector<1x8xf32>
    %cst_157 = arith.constant 7.812500e-03 : f32
    %206 = vector.broadcast %cst_157 : f32 to vector<1x8xf32>
    %207 = arith.mulf %205, %206 : vector<1x8xf32>
    %cst_158 = arith.constant dense<0.000000e+00> : vector<1x64xf32>
    %208 = tpu.matmul %207, %182, %cst_158 {dimension_numbers = #tpu.dot_dimension_numbers<[1], [0], [0], [1], [0, 0, 1, 1], [], []>} : vector<1x8xf32>, vector<8x64xf32>, vector<1x64xf32> -> vector<1x64xf32>
    %209 = vector.broadcast %208 : vector<1x64xf32> to vector<16x64xf32>
    %210 = arith.subf %202, %209 : vector<16x64xf32>
    %211 = arith.mulf %210, %210 : vector<16x64xf32>
    %cst_159 = arith.constant dense<0.000000e+00> : vector<64xf32>
    %212 = vector.multi_reduction <add>, %211, %cst_159 [0] : vector<16x64xf32> to vector<64xf32>
    %213 = vector.shape_cast %212 : vector<64xf32> to vector<1x64xf32>
    %cst_160 = arith.constant dense<0.000000e+00> : vector<1x8xf32>
    %214 = tpu.matmul %213, %190, %cst_160 {dimension_numbers = #tpu.dot_dimension_numbers<[1], [0], [0], [1], [0, 0, 1, 1], [], []>} : vector<1x64xf32>, vector<64x8xf32>, vector<1x8xf32> -> vector<1x8xf32>
    %cst_161 = arith.constant 7.812500e-03 : f32
    %215 = vector.broadcast %cst_161 : f32 to vector<1x8xf32>
    %216 = arith.mulf %214, %215 : vector<1x8xf32>
    %cst_162 = arith.constant 9.99999974E-6 : f32
    %217 = vector.broadcast %cst_162 : f32 to vector<1x8xf32>
    %218 = arith.addf %216, %217 : vector<1x8xf32>
    %219 = math.rsqrt %218 : vector<1x8xf32>
    %220 = arith.mulf %191, %219 : vector<1x8xf32>
    %cst_163 = arith.constant dense<0.000000e+00> : vector<1x64xf32>
    %221 = tpu.matmul %220, %182, %cst_163 {dimension_numbers = #tpu.dot_dimension_numbers<[1], [0], [0], [1], [0, 0, 1, 1], [], []>} : vector<1x8xf32>, vector<8x64xf32>, vector<1x64xf32> -> vector<1x64xf32>
    %222 = vector.broadcast %221 : vector<1x64xf32> to vector<16x64xf32>
    %223 = arith.mulf %210, %222 : vector<16x64xf32>
    %cst_164 = arith.constant dense<0.000000e+00> : vector<1x64xf32>
    %224 = tpu.matmul %192, %182, %cst_164 {dimension_numbers = #tpu.dot_dimension_numbers<[1], [0], [0], [1], [0, 0, 1, 1], [], []>} : vector<1x8xf32>, vector<8x64xf32>, vector<1x64xf32> -> vector<1x64xf32>
    %225 = vector.broadcast %224 : vector<1x64xf32> to vector<16x64xf32>
    %226 = arith.addf %223, %225 : vector<16x64xf32>
    %cst_165 = arith.constant 0.000000e+00 : f32
    %227 = vector.broadcast %cst_165 : f32 to vector<16x64xf32>
    %228 = arith.maximumf %226, %227 : vector<16x64xf32>
    %229 = arith.truncf %228 : vector<16x64xf32> to vector<16x64xbf16>
    %cst_166 = arith.constant dense<0.000000e+00> : vector<16x32xf32>
    %230 = tpu.matmul %229, %187, %cst_166 {dimension_numbers = #tpu.dot_dimension_numbers<[1], [0], [0], [1], [0, 0, 1, 1], [], []>} : vector<16x64xbf16>, vector<64x32xbf16>, vector<16x32xf32> -> vector<16x32xf32>
    %cst_167 = arith.constant dense<0.000000e+00> : vector<16x32xf32>
    %231 = tpu.matmul %229, %188, %cst_167 {dimension_numbers = #tpu.dot_dimension_numbers<[1], [0], [0], [1], [0, 0, 1, 1], [], []>} : vector<16x64xbf16>, vector<64x32xbf16>, vector<16x32xf32> -> vector<16x32xf32>
    %232 = arith.maximumf %230, %231 : vector<16x32xf32>
    %233 = arith.truncf %232 : vector<16x32xf32> to vector<16x32xbf16>
    %cst_168 = arith.constant dense<0.000000e+00> : vector<8x32xf32>
    %234 = tpu.matmul %185, %233, %cst_168 {dimension_numbers = #tpu.dot_dimension_numbers<[1], [0], [0], [1], [0, 0, 1, 1], [], []>} : vector<8x16xbf16>, vector<16x32xbf16>, vector<8x32xf32> -> vector<8x32xf32>
    %cst_169 = arith.constant dense<0.000000e+00> : vector<8x32xf32>
    %235 = tpu.matmul %186, %233, %cst_169 {dimension_numbers = #tpu.dot_dimension_numbers<[1], [0], [0], [1], [0, 0, 1, 1], [], []>} : vector<8x16xbf16>, vector<16x32xbf16>, vector<8x32xf32> -> vector<8x32xf32>
    %236 = arith.maximumf %234, %235 : vector<8x32xf32>
    %c0_170 = arith.constant 0 : index
    %c0_171 = arith.constant 0 : index
    %237 = vector.load %arg17[%c0_170, %c0_171] : memref<104x32xbf16, #tpu.memory_space<vmem>>, vector<32x32xbf16>
    %c32_172 = arith.constant 32 : index
    %c0_173 = arith.constant 0 : index
    %238 = vector.load %arg17[%c32_172, %c0_173] : memref<104x32xbf16, #tpu.memory_space<vmem>>, vector<32x32xbf16>
    %c64_174 = arith.constant 64 : index
    %c0_175 = arith.constant 0 : index
    %239 = vector.load %arg17[%c64_174, %c0_175] : memref<104x32xbf16, #tpu.memory_space<vmem>>, vector<32x32xbf16>
    %c96 = arith.constant 96 : index
    %c0_176 = arith.constant 0 : index
    %240 = vector.load %arg17[%c96, %c0_176] : memref<104x32xbf16, #tpu.memory_space<vmem>>, vector<8x32xbf16>
    %241 = arith.extf %240 : vector<8x32xbf16> to vector<8x32xf32>
    %c0_177 = arith.constant 0 : index
    %c0_178 = arith.constant 0 : index
    %242 = vector.load %arg18[%c0_177, %c0_178] : memref<24x8xbf16, #tpu.memory_space<vmem>>, vector<8x8xbf16>
    %c8 = arith.constant 8 : index
    %c0_179 = arith.constant 0 : index
    %243 = vector.load %arg18[%c8, %c0_179] : memref<24x8xbf16, #tpu.memory_space<vmem>>, vector<8x8xbf16>
    %c16_180 = arith.constant 16 : index
    %c0_181 = arith.constant 0 : index
    %244 = vector.load %arg18[%c16_180, %c0_181] : memref<24x8xbf16, #tpu.memory_space<vmem>>, vector<4x8xbf16>
    %c20 = arith.constant 20 : index
    %c0_182 = arith.constant 0 : index
    %245 = vector.load %arg18[%c20, %c0_182] : memref<24x8xbf16, #tpu.memory_space<vmem>>, vector<4x8xbf16>
    %c0_183 = arith.constant 0 : index
    %c0_184 = arith.constant 0 : index
    %246 = vector.load %arg19[%c0_183, %c0_184] : memref<32x40xbf16, #tpu.memory_space<vmem>>, vector<32x16xbf16>
    %c0_185 = arith.constant 0 : index
    %c16_186 = arith.constant 16 : index
    %247 = vector.load %arg19[%c0_185, %c16_186] : memref<32x40xbf16, #tpu.memory_space<vmem>>, vector<32x16xbf16>
    %c0_187 = arith.constant 0 : index
    %c32_188 = arith.constant 32 : index
    %248 = vector.load %arg19[%c0_187, %c32_188] : memref<32x40xbf16, #tpu.memory_space<vmem>>, vector<32x8xbf16>
    %249 = arith.extf %248 : vector<32x8xbf16> to vector<32x8xf32>
    %c0_189 = arith.constant 0 : index
    %c0_190 = arith.constant 0 : index
    %250 = vector.load %arg20[%c0_189, %c0_190] : memref<2x8xf32, #tpu.memory_space<vmem>>, vector<1x8xf32>
    %c1_191 = arith.constant 1 : index
    %c0_192 = arith.constant 0 : index
    %251 = vector.load %arg20[%c1_191, %c0_192] : memref<2x8xf32, #tpu.memory_space<vmem>>, vector<1x8xf32>
    %252 = arith.truncf %236 : vector<8x32xf32> to vector<8x32xbf16>
    %cst_193 = arith.constant dense<0.000000e+00> : vector<8x32xf32>
    %253 = tpu.matmul %242, %252, %cst_193 {dimension_numbers = #tpu.dot_dimension_numbers<[1], [0], [0], [1], [0, 0, 1, 1], [], []>} : vector<8x8xbf16>, vector<8x32xbf16>, vector<8x32xf32> -> vector<8x32xf32>
    %254 = arith.truncf %253 : vector<8x32xf32> to vector<8x32xbf16>
    %cst_194 = arith.constant dense<0.000000e+00> : vector<8x32xf32>
    %255 = tpu.matmul %243, %252, %cst_194 {dimension_numbers = #tpu.dot_dimension_numbers<[1], [0], [0], [1], [0, 0, 1, 1], [], []>} : vector<8x8xbf16>, vector<8x32xbf16>, vector<8x32xf32> -> vector<8x32xf32>
    %256 = arith.truncf %255 : vector<8x32xf32> to vector<8x32xbf16>
    %cst_195 = arith.constant dense<0.000000e+00> : vector<8x32xf32>
    %257 = tpu.matmul %252, %238, %cst_195 {dimension_numbers = #tpu.dot_dimension_numbers<[1], [0], [0], [1], [0, 0, 1, 1], [], []>} : vector<8x32xbf16>, vector<32x32xbf16>, vector<8x32xf32> -> vector<8x32xf32>
    %cst_196 = arith.constant dense<0.000000e+00> : vector<8x32xf32>
    %258 = tpu.matmul %254, %237, %cst_196 {dimension_numbers = #tpu.dot_dimension_numbers<[1], [0], [0], [1], [0, 0, 1, 1], [], []>} : vector<8x32xbf16>, vector<32x32xbf16>, vector<8x32xf32> -> vector<8x32xf32>
    %259 = arith.addf %257, %258 : vector<8x32xf32>
    %cst_197 = arith.constant dense<0.000000e+00> : vector<8x32xf32>
    %260 = tpu.matmul %256, %239, %cst_197 {dimension_numbers = #tpu.dot_dimension_numbers<[1], [0], [0], [1], [0, 0, 1, 1], [], []>} : vector<8x32xbf16>, vector<32x32xbf16>, vector<8x32xf32> -> vector<8x32xf32>
    %261 = arith.addf %259, %260 : vector<8x32xf32>
    %cst_198 = arith.constant dense<0.000000e+00> : vector<32xf32>
    %262 = vector.multi_reduction <add>, %261, %cst_198 [0] : vector<8x32xf32> to vector<32xf32>
    %263 = vector.shape_cast %262 : vector<32xf32> to vector<1x32xf32>
    %cst_199 = arith.constant dense<0.000000e+00> : vector<1x8xf32>
    %264 = tpu.matmul %263, %249, %cst_199 {dimension_numbers = #tpu.dot_dimension_numbers<[1], [0], [0], [1], [0, 0, 1, 1], [], []>} : vector<1x32xf32>, vector<32x8xf32>, vector<1x8xf32> -> vector<1x8xf32>
    %cst_200 = arith.constant 3.125000e-02 : f32
    %265 = vector.broadcast %cst_200 : f32 to vector<1x8xf32>
    %266 = arith.mulf %264, %265 : vector<1x8xf32>
    %cst_201 = arith.constant dense<0.000000e+00> : vector<1x32xf32>
    %267 = tpu.matmul %266, %241, %cst_201 {dimension_numbers = #tpu.dot_dimension_numbers<[1], [0], [0], [1], [0, 0, 1, 1], [], []>} : vector<1x8xf32>, vector<8x32xf32>, vector<1x32xf32> -> vector<1x32xf32>
    %268 = vector.broadcast %267 : vector<1x32xf32> to vector<8x32xf32>
    %269 = arith.subf %261, %268 : vector<8x32xf32>
    %270 = arith.mulf %269, %269 : vector<8x32xf32>
    %cst_202 = arith.constant dense<0.000000e+00> : vector<32xf32>
    %271 = vector.multi_reduction <add>, %270, %cst_202 [0] : vector<8x32xf32> to vector<32xf32>
    %272 = vector.shape_cast %271 : vector<32xf32> to vector<1x32xf32>
    %cst_203 = arith.constant dense<0.000000e+00> : vector<1x8xf32>
    %273 = tpu.matmul %272, %249, %cst_203 {dimension_numbers = #tpu.dot_dimension_numbers<[1], [0], [0], [1], [0, 0, 1, 1], [], []>} : vector<1x32xf32>, vector<32x8xf32>, vector<1x8xf32> -> vector<1x8xf32>
    %cst_204 = arith.constant 3.125000e-02 : f32
    %274 = vector.broadcast %cst_204 : f32 to vector<1x8xf32>
    %275 = arith.mulf %273, %274 : vector<1x8xf32>
    %cst_205 = arith.constant 9.99999974E-6 : f32
    %276 = vector.broadcast %cst_205 : f32 to vector<1x8xf32>
    %277 = arith.addf %275, %276 : vector<1x8xf32>
    %278 = math.rsqrt %277 : vector<1x8xf32>
    %279 = arith.mulf %250, %278 : vector<1x8xf32>
    %cst_206 = arith.constant dense<0.000000e+00> : vector<1x32xf32>
    %280 = tpu.matmul %279, %241, %cst_206 {dimension_numbers = #tpu.dot_dimension_numbers<[1], [0], [0], [1], [0, 0, 1, 1], [], []>} : vector<1x8xf32>, vector<8x32xf32>, vector<1x32xf32> -> vector<1x32xf32>
    %281 = vector.broadcast %280 : vector<1x32xf32> to vector<8x32xf32>
    %282 = arith.mulf %269, %281 : vector<8x32xf32>
    %cst_207 = arith.constant dense<0.000000e+00> : vector<1x32xf32>
    %283 = tpu.matmul %251, %241, %cst_207 {dimension_numbers = #tpu.dot_dimension_numbers<[1], [0], [0], [1], [0, 0, 1, 1], [], []>} : vector<1x8xf32>, vector<8x32xf32>, vector<1x32xf32> -> vector<1x32xf32>
    %284 = vector.broadcast %283 : vector<1x32xf32> to vector<8x32xf32>
    %285 = arith.addf %282, %284 : vector<8x32xf32>
    %cst_208 = arith.constant 0.000000e+00 : f32
    %286 = vector.broadcast %cst_208 : f32 to vector<8x32xf32>
    %287 = arith.maximumf %285, %286 : vector<8x32xf32>
    %288 = arith.truncf %287 : vector<8x32xf32> to vector<8x32xbf16>
    %cst_209 = arith.constant dense<0.000000e+00> : vector<8x16xf32>
    %289 = tpu.matmul %288, %246, %cst_209 {dimension_numbers = #tpu.dot_dimension_numbers<[1], [0], [0], [1], [0, 0, 1, 1], [], []>} : vector<8x32xbf16>, vector<32x16xbf16>, vector<8x16xf32> -> vector<8x16xf32>
    %cst_210 = arith.constant dense<0.000000e+00> : vector<8x16xf32>
    %290 = tpu.matmul %288, %247, %cst_210 {dimension_numbers = #tpu.dot_dimension_numbers<[1], [0], [0], [1], [0, 0, 1, 1], [], []>} : vector<8x32xbf16>, vector<32x16xbf16>, vector<8x16xf32> -> vector<8x16xf32>
    %291 = arith.maximumf %289, %290 : vector<8x16xf32>
    %292 = arith.truncf %291 : vector<8x16xf32> to vector<8x16xbf16>
    %cst_211 = arith.constant dense<0.000000e+00> : vector<4x16xf32>
    %293 = tpu.matmul %244, %292, %cst_211 {dimension_numbers = #tpu.dot_dimension_numbers<[1], [0], [0], [1], [0, 0, 1, 1], [], []>} : vector<4x8xbf16>, vector<8x16xbf16>, vector<4x16xf32> -> vector<4x16xf32>
    %cst_212 = arith.constant dense<0.000000e+00> : vector<4x16xf32>
    %294 = tpu.matmul %245, %292, %cst_212 {dimension_numbers = #tpu.dot_dimension_numbers<[1], [0], [0], [1], [0, 0, 1, 1], [], []>} : vector<4x8xbf16>, vector<8x16xbf16>, vector<4x16xf32> -> vector<4x16xf32>
    %295 = arith.maximumf %293, %294 : vector<4x16xf32>
    %c0_213 = arith.constant 0 : index
    %c0_214 = arith.constant 0 : index
    %296 = vector.load %arg21[%c0_213, %c0_214] : memref<56x16xbf16, #tpu.memory_space<vmem>>, vector<16x16xbf16>
    %c16_215 = arith.constant 16 : index
    %c0_216 = arith.constant 0 : index
    %297 = vector.load %arg21[%c16_215, %c0_216] : memref<56x16xbf16, #tpu.memory_space<vmem>>, vector<16x16xbf16>
    %c32_217 = arith.constant 32 : index
    %c0_218 = arith.constant 0 : index
    %298 = vector.load %arg21[%c32_217, %c0_218] : memref<56x16xbf16, #tpu.memory_space<vmem>>, vector<16x16xbf16>
    %c48 = arith.constant 48 : index
    %c0_219 = arith.constant 0 : index
    %299 = vector.load %arg21[%c48, %c0_219] : memref<56x16xbf16, #tpu.memory_space<vmem>>, vector<8x16xbf16>
    %300 = arith.extf %299 : vector<8x16xbf16> to vector<8x16xf32>
    %c0_220 = arith.constant 0 : index
    %c0_221 = arith.constant 0 : index
    %301 = vector.load %arg22[%c0_220, %c0_221] : memref<12x4xbf16, #tpu.memory_space<vmem>>, vector<4x4xbf16>
    %c4 = arith.constant 4 : index
    %c0_222 = arith.constant 0 : index
    %302 = vector.load %arg22[%c4, %c0_222] : memref<12x4xbf16, #tpu.memory_space<vmem>>, vector<4x4xbf16>
    %c8_223 = arith.constant 8 : index
    %c0_224 = arith.constant 0 : index
    %303 = vector.load %arg22[%c8_223, %c0_224] : memref<12x4xbf16, #tpu.memory_space<vmem>>, vector<2x4xbf16>
    %c10 = arith.constant 10 : index
    %c0_225 = arith.constant 0 : index
    %304 = vector.load %arg22[%c10, %c0_225] : memref<12x4xbf16, #tpu.memory_space<vmem>>, vector<2x4xbf16>
    %c0_226 = arith.constant 0 : index
    %c0_227 = arith.constant 0 : index
    %305 = vector.load %arg23[%c0_226, %c0_227] : memref<16x24xbf16, #tpu.memory_space<vmem>>, vector<16x8xbf16>
    %c0_228 = arith.constant 0 : index
    %c8_229 = arith.constant 8 : index
    %306 = vector.load %arg23[%c0_228, %c8_229] : memref<16x24xbf16, #tpu.memory_space<vmem>>, vector<16x8xbf16>
    %c0_230 = arith.constant 0 : index
    %c16_231 = arith.constant 16 : index
    %307 = vector.load %arg23[%c0_230, %c16_231] : memref<16x24xbf16, #tpu.memory_space<vmem>>, vector<16x8xbf16>
    %308 = arith.extf %307 : vector<16x8xbf16> to vector<16x8xf32>
    %c0_232 = arith.constant 0 : index
    %c0_233 = arith.constant 0 : index
    %309 = vector.load %arg24[%c0_232, %c0_233] : memref<2x8xf32, #tpu.memory_space<vmem>>, vector<1x8xf32>
    %c1_234 = arith.constant 1 : index
    %c0_235 = arith.constant 0 : index
    %310 = vector.load %arg24[%c1_234, %c0_235] : memref<2x8xf32, #tpu.memory_space<vmem>>, vector<1x8xf32>
    %311 = arith.truncf %295 : vector<4x16xf32> to vector<4x16xbf16>
    %cst_236 = arith.constant dense<0.000000e+00> : vector<4x16xf32>
    %312 = tpu.matmul %301, %311, %cst_236 {dimension_numbers = #tpu.dot_dimension_numbers<[1], [0], [0], [1], [0, 0, 1, 1], [], []>} : vector<4x4xbf16>, vector<4x16xbf16>, vector<4x16xf32> -> vector<4x16xf32>
    %313 = arith.truncf %312 : vector<4x16xf32> to vector<4x16xbf16>
    %cst_237 = arith.constant dense<0.000000e+00> : vector<4x16xf32>
    %314 = tpu.matmul %302, %311, %cst_237 {dimension_numbers = #tpu.dot_dimension_numbers<[1], [0], [0], [1], [0, 0, 1, 1], [], []>} : vector<4x4xbf16>, vector<4x16xbf16>, vector<4x16xf32> -> vector<4x16xf32>
    %315 = arith.truncf %314 : vector<4x16xf32> to vector<4x16xbf16>
    %cst_238 = arith.constant dense<0.000000e+00> : vector<4x16xf32>
    %316 = tpu.matmul %311, %297, %cst_238 {dimension_numbers = #tpu.dot_dimension_numbers<[1], [0], [0], [1], [0, 0, 1, 1], [], []>} : vector<4x16xbf16>, vector<16x16xbf16>, vector<4x16xf32> -> vector<4x16xf32>
    %cst_239 = arith.constant dense<0.000000e+00> : vector<4x16xf32>
    %317 = tpu.matmul %313, %296, %cst_239 {dimension_numbers = #tpu.dot_dimension_numbers<[1], [0], [0], [1], [0, 0, 1, 1], [], []>} : vector<4x16xbf16>, vector<16x16xbf16>, vector<4x16xf32> -> vector<4x16xf32>
    %318 = arith.addf %316, %317 : vector<4x16xf32>
    %cst_240 = arith.constant dense<0.000000e+00> : vector<4x16xf32>
    %319 = tpu.matmul %315, %298, %cst_240 {dimension_numbers = #tpu.dot_dimension_numbers<[1], [0], [0], [1], [0, 0, 1, 1], [], []>} : vector<4x16xbf16>, vector<16x16xbf16>, vector<4x16xf32> -> vector<4x16xf32>
    %320 = arith.addf %318, %319 : vector<4x16xf32>
    %cst_241 = arith.constant dense<0.000000e+00> : vector<16xf32>
    %321 = vector.multi_reduction <add>, %320, %cst_241 [0] : vector<4x16xf32> to vector<16xf32>
    %322 = vector.shape_cast %321 : vector<16xf32> to vector<1x16xf32>
    %cst_242 = arith.constant dense<0.000000e+00> : vector<1x8xf32>
    %323 = tpu.matmul %322, %308, %cst_242 {dimension_numbers = #tpu.dot_dimension_numbers<[1], [0], [0], [1], [0, 0, 1, 1], [], []>} : vector<1x16xf32>, vector<16x8xf32>, vector<1x8xf32> -> vector<1x8xf32>
    %cst_243 = arith.constant 1.250000e-01 : f32
    %324 = vector.broadcast %cst_243 : f32 to vector<1x8xf32>
    %325 = arith.mulf %323, %324 : vector<1x8xf32>
    %cst_244 = arith.constant dense<0.000000e+00> : vector<1x16xf32>
    %326 = tpu.matmul %325, %300, %cst_244 {dimension_numbers = #tpu.dot_dimension_numbers<[1], [0], [0], [1], [0, 0, 1, 1], [], []>} : vector<1x8xf32>, vector<8x16xf32>, vector<1x16xf32> -> vector<1x16xf32>
    %327 = vector.broadcast %326 : vector<1x16xf32> to vector<4x16xf32>
    %328 = arith.subf %320, %327 : vector<4x16xf32>
    %329 = arith.mulf %328, %328 : vector<4x16xf32>
    %cst_245 = arith.constant dense<0.000000e+00> : vector<16xf32>
    %330 = vector.multi_reduction <add>, %329, %cst_245 [0] : vector<4x16xf32> to vector<16xf32>
    %331 = vector.shape_cast %330 : vector<16xf32> to vector<1x16xf32>
    %cst_246 = arith.constant dense<0.000000e+00> : vector<1x8xf32>
    %332 = tpu.matmul %331, %308, %cst_246 {dimension_numbers = #tpu.dot_dimension_numbers<[1], [0], [0], [1], [0, 0, 1, 1], [], []>} : vector<1x16xf32>, vector<16x8xf32>, vector<1x8xf32> -> vector<1x8xf32>
    %cst_247 = arith.constant 1.250000e-01 : f32
    %333 = vector.broadcast %cst_247 : f32 to vector<1x8xf32>
    %334 = arith.mulf %332, %333 : vector<1x8xf32>
    %cst_248 = arith.constant 9.99999974E-6 : f32
    %335 = vector.broadcast %cst_248 : f32 to vector<1x8xf32>
    %336 = arith.addf %334, %335 : vector<1x8xf32>
    %337 = math.rsqrt %336 : vector<1x8xf32>
    %338 = arith.mulf %309, %337 : vector<1x8xf32>
    %cst_249 = arith.constant dense<0.000000e+00> : vector<1x16xf32>
    %339 = tpu.matmul %338, %300, %cst_249 {dimension_numbers = #tpu.dot_dimension_numbers<[1], [0], [0], [1], [0, 0, 1, 1], [], []>} : vector<1x8xf32>, vector<8x16xf32>, vector<1x16xf32> -> vector<1x16xf32>
    %340 = vector.broadcast %339 : vector<1x16xf32> to vector<4x16xf32>
    %341 = arith.mulf %328, %340 : vector<4x16xf32>
    %cst_250 = arith.constant dense<0.000000e+00> : vector<1x16xf32>
    %342 = tpu.matmul %310, %300, %cst_250 {dimension_numbers = #tpu.dot_dimension_numbers<[1], [0], [0], [1], [0, 0, 1, 1], [], []>} : vector<1x8xf32>, vector<8x16xf32>, vector<1x16xf32> -> vector<1x16xf32>
    %343 = vector.broadcast %342 : vector<1x16xf32> to vector<4x16xf32>
    %344 = arith.addf %341, %343 : vector<4x16xf32>
    %cst_251 = arith.constant 0.000000e+00 : f32
    %345 = vector.broadcast %cst_251 : f32 to vector<4x16xf32>
    %346 = arith.maximumf %344, %345 : vector<4x16xf32>
    %347 = arith.truncf %346 : vector<4x16xf32> to vector<4x16xbf16>
    %cst_252 = arith.constant dense<0.000000e+00> : vector<4x8xf32>
    %348 = tpu.matmul %347, %305, %cst_252 {dimension_numbers = #tpu.dot_dimension_numbers<[1], [0], [0], [1], [0, 0, 1, 1], [], []>} : vector<4x16xbf16>, vector<16x8xbf16>, vector<4x8xf32> -> vector<4x8xf32>
    %cst_253 = arith.constant dense<0.000000e+00> : vector<4x8xf32>
    %349 = tpu.matmul %347, %306, %cst_253 {dimension_numbers = #tpu.dot_dimension_numbers<[1], [0], [0], [1], [0, 0, 1, 1], [], []>} : vector<4x16xbf16>, vector<16x8xbf16>, vector<4x8xf32> -> vector<4x8xf32>
    %350 = arith.maximumf %348, %349 : vector<4x8xf32>
    %351 = arith.truncf %350 : vector<4x8xf32> to vector<4x8xbf16>
    %cst_254 = arith.constant dense<0.000000e+00> : vector<2x8xf32>
    %352 = tpu.matmul %303, %351, %cst_254 {dimension_numbers = #tpu.dot_dimension_numbers<[1], [0], [0], [1], [0, 0, 1, 1], [], []>} : vector<2x4xbf16>, vector<4x8xbf16>, vector<2x8xf32> -> vector<2x8xf32>
    %cst_255 = arith.constant dense<0.000000e+00> : vector<2x8xf32>
    %353 = tpu.matmul %304, %351, %cst_255 {dimension_numbers = #tpu.dot_dimension_numbers<[1], [0], [0], [1], [0, 0, 1, 1], [], []>} : vector<2x4xbf16>, vector<4x8xbf16>, vector<2x8xf32> -> vector<2x8xf32>
    %354 = arith.maximumf %352, %353 : vector<2x8xf32>
    %c0_256 = arith.constant 0 : index
    %c0_257 = arith.constant 0 : index
    %355 = vector.load %arg25[%c0_256, %c0_257] : memref<2x8xf32, #tpu.memory_space<vmem>>, vector<2x8xf32>
    tpu.vector_store %arg25[%c0_256, %c0_257], %354 {strides = array<i32>} : memref<2x8xf32, #tpu.memory_space<vmem>>, vector<2x8xf32>,
    return
  }
}

</mosaic_0001>

<bundles_post_ra>
// kernel: protonet_forward.1
= control target key start
LH: loop header
LB: loop body
LE: loop exit
PB: predicated region body
PF: predicated region fallthrough
CT: control target
= control target key end

     0   :  { %s17411_s0 = inlined_call_operand.vmem [shape: f32[128,64], index: 0, kind: input, shape index: {}]   ;;  %s17412_s1 = inlined_call_operand.vmem [shape: bf16[200,512], index: 1, kind: input, shape index: {}]   ;;  %s17413_s2 = inlined_call_operand.vmem [shape: bf16[384,128], index: 2, kind: input, shape index: {}]   ;;  %s17414_s3 = inlined_call_operand.vmem [shape: bf16[512,520], index: 3, kind: input, shape index: {}]   ;;  %s17415_s4 = inlined_call_operand.vmem [shape: f32[2,8], index: 4, kind: input, shape index: {}]   ;;  %s17416_s5 = inlined_call_operand.vmem [shape: bf16[776,256], index: 5, kind: input, shape index: {}]   ;;  %s17417_s6 = inlined_call_operand.vmem [shape: bf16[192,64], index: 6, kind: input, shape index: {}]   ;;  %s17418_s7 = inlined_call_operand.vmem [shape: bf16[256,264], index: 7, kind: input, shape index: {}]   ;;  %s17419_s8 = inlined_call_operand.vmem [shape: f32[2,8], index: 8, kind: input, shape index: {}]   ;;  %s17420_s9 = inlined_call_operand.vmem [shape: bf16[392,128], index: 9, kind: input, shape index: {}]   ;;  %s17421_s10 = inlined_call_operand.vmem [shape: bf16[96,32], index: 10, kind: input, shape index: {}]   ;;  %s17422_s11 = inlined_call_operand.vmem [shape: bf16[128,136], index: 11, kind: input, shape index: {}]   ;;  %s17423_s12 = inlined_call_operand.vmem [shape: f32[2,8], index: 12, kind: input, shape index: {}]   ;;  %s17424_s13 = inlined_call_operand.vmem [shape: bf16[200,64], index: 13, kind: input, shape index: {}]   ;;  %s17425_s14 = inlined_call_operand.vmem [shape: bf16[48,16], index: 14, kind: input, shape index: {}]   ;;  %s17426_s15 = inlined_call_operand.vmem [shape: bf16[64,72], index: 15, kind: input, shape index: {}]   ;;  %s17427_s16 = inlined_call_operand.vmem [shape: f32[2,8], index: 16, kind: input, shape index: {}]   ;;  %s17428_s17 = inlined_call_operand.vmem [shape: bf16[104,32], index: 17, kind: input, shape index: {}]   ;;  %s17429_s18 = inlined_call_operand.vmem [shape: bf16[24,8], index: 18, kind: input, shape index: {}]   ;;  %s17430_s19 = inlined_call_operand.vmem [shape: bf16[32,40], index: 19, kind: input, shape index: {}]   ;;  %s17431_s20 = inlined_call_operand.vmem [shape: f32[2,8], index: 20, kind: input, shape index: {}]   ;;  %s17432_s21 = inlined_call_operand.vmem [shape: bf16[56,16], index: 21, kind: input, shape index: {}]   ;;  %s17433_s22 = inlined_call_operand.vmem [shape: bf16[12,4], index: 22, kind: input, shape index: {}]   ;;  %s17434_s23 = inlined_call_operand.vmem [shape: bf16[16,24], index: 23, kind: input, shape index: {}]   ;;  %s17435_s24 = inlined_call_operand.vmem [shape: f32[2,8], index: 24, kind: input, shape index: {}]   ;;  %s17436_s25 = inlined_call_operand.hbm [shape: f32[2,8], index: 25, kind: output, shape index: {}]  }
   0x1   :  { %17540 = sst [smem:[#allocation66_spill]] %s17411_s0 }
   0x2   :  { %17541 = sst [smem:[#allocation67_spill]] %s17412_s1 }
   0x3   :  { %17542 = sst [smem:[#allocation68_spill]] %s17413_s2 }
   0x4   :  { %17543 = sst [smem:[#allocation69_spill]] %s17414_s3 }
   0x5   :  { %17544 = sst [smem:[#allocation70_spill]] %s17415_s4 }
   0x6   :  { %17545 = sst [smem:[#allocation71_spill]] %s17416_s5 }
   0x7   :  { %17546 = sst [smem:[#allocation72_spill]] %s17417_s6 }
   0x8   :  { %17547 = sst [smem:[#allocation73_spill]] %s17418_s7 }
   0x9   :  { %17548 = sst [smem:[#allocation74_spill]] %s17419_s8 }
   0xa   :  { %17549 = sst [smem:[#allocation75_spill]] %s17420_s9 }
   0xb   :  { %s17550_s6 = sld [smem:[#allocation66_spill]]  ;;  %s17551_s3 = sld [smem:[#allocation68_spill]]  ;;  %v17447_v56 = vmov 0  }
   0xc   :  { %s17552_s5 = sld [smem:[#allocation67_spill]] }
  0x11   :  { %v82_v0 = vld [vmem:[%s17550_s6] sm:$0xff]  ;;  %v83_v1 = vld [vmem:[%s17550_s6 + $0x8] sm:$0xff]  ;;  %v84_v2 = vld [vmem:[%s17550_s6 + $0x10] sm:$0xff] }
  0x12   :  { %v13903_v3 = vpack.c.bf16 %v83_v1, %v82_v0  ;;  %v85_v4 = vld [vmem:[%s17550_s6 + $0x18] sm:$0xff]  ;;  %v86_v6 = vld [vmem:[%s17550_s6 + $0x20] sm:$0xff]  ;;  %v87_v7 = vld [vmem:[%s17550_s6 + $0x28] sm:$0xff] }
  0x13   :  { %v13908_v5 = vpack.c.bf16 %v85_v4, %v84_v2  ;;  %v88_v8 = vld [vmem:[%s17550_s6 + $0x30] sm:$0xff]  ;;  %v13924_v9 = vpack.c.bf16 %v87_v7, %v86_v6  ;;  %v89_v10 = vld [vmem:[%s17550_s6 + $0x38] sm:$0xff]  ;;  %v13109_v11 = vld [vmem:[%s17551_s3] sm:$0xff]  }
  0x14   :  { %11789 = vmatprep.subr.bf16.mxu0 %v13903_v3  ;;  %11821 = vmatprep.subr.bf16.mxu1 %v13903_v3  ;;  %v13935_v12 = vpack.c.bf16 %v89_v10, %v88_v8  ;;  %v90_v13 = vld [vmem:[%s17550_s6 + $0x40] sm:$0xff]  ;;  %v91_v14 = vld [vmem:[%s17550_s6 + $0x48] sm:$0xff]  ;;  %v92_v15 = vld [vmem:[%s17550_s6 + $0x50] sm:$0xff] }
  0x15   :  { %11790 = vmatpush3.bf16.msra.mxu0 %v13903_v3  ;;  %11822 = vmatpush3.bf16.msra.mxu1 %v13903_v3  ;;  %v13950_v16 = vpack.c.bf16 %v91_v14, %v90_v13  ;;  %v93_v17 = vld [vmem:[%s17550_s6 + $0x58] sm:$0xff]  ;;  %v13117_v18 = vld [vmem:[%s17551_s3 + $0x40] sm:$0xff]   ;;  %v95_v21 = vld [vmem:[%s17550_s6 + $0x68] sm:$0xff] }
  0x16   :  { %11791 = vmatprep.subr.bf16.mxu0 %v13908_v5  ;;  %11823 = vmatprep.subr.bf16.mxu1 %v13908_v5  ;;  %v13962_v19 = vpack.c.bf16 %v93_v17, %v92_v15  ;;  %v94_v20 = vld [vmem:[%s17550_s6 + $0x60] sm:$0xff]  ;;  %v96_v23 = vld [vmem:[%s17550_s6 + $0x70] sm:$0xff]  ;;  %v97_v24 = vld [vmem:[%s17550_s6 + $0x78] sm:$0xff] }
  0x17   :  { %11805 = vmatprep.mubr.bf16.mxu0 %v13109_v11  ;;  %11837 = vmatprep.mubr.bf16.mxu1 %v13117_v18  ;;  %v13974_v22 = vpack.c.bf16 %v95_v21, %v94_v20  ;;  %v13986_v25 = vpack.c.bf16 %v97_v24, %v96_v23  ;;  %v13127_v26 = vld [vmem:[%s17552_s5 + $0x4] ss:$16 sps:$4 sm:$0xff]   ;;  %v13110_v27 = vld [vmem:[%s17551_s3 + $0x8] sm:$0xff]   ;;  %v13125_v32 = vld [vmem:[%s17552_s5] ss:$16 sps:$4 sm:$0xff]  }
  0x18   :  { %v13130_v28 = vld [vmem:[%s17552_s5 + $0xc] ss:$16 sps:$4 sm:$0xff]   ;;  %v13111_v29 = vld [vmem:[%s17551_s3 + $0x10] sm:$0xff]   ;;  %v13128_v33 = vld [vmem:[%s17552_s5 + $0x8] ss:$16 sps:$4 sm:$0xff]  }
  0x19   :  { %11792 = vmatpush3.bf16.msra.mxu0 %v13908_v5  ;;  %11824 = vmatpush3.bf16.msra.mxu1 %v13908_v5  ;;  %v13118_v30 = vld [vmem:[%s17551_s3 + $0x48] sm:$0xff]   ;;  %v13119_v31 = vld [vmem:[%s17551_s3 + $0x50] sm:$0xff]   ;;  %v13112_v39 = vld [vmem:[%s17551_s3 + $0x18] sm:$0xff]  }
  0x1a   :  { %11793 = vmatprep.subr.bf16.mxu0 %v13924_v9  ;;  %11825 = vmatprep.subr.bf16.mxu1 %v13924_v9  ;;  %v13133_v34 = vld [vmem:[%s17552_s5 + $0x24] ss:$16 sps:$4 sm:$0xff]   ;;  %v13136_v35 = vld [vmem:[%s17552_s5 + $0x2c] ss:$16 sps:$4 sm:$0xff]   ;;  %v13131_v36 = vld [vmem:[%s17552_s5 + $0x20] ss:$16 sps:$4 sm:$0xff]  }
  0x1b   :  { %v13134_v37 = vld [vmem:[%s17552_s5 + $0x28] ss:$16 sps:$4 sm:$0xff]   ;;  %v13139_v38 = vld [vmem:[%s17552_s5 + $0x44] ss:$16 sps:$4 sm:$0xff]   ;;  %v13142_v40 = vld [vmem:[%s17552_s5 + $0x4c] ss:$16 sps:$4 sm:$0xff]  }
  0x1c   :  { %v13113_v41 = vld [vmem:[%s17551_s3 + $0x20] sm:$0xff]   ;;  %v13120_v42 = vld [vmem:[%s17551_s3 + $0x58] sm:$0xff]   ;;  %v13114_v46 = vld [vmem:[%s17551_s3 + $0x28] sm:$0xff]  }
  0x1d   :  { %11794 = vmatpush3.bf16.msra.mxu0 %v13924_v9  ;;  %11826 = vmatpush3.bf16.msra.mxu1 %v13924_v9  ;;  %v13121_v43 = vld [vmem:[%s17551_s3 + $0x60] sm:$0xff]   ;;  %v13140_v45 = vld [vmem:[%s17552_s5 + $0x48] ss:$16 sps:$4 sm:$0xff]   ;;  %v13115_v47 = vld [vmem:[%s17551_s3 + $0x30] sm:$0xff]  }
  0x1e   :  { %11795 = vmatprep.subr.bf16.mxu0 %v13935_v12  ;;  %11827 = vmatprep.subr.bf16.mxu1 %v13935_v12  ;;  %v13137_v44 = vld [vmem:[%s17552_s5 + $0x40] ss:$16 sps:$4 sm:$0xff]   ;;  %v13122_v48 = vld [vmem:[%s17551_s3 + $0x68] sm:$0xff]   ;;  %v13116_v50 = vld [vmem:[%s17551_s3 + $0x38] sm:$0xff]  }
  0x1f   :  { %v13123_v49 = vld [vmem:[%s17551_s3 + $0x70] sm:$0xff]   ;;  %v13124_v51 = vld [vmem:[%s17551_s3 + $0x78] sm:$0xff]  }
  0x20   :  { %v13145_v52 = vld [vmem:[%s17552_s5 + $0x64] ss:$16 sps:$4 sm:$0xff]   ;;  %v13148_v53 = vld [vmem:[%s17552_s5 + $0x6c] ss:$16 sps:$4 sm:$0xff]   ;;  %v13143_v54 = vld [vmem:[%s17552_s5 + $0x60] ss:$16 sps:$4 sm:$0xff]  }
  0x21   :  { %11796 = vmatpush3.bf16.msra.mxu0 %v13935_v12  ;;  %11828 = vmatpush3.bf16.msra.mxu1 %v13935_v12  ;;  %v13146_v55 = vld [vmem:[%s17552_s5 + $0x68] ss:$16 sps:$4 sm:$0xff]   ;;  %v13151_v57 = vld [vmem:[%s17552_s5 + $0x84] ss:$16 sps:$4 sm:$0xff]   ;;  %v13154_v58 = vld [vmem:[%s17552_s5 + $0x8c] ss:$16 sps:$4 sm:$0xff]  }
  0x22   :  { %11797 = vmatprep.subr.bf16.mxu0 %v13950_v16  ;;  %11829 = vmatprep.subr.bf16.mxu1 %v13950_v16 }
  0x25   :  { %11798 = vmatpush3.bf16.msra.mxu0 %v13950_v16  ;;  %11830 = vmatpush3.bf16.msra.mxu1 %v13950_v16 }
  0x26   :  { %11799 = vmatprep.subr.bf16.mxu0 %v13962_v19  ;;  %11831 = vmatprep.subr.bf16.mxu1 %v13962_v19 }
  0x29   :  { %11800 = vmatpush3.bf16.msra.mxu0 %v13962_v19  ;;  %11832 = vmatpush3.bf16.msra.mxu1 %v13962_v19 }
  0x2a   :  { %11801 = vmatprep.subr.bf16.mxu0 %v13974_v22  ;;  %11833 = vmatprep.subr.bf16.mxu1 %v13974_v22 }
  0x2d   :  { %11802 = vmatpush3.bf16.msra.mxu0 %v13974_v22  ;;  %11834 = vmatpush3.bf16.msra.mxu1 %v13974_v22 }
  0x2e   :  { %11803 = vmatprep.subr.bf16.mxu0 %v13986_v25  ;;  %11835 = vmatprep.subr.bf16.mxu1 %v13986_v25 }
  0x31   :  { %11804 = vmatpush3.bf16.msra.mxu0 %v13986_v25  ;;  %11836 = vmatpush3.bf16.msra.mxu1 %v13986_v25 }
  0x32   :  { %877 = vmatprep.subr.bf16.mxu0 %v13127_v26  ;;  %990 = vmatprep.subr.bf16.mxu1 %v13130_v28 }
  0x34   :  { %11806 = vmatmul.mubr.bf16.vlgmr.msra.gmra.mrb[0].mxu0 %v13110_v27  ;;  %11838 = vmatmul.mubr.bf16.vlgmr.msra.gmra.mrb[0].mxu1 %v13118_v30 }
  0x35   :  { %11809 = vmatprep.mubr.bf16.mxu0 %v13111_v29  ;;  %11841 = vmatprep.mubr.bf16.mxu1 %v13119_v31 }
  0x36   :  { %878 = vmatpush1.bf16.msra.mxu0 %v13125_v32  ;;  %991 = vmatpush1.bf16.msra.mxu1 %v13128_v33 }
  0x37   :  { %879 = vmatprep.subr.bf16.mxu0 %v13133_v34  ;;  %992 = vmatprep.subr.bf16.mxu1 %v13136_v35 }
  0x3a   :  { %880 = vmatpush1.bf16.msra.mxu0 %v13131_v36  ;;  %993 = vmatpush1.bf16.msra.mxu1 %v13134_v37 }
  0x3b   :  { %881 = vmatprep.subr.bf16.mxu0 %v13139_v38  ;;  %994 = vmatprep.subr.bf16.mxu1 %v13142_v40 }
  0x3c   :  { %11810 = vmatmul.mubr.bf16.gmra.mrb[4].mxu0 %v13112_v39  ;;  %11842 = vmatmul.mubr.bf16.gmra.mrb[4].mxu1 %v13120_v42 }
  0x3d   :  { %11813 = vmatprep.mubr.bf16.mxu0 %v13113_v41  ;;  %11845 = vmatprep.mubr.bf16.mxu1 %v13121_v43 }
  0x3e   :  { %882 = vmatpush1.bf16.msra.mxu0 %v13137_v44  ;;  %995 = vmatpush1.bf16.msra.mxu1 %v13140_v45 }
  0x3f   :  { %883 = vmatprep.subr.bf16.mxu0 %v13145_v52  ;;  %996 = vmatprep.subr.bf16.mxu1 %v13148_v53 }
  0x42   :  { %884 = vmatpush1.bf16.msra.mxu0 %v13143_v54  ;;  %997 = vmatpush1.bf16.msra.mxu1 %v13146_v55 }
  0x43   :  { %1207 = vmatprep.subr.bf16.mxu0 %v13151_v57  ;;  %1320 = vmatprep.subr.bf16.mxu1 %v13154_v58 }
  0x44   :  { %11814 = vmatmul.mubr.bf16.gmra.mrb[8].mxu0 %v13114_v46  ;;  %11846 = vmatmul.mubr.bf16.gmra.mrb[8].mxu1 %v13122_v48 }
  0x45   :  { %11817 = vmatprep.mubr.bf16.mxu0 %v13115_v47  ;;  %11849 = vmatprep.mubr.bf16.mxu1 %v13123_v49 }
  0x4c   :  { %11818 = vmatmul.mubr.bf16.gmra.mrb[12].mxu0 %v13116_v50  ;;  %11850 = vmatmul.mubr.bf16.gmra.mrb[12].mxu1 %v13124_v51 }
  0x4d   :  { %909 = vmatprep.mubr.bf16.mxu0 %v17447_v56  ;;  %1022 = vmatprep.mubr.bf16.mxu1 %v17447_v56 }
  0x4e   :  { %30 = vsyncpa [#allocation3], 0  ;;  %vm852_vm0 = vcmask 523264   ;;  %v13149_v2 = vld [vmem:[%s17552_s5 + $0x80] ss:$16 sps:$4 sm:$0xff]   ;;  %s17553_s1 = sld [smem:[#allocation69_spill]] }
  0x4f   :  { %v13152_v4 = vld [vmem:[%s17552_s5 + $0x88] ss:$16 sps:$4 sm:$0xff]   ;;  %v13157_v11 = vld [vmem:[%s17552_s5 + $0xa4] ss:$16 sps:$4 sm:$0xff]   ;;  %v13160_v13 = vld [vmem:[%s17552_s5 + $0xac] ss:$16 sps:$4 sm:$0xff]  }
  0x50   :  { %v13155_v15 = vld [vmem:[%s17552_s5 + $0xa0] ss:$16 sps:$4 sm:$0xff]   ;;  %v13158_v17 = vld [vmem:[%s17552_s5 + $0xa8] ss:$16 sps:$4 sm:$0xff]   ;;  %v13163_v20 = vld [vmem:[%s17552_s5 + $0xc4] ss:$16 sps:$4 sm:$0xff]  }
  0x51   :  { %v13166_v21 = vld [vmem:[%s17552_s5 + $0xcc] ss:$16 sps:$4 sm:$0xff]   ;;  %v13161_v31 = vld [vmem:[%s17552_s5 + $0xc0] ss:$16 sps:$4 sm:$0xff]   ;;  %v13164_v32 = vld [vmem:[%s17552_s5 + $0xc8] ss:$16 sps:$4 sm:$0xff]  }
  0x52   :  { %v13169_v33 = vld [vmem:[%s17552_s5 + $0xe4] ss:$16 sps:$4 sm:$0xff]   ;;  %v13172_v34 = vld [vmem:[%s17552_s5 + $0xec] ss:$16 sps:$4 sm:$0xff]   ;;  %v13167_v39 = vld [vmem:[%s17552_s5 + $0xe0] ss:$16 sps:$4 sm:$0xff]  }
  0x53   :  { %v13170_v40 = vld [vmem:[%s17552_s5 + $0xe8] ss:$16 sps:$4 sm:$0xff]   ;;  %v13175_v43 = vld [vmem:[%s17552_s5 + $0x104] ss:$16 sps:$4 sm:$0xff]   ;;  %v13178_v44 = vld [vmem:[%s17552_s5 + $0x10c] ss:$16 sps:$4 sm:$0xff]  }
  0x54   :  { %vm2052_vm1 = vcmask 64512   ;;  %s17702_s29 = sld [smem:[#allocation70_spill]]  ;;  %s17730_s30 = sld [smem:[#allocation71_spill]]  ;;  %vm6791_vm2 = vcmask 261120   ;;  %vm13758_vm3 = vmmov 0   ;;  %vm7959_vm4 = vcmask 130048  }
  0x55   :  { %s17731_s26 = sld [smem:[#allocation72_spill]]  ;;  %s17735_s0 = sld [smem:[#allocation74_spill]]  ;;  %vm8947_vm5 = vcmask 1043456   ;;  %vm9839_vm6 = vcmask 1041408   ;;  %vm9835_vm7 = vcmask 31744   ;;  %vm10079_vm8 = vcmask 125952  }
  0x56   :  { %s13759_s7 = smov 64   ;;  %vm10678_vm9 = vcmask 58368  }
 0x107   :  { %v11807_v59 = vpop.f32.mrb[0].mxu0  ;;  %v11839_v61 = vpop.f32.mrb[0].mxu1 }
 0x108   :  { %v548_v60 = vpop.f32.mrb[1].mxu0  ;;  %v701_v63 = vpop.f32.mrb[1].mxu1 }
 0x109   :  { %v11808_v62 = vpop.f32.mrb[2].mxu0  ;;  %v11840_v6 = vpop.f32.mrb[2].mxu1 }
 0x10a   :  { %v612_v0 = vpack.c.bf16 %v11808_v62, %v11807_v59  ;;  %v551_v1 = vpop.f32.mrb[3].mxu0  ;;  %v14100_v8 = vpack.c.bf16 %v11840_v6, %v11839_v61  ;;  %v704_v10 = vpop.f32.mrb[3].mxu1  ;;  %v13173_v6 = vld [vmem:[%s17552_s5 + $0x100] ss:$16 sps:$4 sm:$0xff]  }
 0x10b   :  { %v611_v7 = vpack.c.bf16 %v551_v1, %v548_v60  ;;  %v14108_v14 = vpack.c.bf16 %v704_v10, %v701_v63  ;;  %v13181_v10 = vld [vmem:[%s17552_s5 + $0x124] ss:$16 sps:$4 sm:$0xff]  }
 0x10d   :  { %10726 = vmatmul.mubr.msk.bf16.vlgmr.msra.gmra.mrb[16].mxu0 %vm852_vm0, %v611_v7  ;;  %10734 = vmatmul.mubr.msk.bf16.vlgmr.msra.gmra.mrb[16].mxu1 %vm852_vm0, %v611_v7  ;;  %v13176_v7 = vld [vmem:[%s17552_s5 + $0x108] ss:$16 sps:$4 sm:$0xff]  }
 0x10e   :  { %1208 = vmatpush1.bf16.msra.mxu0 %v13149_v2  ;;  %1321 = vmatpush1.bf16.msra.mxu1 %v13152_v4 }
 0x10f   :  { %v11811_v18 = vpop.f32.mrb[4].mxu0  ;;  %919 = vmatprep.mubr.bf16.mxu0 %v17447_v56  ;;  %1032 = vmatprep.mubr.bf16.mxu1 %v17447_v56  ;;  %v11843_v24 = vpop.f32.mrb[4].mxu1 }
 0x110   :  { %v564_v23 = vpop.f32.mrb[5].mxu0  ;;  %1209 = vmatprep.subr.bf16.mxu0 %v13157_v11  ;;  %1322 = vmatprep.subr.bf16.mxu1 %v13160_v13  ;;  %v717_v27 = vpop.f32.mrb[5].mxu1  ;;  %v13184_v11 = vld [vmem:[%s17552_s5 + $0x12c] ss:$16 sps:$4 sm:$0xff]   ;;  %v13179_v13 = vld [vmem:[%s17552_s5 + $0x120] ss:$16 sps:$4 sm:$0xff]  }
 0x111   :  { %v11812_v26 = vpop.f32.mrb[6].mxu0  ;;  %v11844_v35 = vpop.f32.mrb[6].mxu1 }
 0x112   :  { %v614_v28 = vpack.c.bf16 %v11812_v26, %v11811_v18  ;;  %v567_v29 = vpop.f32.mrb[7].mxu0  ;;  %1210 = vmatpush1.bf16.msra.mxu0 %v13155_v15  ;;  %1323 = vmatpush1.bf16.msra.mxu1 %v13158_v17  ;;  %v14142_v36 = vpack.c.bf16 %v11844_v35, %v11843_v24  ;;  %v720_v37 = vpop.f32.mrb[7].mxu1  ;;  %v13182_v15 = vld [vmem:[%s17552_s5 + $0x128] ss:$16 sps:$4 sm:$0xff]   ;;  %v13187_v17 = vld [vmem:[%s17552_s5 + $0x144] ss:$16 sps:$4 sm:$0xff]  }
 0x113   :  { %v613_v30 = vpack.c.bf16 %v567_v29, %v564_v23  ;;  %1211 = vmatprep.subr.bf16.mxu0 %v13163_v20  ;;  %1324 = vmatprep.subr.bf16.mxu1 %v13166_v21  ;;  %v14150_v41 = vpack.c.bf16 %v720_v37, %v717_v27  ;;  %v13185_v18 = vld [vmem:[%s17552_s5 + $0x140] ss:$16 sps:$4 sm:$0xff]   ;;  %v13188_v20 = vld [vmem:[%s17552_s5 + $0x148] ss:$16 sps:$4 sm:$0xff]   ;;  %v13193_v21 = vld [vmem:[%s17552_s5 + $0x164] ss:$16 sps:$4 sm:$0xff]  }
 0x114   :  { %v13196_v23 = vld [vmem:[%s17552_s5 + $0x16c] ss:$16 sps:$4 sm:$0xff]   ;;  %v13191_v24 = vld [vmem:[%s17552_s5 + $0x160] ss:$16 sps:$4 sm:$0xff]   ;;  %v13194_v26 = vld [vmem:[%s17552_s5 + $0x168] ss:$16 sps:$4 sm:$0xff]  }
 0x115   :  { %10727 = vmatmul.mubr.msk.bf16.gmra.mrb[20].mxu0 %vm852_vm0, %v612_v0  ;;  %10735 = vmatmul.mubr.msk.bf16.gmra.mrb[20].mxu1 %vm852_vm0, %v612_v0  ;;  %v14382_v27 = vld [vmem:[%s17553_s1 + $0x420] ss:$20 sps:$4 sm:$0xff]   ;;  %v14430_v35 = vld [vmem:[%s17553_s1 + $0x470] ss:$20 sps:$4 sm:$0xff]  }
 0x116   :  { %929 = vmatprep.mubr.bf16.mxu0 %v17447_v56  ;;  %1042 = vmatprep.mubr.bf16.mxu1 %v17447_v56  ;;  %v14394_v29 = vld [vmem:[%s17553_s1 + $0x2e0] ss:$20 sps:$4 sm:$0xff]   ;;  %v14442_v37 = vld [vmem:[%s17553_s1 + $0x330] ss:$20 sps:$4 sm:$0xff]  }
 0x117   :  { %v11815_v38 = vpop.f32.mrb[8].mxu0  ;;  %1212 = vmatpush1.bf16.msra.mxu0 %v13161_v31  ;;  %1325 = vmatpush1.bf16.msra.mxu1 %v13164_v32  ;;  %v11847_v49 = vpop.f32.mrb[8].mxu1  ;;  %v14406_v31 = vld [vmem:[%s17553_s1 + $0x448] ss:$20 sps:$4 sm:$0xff]  }
 0x118   :  { %v580_v42 = vpop.f32.mrb[9].mxu0  ;;  %1213 = vmatprep.subr.bf16.mxu0 %v13169_v33  ;;  %1326 = vmatprep.subr.bf16.mxu1 %v13172_v34  ;;  %v733_v50 = vpop.f32.mrb[9].mxu1  ;;  %v14413_v32 = vld [vmem:[%s17553_s1 + $0x88] ss:$20 sps:$4 sm:$0xff]   ;;  %v14425_v34 = vld [vmem:[%s17553_s1 + $0x1f0] ss:$20 sps:$4 sm:$0xff]  }
 0x119   :  { %v11816_v45 = vpop.f32.mrb[10].mxu0  ;;  %v11848_v58 = vpop.f32.mrb[10].mxu1  ;;  %v14418_v33 = vld [vmem:[%s17553_s1 + $0x308] ss:$20 sps:$4 sm:$0xff]  }
 0x11a   :  { %v616_v46 = vpack.c.bf16 %v11816_v45, %v11815_v38  ;;  %v583_v47 = vpop.f32.mrb[11].mxu0  ;;  %v14166_v59 = vpack.c.bf16 %v11848_v58, %v11847_v49  ;;  %v736_v60 = vpop.f32.mrb[11].mxu1  ;;  %v14449_v38 = vld [vmem:[%s17553_s1 + $0x218] ss:$20 sps:$4 sm:$0xff]   ;;  %v14488_v45 = vld [vmem:[%s17553_s1 + $0x380] ss:$20 sps:$4 sm:$0xff]  }
 0x11b   :  { %v615_v48 = vpack.c.bf16 %v583_v47, %v580_v42  ;;  %1214 = vmatpush1.bf16.msra.mxu0 %v13167_v39  ;;  %1327 = vmatpush1.bf16.msra.mxu1 %v13170_v40  ;;  %v14168_v61 = vpack.c.bf16 %v736_v60, %v733_v50  ;;  %v14454_v39 = vld [vmem:[%s17553_s1 + $0x498] ss:$20 sps:$4 sm:$0xff]   ;;  %v14473_v42 = vld [vmem:[%s17553_s1 + $0x240] ss:$20 sps:$4 sm:$0xff]   ;;  %v14502_v47 = vld [vmem:[%s17553_s1 + $0x4e8] ss:$20 sps:$4 sm:$0xff]  }
 0x11c   :  { %1537 = vmatprep.subr.bf16.mxu0 %v13175_v43  ;;  %1650 = vmatprep.subr.bf16.mxu1 %v13178_v44  ;;  %v14461_v40 = vld [vmem:[%s17553_s1 + $0xd8] ss:$20 sps:$4 sm:$0xff]   ;;  %v14478_v43 = vld [vmem:[%s17553_s1 + $0x4c0] ss:$20 sps:$4 sm:$0xff]   ;;  %v14512_v49 = vld [vmem:[%s17553_s1 + $0x3a8] ss:$20 sps:$4 sm:$0xff]  }
 0x11d   :  { %10728 = vmatmul.mubr.msk.bf16.gmra.mrb[24].mxu0 %vm852_vm0, %v613_v30  ;;  %10736 = vmatmul.mubr.msk.bf16.gmra.mrb[24].mxu1 %vm852_vm0, %v613_v30  ;;  %v14401_v30 = vld [vmem:[%s17553_s1 + $0x1c8] ss:$20 sps:$4 sm:$0xff]   ;;  %v14483_v44 = vld [vmem:[%s17553_s1 + $0x100] ss:$20 sps:$4 sm:$0xff]  }
 0x11e   :  { %939 = vmatprep.mubr.bf16.mxu0 %v17447_v56  ;;  %1052 = vmatprep.mubr.bf16.mxu1 %v17447_v56 }
 0x11f   :  { %v11819_v51 = vpop.f32.mrb[12].mxu0  ;;  %v11851_v62 = vpop.f32.mrb[12].mxu1 }
 0x120   :  { %v596_v52 = vpop.f32.mrb[13].mxu0  ;;  %v749_v63 = vpop.f32.mrb[13].mxu1 }
 0x121   :  { %v11820_v53 = vpop.f32.mrb[14].mxu0  ;;  %v11852_v0 = vpop.f32.mrb[14].mxu1 }
 0x122   :  { %v618_v54 = vpack.c.bf16 %v11820_v53, %v11819_v51  ;;  %v599_v55 = vpop.f32.mrb[15].mxu0  ;;  %v14178_v1 = vpack.c.bf16 %v11852_v0, %v11851_v62  ;;  %v752_v2 = vpop.f32.mrb[15].mxu1 }
 0x123   :  { %v617_v57 = vpack.c.bf16 %v599_v55, %v596_v52  ;;  %v14180_v4 = vpack.c.bf16 %v752_v2, %v749_v63 }
 0x125   :  { %10729 = vmatmul.mubr.msk.bf16.gmra.mrb[28].mxu0 %vm852_vm0, %v614_v28  ;;  %10737 = vmatmul.mubr.msk.bf16.gmra.mrb[28].mxu1 %vm852_vm0, %v614_v28  ;;  %v14389_v28 = vld [vmem:[%s17553_s1 + $0x60] ss:$20 sps:$4 sm:$0xff]  }
 0x126   :  { %949 = vmatprep.mubr.bf16.mxu0 %v17447_v56  ;;  %1062 = vmatprep.mubr.bf16.mxu1 %v17447_v56 }
 0x12d   :  { %10730 = vmatmul.mubr.msk.bf16.gmra.mrb[32].mxu0 %vm852_vm0, %v615_v48  ;;  %10738 = vmatmul.mubr.msk.bf16.gmra.mrb[32].mxu1 %vm852_vm0, %v615_v48  ;;  %v14507_v48 = vld [vmem:[%s17553_s1 + $0x128] ss:$20 sps:$4 sm:$0xff]  }
 0x12e   :  { %959 = vmatprep.mubr.bf16.mxu0 %v17447_v56  ;;  %1072 = vmatprep.mubr.bf16.mxu1 %v17447_v56 }
 0x135   :  { %10731 = vmatmul.mubr.msk.bf16.gmra.mrb[36].mxu0 %vm852_vm0, %v616_v46  ;;  %10739 = vmatmul.mubr.msk.bf16.gmra.mrb[36].mxu1 %vm852_vm0, %v616_v46  ;;  %v14497_v46 = vld [vmem:[%s17553_s1 + $0x268] ss:$20 sps:$4 sm:$0xff]  }
 0x136   :  { %969 = vmatprep.mubr.bf16.mxu0 %v17447_v56  ;;  %1082 = vmatprep.mubr.bf16.mxu1 %v17447_v56 }
 0x13d   :  { %10732 = vmatmul.mubr.msk.bf16.gmra.mrb[40].mxu0 %vm852_vm0, %v617_v57  ;;  %10740 = vmatmul.mubr.msk.bf16.gmra.mrb[40].mxu1 %vm852_vm0, %v617_v57 }
 0x13e   :  { %979 = vmatprep.mubr.bf16.mxu0 %v17447_v56  ;;  %1092 = vmatprep.mubr.bf16.mxu1 %v17447_v56 }
 0x145   :  { %10733 = vmatmul.mubr.msk.bf16.gmra.mrb[44].mxu0 %vm852_vm0, %v618_v54  ;;  %10741 = vmatmul.mubr.msk.bf16.gmra.mrb[44].mxu1 %vm852_vm0, %v618_v54 }
 0x146   :  { %1239 = vmatprep.mubr.bf16.mxu0 %v17447_v56  ;;  %1352 = vmatprep.mubr.bf16.mxu1 %v17447_v56 }
 0x14d   :  { %10758 = vmatmul.mubr.msk.bf16.vlgmr.msra.gmra.mrb[16].mxu0 %vm852_vm0, %v13903_v3  ;;  %10766 = vmatmul.mubr.msk.bf16.vlgmr.msra.gmra.mrb[16].mxu1 %vm852_vm0, %v13903_v3  ;;  %v13190_v3 = vld [vmem:[%s17552_s5 + $0x14c] ss:$16 sps:$4 sm:$0xff]  }
 0x14e   :  { %1538 = vmatpush1.bf16.msra.mxu0 %v13173_v6  ;;  %1651 = vmatpush1.bf16.msra.mxu1 %v13176_v7 }
 0x14f   :  { %1249 = vmatprep.mubr.bf16.mxu0 %v17447_v56  ;;  %1362 = vmatprep.mubr.bf16.mxu1 %v17447_v56 }
 0x150   :  { %1539 = vmatprep.subr.bf16.mxu0 %v13181_v10  ;;  %1652 = vmatprep.subr.bf16.mxu1 %v13184_v11 }
 0x152   :  { %1540 = vmatpush1.bf16.msra.mxu0 %v13179_v13  ;;  %1653 = vmatpush1.bf16.msra.mxu1 %v13182_v15 }
 0x153   :  { %1541 = vmatprep.subr.bf16.mxu0 %v13187_v17  ;;  %1654 = vmatprep.subr.bf16.mxu1 %v13190_v3 }
 0x155   :  { %10759 = vmatmul.mubr.msk.bf16.gmra.mrb[20].mxu0 %vm852_vm0, %v13908_v5  ;;  %10767 = vmatmul.mubr.msk.bf16.gmra.mrb[20].mxu1 %vm852_vm0, %v13908_v5  ;;  %v14329_v5 = vld [vmem:[%s17553_s1 + $0x150] ss:$20 sps:$4 sm:$0xff]  }
 0x156   :  { %1259 = vmatprep.mubr.bf16.mxu0 %v17447_v56  ;;  %1372 = vmatprep.mubr.bf16.mxu1 %v17447_v56 }
 0x157   :  { %1542 = vmatpush1.bf16.msra.mxu0 %v13185_v18  ;;  %1655 = vmatpush1.bf16.msra.mxu1 %v13188_v20 }
 0x158   :  { %1543 = vmatprep.subr.bf16.mxu0 %v13193_v21  ;;  %1656 = vmatprep.subr.bf16.mxu1 %v13196_v23 }
 0x15b   :  { %1544 = vmatpush1.bf16.msra.mxu0 %v13191_v24  ;;  %1657 = vmatpush1.bf16.msra.mxu1 %v13194_v26 }
 0x15c   :  { %12416 = vmatprep.subr.bf16.mxu0 %v14329_v5 }
 0x15d   :  { %10760 = vmatmul.mubr.msk.bf16.gmra.mrb[24].mxu0 %vm852_vm0, %v13924_v9  ;;  %10768 = vmatmul.mubr.msk.bf16.gmra.mrb[24].mxu1 %vm852_vm0, %v13924_v9  ;;  %v14334_v9 = vld [vmem:[%s17553_s1 + $0x3d0] ss:$20 sps:$4 sm:$0xff]  }
 0x15e   :  { %1269 = vmatprep.mubr.bf16.mxu0 %v17447_v56  ;;  %1382 = vmatprep.mubr.bf16.mxu1 %v17447_v56 }
 0x15f   :  { %12448 = vmatprep.subr.bf16.mxu1 %v14334_v9 }
 0x165   :  { %10761 = vmatmul.mubr.msk.bf16.gmra.mrb[28].mxu0 %vm852_vm0, %v13935_v12  ;;  %10769 = vmatmul.mubr.msk.bf16.gmra.mrb[28].mxu1 %vm852_vm0, %v13935_v12  ;;  %v14341_v12 = vld [vmem:[%s17553_s1 + $0x10] ss:$20 sps:$4 sm:$0xff]  }
 0x166   :  { %1279 = vmatprep.mubr.bf16.mxu0 %v17447_v56  ;;  %1392 = vmatprep.mubr.bf16.mxu1 %v17447_v56 }
 0x16d   :  { %10762 = vmatmul.mubr.msk.bf16.gmra.mrb[32].mxu0 %vm852_vm0, %v13950_v16  ;;  %10770 = vmatmul.mubr.msk.bf16.gmra.mrb[32].mxu1 %vm852_vm0, %v13950_v16  ;;  %v14346_v16 = vld [vmem:[%s17553_s1 + $0x290] ss:$20 sps:$4 sm:$0xff]  }
 0x16e   :  { %1289 = vmatprep.mubr.bf16.mxu0 %v17447_v56  ;;  %1402 = vmatprep.mubr.bf16.mxu1 %v17447_v56 }
 0x175   :  { %10763 = vmatmul.mubr.msk.bf16.gmra.mrb[36].mxu0 %vm852_vm0, %v13962_v19  ;;  %10771 = vmatmul.mubr.msk.bf16.gmra.mrb[36].mxu1 %vm852_vm0, %v13962_v19  ;;  %v14353_v19 = vld [vmem:[%s17553_s1 + $0x178] ss:$20 sps:$4 sm:$0xff]  }
 0x176   :  { %1299 = vmatprep.mubr.bf16.mxu0 %v17447_v56  ;;  %1412 = vmatprep.mubr.bf16.mxu1 %v17447_v56 }
 0x17d   :  { %10764 = vmatmul.mubr.msk.bf16.gmra.mrb[40].mxu0 %vm852_vm0, %v13974_v22  ;;  %10772 = vmatmul.mubr.msk.bf16.gmra.mrb[40].mxu1 %vm852_vm0, %v13974_v22  ;;  %v14358_v22 = vld [vmem:[%s17553_s1 + $0x3f8] ss:$20 sps:$4 sm:$0xff]  }
 0x17e   :  { %1309 = vmatprep.mubr.bf16.mxu0 %v17447_v56  ;;  %1422 = vmatprep.mubr.bf16.mxu1 %v17447_v56 }
 0x185   :  { %10765 = vmatmul.mubr.msk.bf16.gmra.mrb[44].mxu0 %vm852_vm0, %v13986_v25  ;;  %10773 = vmatmul.mubr.msk.bf16.gmra.mrb[44].mxu1 %vm852_vm0, %v13986_v25  ;;  %v14365_v25 = vld [vmem:[%s17553_s1 + $0x38] ss:$20 sps:$4 sm:$0xff]  }
 0x186   :  { %1569 = vmatprep.mubr.bf16.mxu0 %v17447_v56  ;;  %1682 = vmatprep.mubr.bf16.mxu1 %v17447_v56 }
 0x18d   :  { %10790 = vmatmul.mubr.msk.bf16.vlgmr.msra.gmra.mrb[16].mxu0 %vm852_vm0, %v14108_v14  ;;  %10798 = vmatmul.mubr.msk.bf16.vlgmr.msra.gmra.mrb[16].mxu1 %vm852_vm0, %v14108_v14  ;;  %v14377_v14 = vld [vmem:[%s17553_s1 + $0x1a0] ss:$20 sps:$4 sm:$0xff]  }
 0x18e   :  { %1579 = vmatprep.mubr.bf16.mxu0 %v17447_v56  ;;  %1692 = vmatprep.mubr.bf16.mxu1 %v17447_v56 }
 0x18f   :  { %12418 = vmatpush3.bf16.msra.mxu0 %v14341_v12  ;;  %12450 = vmatpush3.bf16.msra.mxu1 %v14346_v16 }
 0x190   :  { %12420 = vmatprep.subr.bf16.mxu0 %v14353_v19  ;;  %12452 = vmatprep.subr.bf16.mxu1 %v14358_v22 }
 0x193   :  { %12422 = vmatpush3.bf16.msra.mxu0 %v14365_v25 }
 0x194   :  { %12424 = vmatprep.subr.bf16.mxu0 %v14377_v14 }
 0x195   :  { %10791 = vmatmul.mubr.msk.bf16.gmra.mrb[20].mxu0 %vm852_vm0, %v14100_v8  ;;  %10799 = vmatmul.mubr.msk.bf16.gmra.mrb[20].mxu1 %vm852_vm0, %v14100_v8  ;;  %v14370_v8 = vld [vmem:[%s17553_s1 + $0x2b8] ss:$20 sps:$4 sm:$0xff]  }
 0x196   :  { %1589 = vmatprep.mubr.bf16.mxu0 %v17447_v56  ;;  %1702 = vmatprep.mubr.bf16.mxu1 %v17447_v56 }
 0x197   :  { %12454 = vmatpush3.bf16.msra.mxu1 %v14370_v8  ;;  %12426 = vmatpush3.bf16.msra.mxu0 %v14389_v28 }
 0x198   :  { %12456 = vmatprep.subr.bf16.mxu1 %v14382_v27  ;;  %12428 = vmatprep.subr.bf16.mxu0 %v14401_v30 }
 0x19b   :  { %12458 = vmatpush3.bf16.msra.mxu1 %v14394_v29  ;;  %12430 = vmatpush3.bf16.msra.mxu0 %v14413_v32 }
 0x19c   :  { %12460 = vmatprep.subr.bf16.mxu1 %v14406_v31  ;;  %12432 = vmatprep.subr.bf16.mxu0 %v14425_v34 }
 0x19d   :  { %10792 = vmatmul.mubr.msk.bf16.gmra.mrb[24].mxu0 %vm852_vm0, %v14150_v41  ;;  %10800 = vmatmul.mubr.msk.bf16.gmra.mrb[24].mxu1 %vm852_vm0, %v14150_v41  ;;  %v14466_v41 = vld [vmem:[%s17553_s1 + $0x358] ss:$20 sps:$4 sm:$0xff]  }
 0x19e   :  { %1599 = vmatprep.mubr.bf16.mxu0 %v17447_v56  ;;  %1712 = vmatprep.mubr.bf16.mxu1 %v17447_v56 }
 0x19f   :  { %12462 = vmatpush3.bf16.msra.mxu1 %v14418_v33 }
 0x1a0   :  { %12464 = vmatprep.subr.bf16.mxu1 %v14430_v35 }
 0x1a3   :  { %12466 = vmatpush3.bf16.msra.mxu1 %v14442_v37 }
 0x1a4   :  { %12468 = vmatprep.subr.bf16.mxu1 %v14454_v39 }
 0x1a5   :  { %10793 = vmatmul.mubr.msk.bf16.gmra.mrb[28].mxu0 %vm852_vm0, %v14142_v36  ;;  %10801 = vmatmul.mubr.msk.bf16.gmra.mrb[28].mxu1 %vm852_vm0, %v14142_v36  ;;  %v14437_v36 = vld [vmem:[%s17553_s1 + $0xb0] ss:$20 sps:$4 sm:$0xff]  }
 0x1a6   :  { %1609 = vmatprep.mubr.bf16.mxu0 %v17447_v56  ;;  %1722 = vmatprep.mubr.bf16.mxu1 %v17447_v56 }
 0x1a7   :  { %12434 = vmatpush3.bf16.msra.mxu0 %v14437_v36  ;;  %12470 = vmatpush3.bf16.msra.mxu1 %v14466_v41 }
 0x1a8   :  { %12436 = vmatprep.subr.bf16.mxu0 %v14449_v38  ;;  %12472 = vmatprep.subr.bf16.mxu1 %v14478_v43 }
 0x1ab   :  { %12438 = vmatpush3.bf16.msra.mxu0 %v14461_v40  ;;  %12474 = vmatpush3.bf16.msra.mxu1 %v14488_v45 }
 0x1ac   :  { %12440 = vmatprep.subr.bf16.mxu0 %v14473_v42  ;;  %12476 = vmatprep.subr.bf16.mxu1 %v14502_v47 }
 0x1ad   :  { %10794 = vmatmul.mubr.msk.bf16.gmra.mrb[32].mxu0 %vm852_vm0, %v14168_v61  ;;  %10802 = vmatmul.mubr.msk.bf16.gmra.mrb[32].mxu1 %vm852_vm0, %v14168_v61 }
 0x1ae   :  { %1619 = vmatprep.mubr.bf16.mxu0 %v17447_v56  ;;  %1732 = vmatprep.mubr.bf16.mxu1 %v17447_v56 }
 0x1af   :  { %12442 = vmatpush3.bf16.msra.mxu0 %v14483_v44  ;;  %12478 = vmatpush3.bf16.msra.mxu1 %v14512_v49 }
 0x1b0   :  { %12444 = vmatprep.subr.bf16.mxu0 %v14497_v46 }
 0x1b3   :  { %12446 = vmatpush3.bf16.msra.mxu0 %v14507_v48 }
 0x1b5   :  { %10795 = vmatmul.mubr.msk.bf16.gmra.mrb[36].mxu0 %vm852_vm0, %v14166_v59  ;;  %10803 = vmatmul.mubr.msk.bf16.gmra.mrb[36].mxu1 %vm852_vm0, %v14166_v59 }
 0x1b6   :  { %1629 = vmatprep.mubr.bf16.mxu0 %v17447_v56  ;;  %1742 = vmatprep.mubr.bf16.mxu1 %v17447_v56 }
 0x1bd   :  { %10796 = vmatmul.mubr.msk.bf16.gmra.mrb[40].mxu0 %vm852_vm0, %v14180_v4  ;;  %10804 = vmatmul.mubr.msk.bf16.gmra.mrb[40].mxu1 %vm852_vm0, %v14180_v4 }
 0x1be   :  { %1639 = vmatprep.mubr.bf16.mxu0 %v17447_v56  ;;  %1752 = vmatprep.mubr.bf16.mxu1 %v17447_v56 }
 0x1c5   :  { %10797 = vmatmul.mubr.msk.bf16.gmra.mrb[44].mxu0 %vm852_vm0, %v14178_v1  ;;  %10805 = vmatmul.mubr.msk.bf16.gmra.mrb[44].mxu1 %vm852_vm0, %v14178_v1 }
 0x260   :  { %v14518_v50 = vpop.f32.mrb[16].mxu0  ;;  %v14520_v51 = vpop.f32.mrb[16].mxu1 }
 0x261   :  { %17554 = vst [vmem:[#allocation5_spill] sm:$0xff] %v14520_v51  ;;  %v14522_v52 = vpop.f32.mrb[17].mxu0  ;;  %v14524_v53 = vpop.f32.mrb[17].mxu1 }
 0x262   :  { %17555 = vst [vmem:[#allocation6_spill] sm:$0xff] %v14522_v52  ;;  %17556 = vst [vmem:[#allocation7_spill] sm:$0xff] %v14524_v53  ;;  %v14526_v54 = vpop.f32.mrb[18].mxu0  ;;  %v14528_v55 = vpop.f32.mrb[18].mxu1 }
 0x263   :  { %17557 = vst [vmem:[#allocation8_spill] sm:$0xff] %v14528_v55  ;;  %v1827_v57 = vadd.f32 %v14526_v54, %v14518_v50  ;;  %v1869_v58 = vadd.f32 %v14528_v55, %v14520_v51  ;;  %v14534_v59 = vpop.f32.mrb[19].mxu0  ;;  %v14536_v60 = vpop.f32.mrb[19].mxu1 }
 0x264   :  { %17558 = vst [vmem:[#allocation9_spill] sm:$0xff] %v14534_v59  ;;  %17559 = vst [vmem:[#allocation10_spill] sm:$0xff] %v14536_v60  ;;  %v1848_v61 = vadd.f32 %v14534_v59, %v14522_v52  ;;  %v1890_v62 = vadd.f32 %v14536_v60, %v14524_v53 }
 0x268   :  { %v14542_v63 = vpop.f32.mrb[20].mxu0  ;;  %v14544_v0 = vpop.f32.mrb[20].mxu1 }
 0x269   :  { %17560 = vst [vmem:[#allocation11_spill] sm:$0xff] %v14544_v0  ;;  %v1828_v1 = vadd.f32 %v1827_v57, %v14542_v63  ;;  %v1870_v2 = vadd.f32 %v1869_v58, %v14544_v0  ;;  %v14548_v4 = vpop.f32.mrb[21].mxu0  ;;  %v14550_v6 = vpop.f32.mrb[21].mxu1 }
 0x26a   :  { %17561 = vst [vmem:[#allocation12_spill] sm:$0xff] %v14548_v4  ;;  %17562 = vst [vmem:[#allocation13_spill] sm:$0xff] %v14550_v6  ;;  %v1849_v7 = vadd.f32 %v1848_v61, %v14548_v4  ;;  %v1891_v10 = vadd.f32 %v1890_v62, %v14550_v6  ;;  %v14554_v11 = vpop.f32.mrb[22].mxu0  ;;  %v14556_v13 = vpop.f32.mrb[22].mxu1 }
 0x26b   :  { %17563 = vst [vmem:[#allocation14_spill] sm:$0xff] %v14556_v13  ;;  %v1829_v15 = vadd.f32 %v1828_v1, %v14554_v11  ;;  %v1871_v17 = vadd.f32 %v1870_v2, %v14556_v13  ;;  %v14560_v3 = vpop.f32.mrb[23].mxu0  ;;  %v14562_v18 = vpop.f32.mrb[23].mxu1 }
 0x26c   :  { %17564 = vst [vmem:[#allocation15_spill] sm:$0xff] %v14560_v3  ;;  %17565 = vst [vmem:[#allocation16_spill] sm:$0xff] %v14562_v18  ;;  %v1850_v20 = vadd.f32 %v1849_v7, %v14560_v3  ;;  %v1892_v21 = vadd.f32 %v1891_v10, %v14562_v18 }
 0x270   :  { %v14566_v23 = vpop.f32.mrb[24].mxu0  ;;  %v14568_v24 = vpop.f32.mrb[24].mxu1 }
 0x271   :  { %17566 = vst [vmem:[#allocation17_spill] sm:$0xff] %v14566_v23  ;;  %17567 = vst [vmem:[#allocation18_spill] sm:$0xff] %v14568_v24  ;;  %v1830_v26 = vadd.f32 %v1829_v15, %v14566_v23  ;;  %v1872_v57 = vadd.f32 %v1871_v17, %v14568_v24  ;;  %v14572_v58 = vpop.f32.mrb[25].mxu0  ;;  %v14574_v61 = vpop.f32.mrb[25].mxu1 }
 0x272   :  { %17568 = vst [vmem:[#allocation19_spill] sm:$0xff] %v14572_v58  ;;  %17569 = vst [vmem:[#allocation20_spill] sm:$0xff] %v14574_v61  ;;  %v1851_v62 = vadd.f32 %v1850_v20, %v14572_v58  ;;  %v1893_v1 = vadd.f32 %v1892_v21, %v14574_v61  ;;  %v14578_v2 = vpop.f32.mrb[26].mxu0  ;;  %v14580_v7 = vpop.f32.mrb[26].mxu1 }
 0x273   :  { %17570 = vst [vmem:[#allocation21_spill] sm:$0xff] %v14578_v2  ;;  %17571 = vst [vmem:[#allocation22_spill] sm:$0xff] %v14580_v7  ;;  %v1831_v10 = vadd.f32 %v1830_v26, %v14578_v2  ;;  %v1873_v56 = vadd.f32 %v1872_v57, %v14580_v7  ;;  %v14584_v13 = vpop.f32.mrb[27].mxu0  ;;  %v14586_v15 = vpop.f32.mrb[27].mxu1 }
 0x274   :  { %17572 = vst [vmem:[#allocation23_spill] sm:$0xff] %v14584_v13  ;;  %17573 = vst [vmem:[#allocation24_spill] sm:$0xff] %v14586_v15  ;;  %v1852_v17 = vadd.f32 %v1851_v62, %v14584_v13  ;;  %v1894_v24 = vadd.f32 %v1893_v1, %v14586_v15 }
 0x278   :  { %v14590_v0 = vpop.f32.mrb[28].mxu0  ;;  %v14592_v20 = vpop.f32.mrb[28].mxu1 }
 0x279   :  { %17574 = vst [vmem:[#allocation25_spill] sm:$0xff] %v14590_v0  ;;  %17575 = vst [vmem:[#allocation26_spill] sm:$0xff] %v14592_v20  ;;  %v1832_v21 = vadd.f32 %v1831_v10, %v14590_v0  ;;  %v1874_v55 = vadd.f32 %v1873_v56, %v14592_v20  ;;  %v14596_v51 = vpop.f32.mrb[29].mxu0  ;;  %v14598_v26 = vpop.f32.mrb[29].mxu1 }
 0x27a   :  { %17576 = vst [vmem:[#allocation27_spill] sm:$0xff] %v14596_v51  ;;  %17577 = vst [vmem:[#allocation28_spill] sm:$0xff] %v14598_v26  ;;  %v1853_v57 = vadd.f32 %v1852_v17, %v14596_v51  ;;  %v1895_v7 = vadd.f32 %v1894_v24, %v14598_v26  ;;  %v14602_v2 = vpop.f32.mrb[30].mxu0  ;;  %v14604_v62 = vpop.f32.mrb[30].mxu1 }
 0x27b   :  { %17578 = vst [vmem:[#allocation29_spill] sm:$0xff] %v14602_v2  ;;  %17579 = vst [vmem:[#allocation30_spill] sm:$0xff] %v14604_v62  ;;  %v1833_v1 = vadd.f32 %v1832_v21, %v14602_v2  ;;  %v1875_v23 = vadd.f32 %v1874_v55, %v14604_v62  ;;  %v14608_v15 = vpop.f32.mrb[31].mxu0  ;;  %v14610_v10 = vpop.f32.mrb[31].mxu1 }
 0x27c   :  { %17580 = vst [vmem:[#allocation31_spill] sm:$0xff] %v14608_v15  ;;  %17581 = vst [vmem:[#allocation32_spill] sm:$0xff] %v14610_v10  ;;  %v1854_v56 = vadd.f32 %v1853_v57, %v14608_v15  ;;  %v1896_v20 = vadd.f32 %v1895_v7, %v14610_v10 }
 0x280   :  { %v14614_v0 = vpop.f32.mrb[32].mxu0  ;;  %v14616_v17 = vpop.f32.mrb[32].mxu1 }
 0x281   :  { %17582 = vst [vmem:[#allocation33_spill] sm:$0xff] %v14614_v0  ;;  %17583 = vst [vmem:[#allocation34_spill] sm:$0xff] %v14616_v17  ;;  %v1834_v24 = vadd.f32 %v1833_v1, %v14614_v0  ;;  %v1876_v26 = vadd.f32 %v1875_v23, %v14616_v17  ;;  %v14620_v61 = vpop.f32.mrb[33].mxu0  ;;  %v14622_v21 = vpop.f32.mrb[33].mxu1 }
 0x282   :  { %17584 = vst [vmem:[#allocation35_spill] sm:$0xff] %v14620_v61  ;;  %17585 = vst [vmem:[#allocation36_spill] sm:$0xff] %v14622_v21  ;;  %v1855_v55 = vadd.f32 %v1854_v56, %v14620_v61  ;;  %v1897_v62 = vadd.f32 %v1896_v20, %v14622_v21  ;;  %v14626_v2 = vpop.f32.mrb[34].mxu0  ;;  %v14628_v57 = vpop.f32.mrb[34].mxu1 }
 0x283   :  { %17586 = vst [vmem:[#allocation37_spill] sm:$0xff] %v14626_v2  ;;  %17587 = vst [vmem:[#allocation38_spill] sm:$0xff] %v14628_v57  ;;  %v1835_v7 = vadd.f32 %v1834_v24, %v14626_v2  ;;  %v1877_v10 = vadd.f32 %v1876_v26, %v14628_v57  ;;  %v14632_v18 = vpop.f32.mrb[35].mxu0  ;;  %v14634_v1 = vpop.f32.mrb[35].mxu1 }
 0x284   :  { %17588 = vst [vmem:[#allocation39_spill] sm:$0xff] %v14632_v18  ;;  %17589 = vst [vmem:[#allocation40_spill] sm:$0xff] %v14634_v1  ;;  %v1856_v23 = vadd.f32 %v1855_v55, %v14632_v18  ;;  %v1898_v17 = vadd.f32 %v1897_v62, %v14634_v1 }
 0x288   :  { %v14638_v0 = vpop.f32.mrb[36].mxu0  ;;  %v14640_v56 = vpop.f32.mrb[36].mxu1 }
 0x289   :  { %17590 = vst [vmem:[#allocation41_spill] sm:$0xff] %v14638_v0  ;;  %17591 = vst [vmem:[#allocation42_spill] sm:$0xff] %v14640_v56  ;;  %v1836_v20 = vadd.f32 %v1835_v7, %v14638_v0  ;;  %v1878_v21 = vadd.f32 %v1877_v10, %v14640_v56  ;;  %v14644_v6 = vpop.f32.mrb[37].mxu0  ;;  %v14646_v24 = vpop.f32.mrb[37].mxu1 }
 0x28a   :  { %17592 = vst [vmem:[#allocation43_spill] sm:$0xff] %v14644_v6  ;;  %17593 = vst [vmem:[#allocation44_spill] sm:$0xff] %v14646_v24  ;;  %v1857_v26 = vadd.f32 %v1856_v23, %v14644_v6  ;;  %v1899_v57 = vadd.f32 %v1898_v17, %v14646_v24  ;;  %v14650_v2 = vpop.f32.mrb[38].mxu0  ;;  %v14652_v55 = vpop.f32.mrb[38].mxu1 }
 0x28b   :  { %17594 = vst [vmem:[#allocation45_spill] sm:$0xff] %v14650_v2  ;;  %17595 = vst [vmem:[#allocation46_spill] sm:$0xff] %v14652_v55  ;;  %v1837_v62 = vadd.f32 %v1836_v20, %v14650_v2  ;;  %v1879_v1 = vadd.f32 %v1878_v21, %v14652_v55  ;;  %v14656_v60 = vpop.f32.mrb[39].mxu0  ;;  %v14658_v7 = vpop.f32.mrb[39].mxu1 }
 0x28c   :  { %17596 = vst [vmem:[#allocation47_spill] sm:$0xff] %v14656_v60  ;;  %17597 = vst [vmem:[#allocation48_spill] sm:$0xff] %v14658_v7  ;;  %v1858_v10 = vadd.f32 %v1857_v26, %v14656_v60  ;;  %v1900_v56 = vadd.f32 %v1899_v57, %v14658_v7 }
 0x290   :  { %v14662_v0 = vpop.f32.mrb[40].mxu0  ;;  %v14664_v23 = vpop.f32.mrb[40].mxu1 }
 0x291   :  { %17598 = vst [vmem:[#allocation49_spill] sm:$0xff] %v14662_v0  ;;  %17599 = vst [vmem:[#allocation50_spill] sm:$0xff] %v14664_v23  ;;  %v1838_v17 = vadd.f32 %v1837_v62, %v14662_v0  ;;  %v1880_v24 = vadd.f32 %v1879_v1, %v14664_v23  ;;  %v14668_v53 = vpop.f32.mrb[41].mxu0  ;;  %v14670_v20 = vpop.f32.mrb[41].mxu1 }
 0x292   :  { %17600 = vst [vmem:[#allocation51_spill] sm:$0xff] %v14668_v53  ;;  %17601 = vst [vmem:[#allocation52_spill] sm:$0xff] %v14670_v20  ;;  %v1859_v21 = vadd.f32 %v1858_v10, %v14668_v53  ;;  %v1901_v55 = vadd.f32 %v1900_v56, %v14670_v20  ;;  %v14674_v2 = vpop.f32.mrb[42].mxu0  ;;  %v14676_v26 = vpop.f32.mrb[42].mxu1 }
 0x293   :  { %17602 = vst [vmem:[#allocation53_spill] sm:$0xff] %v14674_v2  ;;  %17603 = vst [vmem:[#allocation54_spill] sm:$0xff] %v14676_v26  ;;  %v1839_v57 = vadd.f32 %v1838_v17, %v14674_v2  ;;  %v1881_v7 = vadd.f32 %v1880_v24, %v14676_v26  ;;  %v14680_v60 = vpop.f32.mrb[43].mxu0  ;;  %v14682_v62 = vpop.f32.mrb[43].mxu1 }
 0x294   :  { %17604 = vst [vmem:[#allocation55_spill] sm:$0xff] %v14680_v60  ;;  %17605 = vst [vmem:[#allocation56_spill] sm:$0xff] %v14682_v62  ;;  %v1860_v1 = vadd.f32 %v1859_v21, %v14680_v60  ;;  %v1902_v23 = vadd.f32 %v1901_v55, %v14682_v62 }
 0x298   :  { %v14686_v0 = vpop.f32.mrb[44].mxu0  ;;  %v14688_v10 = vpop.f32.mrb[44].mxu1 }
 0x299   :  { %17606 = vst [vmem:[#allocation57_spill] sm:$0xff] %v14686_v0  ;;  %17607 = vst [vmem:[#allocation58_spill] sm:$0xff] %v14688_v10  ;;  %v1840_v56 = vadd.f32 %v1839_v57, %v14686_v0  ;;  %v1882_v20 = vadd.f32 %v1881_v7, %v14688_v10  ;;  %v14692_v53 = vpop.f32.mrb[45].mxu0  ;;  %v14694_v17 = vpop.f32.mrb[45].mxu1 }
 0x29a   :  { %17608 = vst [vmem:[#allocation59_spill] sm:$0xff] %v14692_v53  ;;  %17609 = vst [vmem:[#allocation60_spill] sm:$0xff] %v14694_v17  ;;  %v1861_v24 = vadd.f32 %v1860_v1, %v14692_v53  ;;  %v1903_v26 = vadd.f32 %v1902_v23, %v14694_v17  ;;  %v14698_v2 = vpop.f32.mrb[46].mxu0  ;;  %v14700_v21 = vpop.f32.mrb[46].mxu1 }
 0x29b   :  { %17610 = vst [vmem:[#allocation61_spill] sm:$0xff] %v14698_v2  ;;  %17611 = vst [vmem:[#allocation62_spill] sm:$0xff] %v14700_v21  ;;  %v1841_v55 = vadd.f32 %v1840_v56, %v14698_v2  ;;  %v1883_v62 = vadd.f32 %v1882_v20, %v14700_v21  ;;  %v14704_v60 = vpop.f32.mrb[47].mxu0  ;;  %v14706_v57 = vpop.f32.mrb[47].mxu1 }
 0x29c   :  { %17612 = vst [vmem:[#allocation63_spill] sm:$0xff] %v14704_v60  ;;  %17613 = vst [vmem:[#allocation64_spill] sm:$0xff] %v14706_v57  ;;  %v1862_v7 = vadd.f32 %v1861_v24, %v14704_v60  ;;  %v1904_v10 = vadd.f32 %v1903_v26, %v14706_v57 }
 0x29d   :  { %v1842_v0 = vrot.slane %v1841_v55, 4  ;;  %v1884_v1 = vrot.slane %v1883_v62, 4 }
 0x29e   :  { %v1863_v53 = vrot.slane %v1862_v7, 4  ;;  %v1905_v23 = vrot.slane %v1904_v10, 4 }
 0x29f   :  { %v1843_v17 = vadd.f32 %v1842_v0, %v1841_v55  ;;  %v1885_v6 = vadd.f32 %v1884_v1, %v1883_v62  ;;  %v147_v0 = vld [vmem:[%s17552_s5 + $0x188] sm:$0xff] }
 0x2a0   :  { %v1864_v18 = vadd.f32 %v1863_v53, %v1862_v7  ;;  %v1906_v61 = vadd.f32 %v1905_v23, %v1904_v10  ;;  %v146_v53 = vld [vmem:[%s17552_s5 + $0x180] sm:$0xff]  ;;  %v17634_v10 = vld [vmem:[#allocation51_spill] sm:$0xff] }
 0x2a1   :  { %v1844_v15 = vrot.slane %v1843_v17, 2  ;;  %v1886_v56 = vrot.slane %v1885_v6, 2 }
 0x2a2   :  { %v1865_v2 = vrot.slane %v1864_v18, 2  ;;  %v1907_v20 = vrot.slane %v1906_v61, 2 }
 0x2a3   :  { %v1845_v21 = vadd.f32 %v1844_v15, %v1843_v17  ;;  %v1887_v51 = vadd.f32 %v1886_v56, %v1885_v6  ;;  %v14716_v6 = vunpack.c.h.bf16 %v146_v53  ;;  %v17640_v1 = vld [vmem:[#allocation63_spill] sm:$0xff] }
 0x2a4   :  { %v1866_v13 = vadd.f32 %v1865_v2, %v1864_v18  ;;  %v1908_v58 = vadd.f32 %v1907_v20, %v1906_v61  ;;  %v14718_v18 = vunpack.c.h.bf16 %v147_v0 }
 0x2a5   :  { %v1846_v3 = vrot.slane %v1845_v21, 1  ;;  %v1888_v24 = vrot.slane %v1887_v51, 1  ;;  %2056 = vmatprep.subr.mxu0 %v14716_v6 }
 0x2a6   :  { %v1867_v60 = vrot.slane %v1866_v13, 1  ;;  %v1909_v26 = vrot.slane %v1908_v58, 1  ;;  %2127 = vmatprep.subr.mxu1 %v14718_v18 }
 0x2a7   :  { %v1847_v59 = vadd.f32 %v1846_v3, %v1845_v21  ;;  %v1889_v52 = vadd.f32 %v1888_v24, %v1887_v51  ;;  %v17509_v51 = vmov 0.0   ;;  %v17636_v21 = vld [vmem:[#allocation55_spill] sm:$0xff] }
 0x2a8   :  { %v1868_v57 = vadd.f32 %v1867_v60, %v1866_v13  ;;  %v1910_v4 = vadd.f32 %v1909_v26, %v1908_v58  ;;  %v14720_v60 = vunpack.c.l.bf16 %v146_v53  ;;  %v14722_v13 = vunpack.c.l.bf16 %v147_v0 }
 0x2aa   :  { %1975 = vmatprep.mubr.f32.mxu0 %v1868_v57  ;;  %2045 = vmatprep.mubr.f32.mxu1 %v1910_v4  ;;  %v17638_v57 = vld [vmem:[#allocation59_spill] sm:$0xff] }
 0x2ab   :  { %1976 = vmatmul.mubr.f32.vlgmr.msra.gmra.mrb[48].mxu0 %v1847_v59  ;;  %2046 = vmatmul.mubr.f32.vlgmr.msra.gmra.mrb[48].mxu1 %v1889_v52 }
 0x2ac   :  { %2057 = vmatpush1.msra.mxu0 %v14720_v60  ;;  %2120 = vmatprep.mubr.f32.mxu0 %v17509_v51 }
 0x2ad   :  { %2128 = vmatpush1.msra.mxu1 %v14722_v13  ;;  %2191 = vmatprep.mubr.f32.mxu1 %v17509_v51  ;;  %v17677_v51 = vld [vmem:[#allocation33_spill] sm:$0xff] }
 0x2ae   :  { %12480 = vmatprep.subr.bf16.mxu0 %v14329_v5  ;;  %12512 = vmatprep.subr.bf16.mxu1 %v14334_v9  ;;  %v2198_v5 = vlaneseq }
 0x2b0   :  { %v2199_v9 = vshrl.u32 %v2198_v5, 7  ;;  %v17649_v5 = vld [vmem:[#allocation20_spill] sm:$0xff] }
 0x37e   :  { %v11289_v52 = vpop.f32.mrb[48].mxu0  ;;  %v11324_v59 = vpop.f32.mrb[48].mxu1 }
 0x37f   :  { %v11290_v4 = vpop.f32.mrb[49].mxu0  ;;  %v11325_v3 = vpop.f32.mrb[49].mxu1 }
 0x380   :  { %v11291_v58 = vadd.f32 %v11290_v4, %v11289_v52  ;;  %v11326_v61 = vadd.f32 %v11325_v3, %v11324_v59  ;;  %v17641_v52 = vld [vmem:[#allocation7_spill] sm:$0xff]  ;;  %v17643_v4 = vld [vmem:[#allocation10_spill] sm:$0xff] }
 0x382   :  { %v2048_v2 = vadd.f32 %v11326_v61, %v11291_v58  ;;  %v17645_v58 = vld [vmem:[#allocation13_spill] sm:$0xff] }
 0x384   :  { %v2051_v15 = vmul.f32 0.00012207031, %v2048_v2  ;;  %v17647_v2 = vld [vmem:[#allocation16_spill] sm:$0xff] }
 0x386   :  { %10806 = vmatmul.mubr.msk.f32.vlgmr.msra.gmra.mrb[50].mxu0 %vm2052_vm1, %v2051_v15  ;;  %10807 = vmatmul.mubr.msk.f32.vlgmr.msra.gmra.mrb[50].mxu1 %vm2052_vm1, %v2051_v15 }
 0x387   :  { %12482 = vmatpush3.bf16.msra.mxu0 %v14341_v12  ;;  %12514 = vmatpush3.bf16.msra.mxu1 %v14346_v16  ;;  %v14766_v12 = vsub.s32 0, %v2199_v9 }
 0x388   :  { %12484 = vmatprep.subr.bf16.mxu0 %v14353_v19  ;;  %12516 = vmatprep.subr.bf16.mxu1 %v14358_v22 }
 0x389   :  { %17614 = vst [vmem:[#allocation65_spill] sm:$0xff] %v14766_v12 }
 0x38b   :  { %12486 = vmatpush3.bf16.msra.mxu0 %v14365_v25  ;;  %12518 = vmatpush3.bf16.msra.mxu1 %v14370_v8 }
 0x38c   :  { %12488 = vmatprep.subr.bf16.mxu0 %v14377_v14  ;;  %12520 = vmatprep.subr.bf16.mxu1 %v14382_v27 }
 0x38f   :  { %12490 = vmatpush3.bf16.msra.mxu0 %v14389_v28  ;;  %12522 = vmatpush3.bf16.msra.mxu1 %v14394_v29 }
 0x390   :  { %12492 = vmatprep.subr.bf16.mxu0 %v14401_v30  ;;  %12524 = vmatprep.subr.bf16.mxu1 %v14406_v31  ;;  %v17615_v31 = vld [vmem:[#allocation6_spill] sm:$0xff] }
 0x393   :  { %12494 = vmatpush3.bf16.msra.mxu0 %v14413_v32  ;;  %12526 = vmatpush3.bf16.msra.mxu1 %v14418_v33  ;;  %v17616_v33 = vld [vmem:[#allocation9_spill] sm:$0xff] }
 0x394   :  { %12496 = vmatprep.subr.bf16.mxu0 %v14425_v34  ;;  %12528 = vmatprep.subr.bf16.mxu1 %v14430_v35  ;;  %v17617_v35 = vld [vmem:[#allocation12_spill] sm:$0xff] }
 0x397   :  { %12498 = vmatpush3.bf16.msra.mxu0 %v14437_v36  ;;  %12530 = vmatpush3.bf16.msra.mxu1 %v14442_v37  ;;  %v17618_v37 = vld [vmem:[#allocation15_spill] sm:$0xff] }
 0x398   :  { %12500 = vmatprep.subr.bf16.mxu0 %v14449_v38  ;;  %12532 = vmatprep.subr.bf16.mxu1 %v14454_v39  ;;  %v17619_v39 = vld [vmem:[#allocation19_spill] sm:$0xff] }
 0x39b   :  { %12502 = vmatpush3.bf16.msra.mxu0 %v14461_v40  ;;  %12534 = vmatpush3.bf16.msra.mxu1 %v14466_v41  ;;  %v17620_v41 = vld [vmem:[#allocation23_spill] sm:$0xff] }
 0x39c   :  { %12504 = vmatprep.subr.bf16.mxu0 %v14473_v42  ;;  %12536 = vmatprep.subr.bf16.mxu1 %v14478_v43  ;;  %v17622_v43 = vld [vmem:[#allocation27_spill] sm:$0xff] }
 0x39f   :  { %12506 = vmatpush3.bf16.msra.mxu0 %v14483_v44  ;;  %12538 = vmatpush3.bf16.msra.mxu1 %v14488_v45  ;;  %v17624_v45 = vld [vmem:[#allocation31_spill] sm:$0xff] }
 0x3a0   :  { %12508 = vmatprep.subr.bf16.mxu0 %v14497_v46  ;;  %12540 = vmatprep.subr.bf16.mxu1 %v14502_v47  ;;  %v17626_v47 = vld [vmem:[#allocation35_spill] sm:$0xff] }
 0x3a3   :  { %12510 = vmatpush3.bf16.msra.mxu0 %v14507_v48  ;;  %12542 = vmatpush3.bf16.msra.mxu1 %v14512_v49  ;;  %v17628_v49 = vld [vmem:[#allocation39_spill] sm:$0xff] }
 0x3a4   :  { %2573 = vmatprep.subr.mxu0 %v14716_v6  ;;  %2644 = vmatprep.subr.mxu1 %v14718_v18 }
 0x459   :  { %v2122_v16 = vpop.f32.mrb[50].mxu0  ;;  %v2193_v19 = vpop.f32.mrb[50].mxu1 }
 0x45a   :  { %v14769_v22 = vrot.slane %v2122_v16, %v14766_v12  ;;  %v2124_v25 = vpop.f32.mrb[51].mxu0  ;;  %v2195_v8 = vpop.f32.mrb[51].mxu1  ;;  %v17651_v16 = vld [vmem:[#allocation24_spill] sm:$0xff] }
 0x45b   :  { %v2205_v14 = vrot.slane %v2124_v25, %v14766_v12  ;;  %v2213_v56 = vrot.slane %v2195_v8, %v14766_v12  ;;  %v17653_v8 = vld [vmem:[#allocation28_spill] sm:$0xff] }
 0x45c   :  { %v14774_v27 = vsub.f32 %v14518_v50, %v14769_v22  ;;  %v14778_v28 = vsub.f32 %v14526_v54, %v14769_v22  ;;  %v14782_v29 = vsub.f32 %v14542_v63, %v14769_v22  ;;  %v14786_v30 = vsub.f32 %v14554_v11, %v14769_v22  ;;  %v17630_v54 = vld [vmem:[#allocation43_spill] sm:$0xff] }
 0x45d   :  { %v14789_v32 = vsub.f32 %v17615_v31, %v2205_v14  ;;  %v14792_v34 = vsub.f32 %v17616_v33, %v2205_v14  ;;  %v14795_v36 = vsub.f32 %v17617_v35, %v2205_v14  ;;  %v14798_v38 = vsub.f32 %v17618_v37, %v2205_v14  ;;  %v17632_v11 = vld [vmem:[#allocation47_spill] sm:$0xff]  ;;  %v17655_v33 = vld [vmem:[#allocation32_spill] sm:$0xff] }
 0x45e   :  { %v14801_v40 = vsub.f32 %v17619_v39, %v2205_v14  ;;  %v14804_v42 = vsub.f32 %v17620_v41, %v2205_v14  ;;  %v14807_v44 = vsub.f32 %v17622_v43, %v2205_v14  ;;  %v14810_v46 = vsub.f32 %v17624_v45, %v2205_v14  ;;  %v17657_v37 = vld [vmem:[#allocation36_spill] sm:$0xff] }
 0x45f   :  { %v14813_v48 = vsub.f32 %v17626_v47, %v2205_v14  ;;  %v14816_v50 = vsub.f32 %v17628_v49, %v2205_v14  ;;  %v14819_v63 = vsub.f32 %v17630_v54, %v2205_v14  ;;  %v14822_v62 = vsub.f32 %v17632_v11, %v2205_v14  ;;  %v17659_v41 = vld [vmem:[#allocation40_spill] sm:$0xff] }
 0x460   :  { %17621 = vst [vmem:[#allocation6_spill] sm:$0xff] %v14804_v42  ;;  %17623 = vst [vmem:[#allocation9_spill] sm:$0xff] %v14807_v44  ;;  %v14825_v17 = vsub.f32 %v17634_v10, %v2205_v14  ;;  %v14828_v55 = vsub.f32 %v17636_v21, %v2205_v14  ;;  %v14831_v7 = vsub.f32 %v17638_v57, %v2205_v14  ;;  %v17661_v45 = vld [vmem:[#allocation44_spill] sm:$0xff] }
 0x461   :  { %17625 = vst [vmem:[#allocation12_spill] sm:$0xff] %v14810_v46  ;;  %17627 = vst [vmem:[#allocation15_spill] sm:$0xff] %v14813_v48  ;;  %v14834_v23 = vsub.f32 %v17640_v1, %v2205_v14  ;;  %v2279_v20 = vmul.f32 %v14789_v32, %v14789_v32  ;;  %v2283_v24 = vmul.f32 %v14792_v34, %v14792_v34  ;;  %v17663_v49 = vld [vmem:[#allocation48_spill] sm:$0xff] }
 0x462   :  { %17629 = vst [vmem:[#allocation19_spill] sm:$0xff] %v14816_v50  ;;  %17631 = vst [vmem:[#allocation23_spill] sm:$0xff] %v14819_v63  ;;  %v2287_v26 = vmul.f32 %v14795_v36, %v14795_v36  ;;  %v2291_v53 = vmul.f32 %v14798_v38, %v14798_v38  ;;  %v14846_v59 = vsub.f32 %v17641_v52, %v2213_v56  ;;  %v17665_v11 = vld [vmem:[#allocation52_spill] sm:$0xff] }
 0x463   :  { %17633 = vst [vmem:[#allocation27_spill] sm:$0xff] %v14822_v62  ;;  %17635 = vst [vmem:[#allocation31_spill] sm:$0xff] %v14825_v17  ;;  %v2363_v0 = vadd.f32 %v2283_v24, %v2279_v20  ;;  %v14849_v3 = vsub.f32 %v17643_v4, %v2213_v56  ;;  %v14852_v61 = vsub.f32 %v17645_v58, %v2213_v56  ;;  %v17667_v21 = vld [vmem:[#allocation56_spill] sm:$0xff] }
 0x464   :  { %17637 = vst [vmem:[#allocation35_spill] sm:$0xff] %v14828_v55  ;;  %17639 = vst [vmem:[#allocation39_spill] sm:$0xff] %v14831_v7  ;;  %v14855_v15 = vsub.f32 %v17647_v2, %v2213_v56  ;;  %v14858_v9 = vsub.f32 %v17649_v5, %v2213_v56  ;;  %v14861_v25 = vsub.f32 %v17651_v16, %v2213_v56  ;;  %v17668_v24 = vld [vmem:[#allocation60_spill] sm:$0xff] }
 0x465   :  { %17642 = vst [vmem:[#allocation43_spill] sm:$0xff] %v14846_v59  ;;  %17644 = vst [vmem:[#allocation47_spill] sm:$0xff] %v14849_v3  ;;  %v14864_v14 = vsub.f32 %v17653_v8, %v2213_v56  ;;  %v2364_v31 = vadd.f32 %v2363_v0, %v2287_v26  ;;  %v14867_v35 = vsub.f32 %v17655_v33, %v2213_v56  ;;  %v17670_v0 = vld [vmem:[#allocation64_spill] sm:$0xff] }
 0x466   :  { %17646 = vst [vmem:[#allocation51_spill] sm:$0xff] %v14852_v61  ;;  %17648 = vst [vmem:[#allocation55_spill] sm:$0xff] %v14855_v15  ;;  %v14870_v39 = vsub.f32 %v17657_v37, %v2213_v56  ;;  %v14873_v43 = vsub.f32 %v17659_v41, %v2213_v56  ;;  %v14876_v47 = vsub.f32 %v17661_v45, %v2213_v56 }
 0x467   :  { %17650 = vst [vmem:[#allocation59_spill] sm:$0xff] %v14858_v9  ;;  %17652 = vst [vmem:[#allocation63_spill] sm:$0xff] %v14861_v25  ;;  %v14879_v54 = vsub.f32 %v17663_v49, %v2213_v56  ;;  %v14882_v10 = vsub.f32 %v17665_v11, %v2213_v56  ;;  %v14885_v57 = vsub.f32 %v17667_v21, %v2213_v56  ;;  %v17671_v49 = vld [vmem:[#allocation17_spill] sm:$0xff] }
 0x468   :  { %17654 = vst [vmem:[#allocation7_spill] sm:$0xff] %v14864_v14  ;;  %17656 = vst [vmem:[#allocation10_spill] sm:$0xff] %v14867_v35  ;;  %v2295_v1 = vmul.f32 %v14801_v40, %v14801_v40  ;;  %v2365_v20 = vadd.f32 %v2364_v31, %v2291_v53  ;;  %v14890_v26 = vsub.f32 %v17668_v24, %v2213_v56  ;;  %v17673_v21 = vld [vmem:[#allocation21_spill] sm:$0xff] }
 0x469   :  { %17658 = vst [vmem:[#allocation13_spill] sm:$0xff] %v14870_v39  ;;  %17660 = vst [vmem:[#allocation16_spill] sm:$0xff] %v14873_v43  ;;  %v14893_v52 = vsub.f32 %v17670_v0, %v2213_v56  ;;  %v2281_v4 = vmul.f32 %v14846_v59, %v14846_v59  ;;  %v2285_v58 = vmul.f32 %v14849_v3, %v14849_v3  ;;  %v17675_v24 = vld [vmem:[#allocation25_spill] sm:$0xff] }
 0x46a   :  { %17662 = vst [vmem:[#allocation20_spill] sm:$0xff] %v14876_v47  ;;  %17664 = vst [vmem:[#allocation24_spill] sm:$0xff] %v14879_v54  ;;  %v2299_v2 = vmul.f32 %v14804_v42, %v14804_v42  ;;  %v2366_v5 = vadd.f32 %v2365_v20, %v2295_v1  ;;  %v14902_v16 = vrot.slane %v2193_v19, %v14766_v12 }
 0x46b   :  { %17666 = vst [vmem:[#allocation28_spill] sm:$0xff] %v14882_v10  ;;  %17669 = vst [vmem:[#allocation32_spill] sm:$0xff] %v14890_v26  ;;  %v2303_v53 = vmul.f32 %v14807_v44, %v14807_v44  ;;  %v2307_v56 = vmul.f32 %v14810_v46, %v14810_v46  ;;  %v2311_v8 = vmul.f32 %v14813_v48, %v14813_v48  ;;  %v17688_v48 = vld [vmem:[#allocation14_spill] sm:$0xff] }
 0x46c   :  { %v2315_v31 = vmul.f32 %v14816_v50, %v14816_v50  ;;  %v2319_v33 = vmul.f32 %v14819_v63, %v14819_v63  ;;  %v2367_v37 = vadd.f32 %v2366_v5, %v2299_v2  ;;  %v2289_v19 = vmul.f32 %v14852_v61, %v14852_v61  ;;  %v17676_v2 = vld [vmem:[#allocation29_spill] sm:$0xff] }
 0x46d   :  { %v2293_v41 = vmul.f32 %v14855_v15, %v14855_v15  ;;  %v2405_v45 = vadd.f32 %v2285_v58, %v2281_v4  ;;  %v14920_v11 = vsub.f32 %v17671_v49, %v14769_v22  ;;  %v14924_v1 = vsub.f32 %v17673_v21, %v14769_v22  ;;  %v17678_v49 = vld [vmem:[#allocation37_spill] sm:$0xff] }
 0x46e   :  { %v2368_v20 = vadd.f32 %v2367_v37, %v2303_v53  ;;  %v14928_v0 = vsub.f32 %v17675_v24, %v14769_v22  ;;  %v14932_v5 = vsub.f32 %v17676_v2, %v14769_v22  ;;  %v14936_v4 = vsub.f32 %v17677_v51, %v14769_v22  ;;  %v17679_v21 = vld [vmem:[#allocation41_spill] sm:$0xff] }
 0x46f   :  { %17672 = vst [vmem:[#allocation36_spill] sm:$0xff] %v14920_v11  ;;  %17674 = vst [vmem:[#allocation40_spill] sm:$0xff] %v14924_v1  ;;  %v2406_v58 = vadd.f32 %v2405_v45, %v2289_v19  ;;  %v14940_v15 = vsub.f32 %v17678_v49, %v14769_v22  ;;  %v14944_v53 = vsub.f32 %v17679_v21, %v14769_v22  ;;  %v17680_v37 = vld [vmem:[#allocation45_spill] sm:$0xff] }
 0x470   :  { %v14948_v24 = vsub.f32 %v17680_v37, %v14769_v22  ;;  %v2369_v61 = vadd.f32 %v2368_v20, %v2307_v56  ;;  %v17681_v2 = vld [vmem:[#allocation49_spill] sm:$0xff]  ;;  %v2323_v21 = vmul.f32 %v14822_v62, %v14822_v62  ;;  %v2297_v37 = vmul.f32 %v14858_v9, %v14858_v9 }
 0x471   :  { %v14952_v3 = vsub.f32 %v17681_v2, %v14769_v22  ;;  %v17682_v51 = vld [vmem:[#allocation53_spill] sm:$0xff]  ;;  %v2407_v59 = vadd.f32 %v2406_v58, %v2293_v41  ;;  %v2327_v2 = vmul.f32 %v14825_v17, %v14825_v17  ;;  %v2278_v63 = vmul.f32 %v14774_v27, %v14774_v27 }
 0x472   :  { %v14956_v19 = vsub.f32 %v17682_v51, %v14769_v22  ;;  %v17683_v45 = vld [vmem:[#allocation57_spill] sm:$0xff]  ;;  %v2370_v51 = vadd.f32 %v2369_v61, %v2311_v8  ;;  %v2331_v62 = vmul.f32 %v14828_v55, %v14828_v55  ;;  %v2335_v41 = vmul.f32 %v14831_v7, %v14831_v7 }
 0x473   :  { %v14960_v49 = vsub.f32 %v17683_v45, %v14769_v22  ;;  %v17684_v56 = vld [vmem:[#allocation61_spill] sm:$0xff]  ;;  %v2282_v45 = vmul.f32 %v14778_v28, %v14778_v28  ;;  %v2408_v58 = vadd.f32 %v2407_v59, %v2297_v37  ;;  %v2305_v61 = vmul.f32 %v14864_v14, %v14864_v14 }
 0x474   :  { %v14968_v20 = vsub.f32 %v17684_v56, %v14769_v22  ;;  %v2301_v22 = vmul.f32 %v14861_v25, %v14861_v25  ;;  %v2371_v56 = vadd.f32 %v2370_v51, %v2315_v31  ;;  %v2309_v8 = vmul.f32 %v14867_v35, %v14867_v35 }
 0x475   :  { %v2313_v9 = vmul.f32 %v14870_v39, %v14870_v39  ;;  %v2317_v55 = vmul.f32 %v14873_v43, %v14873_v43  ;;  %v2286_v7 = vmul.f32 %v14782_v29, %v14782_v29  ;;  %v2290_v59 = vmul.f32 %v14786_v30, %v14786_v30  ;;  %v17685_v39 = vld [vmem:[#allocation5_spill] sm:$0xff]  ;;  %v17687_v43 = vld [vmem:[#allocation11_spill] sm:$0xff] }
 0x476   :  { %v2409_v17 = vadd.f32 %v2408_v58, %v2301_v22  ;;  %v2372_v31 = vadd.f32 %v2371_v56, %v2319_v33  ;;  %v2294_v37 = vmul.f32 %v14920_v11, %v14920_v11  ;;  %v2298_v51 = vmul.f32 %v14924_v1, %v14924_v1  ;;  %v17686_v22 = vld [vmem:[#allocation8_spill] sm:$0xff] }
 0x477   :  { %v2342_v35 = vadd.f32 %v2282_v45, %v2278_v63  ;;  %v15000_v25 = vsub.f32 %v17685_v39, %v14902_v16  ;;  %v15004_v58 = vsub.f32 %v17686_v22, %v14902_v16  ;;  %v15008_v50 = vsub.f32 %v17687_v43, %v14902_v16  ;;  %v17689_v63 = vld [vmem:[#allocation18_spill] sm:$0xff] }
 0x478   :  { %v2410_v14 = vadd.f32 %v2409_v17, %v2305_v61  ;;  %v2373_v33 = vadd.f32 %v2372_v31, %v2323_v21  ;;  %v15012_v46 = vsub.f32 %v17688_v48, %v14902_v16  ;;  %v15016_v17 = vsub.f32 %v17689_v63, %v14902_v16  ;;  %v17690_v45 = vld [vmem:[#allocation22_spill] sm:$0xff] }
 0x479   :  { %v2343_v56 = vadd.f32 %v2342_v35, %v2286_v7  ;;  %v15020_v61 = vsub.f32 %v17690_v45, %v14902_v16  ;;  %v17691_v22 = vld [vmem:[#allocation26_spill] sm:$0xff] }
 0x47a   :  { %v2411_v39 = vadd.f32 %v2410_v14, %v2309_v8  ;;  %v15024_v44 = vsub.f32 %v17691_v22, %v14902_v16  ;;  %v17692_v43 = vld [vmem:[#allocation30_spill] sm:$0xff]  ;;  %v2374_v35 = vadd.f32 %v2373_v33, %v2327_v2 }
 0x47b   :  { %v15028_v7 = vsub.f32 %v17692_v43, %v14902_v16  ;;  %v2344_v48 = vadd.f32 %v2343_v56, %v2290_v59  ;;  %v17693_v21 = vld [vmem:[#allocation34_spill] sm:$0xff] }
 0x47c   :  { %v15032_v31 = vsub.f32 %v17693_v21, %v14902_v16  ;;  %v17694_v14 = vld [vmem:[#allocation38_spill] sm:$0xff]  ;;  %v2412_v63 = vadd.f32 %v2411_v39, %v2313_v9  ;;  %v2375_v33 = vadd.f32 %v2374_v35, %v2331_v62  ;;  %v2339_v62 = vmul.f32 %v14834_v23, %v14834_v23 }
 0x47d   :  { %v15036_v8 = vsub.f32 %v17694_v14, %v14902_v16  ;;  %v17695_v45 = vld [vmem:[#allocation42_spill] sm:$0xff]  ;;  %v2345_v56 = vadd.f32 %v2344_v48, %v2294_v37  ;;  %v2321_v14 = vmul.f32 %v14876_v47, %v14876_v47  ;;  %v2302_v35 = vmul.f32 %v14928_v0, %v14928_v0 }
 0x47e   :  { %v15040_v1 = vsub.f32 %v17695_v45, %v14902_v16  ;;  %v17696_v22 = vld [vmem:[#allocation46_spill] sm:$0xff]  ;;  %v2413_v45 = vadd.f32 %v2412_v63, %v2317_v55  ;;  %v2376_v37 = vadd.f32 %v2375_v33, %v2335_v41  ;;  %v2284_v55 = vmul.f32 %v15004_v58, %v15004_v58 }
 0x47f   :  { %v15044_v11 = vsub.f32 %v17696_v22, %v14902_v16  ;;  %v17697_v2 = vld [vmem:[#allocation50_spill] sm:$0xff]  ;;  %v2346_v48 = vadd.f32 %v2345_v56, %v2298_v51  ;;  %v2306_v63 = vmul.f32 %v14932_v5, %v14932_v5  ;;  %v2329_v41 = vmul.f32 %v14882_v10, %v14882_v10 }
 0x480   :  { %v15048_v59 = vsub.f32 %v17697_v2, %v14902_v16  ;;  %v17698_v43 = vld [vmem:[#allocation54_spill] sm:$0xff]  ;;  %v2325_v2 = vmul.f32 %v14879_v54, %v14879_v54  ;;  %v2310_v56 = vmul.f32 %v14936_v4, %v14936_v4 }
 0x481   :  { %v15052_v21 = vsub.f32 %v17698_v43, %v14902_v16  ;;  %v17699_v9 = vld [vmem:[#allocation58_spill] sm:$0xff]  ;;  %v2414_v43 = vadd.f32 %v2413_v45, %v2321_v14  ;;  %v2333_v45 = vmul.f32 %v14885_v57, %v14885_v57 }
 0x482   :  { %v15056_v39 = vsub.f32 %v17699_v9, %v14902_v16  ;;  %v17700_v22 = vld [vmem:[#allocation62_spill] sm:$0xff]  ;;  %v2280_v9 = vmul.f32 %v15000_v25, %v15000_v25 }
 0x483   :  { %v15062_v42 = vsub.f32 %v17700_v22, %v14902_v16  ;;  %v2377_v16 = vadd.f32 %v2376_v37, %v2339_v62  ;;  %v2347_v22 = vadd.f32 %v2346_v48, %v2302_v35  ;;  %v2415_v33 = vadd.f32 %v2414_v43, %v2325_v2 }
 0x484   :  { %v2288_v62 = vmul.f32 %v15008_v50, %v15008_v50  ;;  %v2384_v37 = vadd.f32 %v2284_v55, %v2280_v9  ;;  %v2314_v35 = vmul.f32 %v14940_v15, %v14940_v15  ;;  %v2337_v2 = vmul.f32 %v14890_v26, %v14890_v26 }
 0x485   :  { %v2378_v51 = vrot.slane %v2377_v16, 4  ;;  %v2348_v14 = vadd.f32 %v2347_v22, %v2306_v63  ;;  %v2416_v54 = vadd.f32 %v2415_v33, %v2329_v41  ;;  %v2292_v63 = vmul.f32 %v15012_v46, %v15012_v46 }
 0x486   :  { %v2385_v22 = vadd.f32 %v2384_v37, %v2288_v62  ;;  %v2318_v41 = vmul.f32 %v14944_v53, %v14944_v53  ;;  %v2341_v9 = vmul.f32 %v14893_v52, %v14893_v52  ;;  %v2300_v62 = vmul.f32 %v15020_v61, %v15020_v61 }
 0x487   :  { %v2379_v47 = vadd.f32 %v2378_v51, %v2377_v16  ;;  %v2349_v48 = vadd.f32 %v2348_v14, %v2310_v56  ;;  %v2417_v43 = vadd.f32 %v2416_v54, %v2333_v45  ;;  %v2296_v16 = vmul.f32 %v15016_v17, %v15016_v17 }
 0x488   :  { %v2386_v51 = vadd.f32 %v2385_v22, %v2292_v63  ;;  %v2322_v54 = vmul.f32 %v14948_v24, %v14948_v24 }
 0x489   :  { %v2380_v10 = vrot.slane %v2379_v47, 2  ;;  %v2350_v33 = vadd.f32 %v2349_v48, %v2314_v35  ;;  %v2418_v55 = vadd.f32 %v2417_v43, %v2337_v2  ;;  %v2326_v35 = vmul.f32 %v14952_v3, %v14952_v3 }
 0x48a   :  { %v2387_v37 = vadd.f32 %v2386_v51, %v2296_v16  ;;  %v2304_v43 = vmul.f32 %v15024_v44, %v15024_v44 }
 0x48b   :  { %v2381_v56 = vadd.f32 %v2380_v10, %v2379_v47  ;;  %v2351_v14 = vadd.f32 %v2350_v33, %v2318_v41  ;;  %v2419_v45 = vadd.f32 %v2418_v55, %v2341_v9  ;;  %v2330_v10 = vmul.f32 %v14956_v19, %v14956_v19 }
 0x48c   :  { %v2388_v63 = vadd.f32 %v2387_v37, %v2300_v62  ;;  %v2308_v33 = vmul.f32 %v15028_v7, %v15028_v7  ;;  %v2334_v55 = vmul.f32 %v14960_v49, %v14960_v49 }
 0x48d   :  { %v2382_v26 = vrot.slane %v2381_v56, 1  ;;  %v2352_v48 = vadd.f32 %v2351_v14, %v2322_v54  ;;  %v2420_v2 = vrot.slane %v2419_v45, 4  ;;  %v2312_v54 = vmul.f32 %v15032_v31, %v15032_v31 }
 0x48e   :  { %v2389_v9 = vadd.f32 %v2388_v63, %v2304_v43 }
 0x48f   :  { %v2383_v47 = vadd.f32 %v2382_v26, %v2381_v56  ;;  %v2353_v22 = vadd.f32 %v2352_v48, %v2326_v35  ;;  %v2421_v41 = vadd.f32 %v2420_v2, %v2419_v45  ;;  %v2338_v26 = vmul.f32 %v14968_v20, %v14968_v20 }
 0x490   :  { %v2390_v14 = vadd.f32 %v2389_v9, %v2308_v33  ;;  %v2316_v45 = vmul.f32 %v15036_v8, %v15036_v8  ;;  %v2320_v2 = vmul.f32 %v15040_v1, %v15040_v1 }
 0x491   :  { %2490 = vmatprep.mubr.f32.mxu0 %v2383_v47  ;;  %v2354_v16 = vadd.f32 %v2353_v22, %v2330_v10  ;;  %v2422_v51 = vrot.slane %v2421_v41, 2  ;;  %v2324_v10 = vmul.f32 %v15044_v11, %v15044_v11 }
 0x492   :  { %v2391_v37 = vadd.f32 %v2390_v14, %v2312_v54  ;;  %v2336_v14 = vmul.f32 %v15056_v39, %v15056_v39 }
 0x493   :  { %v2355_v56 = vadd.f32 %v2354_v16, %v2334_v55  ;;  %v2423_v62 = vadd.f32 %v2422_v51, %v2421_v41  ;;  %v2328_v41 = vmul.f32 %v15048_v59, %v15048_v59  ;;  %v2332_v16 = vmul.f32 %v15052_v21, %v15052_v21 }
 0x494   :  { %v2392_v43 = vadd.f32 %v2391_v37, %v2316_v45 }
 0x495   :  { %v2356_v35 = vadd.f32 %v2355_v56, %v2338_v26  ;;  %v2424_v48 = vrot.slane %v2423_v62, 1 }
 0x496   :  { %v2393_v22 = vadd.f32 %v2392_v43, %v2320_v2  ;;  %v17701_v2 = vmov 0.0  }
 0x497   :  { %v2357_v63 = vrot.slane %v2356_v35, 4  ;;  %v2425_v47 = vadd.f32 %v2424_v48, %v2423_v62  ;;  %v2340_v62 = vmul.f32 %v15062_v42, %v15062_v42 }
 0x498   :  { %v2394_v9 = vadd.f32 %v2393_v22, %v2324_v10 }
 0x499   :  { %v2358_v33 = vadd.f32 %v2357_v63, %v2356_v35  ;;  %2560 = vmatprep.mubr.f32.mxu1 %v2425_v47 }
 0x49a   :  { %v2395_v51 = vadd.f32 %v2394_v9, %v2328_v41 }
 0x49b   :  { %v2359_v55 = vrot.slane %v2358_v33, 2 }
 0x49c   :  { %v2396_v26 = vadd.f32 %v2395_v51, %v2332_v16 }
 0x49d   :  { %v2360_v54 = vadd.f32 %v2359_v55, %v2358_v33 }
 0x49e   :  { %v2397_v45 = vadd.f32 %v2396_v26, %v2336_v14  ;;  %v456_v26 = vld [vmem:[%s17702_s29] sm:$0x1] }
 0x49f   :  { %v2361_v56 = vrot.slane %v2360_v54, 1 }
 0x4a0   :  { %v2398_v35 = vadd.f32 %v2397_v45, %v2340_v62  ;;  %v13234_v45 = vld [vmem:[%s17553_s1 + $0xc] ss:$20 sps:$4 sm:$0xff]  }
 0x4a1   :  { %v2362_v37 = vadd.f32 %v2361_v56, %v2360_v54 }
 0x4a2   :  { %v2399_v48 = vrot.slane %v2398_v35, 4 }
 0x4a3   :  { %2491 = vmatmul.mubr.f32.vlgmr.msra.gmra.mrb[52].mxu0 %v2362_v37  ;;  %v457_v37 = vld [vmem:[%s17702_s29 + $0x1] sm:$0x1]  ;;  %s17732_s29 = sld [smem:[#allocation73_spill]] }
 0x4a4   :  { %2574 = vmatpush1.msra.mxu0 %v14720_v60  ;;  %2637 = vmatprep.mubr.f32.mxu0 %v17701_v2  ;;  %v2400_v43 = vadd.f32 %v2399_v48, %v2398_v35  ;;  %v13229_v35 = vld [vmem:[%s17553_s1] ss:$20 sps:$4 sm:$0xff]   ;;  %v13232_v48 = vld [vmem:[%s17553_s1 + $0x8] ss:$20 sps:$4 sm:$0xff]  }
 0x4a5   :  { %2798 = vmatprep.subr.mxu0 %v14716_v6 }
 0x4a6   :  { %v2401_v63 = vrot.slane %v2400_v43, 2 }
 0x4a8   :  { %v2402_v47 = vadd.f32 %v2401_v63, %v2400_v43  ;;  %v13240_v43 = vld [vmem:[%s17553_s1 + $0x34] ss:$20 sps:$4 sm:$0xff]   ;;  %v13238_v63 = vld [vmem:[%s17553_s1 + $0x30] ss:$20 sps:$4 sm:$0xff]  }
 0x4aa   :  { %v2403_v10 = vrot.slane %v2402_v47, 1 }
 0x4ac   :  { %v2404_v22 = vadd.f32 %v2403_v10, %v2402_v47  ;;  %v13243_v47 = vld [vmem:[%s17553_s1 + $0x54] ss:$20 sps:$4 sm:$0xff]   ;;  %v13246_v10 = vld [vmem:[%s17553_s1 + $0x5c] ss:$20 sps:$4 sm:$0xff]  }
 0x4ae   :  { %2561 = vmatmul.mubr.f32.vlgmr.msra.gmra.mrb[52].mxu1 %v2404_v22  ;;  %v13241_v22 = vld [vmem:[%s17553_s1 + $0x50] ss:$20 sps:$4 sm:$0xff]  }
 0x4af   :  { %2645 = vmatpush1.msra.mxu1 %v14722_v13  ;;  %2708 = vmatprep.mubr.f32.mxu1 %v17701_v2 }
 0x4b0   :  { %2869 = vmatprep.subr.mxu1 %v14718_v18  ;;  %v13231_v18 = vld [vmem:[%s17553_s1 + $0x4] ss:$20 sps:$4 sm:$0xff]  }
 0x576   :  { %v11359_v33 = vpop.f32.mrb[52].mxu0 }
 0x577   :  { %v11360_v41 = vpop.f32.mrb[53].mxu0 }
 0x578   :  { %v11361_v9 = vadd.f32 %v11360_v41, %v11359_v33  ;;  %v13244_v33 = vld [vmem:[%s17553_s1 + $0x58] ss:$20 sps:$4 sm:$0xff]   ;;  %v13249_v41 = vld [vmem:[%s17553_s1 + $0x7c] ss:$20 sps:$4 sm:$0xff]  }
 0x581   :  { %v11394_v55 = vpop.f32.mrb[52].mxu1 }
 0x582   :  { %v11395_v16 = vpop.f32.mrb[53].mxu1 }
 0x583   :  { %v11396_v51 = vadd.f32 %v11395_v16, %v11394_v55  ;;  %v13247_v55 = vld [vmem:[%s17553_s1 + $0x78] ss:$20 sps:$4 sm:$0xff]   ;;  %v13250_v16 = vld [vmem:[%s17553_s1 + $0x80] ss:$20 sps:$4 sm:$0xff]  }
 0x585   :  { %v2563_v54 = vadd.f32 %v11396_v51, %v11361_v9  ;;  %v13252_v9 = vld [vmem:[%s17553_s1 + $0x84] ss:$20 sps:$4 sm:$0xff]  }
 0x586   :  { %v13255_v51 = vld [vmem:[%s17553_s1 + $0xa4] ss:$20 sps:$4 sm:$0xff]  }
 0x587   :  { %v2566_v6 = vmul.f32 0.00012207031, %v2563_v54  ;;  %v13258_v54 = vld [vmem:[%s17553_s1 + $0xac] ss:$20 sps:$4 sm:$0xff]  }
 0x589   :  { %v2567_v14 = vadd.f32 1e-05, %v2566_v6  ;;  %v13253_v6 = vld [vmem:[%s17553_s1 + $0xa0] ss:$20 sps:$4 sm:$0xff]  }
 0x58b   :  { %13719 = vrsqrt.f32 %v2567_v14  ;;  %v13256_v14 = vld [vmem:[%s17553_s1 + $0xa8] ss:$20 sps:$4 sm:$0xff]  }
 0x595   :  { %v13720_v56 = vpop.eup %13719 }
 0x596   :  { %v2569_v62 = vmul.f32 %v13720_v56, %v456_v26  ;;  %v13261_v26 = vld [vmem:[%s17553_s1 + $0xcc] ss:$20 sps:$4 sm:$0xff]   ;;  %v13264_v56 = vld [vmem:[%s17553_s1 + $0xd4] ss:$20 sps:$4 sm:$0xff]  }
 0x598   :  { %10808 = vmatmul.mubr.msk.f32.vlgmr.msra.gmra.mrb[54].mxu0 %vm2052_vm1, %v2569_v62  ;;  %10809 = vmatmul.mubr.msk.f32.vlgmr.msra.gmra.mrb[54].mxu1 %vm2052_vm1, %v2569_v62  ;;  %v13259_v62 = vld [vmem:[%s17553_s1 + $0xc8] ss:$20 sps:$4 sm:$0xff]  }
 0x599   :  { %2799 = vmatpush1.msra.mxu0 %v14720_v60  ;;  %2862 = vmatprep.mubr.f32.mxu0 %v17701_v2  ;;  %v13237_v60 = vld [vmem:[%s17553_s1 + $0x2c] ss:$20 sps:$4 sm:$0xff]  }
 0x59a   :  { %2870 = vmatpush1.msra.mxu1 %v14722_v13  ;;  %2933 = vmatprep.mubr.f32.mxu1 %v17701_v2  ;;  %v13235_v13 = vld [vmem:[%s17553_s1 + $0x28] ss:$20 sps:$4 sm:$0xff]  }
 0x59b   :  { %3436 = vmatprep.subr.bf16.mxu0 %v13231_v18  ;;  %3982 = vmatprep.subr.bf16.mxu1 %v13234_v45  ;;  %v13262_v18 = vld [vmem:[%s17553_s1 + $0xd0] ss:$20 sps:$4 sm:$0xff]   ;;  %v13267_v45 = vld [vmem:[%s17553_s1 + $0xf4] ss:$20 sps:$4 sm:$0xff]  }
 0x59c   :  { %10810 = vmatmul.mubr.msk.f32.vlgmr.msra.gmra.mrb[56].mxu0 %vm2052_vm1, %v457_v37  ;;  %10811 = vmatmul.mubr.msk.f32.vlgmr.msra.gmra.mrb[56].mxu1 %vm2052_vm1, %v457_v37  ;;  %v13270_v37 = vld [vmem:[%s17553_s1 + $0xfc] ss:$20 sps:$4 sm:$0xff]  }
 0x59d   :  { %3437 = vmatpush1.bf16.msra.mxu0 %v13229_v35  ;;  %3983 = vmatpush1.bf16.msra.mxu1 %v13232_v48  ;;  %v13265_v35 = vld [vmem:[%s17553_s1 + $0xf0] ss:$20 sps:$4 sm:$0xff]   ;;  %v13268_v48 = vld [vmem:[%s17553_s1 + $0xf8] ss:$20 sps:$4 sm:$0xff]  }
 0x59e   :  { %3438 = vmatprep.subr.bf16.mxu0 %v13237_v60  ;;  %3984 = vmatprep.subr.bf16.mxu1 %v13240_v43  ;;  %v13273_v60 = vld [vmem:[%s17553_s1 + $0x11c] ss:$20 sps:$4 sm:$0xff]   ;;  %v13276_v43 = vld [vmem:[%s17553_s1 + $0x124] ss:$20 sps:$4 sm:$0xff]  }
 0x5a1   :  { %3439 = vmatpush1.bf16.msra.mxu0 %v13235_v13  ;;  %3985 = vmatpush1.bf16.msra.mxu1 %v13238_v63  ;;  %v13271_v13 = vld [vmem:[%s17553_s1 + $0x118] ss:$20 sps:$4 sm:$0xff]   ;;  %v13274_v63 = vld [vmem:[%s17553_s1 + $0x120] ss:$20 sps:$4 sm:$0xff]  }
 0x5a2   :  { %3440 = vmatprep.subr.bf16.mxu0 %v13243_v47  ;;  %3986 = vmatprep.subr.bf16.mxu1 %v13246_v10  ;;  %v13279_v47 = vld [vmem:[%s17553_s1 + $0x144] ss:$20 sps:$4 sm:$0xff]   ;;  %v13282_v10 = vld [vmem:[%s17553_s1 + $0x14c] ss:$20 sps:$4 sm:$0xff]  }
 0x5a5   :  { %3441 = vmatpush1.bf16.msra.mxu0 %v13241_v22  ;;  %3987 = vmatpush1.bf16.msra.mxu1 %v13244_v33  ;;  %v13277_v22 = vld [vmem:[%s17553_s1 + $0x140] ss:$20 sps:$4 sm:$0xff]   ;;  %v13280_v33 = vld [vmem:[%s17553_s1 + $0x148] ss:$20 sps:$4 sm:$0xff]  }
 0x5a6   :  { %3442 = vmatprep.subr.bf16.mxu0 %v13249_v41  ;;  %3988 = vmatprep.subr.bf16.mxu1 %v13252_v9  ;;  %v13285_v41 = vld [vmem:[%s17553_s1 + $0x16c] ss:$20 sps:$4 sm:$0xff]   ;;  %v13288_v9 = vld [vmem:[%s17553_s1 + $0x174] ss:$20 sps:$4 sm:$0xff]  }
 0x5a9   :  { %3443 = vmatpush1.bf16.msra.mxu0 %v13247_v55  ;;  %3989 = vmatpush1.bf16.msra.mxu1 %v13250_v16  ;;  %v13283_v55 = vld [vmem:[%s17553_s1 + $0x168] ss:$20 sps:$4 sm:$0xff]   ;;  %v13286_v16 = vld [vmem:[%s17553_s1 + $0x170] ss:$20 sps:$4 sm:$0xff]  }
 0x5aa   :  { %3444 = vmatprep.subr.bf16.mxu0 %v13255_v51  ;;  %3990 = vmatprep.subr.bf16.mxu1 %v13258_v54  ;;  %v13291_v51 = vld [vmem:[%s17553_s1 + $0x194] ss:$20 sps:$4 sm:$0xff]   ;;  %v13294_v54 = vld [vmem:[%s17553_s1 + $0x19c] ss:$20 sps:$4 sm:$0xff]  }
 0x5ad   :  { %3445 = vmatpush1.bf16.msra.mxu0 %v13253_v6  ;;  %3991 = vmatpush1.bf16.msra.mxu1 %v13256_v14  ;;  %v13289_v6 = vld [vmem:[%s17553_s1 + $0x190] ss:$20 sps:$4 sm:$0xff]   ;;  %v13292_v14 = vld [vmem:[%s17553_s1 + $0x198] ss:$20 sps:$4 sm:$0xff]  }
 0x5ae   :  { %3446 = vmatprep.subr.bf16.mxu0 %v13261_v26  ;;  %3992 = vmatprep.subr.bf16.mxu1 %v13264_v56  ;;  %v13297_v26 = vld [vmem:[%s17553_s1 + $0x1bc] ss:$20 sps:$4 sm:$0xff]   ;;  %v13300_v56 = vld [vmem:[%s17553_s1 + $0x1c4] ss:$20 sps:$4 sm:$0xff]  }
 0x5b1   :  { %3447 = vmatpush1.bf16.msra.mxu0 %v13259_v62  ;;  %3993 = vmatpush1.bf16.msra.mxu1 %v13262_v18  ;;  %v13295_v62 = vld [vmem:[%s17553_s1 + $0x1b8] ss:$20 sps:$4 sm:$0xff]   ;;  %v13298_v18 = vld [vmem:[%s17553_s1 + $0x1c0] ss:$20 sps:$4 sm:$0xff]  }
 0x5b2   :  { %3448 = vmatprep.subr.bf16.mxu0 %v13267_v45  ;;  %3994 = vmatprep.subr.bf16.mxu1 %v13270_v37  ;;  %v13303_v45 = vld [vmem:[%s17553_s1 + $0x1e4] ss:$20 sps:$4 sm:$0xff]   ;;  %v13306_v37 = vld [vmem:[%s17553_s1 + $0x1ec] ss:$20 sps:$4 sm:$0xff]  }
 0x5b5   :  { %3449 = vmatpush1.bf16.msra.mxu0 %v13265_v35  ;;  %3995 = vmatpush1.bf16.msra.mxu1 %v13268_v48  ;;  %v13301_v35 = vld [vmem:[%s17553_s1 + $0x1e0] ss:$20 sps:$4 sm:$0xff]   ;;  %v13304_v48 = vld [vmem:[%s17553_s1 + $0x1e8] ss:$20 sps:$4 sm:$0xff]  }
 0x5b6   :  { %3450 = vmatprep.subr.bf16.mxu0 %v13273_v60  ;;  %3996 = vmatprep.subr.bf16.mxu1 %v13276_v43  ;;  %v13307_v60 = vld [vmem:[%s17553_s1 + $0x208] ss:$20 sps:$4 sm:$0xff]   ;;  %v13309_v43 = vld [vmem:[%s17553_s1 + $0x20c] ss:$20 sps:$4 sm:$0xff]  }
 0x5b9   :  { %3451 = vmatpush1.bf16.msra.mxu0 %v13271_v13  ;;  %3997 = vmatpush1.bf16.msra.mxu1 %v13274_v63  ;;  %v13310_v13 = vld [vmem:[%s17553_s1 + $0x210] ss:$20 sps:$4 sm:$0xff]   ;;  %v13312_v63 = vld [vmem:[%s17553_s1 + $0x214] ss:$20 sps:$4 sm:$0xff]  }
 0x5ba   :  { %3452 = vmatprep.subr.bf16.mxu0 %v13279_v47  ;;  %3998 = vmatprep.subr.bf16.mxu1 %v13282_v10  ;;  %v13313_v47 = vld [vmem:[%s17553_s1 + $0x230] ss:$20 sps:$4 sm:$0xff]   ;;  %v13315_v10 = vld [vmem:[%s17553_s1 + $0x234] ss:$20 sps:$4 sm:$0xff]  }
 0x5bd   :  { %3453 = vmatpush1.bf16.msra.mxu0 %v13277_v22  ;;  %3999 = vmatpush1.bf16.msra.mxu1 %v13280_v33  ;;  %v13316_v22 = vld [vmem:[%s17553_s1 + $0x238] ss:$20 sps:$4 sm:$0xff]   ;;  %v13318_v33 = vld [vmem:[%s17553_s1 + $0x23c] ss:$20 sps:$4 sm:$0xff]  }
 0x5be   :  { %3454 = vmatprep.subr.bf16.mxu0 %v13285_v41  ;;  %4000 = vmatprep.subr.bf16.mxu1 %v13288_v9  ;;  %v13321_v41 = vld [vmem:[%s17553_s1 + $0x25c] ss:$20 sps:$4 sm:$0xff]   ;;  %v13324_v9 = vld [vmem:[%s17553_s1 + $0x264] ss:$20 sps:$4 sm:$0xff]  }
 0x5c1   :  { %3455 = vmatpush1.bf16.msra.mxu0 %v13283_v55  ;;  %4001 = vmatpush1.bf16.msra.mxu1 %v13286_v16  ;;  %v13319_v55 = vld [vmem:[%s17553_s1 + $0x258] ss:$20 sps:$4 sm:$0xff]   ;;  %v13322_v16 = vld [vmem:[%s17553_s1 + $0x260] ss:$20 sps:$4 sm:$0xff]  }
 0x5c2   :  { %3456 = vmatprep.subr.bf16.mxu0 %v13291_v51  ;;  %4002 = vmatprep.subr.bf16.mxu1 %v13294_v54  ;;  %v13327_v51 = vld [vmem:[%s17553_s1 + $0x284] ss:$20 sps:$4 sm:$0xff]   ;;  %v13330_v54 = vld [vmem:[%s17553_s1 + $0x28c] ss:$20 sps:$4 sm:$0xff]  }
 0x5c5   :  { %3457 = vmatpush1.bf16.msra.mxu0 %v13289_v6  ;;  %4003 = vmatpush1.bf16.msra.mxu1 %v13292_v14 }
 0x5c6   :  { %3458 = vmatprep.subr.bf16.mxu0 %v13297_v26  ;;  %4004 = vmatprep.subr.bf16.mxu1 %v13300_v56 }
 0x5c9   :  { %3459 = vmatpush1.bf16.msra.mxu0 %v13295_v62  ;;  %4005 = vmatpush1.bf16.msra.mxu1 %v13298_v18 }
 0x5ca   :  { %3460 = vmatprep.subr.bf16.mxu0 %v13303_v45  ;;  %4006 = vmatprep.subr.bf16.mxu1 %v13306_v37 }
 0x5cd   :  { %3461 = vmatpush1.bf16.msra.mxu0 %v13301_v35  ;;  %4007 = vmatpush1.bf16.msra.mxu1 %v13304_v48 }
 0x5ce   :  { %3462 = vmatprep.subr.bf16.mxu0 %v13309_v43  ;;  %4008 = vmatprep.subr.bf16.mxu1 %v13312_v63 }
 0x5d1   :  { %3463 = vmatpush1.bf16.msra.mxu0 %v13307_v60  ;;  %4009 = vmatpush1.bf16.msra.mxu1 %v13310_v13 }
 0x5d2   :  { %3464 = vmatprep.subr.bf16.mxu0 %v13315_v10  ;;  %4010 = vmatprep.subr.bf16.mxu1 %v13318_v33 }
 0x5d5   :  { %3465 = vmatpush1.bf16.msra.mxu0 %v13313_v47  ;;  %4011 = vmatpush1.bf16.msra.mxu1 %v13316_v22 }
 0x5d6   :  { %3466 = vmatprep.subr.bf16.mxu0 %v13321_v41  ;;  %4012 = vmatprep.subr.bf16.mxu1 %v13324_v9  ;;  %v17703_v41 = vld [vmem:[#allocation6_spill] sm:$0xff] }
 0x5d9   :  { %3467 = vmatpush1.bf16.msra.mxu0 %v13319_v55  ;;  %4013 = vmatpush1.bf16.msra.mxu1 %v13322_v16  ;;  %v17705_v16 = vld [vmem:[#allocation40_spill] sm:$0xff] }
 0x5da   :  { %3549 = vmatprep.subr.bf16.mxu0 %v13327_v51  ;;  %4095 = vmatprep.subr.bf16.mxu1 %v13330_v54 }
 0x66b   :  { %v2639_v6 = vpop.f32.mrb[54].mxu0  ;;  %v2710_v14 = vpop.f32.mrb[54].mxu1 }
 0x66c   :  { %v15347_v26 = vrot.slane %v2639_v6, %v14766_v12  ;;  %v2641_v56 = vpop.f32.mrb[55].mxu0  ;;  %v2712_v62 = vpop.f32.mrb[55].mxu1  ;;  %v15350_v18 = vrot.slane %v2710_v14, %v14766_v12 }
 0x66d   :  { %v15353_v45 = vrot.slane %v2641_v56, %v14766_v12  ;;  %v15356_v37 = vrot.slane %v2712_v62, %v14766_v12 }
 0x66e   :  { %v2731_v35 = vmul.f32 %v15347_v26, %v14774_v27  ;;  %v2735_v48 = vmul.f32 %v15347_v26, %v14778_v28  ;;  %v2739_v60 = vmul.f32 %v15347_v26, %v14782_v29  ;;  %v2743_v43 = vmul.f32 %v15347_v26, %v14786_v30 }
 0x66f   :  { %v2864_v13 = vpop.f32.mrb[56].mxu0  ;;  %v2935_v63 = vpop.f32.mrb[56].mxu1  ;;  %v2732_v47 = vmul.f32 %v15353_v45, %v14789_v32  ;;  %v2736_v10 = vmul.f32 %v15353_v45, %v14792_v34  ;;  %v2740_v27 = vmul.f32 %v15353_v45, %v14795_v36  ;;  %v2744_v28 = vmul.f32 %v15353_v45, %v14798_v38  ;;  %v17704_v38 = vld [vmem:[#allocation36_spill] sm:$0xff] }
 0x670   :  { %v15375_v22 = vrot.slane %v2864_v13, %v14766_v12  ;;  %v15378_v29 = vrot.slane %v2935_v63, %v14766_v12  ;;  %v2866_v30 = vpop.f32.mrb[57].mxu0  ;;  %v2937_v33 = vpop.f32.mrb[57].mxu1  ;;  %v2748_v32 = vmul.f32 %v15353_v45, %v14801_v40  ;;  %v2752_v34 = vmul.f32 %v15353_v45, %v17703_v41 }
 0x671   :  { %v15385_v9 = vrot.slane %v2866_v30, %v14766_v12  ;;  %v15388_v36 = vrot.slane %v2937_v33, %v14766_v12  ;;  %v2747_v55 = vmul.f32 %v15347_v26, %v17704_v38  ;;  %v2751_v51 = vmul.f32 %v15347_v26, %v17705_v16 }
 0x672   :  { %v2956_v54 = vadd.f32 %v15375_v22, %v2731_v35  ;;  %v2960_v6 = vadd.f32 %v15375_v22, %v2735_v48  ;;  %v2964_v40 = vadd.f32 %v15375_v22, %v2739_v60  ;;  %v2968_v14 = vadd.f32 %v15375_v22, %v2743_v43 }
 0x673   :  { %v2957_v56 = vadd.f32 %v15385_v9, %v2732_v47  ;;  %v2961_v62 = vadd.f32 %v15385_v9, %v2736_v10  ;;  %v2965_v13 = vadd.f32 %v15385_v9, %v2740_v27  ;;  %v2969_v63 = vadd.f32 %v15385_v9, %v2744_v28  ;;  %v13325_v27 = vld [vmem:[%s17553_s1 + $0x280] ss:$20 sps:$4 sm:$0xff]  }
 0x674   :  { %v3020_v30 = vmax.f32 %v2956_v54, 0.0  ;;  %v3024_v33 = vmax.f32 %v2960_v6, 0.0  ;;  %v3028_v41 = vmax.f32 %v2964_v40, 0.0  ;;  %v3032_v38 = vmax.f32 %v2968_v14, 0.0  ;;  %v13328_v40 = vld [vmem:[%s17553_s1 + $0x288] ss:$20 sps:$4 sm:$0xff]  }
 0x675   :  { %v3021_v16 = vmax.f32 %v2957_v56, 0.0  ;;  %v3025_v35 = vmax.f32 %v2961_v62, 0.0  ;;  %v3029_v12 = vmax.f32 %v2965_v13, 0.0  ;;  %v3033_v48 = vmax.f32 %v2969_v63, 0.0  ;;  %v17706_v62 = vld [vmem:[#allocation9_spill] sm:$0xff] }
 0x676   :  { %v3084_v2 = vpack.c.bf16 %v3024_v33, %v3020_v30  ;;  %v15402_v60 = vpack.c.bf16 %v3032_v38, %v3028_v41  ;;  %v2973_v43 = vadd.f32 %v15385_v9, %v2748_v32  ;;  %v2977_v47 = vadd.f32 %v15385_v9, %v2752_v34  ;;  %v17707_v34 = vld [vmem:[#allocation12_spill] sm:$0xff] }
 0x677   :  { %v3085_v10 = vpack.c.bf16 %v3025_v35, %v3021_v16  ;;  %v3089_v28 = vpack.c.bf16 %v3033_v48, %v3029_v12  ;;  %v2972_v54 = vadd.f32 %v15375_v22, %v2747_v55  ;;  %v2976_v6 = vadd.f32 %v15375_v22, %v2751_v51  ;;  %v13333_v12 = vld [vmem:[%s17553_s1 + $0x2ac] ss:$20 sps:$4 sm:$0xff]   ;;  %v13336_v55 = vld [vmem:[%s17553_s1 + $0x2b4] ss:$20 sps:$4 sm:$0xff]  }
 0x678   :  { %v3037_v14 = vmax.f32 %v2973_v43, 0.0  ;;  %v3041_v56 = vmax.f32 %v2977_v47, 0.0  ;;  %v2756_v32 = vmul.f32 %v15353_v45, %v17706_v62  ;;  %v2760_v13 = vmul.f32 %v15353_v45, %v17707_v34  ;;  %v13331_v35 = vld [vmem:[%s17553_s1 + $0x2a8] ss:$20 sps:$4 sm:$0xff]  }
 0x679   :  { %3468 = vmatprep.mubr.bf16.mxu0 %v3085_v10  ;;  %4014 = vmatprep.mubr.bf16.mxu1 %v3085_v10  ;;  %v3036_v51 = vmax.f32 %v2972_v54, 0.0  ;;  %v3040_v63 = vmax.f32 %v2976_v6, 0.0  ;;  %v2755_v30 = vmul.f32 %v15347_v26, %v14928_v0  ;;  %v2759_v33 = vmul.f32 %v15347_v26, %v14932_v5  ;;  %v13334_v5 = vld [vmem:[%s17553_s1 + $0x2b0] ss:$20 sps:$4 sm:$0xff]  }
 0x67a   :  { %3469 = vmatmul.mubr.bf16.vlgmr.msra.gmra.mrb[60].mxu0 %v3084_v2  ;;  %4015 = vmatmul.mubr.bf16.vlgmr.msra.gmra.mrb[60].mxu1 %v3084_v2  ;;  %v3093_v41 = vpack.c.bf16 %v3041_v56, %v3037_v14  ;;  %v2981_v38 = vadd.f32 %v15385_v9, %v2756_v32  ;;  %v2985_v16 = vadd.f32 %v15385_v9, %v2760_v13  ;;  %v13339_v2 = vld [vmem:[%s17553_s1 + $0x2d4] ss:$20 sps:$4 sm:$0xff]  }
 0x67b   :  { %3478 = vmatprep.mubr.bf16.mxu0 %v3089_v28  ;;  %3550 = vmatpush1.bf16.msra.mxu0 %v13325_v27  ;;  %v15433_v48 = vpack.c.bf16 %v3040_v63, %v3036_v51  ;;  %v2980_v0 = vadd.f32 %v15375_v22, %v2755_v30  ;;  %v2984_v43 = vadd.f32 %v15375_v22, %v2759_v33  ;;  %v17708_v27 = vld [vmem:[#allocation15_spill] sm:$0xff] }
 0x67c   :  { %4024 = vmatprep.mubr.bf16.mxu1 %v3089_v28  ;;  %4096 = vmatpush1.bf16.msra.mxu1 %v13328_v40  ;;  %v3045_v47 = vmax.f32 %v2981_v38, 0.0  ;;  %v3049_v10 = vmax.f32 %v2985_v16, 0.0  ;;  %v2764_v54 = vmul.f32 %v15353_v45, %v17708_v27  ;;  %v17709_v6 = vld [vmem:[#allocation19_spill] sm:$0xff]  ;;  %v2763_v62 = vmul.f32 %v15347_v26, %v14936_v4 }
 0x67d   :  { %v2768_v14 = vmul.f32 %v15353_v45, %v17709_v6  ;;  %3551 = vmatprep.subr.bf16.mxu0 %v13333_v12  ;;  %4097 = vmatprep.subr.bf16.mxu1 %v13336_v55  ;;  %v13342_v28 = vld [vmem:[%s17553_s1 + $0x2dc] ss:$20 sps:$4 sm:$0xff]   ;;  %v3044_v40 = vmax.f32 %v2980_v0, 0.0  ;;  %v3048_v56 = vmax.f32 %v2984_v43, 0.0  ;;  %v2767_v32 = vmul.f32 %v15347_v26, %v14940_v15  ;;  %v13340_v16 = vld [vmem:[%s17553_s1 + $0x2d8] ss:$20 sps:$4 sm:$0xff]  }
 0x67e   :  { %v15454_v34 = vpack.c.bf16 %v3049_v10, %v3045_v47  ;;  %v2989_v13 = vadd.f32 %v15385_v9, %v2764_v54  ;;  %v17710_v12 = vld [vmem:[#allocation23_spill] sm:$0xff]  ;;  %v2988_v4 = vadd.f32 %v15375_v22, %v2763_v62  ;;  %v2771_v47 = vmul.f32 %v15347_v26, %v14944_v53 }
 0x67f   :  { %v2993_v51 = vadd.f32 %v15385_v9, %v2768_v14  ;;  %v2772_v55 = vmul.f32 %v15353_v45, %v17710_v12  ;;  %3552 = vmatpush1.bf16.msra.mxu0 %v13331_v35  ;;  %v13337_v63 = vld [vmem:[%s17553_s1 + $0x2d0] ss:$20 sps:$4 sm:$0xff]   ;;  %v15463_v30 = vpack.c.bf16 %v3048_v56, %v3044_v40  ;;  %v2992_v15 = vadd.f32 %v15375_v22, %v2767_v32  ;;  %v13343_v62 = vld [vmem:[%s17553_s1 + $0x2f8] ss:$20 sps:$4 sm:$0xff]   ;;  %v13346_v12 = vld [vmem:[%s17553_s1 + $0x300] ss:$20 sps:$4 sm:$0xff]  }
 0x680   :  { %v17711_v33 = vld [vmem:[#allocation27_spill] sm:$0xff]  ;;  %4098 = vmatpush1.bf16.msra.mxu1 %v13334_v5  ;;  %3553 = vmatprep.subr.bf16.mxu0 %v13339_v2  ;;  %v3053_v35 = vmax.f32 %v2989_v13, 0.0  ;;  %v3052_v2 = vmax.f32 %v2988_v4, 0.0  ;;  %v2775_v6 = vmul.f32 %v15347_v26, %v14948_v24 }
 0x681   :  { %v2776_v38 = vmul.f32 %v15353_v45, %v17711_v33  ;;  %v3057_v0 = vmax.f32 %v2993_v51, 0.0  ;;  %v2997_v43 = vadd.f32 %v15385_v9, %v2772_v55  ;;  %4099 = vmatprep.subr.bf16.mxu1 %v13342_v28  ;;  %v13345_v10 = vld [vmem:[%s17553_s1 + $0x2fc] ss:$20 sps:$4 sm:$0xff]   ;;  %v13348_v5 = vld [vmem:[%s17553_s1 + $0x304] ss:$20 sps:$4 sm:$0xff]   ;;  %v3056_v27 = vmax.f32 %v2992_v15, 0.0 }
 0x682   :  { %3479 = vmatmul.mubr.bf16.gmra.mrb[64].mxu0 %v15402_v60  ;;  %4025 = vmatmul.mubr.bf16.gmra.mrb[64].mxu1 %v15402_v60  ;;  %v2996_v28 = vadd.f32 %v15375_v22, %v2771_v47  ;;  %v17712_v40 = vld [vmem:[#allocation31_spill] sm:$0xff]  ;;  %v3000_v13 = vadd.f32 %v15375_v22, %v2775_v6  ;;  %v2779_v15 = vmul.f32 %v15347_v26, %v14952_v3 }
 0x683   :  { %v3001_v54 = vadd.f32 %v15385_v9, %v2776_v38  ;;  %v15486_v53 = vpack.c.bf16 %v3057_v0, %v3053_v35  ;;  %v3061_v14 = vmax.f32 %v2997_v43, 0.0  ;;  %v2780_v56 = vmul.f32 %v15353_v45, %v17712_v40  ;;  %3488 = vmatprep.mubr.bf16.mxu0 %v3093_v41  ;;  %3554 = vmatpush1.bf16.msra.mxu0 %v13337_v63  ;;  %v17713_v60 = vld [vmem:[#allocation35_spill] sm:$0xff] }
 0x684   :  { %v15494_v32 = vpack.c.bf16 %v3056_v27, %v3052_v2  ;;  %v2784_v51 = vmul.f32 %v15353_v45, %v17713_v60  ;;  %4034 = vmatprep.mubr.bf16.mxu1 %v3093_v41  ;;  %4100 = vmatpush1.bf16.msra.mxu1 %v13340_v16  ;;  %v13351_v55 = vld [vmem:[%s17553_s1 + $0x324] ss:$20 sps:$4 sm:$0xff]   ;;  %v3060_v63 = vmax.f32 %v2996_v28, 0.0  ;;  %v2783_v33 = vmul.f32 %v15347_v26, %v14956_v19  ;;  %v13354_v41 = vld [vmem:[%s17553_s1 + $0x32c] ss:$20 sps:$4 sm:$0xff]  }
 0x685   :  { %v3065_v24 = vmax.f32 %v3001_v54, 0.0  ;;  %v3005_v4 = vadd.f32 %v15385_v9, %v2780_v56  ;;  %3555 = vmatprep.subr.bf16.mxu0 %v13345_v10  ;;  %4101 = vmatprep.subr.bf16.mxu1 %v13348_v5  ;;  %v3064_v16 = vmax.f32 %v3000_v13, 0.0  ;;  %v17714_v0 = vld [vmem:[#allocation39_spill] sm:$0xff]  ;;  %v3004_v3 = vadd.f32 %v15375_v22, %v2779_v15  ;;  %v13357_v56 = vld [vmem:[%s17553_s1 + $0x34c] ss:$20 sps:$4 sm:$0xff]  }
 0x686   :  { %v3009_v35 = vadd.f32 %v15385_v9, %v2784_v51  ;;  %v2788_v43 = vmul.f32 %v15353_v45, %v17714_v0  ;;  %v3008_v2 = vadd.f32 %v15375_v22, %v2783_v33  ;;  %v2792_v19 = vmul.f32 %v15353_v45, %v14834_v23  ;;  %v13349_v10 = vld [vmem:[%s17553_s1 + $0x320] ss:$20 sps:$4 sm:$0xff]  }
 0x687   :  { %v15513_v38 = vpack.c.bf16 %v3065_v24, %v3061_v14  ;;  %v3069_v47 = vmax.f32 %v3005_v4, 0.0  ;;  %3556 = vmatpush1.bf16.msra.mxu0 %v13343_v62  ;;  %v15525_v5 = vpack.c.bf16 %v3064_v16, %v3060_v63  ;;  %v2787_v6 = vmul.f32 %v15347_v26, %v14960_v49  ;;  %v13352_v14 = vld [vmem:[%s17553_s1 + $0x328] ss:$20 sps:$4 sm:$0xff]   ;;  %v17715_v60 = vld [vmem:[#allocation43_spill] sm:$0xff] }
 0x688   :  { %v3073_v27 = vmax.f32 %v3009_v35, 0.0  ;;  %v3013_v54 = vadd.f32 %v15385_v9, %v2788_v43  ;;  %4102 = vmatpush1.bf16.msra.mxu1 %v13346_v12  ;;  %3557 = vmatprep.subr.bf16.mxu0 %v13351_v55  ;;  %v3068_v23 = vmax.f32 %v3004_v3, 0.0  ;;  %v3072_v45 = vmax.f32 %v3008_v2, 0.0  ;;  %v13360_v49 = vld [vmem:[%s17553_s1 + $0x354] ss:$20 sps:$4 sm:$0xff]  }
 0x689   :  { %v3017_v28 = vadd.f32 %v15385_v9, %v2792_v19  ;;  %v2791_v40 = vmul.f32 %v15347_v26, %v14968_v20  ;;  %4103 = vmatprep.subr.bf16.mxu1 %v13354_v41  ;;  %v3012_v13 = vadd.f32 %v15375_v22, %v2787_v6  ;;  %v2734_v9 = vmul.f32 %v15356_v37, %v17715_v60  ;;  %v17716_v12 = vld [vmem:[#allocation47_spill] sm:$0xff]  ;;  %v13355_v63 = vld [vmem:[%s17553_s1 + $0x348] ss:$20 sps:$4 sm:$0xff]  }
 0x68a   :  { %v15542_v62 = vpack.c.bf16 %v3073_v27, %v3069_v47  ;;  %v3077_v24 = vmax.f32 %v3013_v54, 0.0  ;;  %3489 = vmatmul.mubr.bf16.gmra.mrb[68].mxu0 %v15433_v48  ;;  %4035 = vmatmul.mubr.bf16.gmra.mrb[68].mxu1 %v15433_v48  ;;  %v15549_v20 = vpack.c.bf16 %v3072_v45, %v3068_v23  ;;  %v2738_v55 = vmul.f32 %v15356_v37, %v17716_v12  ;;  %v13363_v41 = vld [vmem:[%s17553_s1 + $0x374] ss:$20 sps:$4 sm:$0xff]  }
 0x68b   :  { %v3081_v26 = vmax.f32 %v3017_v28, 0.0  ;;  %v3016_v51 = vadd.f32 %v15375_v22, %v2791_v40  ;;  %3498 = vmatprep.mubr.bf16.mxu0 %v15454_v34  ;;  %3558 = vmatpush1.bf16.msra.mxu0 %v13349_v10  ;;  %v3076_v4 = vmax.f32 %v3012_v13, 0.0  ;;  %v2959_v15 = vadd.f32 %v15388_v36, %v2734_v9  ;;  %v13358_v22 = vld [vmem:[%s17553_s1 + $0x350] ss:$20 sps:$4 sm:$0xff]  }
 0x68c   :  { %v2733_v48 = vmul.f32 %v15350_v18, %v15000_v25  ;;  %v2737_v33 = vmul.f32 %v15350_v18, %v15004_v58  ;;  %4044 = vmatprep.mubr.bf16.mxu1 %v15454_v34  ;;  %4104 = vmatpush1.bf16.msra.mxu1 %v13352_v14  ;;  %v2963_v0 = vadd.f32 %v15388_v36, %v2738_v55  ;;  %v17717_v25 = vld [vmem:[#allocation51_spill] sm:$0xff] }
 0x68d   :  { %v15570_v16 = vpack.c.bf16 %v3081_v26, %v3077_v24  ;;  %v3080_v35 = vmax.f32 %v3016_v51, 0.0  ;;  %v2742_v43 = vmul.f32 %v15356_v37, %v17717_v25  ;;  %3559 = vmatprep.subr.bf16.mxu0 %v13357_v56  ;;  %4105 = vmatprep.subr.bf16.mxu1 %v13360_v49  ;;  %v13366_v58 = vld [vmem:[%s17553_s1 + $0x37c] ss:$20 sps:$4 sm:$0xff]   ;;  %v3023_v34 = vmax.f32 %v2959_v15, 0.0  ;;  %v13364_v56 = vld [vmem:[%s17553_s1 + $0x378] ss:$20 sps:$4 sm:$0xff]  }
 0x68e   :  { %v2958_v47 = vadd.f32 %v15378_v29, %v2733_v48  ;;  %v2962_v3 = vadd.f32 %v15378_v29, %v2737_v33  ;;  %v17718_v2 = vld [vmem:[#allocation55_spill] sm:$0xff]  ;;  %v3027_v27 = vmax.f32 %v2963_v0, 0.0  ;;  %v2741_v6 = vmul.f32 %v15350_v18, %v15008_v50 }
 0x68f   :  { %v2746_v19 = vmul.f32 %v15356_v37, %v17718_v2  ;;  %v15582_v10 = vpack.c.bf16 %v3080_v35, %v3076_v4  ;;  %v2967_v54 = vadd.f32 %v15388_v36, %v2742_v43  ;;  %3560 = vmatpush1.bf16.msra.mxu0 %v13355_v63  ;;  %v13361_v14 = vld [vmem:[%s17553_s1 + $0x370] ss:$20 sps:$4 sm:$0xff]   ;;  %v2745_v40 = vmul.f32 %v15350_v18, %v15012_v46 }
 0x690   :  { %v3022_v23 = vmax.f32 %v2958_v47, 0.0  ;;  %v3026_v45 = vmax.f32 %v2962_v3, 0.0  ;;  %4106 = vmatpush1.bf16.msra.mxu1 %v13358_v22  ;;  %3561 = vmatprep.subr.bf16.mxu0 %v13363_v41  ;;  %v15596_v49 = vpack.c.bf16 %v3027_v27, %v3023_v34  ;;  %v2966_v24 = vadd.f32 %v15378_v29, %v2741_v6  ;;  %v17719_v13 = vld [vmem:[#allocation59_spill] sm:$0xff]  ;;  %v17722_v47 = vld [vmem:[#allocation10_spill] sm:$0xff] }
 0x691   :  { %v2971_v28 = vadd.f32 %v15388_v36, %v2746_v19  ;;  %v3031_v50 = vmax.f32 %v2967_v54, 0.0  ;;  %v2750_v60 = vmul.f32 %v15356_v37, %v17719_v13  ;;  %4107 = vmatprep.subr.bf16.mxu1 %v13366_v58  ;;  %v13369_v9 = vld [vmem:[%s17553_s1 + $0x39c] ss:$20 sps:$4 sm:$0xff]   ;;  %v13372_v46 = vld [vmem:[%s17553_s1 + $0x3a4] ss:$20 sps:$4 sm:$0xff]   ;;  %v2970_v12 = vadd.f32 %v15378_v29, %v2745_v40 }
 0x692   :  { %v15607_v26 = vpack.c.bf16 %v3026_v45, %v3022_v23  ;;  %v17720_v55 = vld [vmem:[#allocation63_spill] sm:$0xff]  ;;  %3499 = vmatmul.mubr.bf16.gmra.mrb[72].mxu0 %v15463_v30  ;;  %4045 = vmatmul.mubr.bf16.gmra.mrb[72].mxu1 %v15463_v30  ;;  %v3030_v4 = vmax.f32 %v2966_v24, 0.0  ;;  %v2749_v48 = vmul.f32 %v15350_v18, %v15016_v17  ;;  %v2753_v33 = vmul.f32 %v15350_v18, %v15020_v61  ;;  %v17723_v24 = vld [vmem:[#allocation13_spill] sm:$0xff] }
 0x693   :  { %v3035_v51 = vmax.f32 %v2971_v28, 0.0  ;;  %v2754_v63 = vmul.f32 %v15356_v37, %v17720_v55  ;;  %v2975_v15 = vadd.f32 %v15388_v36, %v2750_v60  ;;  %3508 = vmatprep.mubr.bf16.mxu0 %v15486_v53  ;;  %3562 = vmatpush1.bf16.msra.mxu0 %v13361_v14  ;;  %v13367_v22 = vld [vmem:[%s17553_s1 + $0x398] ss:$20 sps:$4 sm:$0xff]   ;;  %v3034_v35 = vmax.f32 %v2970_v12, 0.0  ;;  %v13370_v17 = vld [vmem:[%s17553_s1 + $0x3a0] ss:$20 sps:$4 sm:$0xff]  }
 0x694   :  { %v17721_v0 = vld [vmem:[#allocation7_spill] sm:$0xff]  ;;  %4054 = vmatprep.mubr.bf16.mxu1 %v15486_v53  ;;  %4108 = vmatpush1.bf16.msra.mxu1 %v13364_v56  ;;  %v2974_v58 = vadd.f32 %v15378_v29, %v2749_v48  ;;  %v2978_v34 = vadd.f32 %v15378_v29, %v2753_v33  ;;  %v2762_v3 = vmul.f32 %v15356_v37, %v17722_v47  ;;  %v13378_v53 = vld [vmem:[%s17553_s1 + $0x3cc] ss:$20 sps:$4 sm:$0xff]   ;;  %v13376_v13 = vld [vmem:[%s17553_s1 + $0x3c8] ss:$20 sps:$4 sm:$0xff]  }
 0x695   :  { %v15623_v41 = vpack.c.bf16 %v3035_v51, %v3031_v50  ;;  %v2979_v30 = vadd.f32 %v15388_v36, %v2754_v63  ;;  %v2758_v25 = vmul.f32 %v15356_v37, %v17721_v0  ;;  %v13375_v61 = vld [vmem:[%s17553_s1 + $0x3c4] ss:$20 sps:$4 sm:$0xff]   ;;  %v3039_v43 = vmax.f32 %v2975_v15, 0.0  ;;  %3563 = vmatprep.subr.bf16.mxu0 %v13369_v9  ;;  %4109 = vmatprep.subr.bf16.mxu1 %v13372_v46  ;;  %v13373_v28 = vld [vmem:[%s17553_s1 + $0x3c0] ss:$20 sps:$4 sm:$0xff]  }
 0x696   :  { %v15642_v2 = vpack.c.bf16 %v3034_v35, %v3030_v4  ;;  %v2757_v54 = vmul.f32 %v15350_v18, %v15024_v44  ;;  %v3038_v6 = vmax.f32 %v2974_v58, 0.0  ;;  %v3042_v14 = vmax.f32 %v2978_v34, 0.0  ;;  %v17724_v46 = vld [vmem:[#allocation16_spill] sm:$0xff]  ;;  %v13384_v55 = vld [vmem:[%s17553_s1 + $0x3f4] ss:$20 sps:$4 sm:$0xff]  }
 0x697   :  { %v3043_v19 = vmax.f32 %v2979_v30, 0.0  ;;  %v2983_v27 = vadd.f32 %v15388_v36, %v2758_v25  ;;  %v2987_v23 = vadd.f32 %v15388_v36, %v2762_v3  ;;  %v2761_v45 = vmul.f32 %v15350_v18, %v15028_v7  ;;  %3564 = vmatpush1.bf16.msra.mxu0 %v13367_v22  ;;  %v13381_v12 = vld [vmem:[%s17553_s1 + $0x3ec] ss:$20 sps:$4 sm:$0xff]   ;;  %v13387_v58 = vld [vmem:[%s17553_s1 + $0x414] ss:$20 sps:$4 sm:$0xff]  }
 0x698   :  { %v2982_v50 = vadd.f32 %v15378_v29, %v2757_v54  ;;  %v2766_v44 = vmul.f32 %v15356_v37, %v17723_v24  ;;  %4110 = vmatpush1.bf16.msra.mxu1 %v13370_v17  ;;  %3565 = vmatprep.subr.bf16.mxu0 %v13375_v61  ;;  %v15661_v7 = vpack.c.bf16 %v3042_v14, %v3038_v6  ;;  %v17725_v30 = vld [vmem:[#allocation20_spill] sm:$0xff] }
 0x699   :  { %v15653_v40 = vpack.c.bf16 %v3043_v19, %v3039_v43  ;;  %v3047_v56 = vmax.f32 %v2983_v27, 0.0  ;;  %v3051_v60 = vmax.f32 %v2987_v23, 0.0  ;;  %v2986_v9 = vadd.f32 %v15378_v29, %v2761_v45  ;;  %4111 = vmatprep.subr.bf16.mxu1 %v13378_v53  ;;  %v17726_v17 = vld [vmem:[#allocation24_spill] sm:$0xff]  ;;  %v13382_v43 = vld [vmem:[%s17553_s1 + $0x3f0] ss:$20 sps:$4 sm:$0xff]  }
 0x69a   :  { %v2770_v51 = vmul.f32 %v15356_v37, %v17724_v46  ;;  %v3046_v63 = vmax.f32 %v2982_v50, 0.0  ;;  %v2991_v4 = vadd.f32 %v15388_v36, %v2766_v44  ;;  %v2765_v15 = vmul.f32 %v15350_v18, %v15032_v31  ;;  %3509 = vmatmul.mubr.bf16.gmra.mrb[76].mxu0 %v15494_v32  ;;  %4055 = vmatmul.mubr.bf16.gmra.mrb[76].mxu1 %v15494_v32  ;;  %v13379_v31 = vld [vmem:[%s17553_s1 + $0x3e8] ss:$20 sps:$4 sm:$0xff]  }
 0x69b   :  { %v2769_v48 = vmul.f32 %v15350_v18, %v15036_v8  ;;  %v15679_v33 = vpack.c.bf16 %v3051_v60, %v3047_v56  ;;  %v3050_v22 = vmax.f32 %v2986_v9, 0.0  ;;  %v2774_v0 = vmul.f32 %v15356_v37, %v17725_v30  ;;  %3518 = vmatprep.mubr.bf16.mxu0 %v15513_v38  ;;  %3566 = vmatpush1.bf16.msra.mxu0 %v13373_v28  ;;  %v17727_v28 = vld [vmem:[#allocation28_spill] sm:$0xff]  ;;  %v13385_v56 = vld [vmem:[%s17553_s1 + $0x410] ss:$20 sps:$4 sm:$0xff]  }
 0x69c   :  { %v2995_v35 = vadd.f32 %v15388_v36, %v2770_v51  ;;  %v3055_v8 = vmax.f32 %v2991_v4, 0.0  ;;  %v2990_v25 = vadd.f32 %v15378_v29, %v2765_v15  ;;  %v2778_v61 = vmul.f32 %v15356_v37, %v17726_v17  ;;  %4064 = vmatprep.mubr.bf16.mxu1 %v15513_v38  ;;  %4112 = vmatpush1.bf16.msra.mxu1 %v13376_v13  ;;  %v13390_v38 = vld [vmem:[%s17553_s1 + $0x41c] ss:$20 sps:$4 sm:$0xff]   ;;  %v13388_v13 = vld [vmem:[%s17553_s1 + $0x418] ss:$20 sps:$4 sm:$0xff]  }
 0x69d   :  { %v2994_v32 = vadd.f32 %v15378_v29, %v2769_v48  ;;  %v15699_v34 = vpack.c.bf16 %v3050_v22, %v3046_v63  ;;  %v2999_v3 = vadd.f32 %v15388_v36, %v2774_v0  ;;  %v2773_v53 = vmul.f32 %v15350_v18, %v15040_v1  ;;  %3567 = vmatprep.subr.bf16.mxu0 %v13381_v12  ;;  %v13396_v12 = vld [vmem:[%s17553_s1 + $0x444] ss:$20 sps:$4 sm:$0xff]  }
 0x69e   :  { %v3059_v47 = vmax.f32 %v2995_v35, 0.0  ;;  %4113 = vmatprep.subr.bf16.mxu1 %v13384_v55  ;;  %v3054_v19 = vmax.f32 %v2990_v25, 0.0  ;;  %v3003_v54 = vadd.f32 %v15388_v36, %v2778_v61  ;;  %v2777_v6 = vmul.f32 %v15350_v18, %v15044_v11  ;;  %v17728_v15 = vld [vmem:[#allocation32_spill] sm:$0xff] }
 0x69f   :  { %v3058_v27 = vmax.f32 %v2994_v32, 0.0  ;;  %v3063_v23 = vmax.f32 %v2999_v3, 0.0  ;;  %v2998_v45 = vadd.f32 %v15378_v29, %v2773_v53  ;;  %v2782_v1 = vmul.f32 %v15356_v37, %v17727_v28  ;;  %3568 = vmatpush1.bf16.msra.mxu0 %v13379_v31  ;;  %v13391_v30 = vld [vmem:[%s17553_s1 + $0x438] ss:$20 sps:$4 sm:$0xff]  }
 0x6a0   :  { %v15710_v14 = vpack.c.bf16 %v3059_v47, %v3055_v8  ;;  %v3067_v24 = vmax.f32 %v3003_v54, 0.0  ;;  %v3002_v44 = vadd.f32 %v15378_v29, %v2777_v6  ;;  %v2786_v11 = vmul.f32 %v15356_v37, %v14885_v57  ;;  %4114 = vmatpush1.bf16.msra.mxu1 %v13382_v43  ;;  %3569 = vmatprep.subr.bf16.mxu0 %v13387_v58  ;;  %v13393_v57 = vld [vmem:[%s17553_s1 + $0x43c] ss:$20 sps:$4 sm:$0xff]   ;;  %v13412_v28 = vld [vmem:[%s17553_s1 + $0x4b8] ss:$20 sps:$4 sm:$0xff]  }
 0x6a1   :  { %v15718_v50 = vpack.c.bf16 %v3058_v27, %v3054_v19  ;;  %v3062_v60 = vmax.f32 %v2998_v45, 0.0  ;;  %v3007_v9 = vadd.f32 %v15388_v36, %v2782_v1  ;;  %v2781_v46 = vmul.f32 %v15350_v18, %v15048_v59  ;;  %4115 = vmatprep.subr.bf16.mxu1 %v13390_v38  ;;  %v13408_v27 = vld [vmem:[%s17553_s1 + $0x494] ss:$20 sps:$4 sm:$0xff]   ;;  %v13417_v1 = vld [vmem:[%s17553_s1 + $0x4dc] ss:$20 sps:$4 sm:$0xff]  }
 0x6a2   :  { %v2785_v51 = vmul.f32 %v15350_v18, %v15052_v21  ;;  %v15737_v55 = vpack.c.bf16 %v3067_v24, %v3063_v23  ;;  %v3066_v63 = vmax.f32 %v3002_v44, 0.0  ;;  %v3011_v4 = vadd.f32 %v15388_v36, %v2786_v11  ;;  %3519 = vmatmul.mubr.bf16.gmra.mrb[80].mxu0 %v15525_v5  ;;  %4065 = vmatmul.mubr.bf16.gmra.mrb[80].mxu1 %v15525_v5  ;;  %v13403_v6 = vld [vmem:[%s17553_s1 + $0x488] ss:$20 sps:$4 sm:$0xff]   ;;  %v13406_v23 = vld [vmem:[%s17553_s1 + $0x490] ss:$20 sps:$4 sm:$0xff]  }
 0x6a3   :  { %v2790_v59 = vmul.f32 %v15356_v37, %v17728_v15  ;;  %v3071_v21 = vmax.f32 %v3007_v9, 0.0  ;;  %v3006_v48 = vadd.f32 %v15378_v29, %v2781_v46  ;;  %v2794_v35 = vmul.f32 %v15356_v37, %v14893_v52  ;;  %3528 = vmatprep.mubr.bf16.mxu0 %v15542_v62  ;;  %3570 = vmatpush1.bf16.msra.mxu0 %v13385_v56  ;;  %v13394_v52 = vld [vmem:[%s17553_s1 + $0x440] ss:$20 sps:$4 sm:$0xff]   ;;  %v13399_v37 = vld [vmem:[%s17553_s1 + $0x464] ss:$20 sps:$4 sm:$0xff]  }
 0x6a4   :  { %v3010_v22 = vadd.f32 %v15378_v29, %v2785_v51  ;;  %v15752_v0 = vpack.c.bf16 %v3066_v63, %v3062_v60  ;;  %v3075_v31 = vmax.f32 %v3011_v4, 0.0  ;;  %v2789_v8 = vmul.f32 %v15350_v18, %v15056_v39  ;;  %4074 = vmatprep.mubr.bf16.mxu1 %v15542_v62  ;;  %4116 = vmatpush1.bf16.msra.mxu1 %v13388_v13  ;;  %v13402_v39 = vld [vmem:[%s17553_s1 + $0x46c] ss:$20 sps:$4 sm:$0xff]   ;;  %v13411_v45 = vld [vmem:[%s17553_s1 + $0x4b4] ss:$20 sps:$4 sm:$0xff]  }
 0x6a5   :  { %v3015_v5 = vadd.f32 %v15388_v36, %v2790_v59  ;;  %v3070_v25 = vmax.f32 %v3006_v48, 0.0  ;;  %v3019_v17 = vadd.f32 %v15388_v36, %v2794_v35  ;;  %v2793_v61 = vmul.f32 %v15350_v18, %v15062_v42  ;;  %3571 = vmatprep.subr.bf16.mxu0 %v13393_v57  ;;  %4117 = vmatprep.subr.bf16.mxu1 %v13396_v12  ;;  %v13397_v42 = vld [vmem:[%s17553_s1 + $0x460] ss:$20 sps:$4 sm:$0xff]   ;;  %v13400_v36 = vld [vmem:[%s17553_s1 + $0x468] ss:$20 sps:$4 sm:$0xff]  }
 0x6a6   :  { %v3074_v32 = vmax.f32 %v3010_v22, 0.0  ;;  %v15770_v62 = vpack.c.bf16 %v3075_v31, %v3071_v21  ;;  %v3014_v58 = vadd.f32 %v15378_v29, %v2789_v8  ;;  %v13420_v56 = vld [vmem:[%s17553_s1 + $0x4e4] ss:$20 sps:$4 sm:$0xff]   ;;  %v13418_v44 = vld [vmem:[%s17553_s1 + $0x4e0] ss:$20 sps:$4 sm:$0xff]  }
 0x6a7   :  { %v3079_v43 = vmax.f32 %v3015_v5, 0.0  ;;  %v3083_v3 = vmax.f32 %v3019_v17, 0.0  ;;  %v3018_v53 = vadd.f32 %v15378_v29, %v2793_v61  ;;  %3572 = vmatpush1.bf16.msra.mxu0 %v13391_v30  ;;  %v13405_v29 = vld [vmem:[%s17553_s1 + $0x48c] ss:$20 sps:$4 sm:$0xff]  }
 0x6a8   :  { %v15773_v47 = vpack.c.bf16 %v3074_v32, %v3070_v25  ;;  %v3078_v18 = vmax.f32 %v3014_v58, 0.0  ;;  %4118 = vmatpush1.bf16.msra.mxu1 %v13394_v52  ;;  %3573 = vmatprep.subr.bf16.mxu0 %v13399_v37  ;;  %v13415_v24 = vld [vmem:[%s17553_s1 + $0x4d8] ss:$20 sps:$4 sm:$0xff]  }
 0x6a9   :  { %v15782_v38 = vpack.c.bf16 %v3083_v3, %v3079_v43  ;;  %v3082_v19 = vmax.f32 %v3018_v53, 0.0  ;;  %4119 = vmatprep.subr.bf16.mxu1 %v13402_v39 }
 0x6aa   :  { %3529 = vmatmul.mubr.bf16.gmra.mrb[84].mxu0 %v15549_v20  ;;  %4075 = vmatmul.mubr.bf16.gmra.mrb[84].mxu1 %v15549_v20  ;;  %v13414_v20 = vld [vmem:[%s17553_s1 + $0x4bc] ss:$20 sps:$4 sm:$0xff]  }
 0x6ab   :  { %v3114_v54 = vpack.c.bf16 %v3082_v19, %v3078_v18  ;;  %3538 = vmatprep.mubr.bf16.mxu0 %v15570_v16  ;;  %3574 = vmatpush1.bf16.msra.mxu0 %v13397_v42 }
 0x6ac   :  { %4084 = vmatprep.mubr.bf16.mxu1 %v15570_v16  ;;  %4120 = vmatpush1.bf16.msra.mxu1 %v13400_v36  ;;  %v13409_v16 = vld [vmem:[%s17553_s1 + $0x4b0] ss:$20 sps:$4 sm:$0xff]  }
 0x6ad   :  { %3575 = vmatprep.subr.bf16.mxu0 %v13405_v29  ;;  %4121 = vmatprep.subr.bf16.mxu1 %v13408_v27 }
 0x6af   :  { %3576 = vmatpush1.bf16.msra.mxu0 %v13403_v6 }
 0x6b0   :  { %4122 = vmatpush1.bf16.msra.mxu1 %v13406_v23  ;;  %3577 = vmatprep.subr.bf16.mxu0 %v13411_v45 }
 0x6b1   :  { %4123 = vmatprep.subr.bf16.mxu1 %v13414_v20 }
 0x6b2   :  { %3539 = vmatmul.mubr.bf16.gmra.mrb[88].mxu0 %v15582_v10  ;;  %4085 = vmatmul.mubr.bf16.gmra.mrb[88].mxu1 %v15582_v10  ;;  %v17729_v10 = vmov 0  }
 0x6b3   :  { %3578 = vmatpush1.bf16.msra.mxu0 %v13409_v16  ;;  %3581 = vmatprep.mubr.bf16.mxu0 %v15596_v49 }
 0x6b4   :  { %4124 = vmatpush1.bf16.msra.mxu1 %v13412_v28  ;;  %4127 = vmatprep.mubr.bf16.mxu1 %v15596_v49 }
 0x6b5   :  { %3579 = vmatprep.subr.bf16.mxu0 %v13417_v1  ;;  %4125 = vmatprep.subr.bf16.mxu1 %v13420_v56 }
 0x6b7   :  { %3580 = vmatpush1.bf16.msra.mxu0 %v13415_v24 }
 0x6b8   :  { %4126 = vmatpush1.bf16.msra.mxu1 %v13418_v44 }
 0x6ba   :  { %3582 = vmatmul.mubr.bf16.vlgmr.msra.gmra.mrb[60].mxu0 %v15607_v26 }
 0x6bb   :  { %4128 = vmatmul.mubr.bf16.vlgmr.msra.gmra.mrb[60].mxu1 %v15607_v26  ;;  %3591 = vmatprep.mubr.bf16.mxu0 %v15623_v41 }
 0x6bc   :  { %4137 = vmatprep.mubr.bf16.mxu1 %v15623_v41 }
 0x6c2   :  { %3592 = vmatmul.mubr.bf16.gmra.mrb[64].mxu0 %v15642_v2 }
 0x6c3   :  { %4138 = vmatmul.mubr.bf16.gmra.mrb[64].mxu1 %v15642_v2  ;;  %3601 = vmatprep.mubr.bf16.mxu0 %v15653_v40 }
 0x6c4   :  { %4147 = vmatprep.mubr.bf16.mxu1 %v15653_v40 }
 0x6ca   :  { %3602 = vmatmul.mubr.bf16.gmra.mrb[68].mxu0 %v15661_v7 }
 0x6cb   :  { %4148 = vmatmul.mubr.bf16.gmra.mrb[68].mxu1 %v15661_v7  ;;  %3611 = vmatprep.mubr.bf16.mxu0 %v15679_v33 }
 0x6cc   :  { %4157 = vmatprep.mubr.bf16.mxu1 %v15679_v33 }
 0x6d2   :  { %3612 = vmatmul.mubr.bf16.gmra.mrb[72].mxu0 %v15699_v34 }
 0x6d3   :  { %4158 = vmatmul.mubr.bf16.gmra.mrb[72].mxu1 %v15699_v34  ;;  %3621 = vmatprep.mubr.bf16.mxu0 %v15710_v14 }
 0x6d4   :  { %4167 = vmatprep.mubr.bf16.mxu1 %v15710_v14 }
 0x6da   :  { %3622 = vmatmul.mubr.bf16.gmra.mrb[76].mxu0 %v15718_v50 }
 0x6db   :  { %4168 = vmatmul.mubr.bf16.gmra.mrb[76].mxu1 %v15718_v50  ;;  %3631 = vmatprep.mubr.bf16.mxu0 %v15737_v55 }
 0x6dc   :  { %4177 = vmatprep.mubr.bf16.mxu1 %v15737_v55 }
 0x6e2   :  { %3632 = vmatmul.mubr.bf16.gmra.mrb[80].mxu0 %v15752_v0 }
 0x6e3   :  { %4178 = vmatmul.mubr.bf16.gmra.mrb[80].mxu1 %v15752_v0  ;;  %3641 = vmatprep.mubr.bf16.mxu0 %v15770_v62 }
 0x6e4   :  { %4187 = vmatprep.mubr.bf16.mxu1 %v15770_v62 }
 0x6ea   :  { %3642 = vmatmul.mubr.bf16.gmra.mrb[84].mxu0 %v15773_v47 }
 0x6eb   :  { %4188 = vmatmul.mubr.bf16.gmra.mrb[84].mxu1 %v15773_v47  ;;  %3651 = vmatprep.mubr.bf16.mxu0 %v15782_v38 }
 0x6ec   :  { %4197 = vmatprep.mubr.bf16.mxu1 %v15782_v38 }
 0x6f2   :  { %3652 = vmatmul.mubr.bf16.gmra.mrb[88].mxu0 %v3114_v54 }
 0x6f3   :  { %4198 = vmatmul.mubr.bf16.gmra.mrb[88].mxu1 %v3114_v54  ;;  %4312 = vmatprep.mubr.bf16.mxu0 %v17729_v10 }
 0x6f4   :  { %4409 = vmatprep.mubr.bf16.mxu1 %v17729_v10 }
 0x78d   :  { %v3583_v49 = vpop.f32.mrb[60].mxu0 }
 0x78e   :  { %v4129_v26 = vpop.f32.mrb[60].mxu1  ;;  %v3585_v41 = vpop.f32.mrb[61].mxu0 }
 0x78f   :  { %v4208_v2 = vmax.f32 %v3583_v49, %v4129_v26  ;;  %v4131_v40 = vpop.f32.mrb[61].mxu1  ;;  %v3587_v7 = vpop.f32.mrb[62].mxu0 }
 0x790   :  { %v4209_v33 = vmax.f32 %v3585_v41, %v4131_v40  ;;  %v4133_v34 = vpop.f32.mrb[62].mxu1  ;;  %v3589_v14 = vpop.f32.mrb[63].mxu0 }
 0x791   :  { %v4210_v50 = vmax.f32 %v3587_v7, %v4133_v34  ;;  %v4135_v11 = vpop.f32.mrb[63].mxu1 }
 0x792   :  { %v4211_v13 = vmax.f32 %v3589_v14, %v4135_v11 }
 0x793   :  { %v4240_v60 = vpack.c.bf16 %v4210_v50, %v4208_v2 }
 0x794   :  { %v4241_v9 = vpack.c.bf16 %v4211_v13, %v4209_v33 }
 0x795   :  { %v3593_v46 = vpop.f32.mrb[64].mxu0 }
 0x796   :  { %v4139_v51 = vpop.f32.mrb[64].mxu1  ;;  %4280 = vmatprep.subr.bf16.mxu0 %v4241_v9  ;;  %4377 = vmatprep.subr.bf16.mxu1 %v4241_v9  ;;  %v3595_v57 = vpop.f32.mrb[65].mxu0 }
 0x797   :  { %v4212_v12 = vmax.f32 %v3593_v46, %v4139_v51  ;;  %v4141_v55 = vpop.f32.mrb[65].mxu1  ;;  %4281 = vmatpush1.bf16.msra.mxu0 %v4240_v60  ;;  %4378 = vmatpush1.bf16.msra.mxu1 %v4240_v60  ;;  %v3597_v63 = vpop.f32.mrb[66].mxu0 }
 0x798   :  { %v4213_v4 = vmax.f32 %v3595_v57, %v4141_v55  ;;  %v4143_v15 = vpop.f32.mrb[66].mxu1  ;;  %v3599_v59 = vpop.f32.mrb[67].mxu0 }
 0x799   :  { %v4214_v21 = vmax.f32 %v3597_v63, %v4143_v15  ;;  %v4145_v48 = vpop.f32.mrb[67].mxu1 }
 0x79a   :  { %v4215_v22 = vmax.f32 %v3599_v59, %v4145_v48 }
 0x79b   :  { %v4242_v35 = vpack.c.bf16 %v4214_v21, %v4212_v12 }
 0x79c   :  { %v4243_v30 = vpack.c.bf16 %v4215_v22, %v4213_v4 }
 0x79d   :  { %v3603_v0 = vpop.f32.mrb[68].mxu0 }
 0x79e   :  { %v4149_v31 = vpop.f32.mrb[68].mxu1  ;;  %4282 = vmatprep.subr.bf16.mxu0 %v4243_v30  ;;  %4379 = vmatprep.subr.bf16.mxu1 %v4243_v30  ;;  %v3605_v5 = vpop.f32.mrb[69].mxu0 }
 0x79f   :  { %v4216_v8 = vmax.f32 %v3603_v0, %v4149_v31  ;;  %v4151_v52 = vpop.f32.mrb[69].mxu1  ;;  %4283 = vmatpush1.bf16.msra.mxu0 %v4242_v35  ;;  %4380 = vmatpush1.bf16.msra.mxu1 %v4242_v35  ;;  %v3607_v37 = vpop.f32.mrb[70].mxu0 }
 0x7a0   :  { %v4217_v25 = vmax.f32 %v3605_v5, %v4151_v52  ;;  %v4153_v32 = vpop.f32.mrb[70].mxu1  ;;  %v3609_v17 = vpop.f32.mrb[71].mxu0 }
 0x7a1   :  { %v4218_v61 = vmax.f32 %v3607_v37, %v4153_v32  ;;  %v4155_v39 = vpop.f32.mrb[71].mxu1 }
 0x7a2   :  { %v4219_v62 = vmax.f32 %v3609_v17, %v4155_v39 }
 0x7a3   :  { %v4244_v43 = vpack.c.bf16 %v4218_v61, %v4216_v8 }
 0x7a4   :  { %v4245_v58 = vpack.c.bf16 %v4219_v62, %v4217_v25 }
 0x7a5   :  { %v3613_v47 = vpop.f32.mrb[72].mxu0 }
 0x7a6   :  { %v4159_v3 = vpop.f32.mrb[72].mxu1  ;;  %4284 = vmatprep.subr.bf16.mxu0 %v4245_v58  ;;  %4381 = vmatprep.subr.bf16.mxu1 %v4245_v58  ;;  %v3615_v53 = vpop.f32.mrb[73].mxu0 }
 0x7a7   :  { %v4220_v42 = vmax.f32 %v3613_v47, %v4159_v3  ;;  %v4161_v18 = vpop.f32.mrb[73].mxu1  ;;  %4285 = vmatpush1.bf16.msra.mxu0 %v4244_v43  ;;  %4382 = vmatpush1.bf16.msra.mxu1 %v4244_v43  ;;  %v3617_v36 = vpop.f32.mrb[74].mxu0 }
 0x7a8   :  { %v4221_v38 = vmax.f32 %v3615_v53, %v4161_v18  ;;  %v4163_v19 = vpop.f32.mrb[74].mxu1  ;;  %v3619_v29 = vpop.f32.mrb[75].mxu0 }
 0x7a9   :  { %v4222_v27 = vmax.f32 %v3617_v36, %v4163_v19  ;;  %v4165_v54 = vpop.f32.mrb[75].mxu1  ;;  %v13421_v19 = vld [vmem:[%s17551_s3 + $0x80] sm:$0xff]  }
 0x7aa   :  { %v4223_v6 = vmax.f32 %v3619_v29, %v4165_v54  ;;  %v13422_v29 = vld [vmem:[%s17551_s3 + $0xa0] sm:$0xff]   ;;  %v13424_v54 = vld [vmem:[%s17551_s3 + $0xa8] sm:$0xff]  }
 0x7ab   :  { %v4246_v23 = vpack.c.bf16 %v4222_v27, %v4220_v42  ;;  %v13423_v27 = vld [vmem:[%s17551_s3 + $0x88] sm:$0xff]  }
 0x7ac   :  { %v4247_v45 = vpack.c.bf16 %v4223_v6, %v4221_v38  ;;  %v13425_v6 = vld [vmem:[%s17551_s3 + $0x90] sm:$0xff]  }
 0x7ad   :  { %v3623_v20 = vpop.f32.mrb[76].mxu0 }
 0x7ae   :  { %v4169_v16 = vpop.f32.mrb[76].mxu1  ;;  %4286 = vmatprep.subr.bf16.mxu0 %v4247_v45  ;;  %4383 = vmatprep.subr.bf16.mxu1 %v4247_v45  ;;  %v3625_v28 = vpop.f32.mrb[77].mxu0  ;;  %v13427_v45 = vld [vmem:[%s17551_s3 + $0x98] sm:$0xff]  }
 0x7af   :  { %v4224_v1 = vmax.f32 %v3623_v20, %v4169_v16  ;;  %v4171_v56 = vpop.f32.mrb[77].mxu1  ;;  %4287 = vmatpush1.bf16.msra.mxu0 %v4246_v23  ;;  %4384 = vmatpush1.bf16.msra.mxu1 %v4246_v23  ;;  %v3627_v24 = vpop.f32.mrb[78].mxu0  ;;  %v13426_v23 = vld [vmem:[%s17551_s3 + $0xb0] sm:$0xff]   ;;  %v13428_v20 = vld [vmem:[%s17551_s3 + $0xb8] sm:$0xff]  }
 0x7b0   :  { %v4225_v44 = vmax.f32 %v3625_v28, %v4171_v56  ;;  %v4173_v49 = vpop.f32.mrb[78].mxu1  ;;  %v3629_v26 = vpop.f32.mrb[79].mxu0 }
 0x7b1   :  { %v4226_v41 = vmax.f32 %v3627_v24, %v4173_v49  ;;  %v4175_v2 = vpop.f32.mrb[79].mxu1 }
 0x7b2   :  { %v4227_v40 = vmax.f32 %v3629_v26, %v4175_v2 }
 0x7b3   :  { %v4248_v7 = vpack.c.bf16 %v4226_v41, %v4224_v1 }
 0x7b4   :  { %v4249_v33 = vpack.c.bf16 %v4227_v40, %v4225_v44 }
 0x7b5   :  { %v3633_v34 = vpop.f32.mrb[80].mxu0 }
 0x7b6   :  { %v4179_v14 = vpop.f32.mrb[80].mxu1  ;;  %4288 = vmatprep.subr.bf16.mxu0 %v4249_v33  ;;  %4385 = vmatprep.subr.bf16.mxu1 %v4249_v33  ;;  %v3635_v50 = vpop.f32.mrb[81].mxu0 }
 0x7b7   :  { %v4228_v11 = vmax.f32 %v3633_v34, %v4179_v14  ;;  %v4181_v13 = vpop.f32.mrb[81].mxu1  ;;  %4289 = vmatpush1.bf16.msra.mxu0 %v4248_v7  ;;  %4386 = vmatpush1.bf16.msra.mxu1 %v4248_v7  ;;  %v3637_v60 = vpop.f32.mrb[82].mxu0 }
 0x7b8   :  { %v4229_v9 = vmax.f32 %v3635_v50, %v4181_v13  ;;  %v4183_v46 = vpop.f32.mrb[82].mxu1  ;;  %v3639_v51 = vpop.f32.mrb[83].mxu0 }
 0x7b9   :  { %v4230_v57 = vmax.f32 %v3637_v60, %v4183_v46  ;;  %v4185_v12 = vpop.f32.mrb[83].mxu1 }
 0x7ba   :  { %v4231_v55 = vmax.f32 %v3639_v51, %v4185_v12 }
 0x7bb   :  { %v4250_v63 = vpack.c.bf16 %v4230_v57, %v4228_v11 }
 0x7bc   :  { %v4251_v4 = vpack.c.bf16 %v4231_v55, %v4229_v9 }
 0x7bd   :  { %v3643_v15 = vpop.f32.mrb[84].mxu0 }
 0x7be   :  { %v4189_v59 = vpop.f32.mrb[84].mxu1  ;;  %4290 = vmatprep.subr.bf16.mxu0 %v4251_v4  ;;  %4387 = vmatprep.subr.bf16.mxu1 %v4251_v4  ;;  %v3645_v21 = vpop.f32.mrb[85].mxu0 }
 0x7bf   :  { %v4232_v48 = vmax.f32 %v3643_v15, %v4189_v59  ;;  %v4191_v22 = vpop.f32.mrb[85].mxu1  ;;  %4291 = vmatpush1.bf16.msra.mxu0 %v4250_v63  ;;  %4388 = vmatpush1.bf16.msra.mxu1 %v4250_v63  ;;  %v3647_v35 = vpop.f32.mrb[86].mxu0 }
 0x7c0   :  { %v4233_v30 = vmax.f32 %v3645_v21, %v4191_v22  ;;  %v4193_v0 = vpop.f32.mrb[86].mxu1  ;;  %v3649_v31 = vpop.f32.mrb[87].mxu0 }
 0x7c1   :  { %v4234_v5 = vmax.f32 %v3647_v35, %v4193_v0  ;;  %v4195_v8 = vpop.f32.mrb[87].mxu1 }
 0x7c2   :  { %v4235_v52 = vmax.f32 %v3649_v31, %v4195_v8 }
 0x7c3   :  { %v4252_v37 = vpack.c.bf16 %v4234_v5, %v4232_v48 }
 0x7c4   :  { %v4253_v25 = vpack.c.bf16 %v4235_v52, %v4233_v30 }
 0x7c5   :  { %v3653_v32 = vpop.f32.mrb[88].mxu0 }
 0x7c6   :  { %v4199_v17 = vpop.f32.mrb[88].mxu1  ;;  %4292 = vmatprep.subr.bf16.mxu0 %v4253_v25  ;;  %4389 = vmatprep.subr.bf16.mxu1 %v4253_v25  ;;  %v3655_v61 = vpop.f32.mrb[89].mxu0 }
 0x7c7   :  { %v4236_v39 = vmax.f32 %v3653_v32, %v4199_v17  ;;  %v4201_v62 = vpop.f32.mrb[89].mxu1  ;;  %4293 = vmatpush1.bf16.msra.mxu0 %v4252_v37  ;;  %4390 = vmatpush1.bf16.msra.mxu1 %v4252_v37  ;;  %v3657_v43 = vpop.f32.mrb[90].mxu0 }
 0x7c8   :  { %v4237_v58 = vmax.f32 %v3655_v61, %v4201_v62  ;;  %v4203_v47 = vpop.f32.mrb[90].mxu1  ;;  %v3659_v3 = vpop.f32.mrb[91].mxu0 }
 0x7c9   :  { %v4238_v53 = vmax.f32 %v3657_v43, %v4203_v47  ;;  %v4205_v42 = vpop.f32.mrb[91].mxu1 }
 0x7ca   :  { %v4239_v18 = vmax.f32 %v3659_v3, %v4205_v42 }
 0x7cb   :  { %v4254_v36 = vpack.c.bf16 %v4238_v53, %v4236_v39 }
 0x7cc   :  { %v4255_v38 = vpack.c.bf16 %v4239_v18, %v4237_v58 }
 0x7ce   :  { %4294 = vmatprep.subr.bf16.mxu0 %v4255_v38  ;;  %4391 = vmatprep.subr.bf16.mxu1 %v4255_v38 }
 0x7cf   :  { %4295 = vmatpush1.bf16.msra.mxu0 %v4254_v36  ;;  %4392 = vmatpush1.bf16.msra.mxu1 %v4254_v36 }
 0x7d2   :  { %4313 = vmatmul.mubr.bf16.vlgmr.msra.gmra.mrb[92].mxu0 %v13421_v19  ;;  %4410 = vmatmul.mubr.bf16.vlgmr.msra.gmra.mrb[92].mxu1 %v13422_v29  ;;  %v13439_v29 = vld [vmem:[%s17730_s30 + $0x4] ss:$8 sps:$4 sm:$0xff]  }
 0x7d3   :  { %4322 = vmatprep.mubr.bf16.mxu0 %v17729_v10  ;;  %4419 = vmatprep.mubr.bf16.mxu1 %v17729_v10 }
 0x7da   :  { %4323 = vmatmul.mubr.bf16.gmra.mrb[96].mxu0 %v13423_v27  ;;  %4420 = vmatmul.mubr.bf16.gmra.mrb[96].mxu1 %v13424_v54  ;;  %v13429_v27 = vld [vmem:[%s17731_s26] sm:$0xff]  }
 0x7db   :  { %4332 = vmatprep.mubr.bf16.mxu0 %v17729_v10  ;;  %4429 = vmatprep.mubr.bf16.mxu1 %v17729_v10  ;;  %v13433_v54 = vld [vmem:[%s17731_s26 + $0x20] sm:$0xff]  }
 0x7e2   :  { %4333 = vmatmul.mubr.bf16.gmra.mrb[100].mxu0 %v13425_v6  ;;  %4430 = vmatmul.mubr.bf16.gmra.mrb[100].mxu1 %v13426_v23  ;;  %v13437_v6 = vld [vmem:[%s17730_s30] ss:$8 sps:$4 sm:$0xff]   ;;  %v13442_v23 = vld [vmem:[%s17730_s30 + $0x14] ss:$8 sps:$4 sm:$0xff]  }
 0x7e3   :  { %4342 = vmatprep.mubr.bf16.mxu0 %v17729_v10  ;;  %4439 = vmatprep.mubr.bf16.mxu1 %v17729_v10 }
 0x7ea   :  { %4343 = vmatmul.mubr.bf16.gmra.mrb[104].mxu0 %v13427_v45  ;;  %4440 = vmatmul.mubr.bf16.gmra.mrb[104].mxu1 %v13428_v20  ;;  %v13440_v45 = vld [vmem:[%s17730_s30 + $0x10] ss:$8 sps:$4 sm:$0xff]   ;;  %v13445_v20 = vld [vmem:[%s17730_s30 + $0x24] ss:$8 sps:$4 sm:$0xff]  }
 0x7eb   :  { %4791 = vmatprep.mubr.bf16.mxu0 %v17729_v10  ;;  %4904 = vmatprep.mubr.bf16.mxu1 %v17729_v10 }
 0x8a5   :  { %v4314_v16 = vpop.f32.mrb[92].mxu0  ;;  %v4411_v28 = vpop.f32.mrb[92].mxu1 }
 0x8a6   :  { %v4450_v1 = vmax.f32 %v4314_v16, %v4411_v28  ;;  %v4316_v56 = vpop.f32.mrb[93].mxu0  ;;  %v4413_v24 = vpop.f32.mrb[93].mxu1  ;;  %v13430_v16 = vld [vmem:[%s17731_s26 + $0x8] sm:$0xff]  }
 0x8a7   :  { %v4451_v44 = vmax.f32 %v4316_v56, %v4413_v24  ;;  %v4318_v49 = vpop.f32.mrb[94].mxu0  ;;  %v4415_v26 = vpop.f32.mrb[94].mxu1  ;;  %v13434_v28 = vld [vmem:[%s17731_s26 + $0x28] sm:$0xff]   ;;  %v13448_v56 = vld [vmem:[%s17730_s30 + $0x34] ss:$8 sps:$4 sm:$0xff]  }
 0x8a8   :  { %v4452_v41 = vmax.f32 %v4318_v49, %v4415_v26  ;;  %v4320_v2 = vpop.f32.mrb[95].mxu0  ;;  %v4417_v40 = vpop.f32.mrb[95].mxu1  ;;  %v13446_v24 = vld [vmem:[%s17730_s30 + $0x30] ss:$8 sps:$4 sm:$0xff]  }
 0x8a9   :  { %v4453_v7 = vmax.f32 %v4320_v2, %v4417_v40  ;;  %v13431_v49 = vld [vmem:[%s17731_s26 + $0x10] sm:$0xff]  }
 0x8aa   :  { %v15890_v33 = vpack.c.bf16 %v4452_v41, %v4450_v1  ;;  %v13443_v1 = vld [vmem:[%s17730_s30 + $0x20] ss:$8 sps:$4 sm:$0xff]   ;;  %v13435_v26 = vld [vmem:[%s17731_s26 + $0x30] sm:$0xff]  }
 0x8ab   :  { %v15892_v34 = vpack.c.bf16 %v4453_v7, %v4451_v44  ;;  %v13451_v44 = vld [vmem:[%s17730_s30 + $0x44] ss:$8 sps:$4 sm:$0xff]   ;;  %v13449_v41 = vld [vmem:[%s17730_s30 + $0x40] ss:$8 sps:$4 sm:$0xff]   ;;  %v13454_v2 = vld [vmem:[%s17730_s30 + $0x54] ss:$8 sps:$4 sm:$0xff]  }
 0x8ac   :  { %v13452_v40 = vld [vmem:[%s17730_s30 + $0x50] ss:$8 sps:$4 sm:$0xff]   ;;  %v13457_v7 = vld [vmem:[%s17730_s30 + $0x64] ss:$8 sps:$4 sm:$0xff]  }
 0x8ad   :  { %v4324_v14 = vpop.f32.mrb[96].mxu0  ;;  %v4421_v50 = vpop.f32.mrb[96].mxu1  ;;  %4759 = vmatprep.subr.bf16.mxu0 %v15892_v34  ;;  %4872 = vmatprep.subr.bf16.mxu1 %v15892_v34 }
 0x8ae   :  { %v4454_v11 = vmax.f32 %v4324_v14, %v4421_v50  ;;  %v4326_v13 = vpop.f32.mrb[97].mxu0  ;;  %v4423_v60 = vpop.f32.mrb[97].mxu1  ;;  %4760 = vmatpush1.bf16.msra.mxu0 %v15890_v33  ;;  %4873 = vmatpush1.bf16.msra.mxu1 %v15890_v33  ;;  %v13432_v14 = vld [vmem:[%s17731_s26 + $0x18] sm:$0xff]  }
 0x8af   :  { %v4455_v9 = vmax.f32 %v4326_v13, %v4423_v60  ;;  %v4328_v46 = vpop.f32.mrb[98].mxu0  ;;  %v4425_v51 = vpop.f32.mrb[98].mxu1  ;;  %v13436_v50 = vld [vmem:[%s17731_s26 + $0x38] sm:$0xff]   ;;  %v13463_v60 = vld [vmem:[%s17730_s30 + $0x84] ss:$8 sps:$4 sm:$0xff]  }
 0x8b0   :  { %v4456_v57 = vmax.f32 %v4328_v46, %v4425_v51  ;;  %v4330_v12 = vpop.f32.mrb[99].mxu0  ;;  %v4427_v55 = vpop.f32.mrb[99].mxu1  ;;  %v13458_v13 = vld [vmem:[%s17730_s30 + $0x70] ss:$8 sps:$4 sm:$0xff]   ;;  %v13466_v46 = vld [vmem:[%s17730_s30 + $0x94] ss:$8 sps:$4 sm:$0xff]  }
 0x8b1   :  { %v4457_v63 = vmax.f32 %v4330_v12, %v4427_v55  ;;  %v13464_v51 = vld [vmem:[%s17730_s30 + $0x90] ss:$8 sps:$4 sm:$0xff]   ;;  %v13467_v12 = vld [vmem:[%s17730_s30 + $0xa0] ss:$8 sps:$4 sm:$0xff]   ;;  %v13472_v55 = vld [vmem:[%s17730_s30 + $0xb4] ss:$8 sps:$4 sm:$0xff]  }
 0x8b2   :  { %v15898_v4 = vpack.c.bf16 %v4456_v57, %v4454_v11  ;;  %v13460_v11 = vld [vmem:[%s17730_s30 + $0x74] ss:$8 sps:$4 sm:$0xff]   ;;  %v13469_v57 = vld [vmem:[%s17730_s30 + $0xa4] ss:$8 sps:$4 sm:$0xff]  }
 0x8b3   :  { %v15900_v15 = vpack.c.bf16 %v4457_v63, %v4455_v9  ;;  %v13461_v9 = vld [vmem:[%s17730_s30 + $0x80] ss:$8 sps:$4 sm:$0xff]   ;;  %v13470_v63 = vld [vmem:[%s17730_s30 + $0xb0] ss:$8 sps:$4 sm:$0xff]  }
 0x8b5   :  { %v4334_v59 = vpop.f32.mrb[100].mxu0  ;;  %v4431_v21 = vpop.f32.mrb[100].mxu1  ;;  %4761 = vmatprep.subr.bf16.mxu0 %v15900_v15  ;;  %4874 = vmatprep.subr.bf16.mxu1 %v15900_v15 }
 0x8b6   :  { %v4458_v48 = vmax.f32 %v4334_v59, %v4431_v21  ;;  %v4336_v22 = vpop.f32.mrb[101].mxu0  ;;  %v4433_v35 = vpop.f32.mrb[101].mxu1  ;;  %4762 = vmatpush1.bf16.msra.mxu0 %v15898_v4  ;;  %4875 = vmatpush1.bf16.msra.mxu1 %v15898_v4  ;;  %v13475_v59 = vld [vmem:[%s17730_s30 + $0xc4] ss:$8 sps:$4 sm:$0xff]   ;;  %v13473_v21 = vld [vmem:[%s17730_s30 + $0xc0] ss:$8 sps:$4 sm:$0xff]  }
 0x8b7   :  { %v4459_v30 = vmax.f32 %v4336_v22, %v4433_v35  ;;  %v4338_v0 = vpop.f32.mrb[102].mxu0  ;;  %v4435_v31 = vpop.f32.mrb[102].mxu1  ;;  %v13476_v22 = vld [vmem:[%s17730_s30 + $0xd0] ss:$8 sps:$4 sm:$0xff]   ;;  %v13481_v35 = vld [vmem:[%s17730_s30 + $0xe4] ss:$8 sps:$4 sm:$0xff]  }
 0x8b8   :  { %v4460_v5 = vmax.f32 %v4338_v0, %v4435_v31  ;;  %v4340_v8 = vpop.f32.mrb[103].mxu0  ;;  %v4437_v52 = vpop.f32.mrb[103].mxu1  ;;  %v13482_v0 = vld [vmem:[%s17730_s30 + $0xf0] ss:$8 sps:$4 sm:$0xff]   ;;  %v13484_v31 = vld [vmem:[%s17730_s30 + $0xf4] ss:$8 sps:$4 sm:$0xff]  }
 0x8b9   :  { %v4461_v37 = vmax.f32 %v4340_v8, %v4437_v52 }
 0x8ba   :  { %v15906_v25 = vpack.c.bf16 %v4460_v5, %v4458_v48  ;;  %v13478_v48 = vld [vmem:[%s17730_s30 + $0xd4] ss:$8 sps:$4 sm:$0xff]   ;;  %v13487_v5 = vld [vmem:[%s17730_s30 + $0x104] ss:$8 sps:$4 sm:$0xff]  }
 0x8bb   :  { %v15908_v32 = vpack.c.bf16 %v4461_v37, %v4459_v30  ;;  %v13479_v30 = vld [vmem:[%s17730_s30 + $0xe0] ss:$8 sps:$4 sm:$0xff]  }
 0x8bd   :  { %v4344_v17 = vpop.f32.mrb[104].mxu0  ;;  %v4441_v61 = vpop.f32.mrb[104].mxu1  ;;  %4763 = vmatprep.subr.bf16.mxu0 %v15908_v32  ;;  %4876 = vmatprep.subr.bf16.mxu1 %v15908_v32 }
 0x8be   :  { %v4462_v39 = vmax.f32 %v4344_v17, %v4441_v61  ;;  %v4346_v62 = vpop.f32.mrb[105].mxu0  ;;  %v4443_v43 = vpop.f32.mrb[105].mxu1  ;;  %4764 = vmatpush1.bf16.msra.mxu0 %v15906_v25  ;;  %4877 = vmatpush1.bf16.msra.mxu1 %v15906_v25 }
 0x8bf   :  { %v4463_v58 = vmax.f32 %v4346_v62, %v4443_v43  ;;  %v4348_v47 = vpop.f32.mrb[106].mxu0  ;;  %v4445_v3 = vpop.f32.mrb[106].mxu1 }
 0x8c0   :  { %v4464_v53 = vmax.f32 %v4348_v47, %v4445_v3  ;;  %v4350_v42 = vpop.f32.mrb[107].mxu0  ;;  %v4447_v18 = vpop.f32.mrb[107].mxu1 }
 0x8c1   :  { %v4465_v36 = vmax.f32 %v4350_v42, %v4447_v18  ;;  %v13490_v18 = vld [vmem:[%s17730_s30 + $0x114] ss:$8 sps:$4 sm:$0xff]  }
 0x8c2   :  { %v15914_v38 = vpack.c.bf16 %v4464_v53, %v4462_v39  ;;  %v13485_v53 = vld [vmem:[%s17730_s30 + $0x100] ss:$8 sps:$4 sm:$0xff]  }
 0x8c3   :  { %v15916_v19 = vpack.c.bf16 %v4465_v36, %v4463_v58 }
 0x8c5   :  { %4765 = vmatprep.subr.bf16.mxu0 %v15916_v19  ;;  %4878 = vmatprep.subr.bf16.mxu1 %v15916_v19 }
 0x8c6   :  { %4766 = vmatpush1.bf16.msra.mxu0 %v15914_v38  ;;  %4879 = vmatpush1.bf16.msra.mxu1 %v15914_v38 }
 0x8c7   :  { %5113 = vmatprep.subr.bf16.mxu0 %v13439_v29  ;;  %v13488_v29 = vld [vmem:[%s17730_s30 + $0x110] ss:$8 sps:$4 sm:$0xff]  }
 0x8c9   :  { %10952 = vmatmul.mubr.msk.bf16.vlgmr.msra.gmra.mrb[108].mxu0 %vm852_vm0, %v13429_v27  ;;  %10960 = vmatmul.mubr.msk.bf16.vlgmr.msra.gmra.mrb[108].mxu1 %vm852_vm0, %v13433_v54 }
 0x8ca   :  { %4801 = vmatprep.mubr.bf16.mxu0 %v17729_v10  ;;  %4914 = vmatprep.mubr.bf16.mxu1 %v17729_v10 }
 0x8cb   :  { %5114 = vmatpush1.bf16.msra.mxu0 %v13437_v6  ;;  %v13493_v6 = vld [vmem:[%s17730_s30 + $0x124] ss:$8 sps:$4 sm:$0xff]  }
 0x8cc   :  { %5115 = vmatprep.subr.bf16.mxu0 %v13442_v23 }
 0x8cf   :  { %5116 = vmatpush1.bf16.msra.mxu0 %v13440_v45 }
 0x8d0   :  { %5117 = vmatprep.subr.bf16.mxu0 %v13445_v20 }
 0x8d1   :  { %10953 = vmatmul.mubr.msk.bf16.gmra.mrb[112].mxu0 %vm852_vm0, %v13430_v16  ;;  %10961 = vmatmul.mubr.msk.bf16.gmra.mrb[112].mxu1 %vm852_vm0, %v13434_v28 }
 0x8d2   :  { %4811 = vmatprep.mubr.bf16.mxu0 %v17729_v10  ;;  %4924 = vmatprep.mubr.bf16.mxu1 %v17729_v10 }
 0x8d3   :  { %5118 = vmatpush1.bf16.msra.mxu0 %v13443_v1 }
 0x8d4   :  { %5119 = vmatprep.subr.bf16.mxu0 %v13448_v56 }
 0x8d7   :  { %5120 = vmatpush1.bf16.msra.mxu0 %v13446_v24 }
 0x8d8   :  { %5121 = vmatprep.subr.bf16.mxu0 %v13451_v44  ;;  %v13491_v44 = vld [vmem:[%s17730_s30 + $0x120] ss:$8 sps:$4 sm:$0xff]  }
 0x8d9   :  { %10954 = vmatmul.mubr.msk.bf16.gmra.mrb[116].mxu0 %vm852_vm0, %v13431_v49  ;;  %10962 = vmatmul.mubr.msk.bf16.gmra.mrb[116].mxu1 %vm852_vm0, %v13435_v26  ;;  %v13496_v26 = vld [vmem:[%s17730_s30 + $0x134] ss:$8 sps:$4 sm:$0xff]  }
 0x8da   :  { %4821 = vmatprep.mubr.bf16.mxu0 %v17729_v10  ;;  %4934 = vmatprep.mubr.bf16.mxu1 %v17729_v10  ;;  %v13455_v10 = vld [vmem:[%s17730_s30 + $0x60] ss:$8 sps:$4 sm:$0xff]  }
 0x8db   :  { %5122 = vmatpush1.bf16.msra.mxu0 %v13449_v41 }
 0x8dc   :  { %5123 = vmatprep.subr.bf16.mxu0 %v13454_v2  ;;  %v13494_v2 = vld [vmem:[%s17730_s30 + $0x130] ss:$8 sps:$4 sm:$0xff]  }
 0x8df   :  { %5124 = vmatpush1.bf16.msra.mxu0 %v13452_v40 }
 0x8e0   :  { %5125 = vmatprep.subr.bf16.mxu0 %v13457_v7 }
 0x8e1   :  { %10955 = vmatmul.mubr.msk.bf16.gmra.mrb[120].mxu0 %vm852_vm0, %v13432_v14  ;;  %10963 = vmatmul.mubr.msk.bf16.gmra.mrb[120].mxu1 %vm852_vm0, %v13436_v50  ;;  %v13499_v14 = vld [vmem:[%s17730_s30 + $0x144] ss:$8 sps:$4 sm:$0xff]  }
 0x8e3   :  { %5126 = vmatpush1.bf16.msra.mxu0 %v13455_v10 }
 0x8e4   :  { %5127 = vmatprep.subr.bf16.mxu0 %v13460_v11 }
 0x8e7   :  { %5128 = vmatpush1.bf16.msra.mxu0 %v13458_v13 }
 0x8e8   :  { %5129 = vmatprep.subr.bf16.mxu0 %v13463_v60 }
 0x8eb   :  { %5130 = vmatpush1.bf16.msra.mxu0 %v13461_v9 }
 0x8ec   :  { %5131 = vmatprep.subr.bf16.mxu0 %v13466_v46 }
 0x8ef   :  { %5132 = vmatpush1.bf16.msra.mxu0 %v13464_v51 }
 0x8f0   :  { %5133 = vmatprep.subr.bf16.mxu0 %v13469_v57  ;;  %v13497_v57 = vld [vmem:[%s17730_s30 + $0x140] ss:$8 sps:$4 sm:$0xff]  }
 0x8f3   :  { %5134 = vmatpush1.bf16.msra.mxu0 %v13467_v12 }
 0x8f4   :  { %5135 = vmatprep.subr.bf16.mxu0 %v13472_v55  ;;  %v13502_v55 = vld [vmem:[%s17730_s30 + $0x154] ss:$8 sps:$4 sm:$0xff]  }
 0x8f7   :  { %5136 = vmatpush1.bf16.msra.mxu0 %v13470_v63 }
 0x8f8   :  { %5137 = vmatprep.subr.bf16.mxu0 %v13475_v59  ;;  %v13500_v59 = vld [vmem:[%s17730_s30 + $0x150] ss:$8 sps:$4 sm:$0xff]  }
 0x8fb   :  { %5138 = vmatpush1.bf16.msra.mxu0 %v13473_v21 }
 0x8fc   :  { %5139 = vmatprep.subr.bf16.mxu0 %v13478_v48 }
 0x8ff   :  { %5140 = vmatpush1.bf16.msra.mxu0 %v13476_v22  ;;  %v13505_v22 = vld [vmem:[%s17730_s30 + $0x164] ss:$8 sps:$4 sm:$0xff]  }
 0x900   :  { %5141 = vmatprep.subr.bf16.mxu0 %v13481_v35 }
 0x903   :  { %5142 = vmatpush1.bf16.msra.mxu0 %v13479_v30 }
 0x904   :  { %5143 = vmatprep.subr.bf16.mxu0 %v13484_v31 }
 0x907   :  { %5144 = vmatpush1.bf16.msra.mxu0 %v13482_v0 }
 0x908   :  { %5346 = vmatprep.subr.bf16.mxu0 %v13487_v5 }
 0x99c   :  { %v4793_v8 = vpop.f32.mrb[108].mxu0  ;;  %v16059_v52 = vpop.f32.mrb[108].mxu1 }
 0x99d   :  { %v4795_v37 = vpop.f32.mrb[109].mxu0  ;;  %v16061_v17 = vpop.f32.mrb[109].mxu1 }
 0x99e   :  { %v4797_v61 = vpop.f32.mrb[110].mxu0  ;;  %v16063_v39 = vpop.f32.mrb[110].mxu1 }
 0x99f   :  { %v4832_v62 = vpack.c.bf16 %v4797_v61, %v4793_v8  ;;  %v4799_v43 = vpop.f32.mrb[111].mxu0  ;;  %v4945_v58 = vpack.c.bf16 %v16063_v39, %v16059_v52  ;;  %v16067_v47 = vpop.f32.mrb[111].mxu1  ;;  %v16331_v52 = vld [vmem:[%s17732_s29 + $0xc8] ss:$12 sps:$4 sm:$0xff]  }
 0x9a0   :  { %v4833_v3 = vpack.c.bf16 %v4799_v43, %v4795_v37  ;;  %v4946_v42 = vpack.c.bf16 %v16067_v47, %v16061_v17  ;;  %v13560_v17 = vld [vmem:[%s17730_s30 + $0x290] ss:$8 sps:$4 sm:$0xff]   ;;  %v13565_v47 = vld [vmem:[%s17730_s30 + $0x2a4] ss:$8 sps:$4 sm:$0xff]   ;;  %v16336_v39 = vld [vmem:[%s17732_s29 + $0x8] ss:$12 sps:$4 sm:$0xff]   ;;  %12544 = vmatprep.subr.bf16.mxu1 %v16331_v52 }
 0x9a1   :  { %12546 = vmatpush3.bf16.msra.mxu1 %v16336_v39 }
 0x9a2   :  { %5145 = vmatprep.mubr.bf16.mxu0 %v4833_v3  ;;  %v13508_v3 = vld [vmem:[%s17730_s30 + $0x174] ss:$8 sps:$4 sm:$0xff]  }
 0x9a3   :  { %5146 = vmatmul.mubr.bf16.vlgmr.msra.gmra.mrb[124].mxu0 %v4832_v62  ;;  %v13503_v62 = vld [vmem:[%s17730_s30 + $0x160] ss:$8 sps:$4 sm:$0xff]  }
 0x9a4   :  { %5347 = vmatpush1.bf16.msra.mxu0 %v13485_v53  ;;  %v4803_v36 = vpop.f32.mrb[112].mxu0  ;;  %v16080_v27 = vpop.f32.mrb[112].mxu1  ;;  %v13506_v53 = vld [vmem:[%s17730_s30 + $0x170] ss:$8 sps:$4 sm:$0xff]  }
 0x9a5   :  { %v4805_v54 = vpop.f32.mrb[113].mxu0  ;;  %5348 = vmatprep.subr.bf16.mxu0 %v13490_v18  ;;  %v16085_v23 = vpop.f32.mrb[113].mxu1  ;;  %v13511_v18 = vld [vmem:[%s17730_s30 + $0x184] ss:$8 sps:$4 sm:$0xff]  }
 0x9a6   :  { %v4807_v45 = vpop.f32.mrb[114].mxu0  ;;  %v16087_v20 = vpop.f32.mrb[114].mxu1 }
 0x9a7   :  { %v4834_v16 = vpack.c.bf16 %v4807_v45, %v4803_v36  ;;  %v4809_v28 = vpop.f32.mrb[115].mxu0  ;;  %v4947_v1 = vpack.c.bf16 %v16087_v20, %v16080_v27  ;;  %v16091_v56 = vpop.f32.mrb[115].mxu1  ;;  %v13509_v36 = vld [vmem:[%s17730_s30 + $0x180] ss:$8 sps:$4 sm:$0xff]   ;;  %v13520_v45 = vld [vmem:[%s17730_s30 + $0x1b4] ss:$8 sps:$4 sm:$0xff]  }
 0x9a8   :  { %v4835_v24 = vpack.c.bf16 %v4809_v28, %v4805_v54  ;;  %5349 = vmatpush1.bf16.msra.mxu0 %v13488_v29  ;;  %v4948_v49 = vpack.c.bf16 %v16091_v56, %v16085_v23  ;;  %v13514_v29 = vld [vmem:[%s17730_s30 + $0x194] ss:$8 sps:$4 sm:$0xff]   ;;  %v13517_v54 = vld [vmem:[%s17730_s30 + $0x1a4] ss:$8 sps:$4 sm:$0xff]  }
 0x9a9   :  { %5350 = vmatprep.subr.bf16.mxu0 %v13493_v6  ;;  %v13515_v6 = vld [vmem:[%s17730_s30 + $0x1a0] ss:$8 sps:$4 sm:$0xff]   ;;  %v13523_v28 = vld [vmem:[%s17730_s30 + $0x1c4] ss:$8 sps:$4 sm:$0xff]   ;;  %v16373_v56 = vld [vmem:[%s17732_s29 + $0x50] ss:$12 sps:$4 sm:$0xff]  }
 0x9aa   :  { %5155 = vmatprep.mubr.bf16.mxu0 %v4835_v24  ;;  %v13521_v24 = vld [vmem:[%s17730_s30 + $0x1c0] ss:$8 sps:$4 sm:$0xff]   ;;  %v16355_v23 = vld [vmem:[%s17732_s29 + $0xf8] ss:$12 sps:$4 sm:$0xff]  }
 0x9ab   :  { %5156 = vmatmul.mubr.bf16.gmra.mrb[128].mxu0 %v4834_v16  ;;  %v13518_v16 = vld [vmem:[%s17730_s30 + $0x1b0] ss:$8 sps:$4 sm:$0xff]   ;;  %v16349_v27 = vld [vmem:[%s17732_s29 + $0x20] ss:$12 sps:$4 sm:$0xff]  }
 0x9ac   :  { %5351 = vmatpush1.bf16.msra.mxu0 %v13491_v44  ;;  %v4813_v41 = vpop.f32.mrb[116].mxu0  ;;  %v16104_v40 = vpop.f32.mrb[116].mxu1  ;;  %v13526_v44 = vld [vmem:[%s17730_s30 + $0x1d4] ss:$8 sps:$4 sm:$0xff]   ;;  %v16360_v20 = vld [vmem:[%s17732_s29 + $0x38] ss:$12 sps:$4 sm:$0xff]  }
 0x9ad   :  { %v4815_v7 = vpop.f32.mrb[117].mxu0  ;;  %5352 = vmatprep.subr.bf16.mxu0 %v13496_v26  ;;  %v16109_v50 = vpop.f32.mrb[117].mxu1  ;;  %v13524_v26 = vld [vmem:[%s17730_s30 + $0x1d0] ss:$8 sps:$4 sm:$0xff]  }
 0x9ae   :  { %v4817_v10 = vpop.f32.mrb[118].mxu0  ;;  %v16111_v11 = vpop.f32.mrb[118].mxu1 }
 0x9af   :  { %v4836_v13 = vpack.c.bf16 %v4817_v10, %v4813_v41  ;;  %v4819_v60 = vpop.f32.mrb[119].mxu0  ;;  %v4949_v9 = vpack.c.bf16 %v16111_v11, %v16104_v40  ;;  %v16115_v46 = vpop.f32.mrb[119].mxu1  ;;  %v13529_v41 = vld [vmem:[%s17730_s30 + $0x1e4] ss:$8 sps:$4 sm:$0xff]   ;;  %v16384_v40 = vld [vmem:[%s17732_s29 + $0x68] ss:$12 sps:$4 sm:$0xff]  }
 0x9b0   :  { %v4837_v51 = vpack.c.bf16 %v4819_v60, %v4815_v7  ;;  %5353 = vmatpush1.bf16.msra.mxu0 %v13494_v2  ;;  %v4950_v12 = vpack.c.bf16 %v16115_v46, %v16109_v50  ;;  %v13527_v2 = vld [vmem:[%s17730_s30 + $0x1e0] ss:$8 sps:$4 sm:$0xff]   ;;  %v13532_v7 = vld [vmem:[%s17730_s30 + $0x1f4] ss:$8 sps:$4 sm:$0xff]   ;;  %v13535_v10 = vld [vmem:[%s17730_s30 + $0x204] ss:$8 sps:$4 sm:$0xff]  }
 0x9b1   :  { %5354 = vmatprep.subr.bf16.mxu0 %v13499_v14  ;;  %v13530_v14 = vld [vmem:[%s17730_s30 + $0x1f0] ss:$8 sps:$4 sm:$0xff]   ;;  %v13538_v60 = vld [vmem:[%s17730_s30 + $0x214] ss:$8 sps:$4 sm:$0xff]   ;;  %v16389_v50 = vld [vmem:[%s17732_s29 + $0x140] ss:$12 sps:$4 sm:$0xff]  }
 0x9b2   :  { %5165 = vmatprep.mubr.bf16.mxu0 %v4837_v51  ;;  %v13536_v51 = vld [vmem:[%s17730_s30 + $0x210] ss:$8 sps:$4 sm:$0xff]   ;;  %v16396_v11 = vld [vmem:[%s17732_s29 + $0x80] ss:$12 sps:$4 sm:$0xff]  }
 0x9b3   :  { %5166 = vmatmul.mubr.bf16.gmra.mrb[132].mxu0 %v4836_v13  ;;  %v13533_v13 = vld [vmem:[%s17730_s30 + $0x200] ss:$8 sps:$4 sm:$0xff]   ;;  %v16408_v46 = vld [vmem:[%s17732_s29 + $0x98] ss:$12 sps:$4 sm:$0xff]  }
 0x9b4   :  { %5355 = vmatpush1.bf16.msra.mxu0 %v13497_v57  ;;  %v4823_v63 = vpop.f32.mrb[120].mxu0  ;;  %v16128_v21 = vpop.f32.mrb[120].mxu1  ;;  %v13541_v57 = vld [vmem:[%s17730_s30 + $0x224] ss:$8 sps:$4 sm:$0xff]  }
 0x9b5   :  { %v4825_v48 = vpop.f32.mrb[121].mxu0  ;;  %5356 = vmatprep.subr.bf16.mxu0 %v13502_v55  ;;  %v16133_v35 = vpop.f32.mrb[121].mxu1  ;;  %v13539_v55 = vld [vmem:[%s17730_s30 + $0x220] ss:$8 sps:$4 sm:$0xff]  }
 0x9b6   :  { %v4827_v30 = vpop.f32.mrb[122].mxu0  ;;  %v16135_v0 = vpop.f32.mrb[122].mxu1 }
 0x9b7   :  { %v4838_v31 = vpack.c.bf16 %v4827_v30, %v4823_v63  ;;  %v4829_v5 = vpop.f32.mrb[123].mxu0  ;;  %v4951_v8 = vpack.c.bf16 %v16135_v0, %v16128_v21  ;;  %v16139_v37 = vpop.f32.mrb[123].mxu1  ;;  %v13547_v63 = vld [vmem:[%s17730_s30 + $0x244] ss:$8 sps:$4 sm:$0xff]   ;;  %v16420_v21 = vld [vmem:[%s17732_s29 + $0xb0] ss:$12 sps:$4 sm:$0xff]  }
 0x9b8   :  { %v4839_v61 = vpack.c.bf16 %v4829_v5, %v4825_v48  ;;  %5357 = vmatpush1.bf16.msra.mxu0 %v13500_v59  ;;  %v4952_v43 = vpack.c.bf16 %v16139_v37, %v16133_v35  ;;  %v13545_v59 = vld [vmem:[%s17730_s30 + $0x240] ss:$8 sps:$4 sm:$0xff]   ;;  %v13553_v48 = vld [vmem:[%s17730_s30 + $0x264] ss:$8 sps:$4 sm:$0xff]   ;;  %v13568_v5 = vld [vmem:[%s17730_s30 + $0x2b4] ss:$8 sps:$4 sm:$0xff]  }
 0x9b9   :  { %5358 = vmatprep.subr.bf16.mxu0 %v13505_v22  ;;  %v13551_v22 = vld [vmem:[%s17730_s30 + $0x260] ss:$8 sps:$4 sm:$0xff]   ;;  %v13559_v30 = vld [vmem:[%s17730_s30 + $0x284] ss:$8 sps:$4 sm:$0xff]  }
 0x9ba   :  { %5175 = vmatprep.mubr.bf16.mxu0 %v4839_v61  ;;  %v13566_v61 = vld [vmem:[%s17730_s30 + $0x2b0] ss:$8 sps:$4 sm:$0xff]  }
 0x9bb   :  { %5176 = vmatmul.mubr.bf16.gmra.mrb[136].mxu0 %v4838_v31  ;;  %v13557_v31 = vld [vmem:[%s17730_s30 + $0x280] ss:$8 sps:$4 sm:$0xff]  }
 0x9bc   :  { %5359 = vmatpush1.bf16.msra.mxu0 %v13503_v62  ;;  %5378 = vmatprep.mubr.bf16.mxu0 %v15892_v34  ;;  %v13512_v34 = vld [vmem:[%s17730_s30 + $0x190] ss:$8 sps:$4 sm:$0xff]   ;;  %v13571_v62 = vld [vmem:[%s17730_s30 + $0x2c4] ss:$8 sps:$4 sm:$0xff]  }
 0x9bd   :  { %5360 = vmatprep.subr.bf16.mxu0 %v13508_v3  ;;  %v13569_v3 = vld [vmem:[%s17730_s30 + $0x2c0] ss:$8 sps:$4 sm:$0xff]  }
 0x9c0   :  { %5361 = vmatpush1.bf16.msra.mxu0 %v13506_v53  ;;  %v13574_v53 = vld [vmem:[%s17730_s30 + $0x2d4] ss:$8 sps:$4 sm:$0xff]  }
 0x9c1   :  { %5362 = vmatprep.subr.bf16.mxu0 %v13511_v18  ;;  %v13572_v18 = vld [vmem:[%s17730_s30 + $0x2d0] ss:$8 sps:$4 sm:$0xff]  }
 0x9c4   :  { %5363 = vmatpush1.bf16.msra.mxu0 %v13509_v36  ;;  %v13577_v36 = vld [vmem:[%s17730_s30 + $0x2e4] ss:$8 sps:$4 sm:$0xff]  }
 0x9c5   :  { %5364 = vmatprep.subr.bf16.mxu0 %v13514_v29  ;;  %v13575_v29 = vld [vmem:[%s17730_s30 + $0x2e0] ss:$8 sps:$4 sm:$0xff]  }
 0x9c8   :  { %5365 = vmatpush1.bf16.msra.mxu0 %v13512_v34  ;;  %v13580_v34 = vld [vmem:[%s17730_s30 + $0x2f4] ss:$8 sps:$4 sm:$0xff]  }
 0x9c9   :  { %5366 = vmatprep.subr.bf16.mxu0 %v13517_v54  ;;  %v13578_v54 = vld [vmem:[%s17730_s30 + $0x2f0] ss:$8 sps:$4 sm:$0xff]  }
 0x9cc   :  { %5367 = vmatpush1.bf16.msra.mxu0 %v13515_v6 }
 0x9cd   :  { %5368 = vmatprep.subr.bf16.mxu0 %v13520_v45 }
 0x9d0   :  { %5369 = vmatpush1.bf16.msra.mxu0 %v13518_v16 }
 0x9d1   :  { %5370 = vmatprep.subr.bf16.mxu0 %v13523_v28 }
 0x9d4   :  { %5371 = vmatpush1.bf16.msra.mxu0 %v13521_v24 }
 0x9d5   :  { %5372 = vmatprep.subr.bf16.mxu0 %v13526_v44 }
 0x9d8   :  { %5373 = vmatpush1.bf16.msra.mxu0 %v13524_v26 }
 0x9d9   :  { %5374 = vmatprep.subr.bf16.mxu0 %v13529_v41 }
 0x9dc   :  { %5375 = vmatpush1.bf16.msra.mxu0 %v13527_v2 }
 0x9dd   :  { %5376 = vmatprep.subr.bf16.mxu0 %v13532_v7 }
 0x9e0   :  { %5377 = vmatpush1.bf16.msra.mxu0 %v13530_v14 }
 0x9e1   :  { %5579 = vmatprep.subr.bf16.mxu0 %v13535_v10 }
 0x9e3   :  { %5379 = vmatmul.mubr.bf16.vlgmr.msra.gmra.mrb[124].mxu0 %v15890_v33  ;;  %v13544_v33 = vld [vmem:[%s17730_s30 + $0x234] ss:$8 sps:$4 sm:$0xff]  }
 0x9e4   :  { %5388 = vmatprep.mubr.bf16.mxu0 %v15900_v15  ;;  %5580 = vmatpush1.bf16.msra.mxu0 %v13533_v13  ;;  %v13542_v15 = vld [vmem:[%s17730_s30 + $0x230] ss:$8 sps:$4 sm:$0xff]  }
 0x9e5   :  { %5581 = vmatprep.subr.bf16.mxu0 %v13538_v60 }
 0x9e8   :  { %5582 = vmatpush1.bf16.msra.mxu0 %v13536_v51 }
 0x9e9   :  { %5583 = vmatprep.subr.bf16.mxu0 %v13541_v57 }
 0x9eb   :  { %5389 = vmatmul.mubr.bf16.gmra.mrb[128].mxu0 %v15898_v4  ;;  %v13550_v4 = vld [vmem:[%s17730_s30 + $0x254] ss:$8 sps:$4 sm:$0xff]  }
 0x9ec   :  { %5398 = vmatprep.mubr.bf16.mxu0 %v15908_v32  ;;  %5584 = vmatpush1.bf16.msra.mxu0 %v13539_v55  ;;  %v13548_v32 = vld [vmem:[%s17730_s30 + $0x250] ss:$8 sps:$4 sm:$0xff]  }
 0x9ed   :  { %5585 = vmatprep.subr.bf16.mxu0 %v13544_v33 }
 0x9f0   :  { %5586 = vmatpush1.bf16.msra.mxu0 %v13542_v15 }
 0x9f1   :  { %5587 = vmatprep.subr.bf16.mxu0 %v13547_v63 }
 0x9f3   :  { %5399 = vmatmul.mubr.bf16.gmra.mrb[132].mxu0 %v15906_v25  ;;  %v13556_v25 = vld [vmem:[%s17730_s30 + $0x274] ss:$8 sps:$4 sm:$0xff]  }
 0x9f4   :  { %5408 = vmatprep.mubr.bf16.mxu0 %v15916_v19  ;;  %5588 = vmatpush1.bf16.msra.mxu0 %v13545_v59  ;;  %v13554_v19 = vld [vmem:[%s17730_s30 + $0x270] ss:$8 sps:$4 sm:$0xff]  }
 0x9f5   :  { %5589 = vmatprep.subr.bf16.mxu0 %v13550_v4 }
 0x9f8   :  { %5590 = vmatpush1.bf16.msra.mxu0 %v13548_v32 }
 0x9f9   :  { %5591 = vmatprep.subr.bf16.mxu0 %v13553_v48 }
 0x9fb   :  { %5409 = vmatmul.mubr.bf16.gmra.mrb[136].mxu0 %v15914_v38  ;;  %v13562_v38 = vld [vmem:[%s17730_s30 + $0x294] ss:$8 sps:$4 sm:$0xff]  }
 0x9fc   :  { %5592 = vmatpush1.bf16.msra.mxu0 %v13551_v22  ;;  %5611 = vmatprep.mubr.bf16.mxu0 %v4946_v42  ;;  %v13563_v42 = vld [vmem:[%s17730_s30 + $0x2a0] ss:$8 sps:$4 sm:$0xff]  }
 0x9fd   :  { %5593 = vmatprep.subr.bf16.mxu0 %v13556_v25 }
 0xa00   :  { %5594 = vmatpush1.bf16.msra.mxu0 %v13554_v19 }
 0xa01   :  { %5595 = vmatprep.subr.bf16.mxu0 %v13559_v30 }
 0xa04   :  { %5596 = vmatpush1.bf16.msra.mxu0 %v13557_v31 }
 0xa05   :  { %5597 = vmatprep.subr.bf16.mxu0 %v13562_v38 }
 0xa08   :  { %5598 = vmatpush1.bf16.msra.mxu0 %v13560_v17 }
 0xa09   :  { %5599 = vmatprep.subr.bf16.mxu0 %v13565_v47 }
 0xa0c   :  { %5600 = vmatpush1.bf16.msra.mxu0 %v13563_v42 }
 0xa0d   :  { %5601 = vmatprep.subr.bf16.mxu0 %v13568_v5 }
 0xa10   :  { %5602 = vmatpush1.bf16.msra.mxu0 %v13566_v61 }
 0xa11   :  { %5603 = vmatprep.subr.bf16.mxu0 %v13571_v62 }
 0xa14   :  { %5604 = vmatpush1.bf16.msra.mxu0 %v13569_v3 }
 0xa15   :  { %5605 = vmatprep.subr.bf16.mxu0 %v13574_v53  ;;  %v17733_v53 = vmov 0.0  }
 0xa18   :  { %5606 = vmatpush1.bf16.msra.mxu0 %v13572_v18  ;;  %v4562_v18 = vld [vmem:[%s17730_s30 + $0x300] sm:$0xff] }
 0xa19   :  { %5607 = vmatprep.subr.bf16.mxu0 %v13577_v36  ;;  %v16470_v36 = vunpack.c.l.bf16 %v4562_v18 }
 0xa1c   :  { %5608 = vmatpush1.bf16.msra.mxu0 %v13575_v29  ;;  %v16472_v29 = vunpack.c.h.bf16 %v4562_v18 }
 0xa1d   :  { %5609 = vmatprep.subr.bf16.mxu0 %v13580_v34 }
 0xa20   :  { %5610 = vmatpush1.bf16.msra.mxu0 %v13578_v54 }
 0xa23   :  { %5612 = vmatmul.mubr.bf16.vlgmr.msra.gmra.mrb[124].mxu0 %v4945_v58  ;;  %v16341_v58 = vld [vmem:[%s17732_s29 + $0xe0] ss:$12 sps:$4 sm:$0xff]  }
 0xa24   :  { %5621 = vmatprep.mubr.bf16.mxu0 %v4948_v49  ;;  %12548 = vmatprep.subr.bf16.mxu1 %v16341_v58  ;;  %v16379_v49 = vld [vmem:[%s17732_s29 + $0x128] ss:$12 sps:$4 sm:$0xff]  }
 0xa25   :  { %12550 = vmatpush3.bf16.msra.mxu1 %v16349_v27 }
 0xa26   :  { %12552 = vmatprep.subr.bf16.mxu1 %v16355_v23 }
 0xa29   :  { %12554 = vmatpush3.bf16.msra.mxu1 %v16360_v20 }
 0xa2b   :  { %5622 = vmatmul.mubr.bf16.gmra.mrb[128].mxu0 %v4947_v1  ;;  %v16365_v1 = vld [vmem:[%s17732_s29 + $0x110] ss:$12 sps:$4 sm:$0xff]  }
 0xa2c   :  { %5631 = vmatprep.mubr.bf16.mxu0 %v4950_v12  ;;  %12556 = vmatprep.subr.bf16.mxu1 %v16365_v1  ;;  %v16414_v12 = vld [vmem:[%s17732_s29 + $0x170] ss:$12 sps:$4 sm:$0xff]  }
 0xa2d   :  { %12558 = vmatpush3.bf16.msra.mxu1 %v16373_v56 }
 0xa2e   :  { %12560 = vmatprep.subr.bf16.mxu1 %v16379_v49 }
 0xa31   :  { %12562 = vmatpush3.bf16.msra.mxu1 %v16384_v40 }
 0xa32   :  { %12564 = vmatprep.subr.bf16.mxu1 %v16389_v50 }
 0xa33   :  { %5632 = vmatmul.mubr.bf16.gmra.mrb[132].mxu0 %v4949_v9  ;;  %v16402_v9 = vld [vmem:[%s17732_s29 + $0x158] ss:$12 sps:$4 sm:$0xff]  }
 0xa34   :  { %5641 = vmatprep.mubr.bf16.mxu0 %v4952_v43 }
 0xa35   :  { %12566 = vmatpush3.bf16.msra.mxu1 %v16396_v11 }
 0xa36   :  { %12568 = vmatprep.subr.bf16.mxu1 %v16402_v9 }
 0xa39   :  { %12570 = vmatpush3.bf16.msra.mxu1 %v16408_v46 }
 0xa3a   :  { %12572 = vmatprep.subr.bf16.mxu1 %v16414_v12 }
 0xa3b   :  { %5642 = vmatmul.mubr.bf16.gmra.mrb[136].mxu0 %v4951_v8 }
 0xa3d   :  { %12574 = vmatpush3.bf16.msra.mxu1 %v16420_v21 }
 0xa3e   :  { %5768 = vmatprep.subr.mxu1 %v16472_v29 }
 0xaf6   :  { %v16424_v35 = vpop.f32.mrb[124].mxu0 }
 0xaf7   :  { %v16426_v0 = vpop.f32.mrb[125].mxu0 }
 0xaf8   :  { %v16428_v8 = vpop.f32.mrb[126].mxu0 }
 0xaf9   :  { %v5668_v37 = vadd.f32 %v16428_v8, %v16424_v35  ;;  %v16432_v43 = vpop.f32.mrb[127].mxu0 }
 0xafa   :  { %v5681_v6 = vadd.f32 %v16432_v43, %v16426_v0 }
 0xafe   :  { %v16436_v45 = vpop.f32.mrb[128].mxu0 }
 0xaff   :  { %v5669_v16 = vadd.f32 %v5668_v37, %v16436_v45  ;;  %v16439_v28 = vpop.f32.mrb[129].mxu0 }
 0xb00   :  { %v5682_v24 = vadd.f32 %v5681_v6, %v16439_v28  ;;  %v16442_v44 = vpop.f32.mrb[130].mxu0 }
 0xb01   :  { %v5670_v26 = vadd.f32 %v5669_v16, %v16442_v44  ;;  %v16445_v41 = vpop.f32.mrb[131].mxu0 }
 0xb02   :  { %v5683_v2 = vadd.f32 %v5682_v24, %v16445_v41 }
 0xb06   :  { %v16448_v7 = vpop.f32.mrb[132].mxu0 }
 0xb07   :  { %v5671_v14 = vadd.f32 %v5670_v26, %v16448_v7  ;;  %v16451_v10 = vpop.f32.mrb[133].mxu0 }
 0xb08   :  { %v5684_v13 = vadd.f32 %v5683_v2, %v16451_v10  ;;  %v16454_v60 = vpop.f32.mrb[134].mxu0 }
 0xb09   :  { %v5672_v51 = vadd.f32 %v5671_v14, %v16454_v60  ;;  %v16457_v57 = vpop.f32.mrb[135].mxu0 }
 0xb0a   :  { %v5685_v55 = vadd.f32 %v5684_v13, %v16457_v57 }
 0xb0e   :  { %v16460_v33 = vpop.f32.mrb[136].mxu0 }
 0xb0f   :  { %v5673_v15 = vadd.f32 %v5672_v51, %v16460_v33  ;;  %v5645_v63 = vpop.f32.mrb[137].mxu0 }
 0xb10   :  { %v5686_v59 = vadd.f32 %v5685_v55, %v5645_v63  ;;  %v16463_v4 = vpop.f32.mrb[138].mxu0 }
 0xb11   :  { %v5674_v32 = vadd.f32 %v5673_v15, %v16463_v4  ;;  %v5649_v48 = vpop.f32.mrb[139].mxu0 }
 0xb12   :  { %v5687_v22 = vadd.f32 %v5686_v59, %v5649_v48 }
 0xb13   :  { %v5675_v25 = vrot.slane %v5674_v32, 4 }
 0xb14   :  { %v5688_v19 = vrot.slane %v5687_v22, 4 }
 0xb15   :  { %v5676_v30 = vadd.f32 %v5675_v25, %v5674_v32 }
 0xb16   :  { %v5689_v31 = vadd.f32 %v5688_v19, %v5687_v22 }
 0xb17   :  { %v5677_v38 = vrot.slane %v5676_v30, 2 }
 0xb18   :  { %v5690_v17 = vrot.slane %v5689_v31, 2 }
 0xb19   :  { %v5678_v47 = vadd.f32 %v5677_v38, %v5676_v30 }
 0xb1a   :  { %v5691_v42 = vadd.f32 %v5690_v17, %v5689_v31 }
 0xb1b   :  { %v5679_v5 = vrot.slane %v5678_v47, 1 }
 0xb1c   :  { %v5692_v61 = vrot.slane %v5691_v42, 1 }
 0xb1d   :  { %v5680_v3 = vadd.f32 %v5679_v5, %v5678_v47 }
 0xb1e   :  { %v5693_v62 = vadd.f32 %v5692_v61, %v5691_v42 }
 0xb20   :  { %5758 = vmatprep.mubr.f32.mxu1 %v5693_v62 }
 0xb21   :  { %5759 = vmatmul.mubr.f32.vlgmr.msra.gmra.mrb[58].mxu1 %v5680_v3 }
 0xb22   :  { %5832 = vmatprep.mubr.f32.mxu1 %v17733_v53  ;;  %5769 = vmatpush1.msra.mxu1 %v16470_v36 }
 0xb23   :  { %12576 = vmatprep.subr.bf16.mxu1 %v16331_v52 }
 0xbf4   :  { %v11429_v34 = vpop.f32.mrb[58].mxu1 }
 0xbf5   :  { %v11430_v54 = vpop.f32.mrb[59].mxu1 }
 0xbf6   :  { %v11431_v37 = vadd.f32 %v11430_v54, %v11429_v34 }
 0xbf8   :  { %v5764_v6 = vmul.f32 0.00048828125, %v11431_v37 }
 0xbfa   :  { %11060 = vmatmul.mubr.msk.f32.vlgmr.msra.gmra.mrb[124].mxu1 %vm2052_vm1, %v5764_v6 }
 0xbfb   :  { %12578 = vmatpush3.bf16.msra.mxu1 %v16336_v39  ;;  %v17734_v39 = vld [vmem:[#allocation65_spill] sm:$0xff] }
 0xbfc   :  { %12580 = vmatprep.subr.bf16.mxu1 %v16341_v58 }
 0xbff   :  { %12582 = vmatpush3.bf16.msra.mxu1 %v16349_v27 }
 0xc00   :  { %12584 = vmatprep.subr.bf16.mxu1 %v16355_v23 }
 0xc03   :  { %12586 = vmatpush3.bf16.msra.mxu1 %v16360_v20 }
 0xc04   :  { %12588 = vmatprep.subr.bf16.mxu1 %v16365_v1 }
 0xc07   :  { %12590 = vmatpush3.bf16.msra.mxu1 %v16373_v56 }
 0xc08   :  { %12592 = vmatprep.subr.bf16.mxu1 %v16379_v49 }
 0xc0b   :  { %12594 = vmatpush3.bf16.msra.mxu1 %v16384_v40 }
 0xc0c   :  { %12596 = vmatprep.subr.bf16.mxu1 %v16389_v50 }
 0xc0f   :  { %12598 = vmatpush3.bf16.msra.mxu1 %v16396_v11 }
 0xc10   :  { %12600 = vmatprep.subr.bf16.mxu1 %v16402_v9 }
 0xc13   :  { %12602 = vmatpush3.bf16.msra.mxu1 %v16408_v46 }
 0xc14   :  { %12604 = vmatprep.subr.bf16.mxu1 %v16414_v12 }
 0xc17   :  { %12606 = vmatpush3.bf16.msra.mxu1 %v16420_v21 }
 0xc18   :  { %5982 = vmatprep.subr.mxu1 %v16472_v29 }
 0xccd   :  { %v5834_v52 = vpop.f32.mrb[124].mxu1 }
 0xcce   :  { %v5842_v58 = vrot.slane %v5834_v52, %v17734_v39  ;;  %v5836_v27 = vpop.f32.mrb[125].mxu1 }
 0xccf   :  { %v5846_v23 = vrot.slane %v5836_v27, %v17734_v39 }
 0xcd0   :  { %v16497_v20 = vsub.f32 %v16424_v35, %v5842_v58  ;;  %v16500_v1 = vsub.f32 %v16428_v8, %v5842_v58  ;;  %v16503_v56 = vsub.f32 %v16436_v45, %v5842_v58  ;;  %v16506_v49 = vsub.f32 %v16442_v44, %v5842_v58 }
 0xcd1   :  { %v16509_v40 = vsub.f32 %v16426_v0, %v5846_v23  ;;  %v16512_v50 = vsub.f32 %v16432_v43, %v5846_v23  ;;  %v16515_v11 = vsub.f32 %v16439_v28, %v5846_v23  ;;  %v16518_v9 = vsub.f32 %v16445_v41, %v5846_v23 }
 0xcd2   :  { %v16521_v46 = vsub.f32 %v16451_v10, %v5846_v23  ;;  %v16524_v12 = vsub.f32 %v16457_v57, %v5846_v23  ;;  %v16526_v21 = vsub.f32 %v5645_v63, %v5846_v23  ;;  %v16528_v35 = vsub.f32 %v5649_v48, %v5846_v23 }
 0xcd3   :  { %v5864_v0 = vmul.f32 %v16509_v40, %v16509_v40  ;;  %v5866_v8 = vmul.f32 %v16512_v50, %v16512_v50  ;;  %v5868_v43 = vmul.f32 %v16515_v11, %v16515_v11  ;;  %v16537_v16 = vsub.f32 %v16448_v7, %v5842_v58 }
 0xcd4   :  { %v16540_v28 = vsub.f32 %v16454_v60, %v5842_v58  ;;  %v16543_v24 = vsub.f32 %v16460_v33, %v5842_v58  ;;  %v16546_v44 = vsub.f32 %v16463_v4, %v5842_v58  ;;  %v5863_v26 = vmul.f32 %v16497_v20, %v16497_v20 }
 0xcd5   :  { %v5892_v45 = vadd.f32 %v5866_v8, %v5864_v0  ;;  %v5865_v41 = vmul.f32 %v16500_v1, %v16500_v1  ;;  %v5870_v2 = vmul.f32 %v16518_v9, %v16518_v9  ;;  %v5867_v14 = vmul.f32 %v16503_v56, %v16503_v56 }
 0xcd6   :  { %v5872_v13 = vmul.f32 %v16521_v46, %v16521_v46  ;;  %v5869_v51 = vmul.f32 %v16506_v49, %v16506_v49  ;;  %v5874_v55 = vmul.f32 %v16524_v12, %v16524_v12  ;;  %v5871_v15 = vmul.f32 %v16537_v16, %v16537_v16 }
 0xcd7   :  { %v5893_v7 = vadd.f32 %v5892_v45, %v5868_v43  ;;  %v5879_v10 = vadd.f32 %v5865_v41, %v5863_v26  ;;  %v5876_v59 = vmul.f32 %v16526_v21, %v16526_v21  ;;  %v5873_v32 = vmul.f32 %v16540_v28, %v16540_v28  ;;  %v4717_v45 = vld [vmem:[%s17735_s0] sm:$0x1] }
 0xcd8   :  { %v5878_v22 = vmul.f32 %v16528_v35, %v16528_v35  ;;  %v5875_v19 = vmul.f32 %v16543_v24, %v16543_v24  ;;  %v5877_v38 = vmul.f32 %v16546_v44, %v16546_v44 }
 0xcd9   :  { %v5894_v60 = vadd.f32 %v5893_v7, %v5870_v2  ;;  %v5880_v57 = vadd.f32 %v5879_v10, %v5867_v14  ;;  %v13597_v2 = vld [vmem:[%s17732_s29 + $0xc0] ss:$12 sps:$4 sm:$0xff]   ;;  %v13599_v14 = vld [vmem:[%s17732_s29 + $0xd8] ss:$12 sps:$4 sm:$0xff]   ;;  %v13601_v10 = vld [vmem:[%s17732_s29 + $0xf0] ss:$12 sps:$4 sm:$0xff]  }
 0xcda   :  { %v13598_v7 = vld [vmem:[%s17732_s29] ss:$12 sps:$4 sm:$0xff]  }
 0xcdb   :  { %v5895_v33 = vadd.f32 %v5894_v60, %v5872_v13  ;;  %v5881_v63 = vadd.f32 %v5880_v57, %v5869_v51  ;;  %v13602_v13 = vld [vmem:[%s17732_s29 + $0x30] ss:$12 sps:$4 sm:$0xff]   ;;  %v13603_v60 = vld [vmem:[%s17732_s29 + $0x108] ss:$12 sps:$4 sm:$0xff]   ;;  %v13605_v57 = vld [vmem:[%s17732_s29 + $0x120] ss:$12 sps:$4 sm:$0xff]  }
 0xcdc   :  { %v13604_v51 = vld [vmem:[%s17732_s29 + $0x48] ss:$12 sps:$4 sm:$0xff]  }
 0xcdd   :  { %v5896_v4 = vadd.f32 %v5895_v33, %v5874_v55  ;;  %v5882_v48 = vadd.f32 %v5881_v63, %v5871_v15  ;;  %v13606_v55 = vld [vmem:[%s17732_s29 + $0x60] ss:$12 sps:$4 sm:$0xff]   ;;  %v13607_v33 = vld [vmem:[%s17732_s29 + $0x138] ss:$12 sps:$4 sm:$0xff]   ;;  %v13609_v63 = vld [vmem:[%s17732_s29 + $0x150] ss:$12 sps:$4 sm:$0xff]  }
 0xcde   :  { %v13608_v15 = vld [vmem:[%s17732_s29 + $0x78] ss:$12 sps:$4 sm:$0xff]  }
 0xcdf   :  { %v5897_v25 = vadd.f32 %v5896_v4, %v5876_v59  ;;  %v5883_v30 = vadd.f32 %v5882_v48, %v5873_v32  ;;  %v13610_v59 = vld [vmem:[%s17732_s29 + $0x90] ss:$12 sps:$4 sm:$0xff]   ;;  %v13611_v4 = vld [vmem:[%s17732_s29 + $0x168] ss:$12 sps:$4 sm:$0xff]  }
 0xce0   :  { %v13612_v32 = vld [vmem:[%s17732_s29 + $0xa8] ss:$12 sps:$4 sm:$0xff]   ;;  %v13613_v48 = vld [vmem:[%s17732_s29 + $0xc4] ss:$12 sps:$4 sm:$0xff]  }
 0xce1   :  { %v5898_v31 = vadd.f32 %v5897_v25, %v5878_v22  ;;  %v5884_v17 = vadd.f32 %v5883_v30, %v5875_v19 }
 0xce3   :  { %v5899_v47 = vrot.slane %v5898_v31, 4  ;;  %v5885_v42 = vadd.f32 %v5884_v17, %v5877_v38 }
 0xce5   :  { %v5900_v5 = vadd.f32 %v5899_v47, %v5898_v31  ;;  %v5886_v61 = vrot.slane %v5885_v42, 4 }
 0xce7   :  { %v5901_v62 = vrot.slane %v5900_v5, 2  ;;  %v5887_v3 = vadd.f32 %v5886_v61, %v5885_v42 }
 0xce9   :  { %v5902_v18 = vadd.f32 %v5901_v62, %v5900_v5  ;;  %v5888_v34 = vrot.slane %v5887_v3, 2 }
 0xceb   :  { %v5903_v54 = vrot.slane %v5902_v18, 1  ;;  %v5889_v37 = vadd.f32 %v5888_v34, %v5887_v3 }
 0xced   :  { %v5904_v6 = vadd.f32 %v5903_v54, %v5902_v18  ;;  %v5890_v52 = vrot.slane %v5889_v37, 1 }
 0xcef   :  { %5969 = vmatprep.mubr.f32.mxu1 %v5904_v6  ;;  %v5891_v58 = vadd.f32 %v5890_v52, %v5889_v37 }
 0xcf1   :  { %5970 = vmatmul.mubr.f32.vlgmr.msra.gmra.mrb[126].mxu1 %v5891_v58 }
 0xcf2   :  { %5983 = vmatpush1.msra.mxu1 %v16470_v36  ;;  %6046 = vmatprep.mubr.f32.mxu1 %v17733_v53 }
 0xcf3   :  { %6080 = vmatprep.subr.mxu1 %v16472_v29  ;;  %v4718_v29 = vld [vmem:[%s17735_s0 + $0x1] sm:$0x1]  ;;  %s17736_s0 = sld [smem:[#allocation75_spill]] }
 0xdc4   :  { %v11464_v27 = vpop.f32.mrb[126].mxu1 }
 0xdc5   :  { %v11465_v23 = vpop.f32.mrb[127].mxu1 }
 0xdc6   :  { %v11466_v0 = vadd.f32 %v11465_v23, %v11464_v27 }
 0xdc8   :  { %v5975_v8 = vmul.f32 0.00048828125, %v11466_v0 }
 0xdca   :  { %v5976_v43 = vadd.f32 1e-05, %v5975_v8 }
 0xdcc   :  { %13721 = vrsqrt.f32 %v5976_v43 }
 0xdd6   :  { %v13722_v26 = vpop.eup %13721 }
 0xdd7   :  { %v5978_v41 = vmul.f32 %v13722_v26, %v4717_v45 }
 0xdd9   :  { %11061 = vmatmul.mubr.msk.f32.vlgmr.msra.gmra.mrb[128].mxu1 %vm2052_vm1, %v5978_v41 }
 0xdda   :  { %6081 = vmatpush1.msra.mxu1 %v16470_v36  ;;  %6144 = vmatprep.mubr.f32.mxu1 %v17733_v53  ;;  %v13600_v36 = vld [vmem:[%s17732_s29 + $0x18] ss:$12 sps:$4 sm:$0xff]  }
 0xddb   :  { %11467 = vmatprep.subr.bf16.mxu1 %v13597_v2 }
 0xddd   :  { %11062 = vmatmul.mubr.msk.f32.vlgmr.msra.gmra.mrb[130].mxu1 %vm2052_vm1, %v4718_v29 }
 0xdde   :  { %11468 = vmatpush3.bf16.msra.mxu1 %v13598_v7  ;;  %v13614_v7 = vld [vmem:[%s17732_s29 + $0x4] ss:$12 sps:$4 sm:$0xff]  }
 0xddf   :  { %11469 = vmatprep.subr.bf16.mxu1 %v13599_v14 }
 0xde2   :  { %11470 = vmatpush3.bf16.msra.mxu1 %v13600_v36 }
 0xde3   :  { %11471 = vmatprep.subr.bf16.mxu1 %v13601_v10  ;;  %v13615_v10 = vld [vmem:[%s17732_s29 + $0xdc] ss:$12 sps:$4 sm:$0xff]  }
 0xde6   :  { %11472 = vmatpush3.bf16.msra.mxu1 %v13602_v13 }
 0xde7   :  { %11473 = vmatprep.subr.bf16.mxu1 %v13603_v60 }
 0xdea   :  { %11474 = vmatpush3.bf16.msra.mxu1 %v13604_v51 }
 0xdeb   :  { %11475 = vmatprep.subr.bf16.mxu1 %v13605_v57 }
 0xdee   :  { %11476 = vmatpush3.bf16.msra.mxu1 %v13606_v55 }
 0xdef   :  { %11477 = vmatprep.subr.bf16.mxu1 %v13607_v33 }
 0xdf2   :  { %11478 = vmatpush3.bf16.msra.mxu1 %v13608_v15 }
 0xdf3   :  { %11479 = vmatprep.subr.bf16.mxu1 %v13609_v63 }
 0xdf6   :  { %11480 = vmatpush3.bf16.msra.mxu1 %v13610_v59 }
 0xdf7   :  { %11481 = vmatprep.subr.bf16.mxu1 %v13611_v4 }
 0xdfa   :  { %11482 = vmatpush3.bf16.msra.mxu1 %v13612_v32 }
 0xdfb   :  { %11507 = vmatprep.subr.bf16.mxu1 %v13613_v48  ;;  %v13616_v48 = vld [vmem:[%s17732_s29 + $0x1c] ss:$12 sps:$4 sm:$0xff]  }
 0xeac   :  { %v6048_v22 = vpop.f32.mrb[128].mxu1 }
 0xead   :  { %v6056_v25 = vrot.slane %v6048_v22, %v17734_v39  ;;  %v6050_v19 = vpop.f32.mrb[129].mxu1 }
 0xeae   :  { %v6060_v30 = vrot.slane %v6050_v19, %v17734_v39 }
 0xeaf   :  { %v6061_v31 = vmul.f32 %v6056_v25, %v16497_v20  ;;  %v6063_v38 = vmul.f32 %v6056_v25, %v16500_v1  ;;  %v6065_v17 = vmul.f32 %v6056_v25, %v16503_v56  ;;  %v6067_v47 = vmul.f32 %v6056_v25, %v16506_v49 }
 0xeb0   :  { %v6146_v42 = vpop.f32.mrb[130].mxu1  ;;  %v6062_v5 = vmul.f32 %v6060_v30, %v16509_v40  ;;  %v6064_v61 = vmul.f32 %v6060_v30, %v16512_v50  ;;  %v6066_v62 = vmul.f32 %v6060_v30, %v16515_v11  ;;  %v6068_v3 = vmul.f32 %v6060_v30, %v16518_v9 }
 0xeb1   :  { %v6154_v18 = vrot.slane %v6146_v42, %v17734_v39  ;;  %v6148_v34 = vpop.f32.mrb[131].mxu1  ;;  %v6070_v20 = vmul.f32 %v6060_v30, %v16521_v46  ;;  %v6072_v1 = vmul.f32 %v6060_v30, %v16524_v12  ;;  %v6069_v56 = vmul.f32 %v6056_v25, %v16537_v16  ;;  %v13620_v42 = vld [vmem:[%s17732_s29 + $0x4c] ss:$12 sps:$4 sm:$0xff]  }
 0xeb2   :  { %v6158_v49 = vrot.slane %v6148_v34, %v17734_v39  ;;  %v6071_v54 = vmul.f32 %v6056_v25, %v16540_v28  ;;  %v6074_v40 = vmul.f32 %v6060_v30, %v16526_v21  ;;  %v6076_v50 = vmul.f32 %v6060_v30, %v16528_v35  ;;  %v13626_v34 = vld [vmem:[%s17732_s29 + $0x94] ss:$12 sps:$4 sm:$0xff]  }
 0xeb3   :  { %v6159_v11 = vadd.f32 %v6154_v18, %v6061_v31  ;;  %v6161_v37 = vadd.f32 %v6154_v18, %v6063_v38  ;;  %v6163_v9 = vadd.f32 %v6154_v18, %v6065_v17  ;;  %v6165_v6 = vadd.f32 %v6154_v18, %v6067_v47  ;;  %v13618_v38 = vld [vmem:[%s17732_s29 + $0x34] ss:$12 sps:$4 sm:$0xff]   ;;  %v13619_v47 = vld [vmem:[%s17732_s29 + $0x10c] ss:$12 sps:$4 sm:$0xff]  }
 0xeb4   :  { %v6160_v52 = vadd.f32 %v6158_v49, %v6062_v5  ;;  %v6162_v58 = vadd.f32 %v6158_v49, %v6064_v61  ;;  %v6164_v27 = vadd.f32 %v6158_v49, %v6066_v62  ;;  %v6166_v46 = vadd.f32 %v6158_v49, %v6068_v3  ;;  %v13621_v5 = vld [vmem:[%s17732_s29 + $0x124] ss:$12 sps:$4 sm:$0xff]   ;;  %v13623_v62 = vld [vmem:[%s17732_s29 + $0x13c] ss:$12 sps:$4 sm:$0xff]  }
 0xeb5   :  { %v6175_v23 = vmax.f32 %v6159_v11, 0.0  ;;  %v6177_v12 = vmax.f32 %v6161_v37, 0.0  ;;  %v6179_v0 = vmax.f32 %v6163_v9, 0.0  ;;  %v6181_v16 = vmax.f32 %v6165_v6, 0.0  ;;  %v13622_v61 = vld [vmem:[%s17732_s29 + $0x64] ss:$12 sps:$4 sm:$0xff]  }
 0xeb6   :  { %v6176_v8 = vmax.f32 %v6160_v52, 0.0  ;;  %v6178_v43 = vmax.f32 %v6162_v58, 0.0  ;;  %v6180_v45 = vmax.f32 %v6164_v27, 0.0  ;;  %v6182_v28 = vmax.f32 %v6166_v46, 0.0  ;;  %v13624_v3 = vld [vmem:[%s17732_s29 + $0x7c] ss:$12 sps:$4 sm:$0xff]  }
 0xeb7   :  { %v16656_v26 = vpack.c.bf16 %v6177_v12, %v6175_v23  ;;  %v16658_v21 = vpack.c.bf16 %v6181_v16, %v6179_v0  ;;  %v6168_v35 = vadd.f32 %v6158_v49, %v6070_v20  ;;  %v6170_v41 = vadd.f32 %v6158_v49, %v6072_v1  ;;  %v13627_v20 = vld [vmem:[%s17732_s29 + $0x16c] ss:$12 sps:$4 sm:$0xff]  }
 0xeb8   :  { %v6192_v2 = vpack.c.bf16 %v6178_v43, %v6176_v8  ;;  %v6194_v29 = vpack.c.bf16 %v6182_v28, %v6180_v45  ;;  %v6167_v14 = vadd.f32 %v6154_v18, %v6069_v56  ;;  %v6169_v36 = vadd.f32 %v6154_v18, %v6071_v54  ;;  %v13628_v1 = vld [vmem:[%s17732_s29 + $0xac] ss:$12 sps:$4 sm:$0xff]   ;;  %v13629_v56 = vld [vmem:[%s17731_s26 + $0x40] sm:$0xff]  }
 0xeb9   :  { %v6184_v13 = vmax.f32 %v6168_v35, 0.0  ;;  %v6186_v60 = vmax.f32 %v6170_v41, 0.0  ;;  %v6172_v51 = vadd.f32 %v6158_v49, %v6074_v40  ;;  %v6174_v57 = vadd.f32 %v6158_v49, %v6076_v50 }
 0xeba   :  { %6327 = vmatprep.mubr.bf16.mxu1 %v6192_v2  ;;  %v6183_v55 = vmax.f32 %v6167_v14, 0.0  ;;  %v6185_v33 = vmax.f32 %v6169_v36, 0.0  ;;  %v6073_v15 = vmul.f32 %v6056_v25, %v16543_v24  ;;  %v6075_v63 = vmul.f32 %v6056_v25, %v16546_v44  ;;  %v13617_v24 = vld [vmem:[%s17732_s29 + $0xf4] ss:$12 sps:$4 sm:$0xff]  }
 0xebb   :  { %6328 = vmatmul.mubr.bf16.vlgmr.msra.gmra.mrb[132].mxu1 %v16656_v26  ;;  %v6196_v59 = vpack.c.bf16 %v6186_v60, %v6184_v13  ;;  %v6188_v4 = vmax.f32 %v6172_v51, 0.0  ;;  %v6190_v32 = vmax.f32 %v6174_v57, 0.0 }
 0xebc   :  { %6335 = vmatprep.mubr.bf16.mxu1 %v6194_v29  ;;  %11508 = vmatpush3.bf16.msra.mxu1 %v13614_v7  ;;  %v6195_v22 = vpack.c.bf16 %v6185_v33, %v6183_v55  ;;  %v6171_v19 = vadd.f32 %v6154_v18, %v6073_v15  ;;  %v6173_v30 = vadd.f32 %v6154_v18, %v6075_v63  ;;  %v13625_v18 = vld [vmem:[%s17732_s29 + $0x154] ss:$12 sps:$4 sm:$0xff]  }
 0xebd   :  { %11509 = vmatprep.subr.bf16.mxu1 %v13615_v10  ;;  %v6198_v44 = vpack.c.bf16 %v6190_v32, %v6188_v4 }
 0xebe   :  { %v6187_v25 = vmax.f32 %v6171_v19, 0.0  ;;  %v6189_v31 = vmax.f32 %v6173_v30, 0.0 }
 0xec0   :  { %11510 = vmatpush3.bf16.msra.mxu1 %v13616_v48  ;;  %v6197_v17 = vpack.c.bf16 %v6189_v31, %v6187_v25 }
 0xec1   :  { %11511 = vmatprep.subr.bf16.mxu1 %v13617_v24 }
 0xec3   :  { %6336 = vmatmul.mubr.bf16.gmra.mrb[136].mxu1 %v16658_v21 }
 0xec4   :  { %6343 = vmatprep.mubr.bf16.mxu1 %v6196_v59  ;;  %11512 = vmatpush3.bf16.msra.mxu1 %v13618_v38 }
 0xec5   :  { %11513 = vmatprep.subr.bf16.mxu1 %v13619_v47 }
 0xec8   :  { %11514 = vmatpush3.bf16.msra.mxu1 %v13620_v42 }
 0xec9   :  { %11515 = vmatprep.subr.bf16.mxu1 %v13621_v5 }
 0xecb   :  { %6344 = vmatmul.mubr.bf16.gmra.mrb[140].mxu1 %v6195_v22 }
 0xecc   :  { %6351 = vmatprep.mubr.bf16.mxu1 %v6198_v44  ;;  %11516 = vmatpush3.bf16.msra.mxu1 %v13622_v61 }
 0xecd   :  { %11517 = vmatprep.subr.bf16.mxu1 %v13623_v62 }
 0xed0   :  { %11518 = vmatpush3.bf16.msra.mxu1 %v13624_v3 }
 0xed1   :  { %11519 = vmatprep.subr.bf16.mxu1 %v13625_v18 }
 0xed3   :  { %6352 = vmatmul.mubr.bf16.gmra.mrb[144].mxu1 %v6197_v17 }
 0xed4   :  { %11520 = vmatpush3.bf16.msra.mxu1 %v13626_v34  ;;  %6488 = vmatprep.mubr.bf16.mxu1 %v6192_v2 }
 0xed5   :  { %11521 = vmatprep.subr.bf16.mxu1 %v13627_v20 }
 0xed8   :  { %11522 = vmatpush3.bf16.msra.mxu1 %v13628_v1  ;;  %v13630_v1 = vld [vmem:[%s17731_s26 + $0x48] sm:$0xff]  }
 0xedb   :  { %6489 = vmatmul.mubr.bf16.vlgmr.msra.gmra.mrb[148].mxu1 %v16656_v26 }
 0xedc   :  { %6496 = vmatprep.mubr.bf16.mxu1 %v6194_v29 }
 0xee3   :  { %6497 = vmatmul.mubr.bf16.gmra.mrb[152].mxu1 %v16658_v21 }
 0xee4   :  { %6504 = vmatprep.mubr.bf16.mxu1 %v6196_v59 }
 0xeeb   :  { %6505 = vmatmul.mubr.bf16.gmra.mrb[156].mxu1 %v6195_v22 }
 0xeec   :  { %6512 = vmatprep.mubr.bf16.mxu1 %v6198_v44 }
 0xef3   :  { %6513 = vmatmul.mubr.bf16.gmra.mrb[160].mxu1 %v6197_v17 }
 0xef4   :  { %11861 = vmatprep.mubr.msk.bf16.mxu1 %vm852_vm0, %v13629_v56  ;;  %v13631_v56 = vld [vmem:[%s17731_s26 + $0x50] sm:$0xff]  }
 0xf8e   :  { %v11483_v49 = vpop.f32.mrb[132].mxu1 }
 0xf8f   :  { %v11484_v54 = vpop.f32.mrb[133].mxu1 }
 0xf90   :  { %v11485_v40 = vadd.f32 %v11484_v54, %v11483_v49  ;;  %v11486_v50 = vpop.f32.mrb[134].mxu1  ;;  %v13632_v49 = vld [vmem:[%s17731_s26 + $0x58] sm:$0xff]   ;;  %v13633_v54 = vld [vmem:[%s17421_s10] sm:$0xff]  }
 0xf91   :  { %v11487_v11 = vpop.f32.mrb[135].mxu1 }
 0xf92   :  { %v11488_v37 = vadd.f32 %v11487_v11, %v11486_v50  ;;  %v13638_v50 = vld [vmem:[%s17736_s0 + $0x8] sm:$0xff]   ;;  %v13639_v11 = vld [vmem:[%s17736_s0 + $0x10] sm:$0xff]  }
 0xf96   :  { %v11489_v9 = vpop.f32.mrb[136].mxu1 }
 0xf97   :  { %v11490_v6 = vpop.f32.mrb[137].mxu1 }
 0xf98   :  { %v11491_v52 = vadd.f32 %v11490_v6, %v11489_v9  ;;  %v11492_v58 = vpop.f32.mrb[138].mxu1  ;;  %v13641_v9 = vld [vmem:[%s17736_s0 + $0x20] sm:$0xff]   ;;  %v13642_v6 = vld [vmem:[%s17736_s0 + $0x28] sm:$0xff]  }
 0xf99   :  { %v11493_v27 = vpop.f32.mrb[139].mxu1 }
 0xf9a   :  { %v11494_v46 = vadd.f32 %v11493_v27, %v11492_v58 }
 0xf9e   :  { %v11495_v23 = vpop.f32.mrb[140].mxu1 }
 0xf9f   :  { %v11496_v12 = vpop.f32.mrb[141].mxu1 }
 0xfa0   :  { %v11497_v0 = vadd.f32 %v11496_v12, %v11495_v23  ;;  %v11498_v16 = vpop.f32.mrb[142].mxu1 }
 0xfa1   :  { %v11499_v8 = vpop.f32.mrb[143].mxu1 }
 0xfa2   :  { %v11500_v43 = vadd.f32 %v11499_v8, %v11498_v16 }
 0xfa6   :  { %v11501_v45 = vpop.f32.mrb[144].mxu1 }
 0xfa7   :  { %v11502_v28 = vpop.f32.mrb[145].mxu1 }
 0xfa8   :  { %v11503_v26 = vadd.f32 %v11502_v28, %v11501_v45  ;;  %v11504_v21 = vpop.f32.mrb[146].mxu1 }
 0xfa9   :  { %v11505_v35 = vpop.f32.mrb[147].mxu1 }
 0xfaa   :  { %v11506_v41 = vadd.f32 %v11505_v35, %v11504_v21 }
 0xfae   :  { %v11523_v2 = vpop.f32.mrb[148].mxu1 }
 0xfaf   :  { %v11524_v29 = vpop.f32.mrb[149].mxu1 }
 0xfb0   :  { %v11525_v7 = vadd.f32 %v11524_v29, %v11523_v2  ;;  %v11526_v14 = vpop.f32.mrb[150].mxu1  ;;  %v13635_v2 = vld [vmem:[%s17421_s10 + $0x10] sm:$0xff]   ;;  %v13636_v29 = vld [vmem:[%s17421_s10 + $0x18] sm:$0xff]  }
 0xfb1   :  { %v11527_v36 = vpop.f32.mrb[151].mxu1 }
 0xfb2   :  { %v6521_v10 = vmax.f32 %v11485_v40, %v11525_v7  ;;  %v11528_v13 = vadd.f32 %v11527_v36, %v11526_v14  ;;  %v13637_v40 = vld [vmem:[%s17736_s0] sm:$0xff]   ;;  %v13644_v7 = vld [vmem:[%s17736_s0 + $0x38] sm:$0xff]  }
 0xfb3   :  { %11893 = vmatprep.subr.bf16.mxu0 %v13637_v40  ;;  %v13645_v14 = vld [vmem:[%s17736_s0 + $0x40] sm:$0xff]  }
 0xfb4   :  { %v6522_v60 = vmax.f32 %v11488_v37, %v11528_v13  ;;  %11894 = vmatpush3.bf16.msra.mxu0 %v13637_v40  ;;  %v13640_v37 = vld [vmem:[%s17736_s0 + $0x18] sm:$0xff]   ;;  %v16779_v36 = vld [vmem:[%s17422_s11 + $0x4] ss:$8 sps:$4 sm:$0xff]  }
 0xfb5   :  { %11895 = vmatprep.subr.bf16.mxu0 %v13638_v50  ;;  %v16786_v13 = vld [vmem:[%s17422_s11 + $0x14] ss:$8 sps:$4 sm:$0xff]  }
 0xfb6   :  { %v6529_v51 = vpack.c.bf16 %v6522_v60, %v6521_v10  ;;  %v11529_v57 = vpop.f32.mrb[152].mxu1  ;;  %v13757_v10 = vmov 0.0|0.0   ;;  %v16793_v60 = vld [vmem:[%s17422_s11 + $0x24] ss:$8 sps:$4 sm:$0xff]  }
 0xfb7   :  { %v11530_v55 = vpop.f32.mrb[153].mxu1 }
 0xfb8   :  { %v11531_v33 = vadd.f32 %v11530_v55, %v11529_v57  ;;  %v11532_v15 = vpop.f32.mrb[154].mxu1  ;;  %11853 = vmatprep.subr.bf16.mxu1 %v6529_v51  ;;  %11896 = vmatpush3.bf16.msra.mxu0 %v13638_v50 }
 0xfb9   :  { %v11533_v63 = vpop.f32.mrb[155].mxu1  ;;  %11854 = vmatpush3.bf16.msra.mxu1 %v6529_v51  ;;  %11897 = vmatprep.subr.bf16.mxu0 %v13639_v11 }
 0xfba   :  { %v6523_v59 = vmax.f32 %v11491_v52, %v11531_v33  ;;  %v11534_v4 = vadd.f32 %v11533_v63, %v11532_v15  ;;  %v13643_v52 = vld [vmem:[%s17736_s0 + $0x30] sm:$0xff]  }
 0xfbc   :  { %v6524_v32 = vmax.f32 %v11494_v46, %v11534_v4  ;;  %11898 = vmatpush3.bf16.msra.mxu0 %v13639_v11 }
 0xfbd   :  { %11899 = vmatprep.subr.bf16.mxu0 %v13640_v37 }
 0xfbe   :  { %v6530_v48 = vpack.c.bf16 %v6524_v32, %v6523_v59  ;;  %v11535_v22 = vpop.f32.mrb[156].mxu1  ;;  %v13646_v59 = vld [vmem:[%s17736_s0 + $0x48] sm:$0xff]   ;;  %v13647_v32 = vld [vmem:[%s17736_s0 + $0x50] sm:$0xff]  }
 0xfbf   :  { %v11536_v19 = vpop.f32.mrb[157].mxu1 }
 0xfc0   :  { %v11537_v30 = vadd.f32 %v11536_v19, %v11535_v22  ;;  %v11538_v24 = vpop.f32.mrb[158].mxu1  ;;  %11855 = vmatprep.subr.bf16.mxu1 %v6530_v48  ;;  %11900 = vmatpush3.bf16.msra.mxu0 %v13640_v37 }
 0xfc1   :  { %v11539_v44 = vpop.f32.mrb[159].mxu1  ;;  %11856 = vmatpush3.bf16.msra.mxu1 %v6530_v48  ;;  %11901 = vmatprep.subr.bf16.mxu0 %v13641_v9 }
 0xfc2   :  { %v6525_v25 = vmax.f32 %v11497_v0, %v11537_v30  ;;  %v11540_v31 = vadd.f32 %v11539_v44, %v11538_v24  ;;  %v13648_v44 = vld [vmem:[%s17736_s0 + $0x58] sm:$0xff]  }
 0xfc4   :  { %v6526_v38 = vmax.f32 %v11500_v43, %v11540_v31  ;;  %11902 = vmatpush3.bf16.msra.mxu0 %v13641_v9  ;;  %v13650_v31 = vld [vmem:[%s17736_s0 + $0x68] sm:$0xff]  }
 0xfc5   :  { %11903 = vmatprep.subr.bf16.mxu0 %v13642_v6 }
 0xfc6   :  { %v6531_v17 = vpack.c.bf16 %v6526_v38, %v6525_v25  ;;  %v11541_v47 = vpop.f32.mrb[160].mxu1  ;;  %v13649_v25 = vld [vmem:[%s17736_s0 + $0x60] sm:$0xff]   ;;  %v13651_v38 = vld [vmem:[%s17736_s0 + $0x70] sm:$0xff]  }
 0xfc7   :  { %v11542_v42 = vpop.f32.mrb[161].mxu1 }
 0xfc8   :  { %v11543_v5 = vadd.f32 %v11542_v42, %v11541_v47  ;;  %v11544_v61 = vpop.f32.mrb[162].mxu1  ;;  %11857 = vmatprep.subr.bf16.mxu1 %v6531_v17  ;;  %11904 = vmatpush3.bf16.msra.mxu0 %v13642_v6  ;;  %v13653_v47 = vld [vmem:[%s17736_s0 + $0x80] sm:$0xff]   ;;  %v13654_v42 = vld [vmem:[%s17736_s0 + $0x88] sm:$0xff]  }
 0xfc9   :  { %v11545_v62 = vpop.f32.mrb[163].mxu1  ;;  %11858 = vmatpush3.bf16.msra.mxu1 %v6531_v17  ;;  %11905 = vmatprep.subr.bf16.mxu0 %v13643_v52 }
 0xfca   :  { %v6527_v3 = vmax.f32 %v11503_v26, %v11543_v5  ;;  %v11546_v18 = vadd.f32 %v11545_v62, %v11544_v61  ;;  %v13655_v5 = vld [vmem:[%s17736_s0 + $0x90] sm:$0xff]   ;;  %v13656_v61 = vld [vmem:[%s17736_s0 + $0x98] sm:$0xff]   ;;  %v13657_v62 = vld [vmem:[%s17736_s0 + $0xa0] sm:$0xff]  }
 0xfcc   :  { %v6528_v34 = vmax.f32 %v11506_v41, %v11546_v18  ;;  %11906 = vmatpush3.bf16.msra.mxu0 %v13643_v52  ;;  %v13634_v41 = vld [vmem:[%s17421_s10 + $0x8] sm:$0xff]   ;;  %v13659_v18 = vld [vmem:[%s17736_s0 + $0xb0] sm:$0xff]  }
 0xfcd   :  { %11907 = vmatprep.subr.bf16.mxu0 %v13644_v7 }
 0xfce   :  { %v6532_v20 = vpack.c.bf16 %v6528_v34, %v6527_v3  ;;  %v13658_v3 = vld [vmem:[%s17736_s0 + $0xa8] sm:$0xff]   ;;  %v13660_v34 = vld [vmem:[%s17736_s0 + $0xb8] sm:$0xff]  }
 0xfd0   :  { %11859 = vmatprep.subr.bf16.mxu1 %v6532_v20  ;;  %11908 = vmatpush3.bf16.msra.mxu0 %v13644_v7 }
 0xfd1   :  { %11860 = vmatpush3.bf16.msra.mxu1 %v6532_v20  ;;  %11913 = vmatprep.subr.bf16.mxu0 %v13645_v14 }
 0xfd2   :  { %11865 = vmatprep.subr.bf16.mxu1 %v6529_v51 }
 0xfd4   :  { %11862 = vmatmul.mubr.msk.bf16.vlgmr.msra.gmra.mrb[164].mxu1 %vm852_vm0, %v13630_v1  ;;  %v13665_v1 = vld [vmem:[%s17422_s11 + $0x44] ss:$8 sps:$4 sm:$0xff]  }
 0xfd5   :  { %11866 = vmatpush3.bf16.msra.mxu1 %v6529_v51  ;;  %11873 = vmatprep.mubr.msk.bf16.mxu1 %vm852_vm0, %v13631_v56  ;;  %v13666_v56 = vld [vmem:[%s17422_s11 + $0x54] ss:$8 sps:$4 sm:$0xff]  }
 0xfd6   :  { %11867 = vmatprep.subr.bf16.mxu1 %v6530_v48 }
 0xfd9   :  { %11868 = vmatpush3.bf16.msra.mxu1 %v6530_v48 }
 0xfda   :  { %11869 = vmatprep.subr.bf16.mxu1 %v6531_v17 }
 0xfdd   :  { %11870 = vmatpush3.bf16.msra.mxu1 %v6531_v17  ;;  %v13652_v17 = vld [vmem:[%s17736_s0 + $0x78] sm:$0xff]  }
 0xfde   :  { %11871 = vmatprep.subr.bf16.mxu1 %v6532_v20 }
 0xfe1   :  { %11872 = vmatpush3.bf16.msra.mxu1 %v6532_v20  ;;  %v13664_v20 = vld [vmem:[%s17422_s11 + $0x34] ss:$8 sps:$4 sm:$0xff]  }
 0xfe4   :  { %11874 = vmatmul.mubr.msk.bf16.vlgmr.msra.gmra.mrb[168].mxu1 %vm852_vm0, %v13632_v49  ;;  %v13667_v49 = vld [vmem:[%s17422_s11 + $0x64] ss:$8 sps:$4 sm:$0xff]  }
 0xfe5   :  { %11881 = vmatprep.mubr.msk.bf16.mxu1 %vm6791_vm2, %v13633_v54  ;;  %v13668_v54 = vld [vmem:[%s17422_s11 + $0x74] ss:$8 sps:$4 sm:$0xff]  }
0x10a7   :  { %v11863_v58 = vpop.f32.mrb[164].mxu1 }
0x10a8   :  { %v6583_v27 = vpop.f32.mrb[165].mxu1 }
0x10a9   :  { %v11864_v46 = vpop.f32.mrb[166].mxu1 }
0x10aa   :  { %v6586_v23 = vpop.f32.mrb[167].mxu1 }
0x10b7   :  { %v11875_v12 = vpop.f32.mrb[168].mxu1 }
0x10b8   :  { %v6665_v0 = vmax.f32 %v11863_v58, %v11875_v12  ;;  %v6648_v16 = vpop.f32.mrb[169].mxu1 }
0x10b9   :  { %v6663_v8 = vmax.f32 %v6583_v27, %v6648_v16  ;;  %v11876_v43 = vpop.f32.mrb[170].mxu1  ;;  %v6715_v16 = vld [vmem:[%s17736_s0 + $0xc0] sm:$0xf]  ;;  %s13763_s0 = smov [#allocation2]  }
0x10ba   :  { %v6666_v45 = vmax.f32 %v11864_v46, %v11876_v43  ;;  %v6651_v28 = vpop.f32.mrb[171].mxu1  ;;  %s10686_s3 = sshll.u32 %s13763_s0, 4  ;;  %s10687_s3 = int_to_ptr.vmem [resolvable:$true] %s10686_s3 }
0x10bb   :  { %v6664_v26 = vmax.f32 %v6586_v23, %v6651_v28  ;;  %p13736_p1 = scmp.lt.s32.totalorder %s10687_s3, %s10687_s3 }
0x10bc   :  { %v16752_v21 = vpack.c.bf16 %v6666_v45, %v6665_v0 }
0x10bd   :  { %v6779_v35 = vpack.c.bf16 %v6664_v26, %v6663_v8  ;;  %v16871_v8 = vunpack.c.l.bf16 %v6715_v16 }
0x10bf   :  { %11877 = vmatprep.subr.bf16.mxu1 %v6779_v35 }
0x10c0   :  { %11878 = vmatpush3.bf16.msra.mxu1 %v6779_v35 }
0x10c1   :  { %11879 = vmatprep.subr.bf16.mxu1 %v16752_v21 }
0x10c4   :  { %11880 = vmatpush3.bf16.msra.mxu1 %v16752_v21 }
0x10c5   :  { %11885 = vmatprep.subr.bf16.mxu1 %v6779_v35 }
0x10c7   :  { %11882 = vmatmul.mubr.msk.bf16.vlgmr.msra.gmra.mrb[172].mxu1 %vm6791_vm2, %v13634_v41 }
0x10c8   :  { %11886 = vmatpush3.bf16.msra.mxu1 %v6779_v35  ;;  %11889 = vmatprep.mubr.msk.bf16.mxu1 %vm6791_vm2, %v13635_v2 }
0x10c9   :  { %11887 = vmatprep.subr.bf16.mxu1 %v16752_v21 }
0x10cc   :  { %11888 = vmatpush3.bf16.msra.mxu1 %v16752_v21 }
0x10cd   :  { %12607 = vmatprep.subr.bf16.mxu1 %v13757_v10 }
0x10cf   :  { %11890 = vmatmul.mubr.msk.bf16.vlgmr.msra.gmra.mrb[176].mxu1 %vm6791_vm2, %v13636_v29 }
0x10d0   :  { %12609 = vmatpush3.bf16.msra.mxu1 %v16779_v36  ;;  %11985 = vmatprep.mubr.msk.f32.mxu1 %vm13758_vm3, %v17733_v53 }
0x10d1   :  { %12610 = vmatprep.subr.bf16.mxu1 %v13757_v10 }
0x10d4   :  { %12612 = vmatpush3.bf16.msra.mxu1 %v16786_v13 }
0x10d5   :  { %12613 = vmatprep.subr.bf16.mxu1 %v13757_v10 }
0x10d8   :  { %12615 = vmatpush3.bf16.msra.mxu1 %v16793_v60 }
0x10d9   :  { %12616 = vmatprep.subr.bf16.mxu1 %v13757_v10 }
0x10dc   :  { %12618 = vmatpush3.bf16.msra.mxu1 %v13664_v20 }
0x10dd   :  { %12619 = vmatprep.subr.bf16.mxu1 %v13757_v10 }
0x10e0   :  { %12621 = vmatpush3.bf16.msra.mxu1 %v13665_v1 }
0x10e1   :  { %12622 = vmatprep.subr.bf16.mxu1 %v13757_v10 }
0x10e4   :  { %12624 = vmatpush3.bf16.msra.mxu1 %v13666_v56 }
0x10e5   :  { %12625 = vmatprep.subr.bf16.mxu1 %v13757_v10 }
0x10e8   :  { %12627 = vmatpush3.bf16.msra.mxu1 %v13667_v49 }
0x10e9   :  { %12628 = vmatprep.subr.bf16.mxu1 %v13757_v10 }
0x10ec   :  { %12630 = vmatpush3.bf16.msra.mxu1 %v13668_v54 }
0x10ed   :  { %11988 = vmatprep.subr.mxu1 %v17733_v53 }
0x119a   :  { %v11883_v51 = vpop.f32.mrb[172].mxu1 }
0x119b   :  { %v6832_v57 = vpop.f32.mrb[173].mxu1 }
0x119c   :  { %v11884_v55 = vpop.f32.mrb[174].mxu1 }
0x119d   :  { %v6848_v33 = vpack.c.bf16 %v11884_v55, %v11883_v51  ;;  %v6835_v15 = vpop.f32.mrb[175].mxu1 }
0x119e   :  { %v6847_v63 = vpack.c.bf16 %v6835_v15, %v6832_v57 }
0x11a0   :  { %11909 = vmatprep.mubr.bf16.mxu0 %v6847_v63 }
0x11a1   :  { %11910 = vmatmul.mubr.bf16.vlgmr.msra.gmra.mrb[140].mxu0 %v6848_v33 }
0x11a2   :  { %11914 = vmatpush3.bf16.msra.mxu0 %v13645_v14  ;;  %11929 = vmatprep.mubr.bf16.mxu0 %v6779_v35  ;;  %v11891_v4 = vpop.f32.mrb[176].mxu1 }
0x11a3   :  { %11915 = vmatprep.subr.bf16.mxu0 %v13646_v59  ;;  %v6899_v48 = vpop.f32.mrb[177].mxu1 }
0x11a4   :  { %v11892_v22 = vpop.f32.mrb[178].mxu1 }
0x11a5   :  { %v6915_v19 = vpack.c.bf16 %v11892_v22, %v11891_v4  ;;  %v6902_v30 = vpop.f32.mrb[179].mxu1  ;;  %v13671_v22 = vld [vmem:[%s17422_s11 + $0x20] ss:$8 sps:$4 sm:$0xff]  }
0x11a6   :  { %11916 = vmatpush3.bf16.msra.mxu0 %v13646_v59  ;;  %v6914_v24 = vpack.c.bf16 %v6902_v30, %v6899_v48  ;;  %v13669_v48 = vld [vmem:[%s17422_s11] ss:$8 sps:$4 sm:$0xff]   ;;  %7728 = vrot.lane.b32.xlu1 %v13671_v22, %s13759_s7  ;;  %v13672_v30 = vld [vmem:[%s17422_s11 + $0x30] ss:$8 sps:$4 sm:$0xff]  }
0x11a7   :  { %11917 = vmatprep.subr.bf16.mxu0 %v13647_v32  ;;  %7724 = vrot.lane.b32.xlu0 %v13669_v48, %s13759_s7 }
0x11aa   :  { %11918 = vmatpush3.bf16.msra.mxu0 %v13647_v32  ;;  %7730 = vrot.lane.b32.xlu1 %v13672_v30, %s13759_s7 }
0x11ab   :  { %11919 = vmatprep.subr.bf16.mxu0 %v13648_v44 }
0x11ae   :  { %11920 = vmatpush3.bf16.msra.mxu0 %v13648_v44  ;;  %v13674_v44 = vld [vmem:[%s17422_s11 + $0x50] ss:$8 sps:$4 sm:$0xff]  }
0x11af   :  { %11921 = vmatprep.subr.bf16.mxu0 %v13649_v25  ;;  %7734 = vrot.lane.b32.xlu1 %v13674_v44, %s13759_s7 }
0x11b2   :  { %11922 = vmatpush3.bf16.msra.mxu0 %v13649_v25  ;;  %v13675_v25 = vld [vmem:[%s17422_s11 + $0x60] ss:$8 sps:$4 sm:$0xff]  }
0x11b3   :  { %11923 = vmatprep.subr.bf16.mxu0 %v13650_v31 }
0x11b6   :  { %11924 = vmatpush3.bf16.msra.mxu0 %v13650_v31  ;;  %v13676_v31 = vld [vmem:[%s17422_s11 + $0x70] ss:$8 sps:$4 sm:$0xff]  }
0x11b7   :  { %11925 = vmatprep.subr.bf16.mxu0 %v13651_v38  ;;  %7738 = vrot.lane.b32.xlu1 %v13676_v31, %s13759_s7 }
0x11ba   :  { %11926 = vmatpush3.bf16.msra.mxu0 %v13651_v38 }
0x11bb   :  { %11927 = vmatprep.subr.bf16.mxu0 %v13652_v17 }
0x11be   :  { %11928 = vmatpush3.bf16.msra.mxu0 %v13652_v17 }
0x11bf   :  { %11933 = vmatprep.subr.bf16.mxu0 %v13653_v47 }
0x11c1   :  { %11930 = vmatmul.mubr.bf16.vlgmr.msra.gmra.mrb[140].mxu0 %v16752_v21 }
0x11c2   :  { %11934 = vmatpush3.bf16.msra.mxu0 %v13653_v47  ;;  %11949 = vmatprep.mubr.bf16.mxu0 %v6914_v24  ;;  %v13673_v24 = vld [vmem:[%s17422_s11 + $0x40] ss:$8 sps:$4 sm:$0xff]  }
0x11c3   :  { %11935 = vmatprep.subr.bf16.mxu0 %v13654_v42 }
0x11c6   :  { %11936 = vmatpush3.bf16.msra.mxu0 %v13654_v42 }
0x11c7   :  { %11937 = vmatprep.subr.bf16.mxu0 %v13655_v5 }
0x11ca   :  { %11938 = vmatpush3.bf16.msra.mxu0 %v13655_v5 }
0x11cb   :  { %11939 = vmatprep.subr.bf16.mxu0 %v13656_v61 }
0x11ce   :  { %11940 = vmatpush3.bf16.msra.mxu0 %v13656_v61 }
0x11cf   :  { %11941 = vmatprep.subr.bf16.mxu0 %v13657_v62 }
0x11d2   :  { %11942 = vmatpush3.bf16.msra.mxu0 %v13657_v62  ;;  %v6777_v62 = vld [vmem:[%s17423_s12] sm:$0x1] }
0x11d3   :  { %11943 = vmatprep.subr.bf16.mxu0 %v13658_v3 }
0x11d6   :  { %11944 = vmatpush3.bf16.msra.mxu0 %v13658_v3 }
0x11d7   :  { %11945 = vmatprep.subr.bf16.mxu0 %v13659_v18 }
0x11da   :  { %11946 = vmatpush3.bf16.msra.mxu0 %v13659_v18 }
0x11db   :  { %11947 = vmatprep.subr.bf16.mxu0 %v13660_v34 }
0x11de   :  { %11948 = vmatpush3.bf16.msra.mxu0 %v13660_v34 }
0x11e1   :  { %11950 = vmatmul.mubr.bf16.vlgmr.msra.gmra.mrb[140].mxu0 %v6915_v19  ;;  %v13670_v19 = vld [vmem:[%s17422_s11 + $0x10] ss:$8 sps:$4 sm:$0xff]  }
0x11e2   :  { %7726 = vrot.lane.b32.xlu0 %v13670_v19, %s13759_s7 }
0x11e6   :  { %7732 = vrot.lane.b32.xlu0 %v13673_v24, %s13759_s7 }
0x11ea   :  { %7736 = vrot.lane.b32.xlu0 %v13675_v25, %s13759_s7 }
0x1218   :  { %v7729_v61 = vpop.permute.xlu1 %7728 }
0x1219   :  { %v7725_v5 = vpop.permute.xlu0 %7724 }
0x121a   :  { %12058 = vmatprep.subr.bf16.mxu0 %v7725_v5 }
0x121b   :  { %12059 = vmatpush3.bf16.msra.mxu0 %v7725_v5  ;;  %v13681_v5 = vld [vmem:[%s17424_s13] sm:$0xff]  }
0x1254   :  { %v7727_v3 = vpop.permute.xlu0 %7726 }
0x1255   :  { %12060 = vmatprep.subr.bf16.mxu0 %v7727_v3 }
0x1256   :  { %12061 = vmatpush3.bf16.msra.mxu0 %v7727_v3  ;;  %v13684_v3 = vld [vmem:[%s17424_s13 + $0x18] sm:$0xff]  }
0x1257   :  { %12062 = vmatprep.subr.bf16.mxu0 %v7729_v61 }
0x125a   :  { %12063 = vmatpush3.bf16.msra.mxu0 %v7729_v61  ;;  %v13682_v61 = vld [vmem:[%s17424_s13 + $0x8] sm:$0xff]  }
0x12b4   :  { %v11951_v40 = vpop.f32.mrb[140].mxu0 }
0x12b5   :  { %v7192_v50 = vpop.f32.mrb[141].mxu0 }
0x12b6   :  { %v11952_v11 = vpop.f32.mrb[142].mxu0 }
0x12b7   :  { %v7195_v37 = vpop.f32.mrb[143].mxu0 }
0x12b8   :  { %v7211_v9 = vadd.f32 %v7195_v37, %v7192_v50 }
0x12ba   :  { %v7212_v6 = vadd.f32 %v11951_v40, %v7211_v9 }
0x12bc   :  { %v7213_v52 = vadd.f32 %v11952_v11, %v7212_v6 }
0x12be   :  { %v7214_v58 = vrot.slane %v7213_v52, 4 }
0x12c0   :  { %v7215_v27 = vadd.f32 %v7214_v58, %v7213_v52 }
0x12c2   :  { %v7216_v46 = vrot.slane %v7215_v27, 2 }
0x12c4   :  { %v7217_v23 = vadd.f32 %v7216_v46, %v7215_v27 }
0x12c6   :  { %v7218_v12 = vrot.slane %v7217_v23, 1 }
0x12c8   :  { %v7219_v0 = vadd.f32 %v7218_v12, %v7217_v23 }
0x12ca   :  { %11986 = vmatmul.mubr.f32.vlgmr.msra.gmra.mrb[180].mxu1 %v7219_v0 }
0x12cb   :  { %11990 = vmatprep.mubr.msk.f32.mxu1 %vm13758_vm3, %v17733_v53  ;;  %11989 = vmatpush3.msra.mxu1 %v16871_v8 }
0x12cc   :  { %12631 = vmatprep.subr.bf16.mxu1 %v13757_v10 }
0x139d   :  { %v7286_v43 = vpop.f32.mrb[180].mxu1 }
0x139e   :  { %v7290_v45 = vmul.f32 0.001953125, %v7286_v43  ;;  %v11987_v28 = vpop.f32.mrb[181].mxu1 }
0x13a0   :  { %11991 = vmatmul.mubr.msk.f32.vlgmr.msra.gmra.mrb[182].mxu1 %vm2052_vm1, %v7290_v45 }
0x13a1   :  { %12633 = vmatpush3.bf16.msra.mxu1 %v16779_v36  ;;  %12025 = vmatprep.mubr.msk.f32.mxu1 %vm13758_vm3, %v17733_v53 }
0x13a2   :  { %12634 = vmatprep.subr.bf16.mxu1 %v13757_v10 }
0x13a5   :  { %12636 = vmatpush3.bf16.msra.mxu1 %v16786_v13 }
0x13a6   :  { %12637 = vmatprep.subr.bf16.mxu1 %v13757_v10 }
0x13a9   :  { %12639 = vmatpush3.bf16.msra.mxu1 %v16793_v60 }
0x13aa   :  { %12640 = vmatprep.subr.bf16.mxu1 %v13757_v10 }
0x13ad   :  { %12642 = vmatpush3.bf16.msra.mxu1 %v13664_v20  ;;  %v7731_v20 = vpop.permute.xlu1 %7730 }
0x13ae   :  { %12643 = vmatprep.subr.bf16.mxu1 %v13757_v10  ;;  %12064 = vmatprep.subr.bf16.mxu0 %v7731_v20 }
0x13af   :  { %12065 = vmatpush3.bf16.msra.mxu0 %v7731_v20  ;;  %v17028_v20 = vld [vmem:[%s17426_s15 + $0x10] sm:$0xff]  }
0x13b1   :  { %12645 = vmatpush3.bf16.msra.mxu1 %v13665_v1  ;;  %v6778_v1 = vld [vmem:[%s17423_s12 + $0x1] sm:$0x1] }
0x13b2   :  { %12646 = vmatprep.subr.bf16.mxu1 %v13757_v10 }
0x13b5   :  { %12648 = vmatpush3.bf16.msra.mxu1 %v13666_v56  ;;  %v7733_v56 = vpop.permute.xlu0 %7732 }
0x13b6   :  { %12649 = vmatprep.subr.bf16.mxu1 %v13757_v10  ;;  %12066 = vmatprep.subr.bf16.mxu0 %v7733_v56 }
0x13b7   :  { %12067 = vmatpush3.bf16.msra.mxu0 %v7733_v56 }
0x13b9   :  { %12651 = vmatpush3.bf16.msra.mxu1 %v13667_v49  ;;  %v7735_v49 = vpop.permute.xlu1 %7734 }
0x13ba   :  { %12652 = vmatprep.subr.bf16.mxu1 %v13757_v10  ;;  %12068 = vmatprep.subr.bf16.mxu0 %v7735_v49 }
0x13bb   :  { %12069 = vmatpush3.bf16.msra.mxu0 %v7735_v49 }
0x13bd   :  { %12654 = vmatpush3.bf16.msra.mxu1 %v13668_v54  ;;  %v7737_v54 = vpop.permute.xlu0 %7736 }
0x13be   :  { %12028 = vmatprep.subr.mxu1 %v17733_v53  ;;  %12070 = vmatprep.subr.bf16.mxu0 %v7737_v54 }
0x13bf   :  { %12071 = vmatpush3.bf16.msra.mxu0 %v7737_v54 }
0x1473   :  { %v7360_v26 = vpop.f32.mrb[182].mxu1 }
0x1474   :  { %v7367_v21 = vrot.slane %v7360_v26, %v17734_v39  ;;  %v11992_v35 = vpop.f32.mrb[183].mxu1 }
0x1476   :  { %v16890_v41 = vsub.f32 %v7192_v50, %v7367_v21  ;;  %v16892_v2 = vsub.f32 %v7195_v37, %v7367_v21  ;;  %v16894_v29 = vsub.f32 %v11951_v40, %v7367_v21  ;;  %v16896_v7 = vsub.f32 %v11952_v11, %v7367_v21  ;;  %v7739_v40 = vpop.permute.xlu1 %7738 }
0x1477   :  { %12072 = vmatprep.subr.bf16.mxu0 %v7739_v40 }
0x1478   :  { %v7372_v14 = vmul.f32 %v16890_v41, %v16890_v41  ;;  %v7373_v36 = vmul.f32 %v16892_v2, %v16892_v2  ;;  %v7374_v13 = vmul.f32 %v16894_v29, %v16894_v29  ;;  %v7375_v51 = vmul.f32 %v16896_v7, %v16896_v7  ;;  %12073 = vmatpush3.bf16.msra.mxu0 %v7739_v40  ;;  %v17037_v40 = vld [vmem:[%s17426_s15 + $0x18] sm:$0xff]  }
0x1479   :  { %12086 = vmatprep.subr.bf16.mxu0 %v17733_v53 }
0x147a   :  { %v7376_v60 = vadd.f32 %v7373_v36, %v7372_v14 }
0x147c   :  { %v7377_v57 = vadd.f32 %v7376_v60, %v7374_v13 }
0x147e   :  { %v7378_v55 = vadd.f32 %v7377_v57, %v7375_v51 }
0x1480   :  { %v7379_v33 = vrot.slane %v7378_v55, 4 }
0x1482   :  { %v7380_v15 = vadd.f32 %v7379_v33, %v7378_v55 }
0x1484   :  { %v7381_v63 = vrot.slane %v7380_v15, 2 }
0x1486   :  { %v7382_v59 = vadd.f32 %v7381_v63, %v7380_v15 }
0x1488   :  { %v7383_v4 = vrot.slane %v7382_v59, 1 }
0x148a   :  { %v7384_v32 = vadd.f32 %v7383_v4, %v7382_v59  ;;  %v13677_v59 = vld [vmem:[%s17421_s10 + $0x20] sm:$0xff]   ;;  %v13678_v4 = vld [vmem:[%s17421_s10 + $0x28] sm:$0xff]  }
0x148c   :  { %12026 = vmatmul.mubr.f32.vlgmr.msra.gmra.mrb[184].mxu1 %v7384_v32 }
0x148d   :  { %12029 = vmatpush3.msra.mxu1 %v16871_v8  ;;  %12030 = vmatprep.mubr.msk.f32.mxu1 %vm13758_vm3, %v17733_v53 }
0x148e   :  { %12033 = vmatprep.subr.mxu1 %v17733_v53 }
0x155f   :  { %v7451_v38 = vpop.f32.mrb[184].mxu1 }
0x1560   :  { %v7455_v17 = vmul.f32 0.001953125, %v7451_v38  ;;  %v12027_v47 = vpop.f32.mrb[185].mxu1 }
0x1561   :  { %v13679_v47 = vld [vmem:[%s17425_s14] sm:$0xff]  }
0x1562   :  { %v7456_v42 = vadd.f32 1e-05, %v7455_v17 }
0x1564   :  { %13723 = vrsqrt.f32 %v7456_v42  ;;  %v13680_v42 = vld [vmem:[%s17425_s14 + $0x8] sm:$0xff]  }
0x156e   :  { %v13724_v18 = vpop.eup %13723 }
0x156f   :  { %v7458_v34 = vmul.f32 %v13724_v18, %v6777_v62  ;;  %v13683_v62 = vld [vmem:[%s17424_s13 + $0x10] sm:$0xff]   ;;  %v17018_v18 = vld [vmem:[%s17426_s15] sm:$0xff]  }
0x1570   :  { %v7944_v56 = vunpack.c.h.bf16 %v17018_v18 }
0x1571   :  { %12031 = vmatmul.mubr.msk.f32.vlgmr.msra.gmra.mrb[186].mxu1 %vm2052_vm1, %v7458_v34  ;;  %v17023_v34 = vld [vmem:[%s17426_s15 + $0x8] sm:$0xff]  }
0x1572   :  { %12034 = vmatpush3.msra.mxu1 %v16871_v8  ;;  %12035 = vmatprep.mubr.msk.f32.mxu1 %vm13758_vm3, %v17733_v53  ;;  %v7945_v49 = vunpack.c.l.bf16 %v17023_v34  ;;  %v7946_v54 = vunpack.c.h.bf16 %v17023_v34 }
0x1573   :  { %12038 = vmatprep.subr.bf16.mxu1 %v13669_v48 }
0x1575   :  { %12036 = vmatmul.mubr.msk.f32.vlgmr.msra.gmra.mrb[188].mxu1 %vm2052_vm1, %v6778_v1  ;;  %v7943_v1 = vunpack.c.l.bf16 %v17018_v18 }
0x1576   :  { %12039 = vmatpush3.bf16.msra.mxu1 %v13669_v48 }
0x1577   :  { %12040 = vmatprep.subr.bf16.mxu1 %v13670_v19 }
0x157a   :  { %12041 = vmatpush3.bf16.msra.mxu1 %v13670_v19 }
0x157b   :  { %12042 = vmatprep.subr.bf16.mxu1 %v13671_v22 }
0x157e   :  { %12043 = vmatpush3.bf16.msra.mxu1 %v13671_v22 }
0x157f   :  { %12044 = vmatprep.subr.bf16.mxu1 %v13672_v30 }
0x1582   :  { %12045 = vmatpush3.bf16.msra.mxu1 %v13672_v30 }
0x1583   :  { %12046 = vmatprep.subr.bf16.mxu1 %v13673_v24 }
0x1586   :  { %12047 = vmatpush3.bf16.msra.mxu1 %v13673_v24 }
0x1587   :  { %12048 = vmatprep.subr.bf16.mxu1 %v13674_v44 }
0x158a   :  { %12049 = vmatpush3.bf16.msra.mxu1 %v13674_v44 }
0x158b   :  { %12050 = vmatprep.subr.bf16.mxu1 %v13675_v25 }
0x158e   :  { %12051 = vmatpush3.bf16.msra.mxu1 %v13675_v25 }
0x158f   :  { %12052 = vmatprep.subr.bf16.mxu1 %v13676_v31 }
0x1592   :  { %12053 = vmatpush3.bf16.msra.mxu1 %v13676_v31 }
0x1593   :  { %12078 = vmatprep.subr.bf16.mxu1 %v17733_v53 }
0x1644   :  { %v7528_v50 = vpop.f32.mrb[186].mxu1 }
0x1645   :  { %v7535_v11 = vrot.slane %v7528_v50, %v17734_v39  ;;  %v12032_v37 = vpop.f32.mrb[187].mxu1  ;;  %v7947_v50 = vunpack.c.l.bf16 %v17028_v20 }
0x1646   :  { %v7949_v37 = vunpack.c.l.bf16 %v17037_v40 }
0x1647   :  { %v7538_v9 = vmul.f32 %v7535_v11, %v16894_v29  ;;  %v7539_v52 = vmul.f32 %v7535_v11, %v16896_v7  ;;  %v7536_v46 = vmul.f32 %v7535_v11, %v16890_v41  ;;  %v7537_v23 = vmul.f32 %v7535_v11, %v16892_v2 }
0x1648   :  { %v7609_v6 = vpop.f32.mrb[188].mxu1  ;;  %v7948_v11 = vunpack.c.h.bf16 %v17028_v20 }
0x1649   :  { %v7616_v58 = vrot.slane %v7609_v6, %v17734_v39  ;;  %v12037_v27 = vpop.f32.mrb[189].mxu1  ;;  %v13074_v6 = vpack.i.bf16 %v7944_v56, %v7943_v1 }
0x164b   :  { %v7619_v12 = vadd.f32 %v7616_v58, %v7538_v9  ;;  %v7620_v0 = vadd.f32 %v7616_v58, %v7539_v52  ;;  %v7617_v16 = vadd.f32 %v7616_v58, %v7536_v46  ;;  %v7618_v8 = vadd.f32 %v7616_v58, %v7537_v23  ;;  %13075 = vrot.lane.b32.xlu0 %v13074_v6, %s13759_s7 }
0x164c   :  { %v7950_v9 = vunpack.c.h.bf16 %v17037_v40  ;;  %v13079_v52 = vpack.i.bf16 %v7946_v54, %v7945_v49  ;;  %v13084_v58 = vpack.i.bf16 %v7948_v11, %v7947_v50  ;;  %v7927_v49 = vld [vmem:[%s17424_s13 + $0x60] sm:$0xf] }
0x164d   :  { %v7623_v43 = vmax.f32 %v7619_v12, 0.0  ;;  %v7624_v45 = vmax.f32 %v7620_v0, 0.0  ;;  %v7621_v28 = vmax.f32 %v7617_v16, 0.0  ;;  %v7622_v26 = vmax.f32 %v7618_v8, 0.0  ;;  %v13685_v8 = vld [vmem:[%s17424_s13 + $0x20] sm:$0xff]  }
0x164e   :  { %13080 = vrot.lane.b32.xlu1 %v13079_v52, %s13759_s7  ;;  %v13089_v27 = vpack.i.bf16 %v7950_v9, %v7949_v37  ;;  %v7928_v54 = vunpack.c.l.bf16 %v7927_v49 }
0x164f   :  { %v7625_v21 = vpack.c.bf16 %v7622_v26, %v7621_v28  ;;  %v7626_v35 = vpack.c.bf16 %v7624_v45, %v7623_v43  ;;  %13085 = vrot.lane.b32.xlu0 %v13084_v58, %s13759_s7 }
0x1651   :  { %12054 = vmatprep.mubr.bf16.mxu1 %v7625_v21  ;;  %12074 = vmatprep.mubr.bf16.mxu0 %v7625_v21 }
0x1652   :  { %12055 = vmatmul.mubr.bf16.vlgmr.msra.gmra.mrb[192].mxu1 %v7626_v35  ;;  %12075 = vmatmul.mubr.bf16.vlgmr.msra.gmra.mrb[144].mxu0 %v7626_v35  ;;  %v13686_v35 = vld [vmem:[%s17424_s13 + $0x28] sm:$0xff]  }
0x1653   :  { %12082 = vmatprep.mubr.msk.bf16.mxu1 %vm13758_vm3, %v17733_v53  ;;  %12090 = vmatprep.mubr.msk.bf16.mxu0 %vm13758_vm3, %v17733_v53 }
0x1654   :  { %13090 = vrot.lane.b32.xlu1 %v13089_v27, %s13759_s7 }
0x1725   :  { %v12056_v41 = vpop.f32.mrb[192].mxu1  ;;  %v12076_v2 = vpop.f32.mrb[144].mxu0 }
0x1726   :  { %v7799_v29 = vmax.f32 %v12056_v41, %v12076_v2  ;;  %v7709_v7 = vpop.f32.mrb[193].mxu1  ;;  %v7782_v14 = vpop.f32.mrb[145].mxu0  ;;  %v13687_v41 = vld [vmem:[%s17424_s13 + $0x30] sm:$0xff]   ;;  %v13688_v2 = vld [vmem:[%s17424_s13 + $0x38] sm:$0xff]  }
0x1727   :  { %v7797_v36 = vmax.f32 %v7709_v7, %v7782_v14  ;;  %v12057_v13 = vpop.f32.mrb[194].mxu1  ;;  %v12077_v60 = vpop.f32.mrb[146].mxu0  ;;  %v13690_v7 = vld [vmem:[%s17424_s13 + $0x48] sm:$0xff]   ;;  %v13691_v14 = vld [vmem:[%s17424_s13 + $0x50] sm:$0xff]  }
0x1728   :  { %v7800_v51 = vmax.f32 %v12057_v13, %v12077_v60  ;;  %v7712_v57 = vpop.f32.mrb[195].mxu1  ;;  %v7785_v55 = vpop.f32.mrb[147].mxu0 }
0x1729   :  { %v7798_v33 = vmax.f32 %v7712_v57, %v7785_v55  ;;  %v13081_v55 = vpop.permute.xlu1 %13080 }
0x172a   :  { %v7802_v15 = vpack.c.bf16 %v7800_v51, %v7799_v29  ;;  %v13689_v29 = vld [vmem:[%s17424_s13 + $0x40] sm:$0xff]   ;;  %v13692_v51 = vld [vmem:[%s17424_s13 + $0x58] sm:$0xff]   ;;  %s13760_s13 = smov 96  }
0x172b   :  { %v7801_v63 = vpack.c.bf16 %v7798_v33, %v7797_v36  ;;  %v13076_v36 = vpop.permute.xlu0 %13075  ;;  %v13083_v33 = vunpack.i.h.bf16 %v13081_v55  ;;  %8772 = vrot.lane.b32.xlu0 %v17018_v18, %s13760_s13  ;;  %8774 = vrot.lane.b32.xlu1 %v17023_v34, %s13760_s13 }
0x172c   :  { %v13078_v13 = vunpack.i.h.bf16 %v13076_v36  ;;  %v13077_v60 = vunpack.i.l.bf16 %v13076_v36 }
0x172d   :  { %12079 = vmatpush3.bf16.msra.mxu1 %v7801_v63  ;;  %12087 = vmatpush3.bf16.msra.mxu0 %v7801_v63 }
0x172e   :  { %12080 = vmatprep.subr.bf16.mxu1 %v17733_v53  ;;  %12088 = vmatprep.subr.bf16.mxu0 %v17733_v53  ;;  %v12656_v57 = vpack.c.bf16 %v13078_v13, %v13077_v60 }
0x172f   :  { %8776 = vrot.lane.b32.xlu0 %v17028_v20, %s13760_s13  ;;  %8778 = vrot.lane.b32.xlu1 %v17037_v40, %s13760_s13 }
0x1731   :  { %12081 = vmatpush3.bf16.msra.mxu1 %v7802_v15  ;;  %12089 = vmatpush3.bf16.msra.mxu0 %v7802_v15  ;;  %v13082_v15 = vunpack.i.l.bf16 %v13081_v55 }
0x1732   :  { %12094 = vmatprep.subr.bf16.mxu1 %v17733_v53  ;;  %12100 = vmatprep.subr.bf16.mxu0 %v17733_v53 }
0x1733   :  { %v12659_v63 = vpack.c.bf16 %v13083_v33, %v13082_v15 }
0x1734   :  { %12083 = vmatmul.mubr.msk.bf16.vlgmr.msra.gmra.mrb[196].mxu1 %vm6791_vm2, %v13677_v59  ;;  %12091 = vmatmul.mubr.msk.bf16.vlgmr.msra.gmra.mrb[148].mxu0 %vm6791_vm2, %v13678_v4  ;;  %v13086_v59 = vpop.permute.xlu0 %13085  ;;  %v13091_v4 = vpop.permute.xlu1 %13090 }
0x1735   :  { %12096 = vmatprep.mubr.msk.bf16.mxu1 %vm13758_vm3, %v17733_v53  ;;  %12102 = vmatprep.mubr.msk.bf16.mxu0 %vm13758_vm3, %v17733_v53 }
0x1807   :  { %v7845_v32 = vpop.f32.mrb[196].mxu1  ;;  %v7894_v48 = vpop.f32.mrb[148].mxu0 }
0x1808   :  { %v7901_v22 = vmax.f32 %v7845_v32, %v7894_v48  ;;  %v12084_v19 = vpop.f32.mrb[197].mxu1  ;;  %v12092_v30 = vpop.f32.mrb[149].mxu0  ;;  %v13088_v32 = vunpack.i.h.bf16 %v13086_v59  ;;  %v13087_v48 = vunpack.i.l.bf16 %v13086_v59 }
0x1809   :  { %v7848_v24 = vpop.f32.mrb[198].mxu1  ;;  %v7897_v44 = vpop.f32.mrb[150].mxu0  ;;  %v13092_v19 = vunpack.i.l.bf16 %v13091_v4 }
0x180a   :  { %v7902_v25 = vmax.f32 %v7848_v24, %v7897_v44  ;;  %v12085_v31 = vpop.f32.mrb[199].mxu1  ;;  %v12093_v38 = vpop.f32.mrb[151].mxu0  ;;  %v12662_v30 = vpack.c.bf16 %v13088_v32, %v13087_v48 }
0x180c   :  { %v16981_v17 = vpack.c.bf16 %v7902_v25, %v7901_v22  ;;  %v13093_v22 = vunpack.i.h.bf16 %v13091_v4 }
0x180e   :  { %12095 = vmatpush3.bf16.msra.mxu1 %v16981_v17  ;;  %12101 = vmatpush3.bf16.msra.mxu0 %v16981_v17  ;;  %v12665_v24 = vpack.c.bf16 %v13093_v22, %v13092_v19 }
0x180f   :  { %12106 = vmatprep.subr.bf16.mxu1 %v17733_v53  ;;  %12655 = vmatprep.subr.bf16.mxu0 %v13757_v10 }
0x1811   :  { %12097 = vmatmul.mubr.msk.bf16.vlgmr.msra.gmra.mrb[200].mxu1 %vm7959_vm4, %v13679_v47  ;;  %12103 = vmatmul.mubr.msk.bf16.vlgmr.msra.gmra.mrb[152].mxu0 %vm7959_vm4, %v13680_v42 }
0x1812   :  { %12107 = vmatpush3.bf16.msra.mxu1 %v13681_v5  ;;  %12114 = vmatprep.mubr.msk.bf16.mxu1 %vm13758_vm3, %v17733_v53 }
0x1813   :  { %12108 = vmatprep.subr.bf16.mxu1 %v17733_v53  ;;  %12158 = vmatprep.mubr.msk.f32.mxu0 %vm13758_vm3, %v17733_v53 }
0x1814   :  { %12657 = vmatpush3.bf16.msra.mxu0 %v12656_v57 }
0x1815   :  { %12658 = vmatprep.subr.bf16.mxu0 %v13757_v10 }
0x1816   :  { %12109 = vmatpush3.bf16.msra.mxu1 %v13682_v61 }
0x1817   :  { %12110 = vmatprep.subr.bf16.mxu1 %v17733_v53 }
0x1818   :  { %12660 = vmatpush3.bf16.msra.mxu0 %v12659_v63 }
0x1819   :  { %12661 = vmatprep.subr.bf16.mxu0 %v13757_v10 }
0x181a   :  { %12111 = vmatpush3.bf16.msra.mxu1 %v13683_v62 }
0x181b   :  { %12112 = vmatprep.subr.bf16.mxu1 %v17733_v53 }
0x181c   :  { %12663 = vmatpush3.bf16.msra.mxu0 %v12662_v30 }
0x181d   :  { %12664 = vmatprep.subr.bf16.mxu0 %v13757_v10 }
0x181e   :  { %12113 = vmatpush3.bf16.msra.mxu1 %v13684_v3 }
0x181f   :  { %12118 = vmatprep.subr.bf16.mxu1 %v17733_v53 }
0x1820   :  { %12666 = vmatpush3.bf16.msra.mxu0 %v12665_v24 }
0x1821   :  { %12161 = vmatprep.subr.mxu0 %v17733_v53 }
0x18e4   :  { %v7997_v46 = vpop.f32.mrb[200].mxu1  ;;  %v8047_v23 = vpop.f32.mrb[152].mxu0 }
0x18e5   :  { %v12098_v12 = vpop.f32.mrb[201].mxu1  ;;  %v12104_v0 = vpop.f32.mrb[153].mxu0 }
0x18e6   :  { %v8000_v16 = vpop.f32.mrb[202].mxu1  ;;  %v8050_v43 = vpop.f32.mrb[154].mxu0 }
0x18e7   :  { %v8004_v45 = vpack.c.bf16 %v8000_v16, %v7997_v46  ;;  %v12099_v28 = vpop.f32.mrb[203].mxu1  ;;  %v8054_v26 = vpack.c.bf16 %v8050_v43, %v8047_v23  ;;  %v12105_v21 = vpop.f32.mrb[155].mxu0 }
0x18e9   :  { %12115 = vmatmul.mubr.msk.bf16.vlgmr.msra.gmra.mrb[204].mxu1 %vm852_vm0, %v8004_v45 }
0x18ea   :  { %12119 = vmatpush3.bf16.msra.mxu1 %v13685_v8  ;;  %12126 = vmatprep.mubr.msk.bf16.mxu1 %vm13758_vm3, %v17733_v53 }
0x18eb   :  { %12120 = vmatprep.subr.bf16.mxu1 %v17733_v53 }
0x18ee   :  { %12121 = vmatpush3.bf16.msra.mxu1 %v13686_v35 }
0x18ef   :  { %12122 = vmatprep.subr.bf16.mxu1 %v17733_v53 }
0x18f2   :  { %12123 = vmatpush3.bf16.msra.mxu1 %v13687_v41 }
0x18f3   :  { %12124 = vmatprep.subr.bf16.mxu1 %v17733_v53 }
0x18f6   :  { %12125 = vmatpush3.bf16.msra.mxu1 %v13688_v2 }
0x18f7   :  { %12130 = vmatprep.subr.bf16.mxu1 %v17733_v53 }
0x18f9   :  { %12127 = vmatmul.mubr.msk.bf16.vlgmr.msra.gmra.mrb[204].mxu1 %vm852_vm0, %v16981_v17 }
0x18fa   :  { %12131 = vmatpush3.bf16.msra.mxu1 %v13689_v29  ;;  %12138 = vmatprep.mubr.msk.bf16.mxu1 %vm13758_vm3, %v17733_v53  ;;  %v7951_v29 = vld [vmem:[%s17427_s16] sm:$0x1] }
0x18fb   :  { %12132 = vmatprep.subr.bf16.mxu1 %v17733_v53 }
0x18fe   :  { %12133 = vmatpush3.bf16.msra.mxu1 %v13690_v7 }
0x18ff   :  { %12134 = vmatprep.subr.bf16.mxu1 %v17733_v53 }
0x1902   :  { %12135 = vmatpush3.bf16.msra.mxu1 %v13691_v14  ;;  %v8775_v14 = vpop.permute.xlu1 %8774 }
0x1903   :  { %12136 = vmatprep.subr.bf16.mxu1 %v17733_v53 }
0x1906   :  { %12137 = vmatpush3.bf16.msra.mxu1 %v13692_v51  ;;  %v8779_v13 = vpop.permute.xlu1 %8778 }
0x1907   :  { %12195 = vmatprep.subr.bf16.mxu1 %v17733_v53 }
0x1909   :  { %12139 = vmatmul.mubr.msk.bf16.vlgmr.msra.gmra.mrb[204].mxu1 %vm852_vm0, %v8054_v26 }
0x190a   :  { %12203 = vmatprep.mubr.msk.bf16.mxu1 %vm13758_vm3, %v17733_v53  ;;  %12196 = vmatpush3.bf16.msra.mxu1 %v17018_v18 }
0x190b   :  { %12197 = vmatprep.subr.bf16.mxu1 %v17733_v53 }
0x190e   :  { %12198 = vmatpush3.bf16.msra.mxu1 %v17023_v34 }
0x190f   :  { %12199 = vmatprep.subr.bf16.mxu1 %v17733_v53 }
0x1912   :  { %12200 = vmatpush3.bf16.msra.mxu1 %v17028_v20  ;;  %v7952_v20 = vld [vmem:[%s17427_s16 + $0x1] sm:$0x1] }
0x1913   :  { %12201 = vmatprep.subr.bf16.mxu1 %v17733_v53 }
0x1916   :  { %12202 = vmatpush3.bf16.msra.mxu1 %v17037_v40  ;;  %v8773_v40 = vpop.permute.xlu0 %8772 }
0x1917   :  { %12219 = vmatprep.subr.bf16.mxu1 %v17733_v53 }
0x191a   :  { %v8777_v36 = vpop.permute.xlu0 %8776 }
0x19dc   :  { %v8252_v44 = vpop.f32.mrb[204].mxu1 }
0x19dd   :  { %v12140_v25 = vpop.f32.mrb[205].mxu1  ;;  %v8261_v38 = vsel %vm852_vm0, %v8252_v44, 0.0 }
0x19de   :  { %v8255_v31 = vpop.f32.mrb[206].mxu1 }
0x19df   :  { %v8262_v17 = vsel %vm852_vm0, %v8255_v31, 0.0  ;;  %v12141_v47 = vpop.f32.mrb[207].mxu1 }
0x19e0   :  { %v8263_v42 = vadd.f32 %v8262_v17, %v8261_v38 }
0x19e2   :  { %v8264_v5 = vrot.slane %v8263_v42, 4 }
0x19e4   :  { %v8265_v61 = vadd.f32 %v8264_v5, %v8263_v42 }
0x19e6   :  { %v8266_v62 = vrot.slane %v8265_v61, 2 }
0x19e8   :  { %v8267_v3 = vadd.f32 %v8266_v62, %v8265_v61  ;;  %v7933_v62 = vld [vmem:[%s17425_s14 + $0x10] sm:$0xf] }
0x19ea   :  { %v8268_v1 = vrot.slane %v8267_v3, 1 }
0x19ec   :  { %v8269_v56 = vadd.f32 %v8268_v1, %v8267_v3  ;;  %v7934_v3 = vld [vmem:[%s17425_s14 + $0x14] sm:$0xf] }
0x19ee   :  { %12159 = vmatmul.mubr.msk.f32.vlgmr.msra.gmra.mrb[58].mxu0 %vm852_vm0, %v8269_v56 }
0x19ef   :  { %12163 = vmatprep.mubr.msk.f32.mxu0 %vm13758_vm3, %v17733_v53  ;;  %12162 = vmatpush3.msra.mxu0 %v7928_v54 }
0x19f0   :  { %12667 = vmatprep.subr.bf16.mxu0 %v13757_v10 }
0x1ac1   :  { %v8371_v50 = vpop.f32.mrb[58].mxu0 }
0x1ac2   :  { %v8375_v11 = vmul.f32 0.0078125, %v8371_v50  ;;  %v12160_v37 = vpop.f32.mrb[59].mxu0 }
0x1ac4   :  { %12164 = vmatmul.mubr.msk.f32.vlgmr.msra.gmra.mrb[156].mxu0 %vm2052_vm1, %v8375_v11 }
0x1ac5   :  { %12669 = vmatpush3.bf16.msra.mxu0 %v12656_v57  ;;  %12182 = vmatprep.mubr.msk.f32.mxu0 %vm13758_vm3, %v17733_v53 }
0x1ac6   :  { %12670 = vmatprep.subr.bf16.mxu0 %v13757_v10 }
0x1ac9   :  { %12672 = vmatpush3.bf16.msra.mxu0 %v12659_v63 }
0x1aca   :  { %12673 = vmatprep.subr.bf16.mxu0 %v13757_v10 }
0x1acd   :  { %12675 = vmatpush3.bf16.msra.mxu0 %v12662_v30 }
0x1ace   :  { %12676 = vmatprep.subr.bf16.mxu0 %v13757_v10 }
0x1ad1   :  { %12678 = vmatpush3.bf16.msra.mxu0 %v12665_v24 }
0x1ad2   :  { %12185 = vmatprep.subr.mxu0 %v17733_v53 }
0x1b97   :  { %v8445_v9 = vpop.f32.mrb[156].mxu0 }
0x1b98   :  { %v8452_v6 = vrot.slane %v8445_v9, %v17734_v39  ;;  %v12165_v52 = vpop.f32.mrb[157].mxu0 }
0x1b9a   :  { %v8453_v58 = vsub.f32 %v8252_v44, %v8452_v6  ;;  %v8454_v27 = vsub.f32 %v8255_v31, %v8452_v6 }
0x1b9c   :  { %v8455_v46 = vmul.f32 %v8453_v58, %v8453_v58  ;;  %v8456_v23 = vmul.f32 %v8454_v27, %v8454_v27 }
0x1b9e   :  { %v8457_v12 = vsel %vm852_vm0, %v8455_v46, 0.0  ;;  %v8458_v0 = vsel %vm852_vm0, %v8456_v23, 0.0  ;;  %v8930_v46 = vld [vmem:[%s17429_s18 + $0x4] sm:$0xf] }
0x1b9f   :  { %v8459_v16 = vadd.f32 %v8458_v0, %v8457_v12  ;;  %v13697_v23 = vld [vmem:[%s17428_s17] sm:$0xff]   ;;  %v13698_v12 = vld [vmem:[%s17428_s17 + $0x8] sm:$0xff]  }
0x1ba0   :  { %v17197_v0 = vld [vmem:[%s17430_s19] sm:$0xff]  }
0x1ba1   :  { %v8460_v8 = vrot.slane %v8459_v16, 4 }
0x1ba3   :  { %v8461_v43 = vadd.f32 %v8460_v8, %v8459_v16  ;;  %v17202_v16 = vld [vmem:[%s17430_s19 + $0x8] sm:$0xff]   ;;  %v8937_v8 = vunpack.c.l.bf16 %v17197_v0 }
0x1ba5   :  { %v8462_v45 = vrot.slane %v8461_v43, 2 }
0x1ba7   :  { %v8463_v28 = vadd.f32 %v8462_v45, %v8461_v43  ;;  %v8938_v43 = vunpack.c.h.bf16 %v17197_v0  ;;  %v8939_v45 = vunpack.c.l.bf16 %v17202_v16 }
0x1ba9   :  { %v8464_v26 = vrot.slane %v8463_v28, 1 }
0x1bab   :  { %v8465_v21 = vadd.f32 %v8464_v26, %v8463_v28  ;;  %v8940_v28 = vunpack.c.h.bf16 %v17202_v16  ;;  %v13094_v26 = vpack.i.bf16 %v8938_v43, %v8937_v8  ;;  %v8941_v43 = vld [vmem:[%s17431_s20] sm:$0x1] }
0x1bad   :  { %12183 = vmatmul.mubr.msk.f32.vlgmr.msra.gmra.mrb[158].mxu0 %vm852_vm0, %v8465_v21  ;;  %v13099_v21 = vpack.i.bf16 %v8940_v28, %v8939_v45  ;;  %13095 = vrot.lane.b32.xlu0 %v13094_v26, %s13760_s13 }
0x1bae   :  { %12186 = vmatpush3.msra.mxu0 %v7928_v54  ;;  %12187 = vmatprep.mubr.msk.f32.mxu0 %vm13758_vm3, %v17733_v53 }
0x1baf   :  { %12190 = vmatprep.subr.mxu0 %v17733_v53  ;;  %13100 = vrot.lane.b32.xlu1 %v13099_v21, %s13760_s13 }
0x1c80   :  { %v8535_v18 = vpop.f32.mrb[158].mxu0 }
0x1c81   :  { %v8539_v35 = vmul.f32 0.0078125, %v8535_v18  ;;  %v12184_v41 = vpop.f32.mrb[159].mxu0 }
0x1c83   :  { %v8540_v2 = vadd.f32 1e-05, %v8539_v35  ;;  %v13699_v35 = vld [vmem:[%s17428_s17 + $0x10] sm:$0xff]  }
0x1c85   :  { %13725 = vrsqrt.f32 %v8540_v2 }
0x1c8f   :  { %v13726_v34 = vpop.eup %13725 }
0x1c90   :  { %v8542_v7 = vmul.f32 %v13726_v34, %v7951_v29 }
0x1c92   :  { %12188 = vmatmul.mubr.msk.f32.vlgmr.msra.gmra.mrb[160].mxu0 %vm2052_vm1, %v8542_v7 }
0x1c93   :  { %12191 = vmatpush3.msra.mxu0 %v7928_v54  ;;  %12192 = vmatprep.mubr.msk.f32.mxu0 %vm13758_vm3, %v17733_v53 }
0x1c94   :  { %12207 = vmatprep.subr.bf16.mxu0 %v17733_v53 }
0x1c96   :  { %12193 = vmatmul.mubr.msk.f32.vlgmr.msra.gmra.mrb[162].mxu0 %vm2052_vm1, %v7952_v20 }
0x1c97   :  { %12208 = vmatpush3.bf16.msra.mxu0 %v8773_v40  ;;  %12215 = vmatprep.mubr.msk.bf16.mxu0 %vm13758_vm3, %v17733_v53 }
0x1c98   :  { %12209 = vmatprep.subr.bf16.mxu0 %v17733_v53 }
0x1c9b   :  { %12210 = vmatpush3.bf16.msra.mxu0 %v8775_v14 }
0x1c9c   :  { %12211 = vmatprep.subr.bf16.mxu0 %v17733_v53 }
0x1c9f   :  { %12212 = vmatpush3.bf16.msra.mxu0 %v8777_v36  ;;  %v13700_v36 = vld [vmem:[%s17428_s17 + $0x18] sm:$0xff]  }
0x1ca0   :  { %12213 = vmatprep.subr.bf16.mxu0 %v17733_v53 }
0x1ca3   :  { %12214 = vmatpush3.bf16.msra.mxu0 %v8779_v13  ;;  %v13701_v13 = vld [vmem:[%s17428_s17 + $0x20] sm:$0xff]  }
0x1ca4   :  { %12225 = vmatprep.subr.bf16.mxu0 %v17733_v53 }
0x1d65   :  { %v8612_v60 = vpop.f32.mrb[160].mxu0 }
0x1d66   :  { %v8619_v51 = vrot.slane %v8612_v60, %v17734_v39  ;;  %v12189_v57 = vpop.f32.mrb[161].mxu0  ;;  %v13702_v60 = vld [vmem:[%s17428_s17 + $0x28] sm:$0xff]  }
0x1d67   :  { %v13096_v57 = vpop.permute.xlu0 %13095 }
0x1d68   :  { %v8620_v33 = vmul.f32 %v8619_v51, %v8453_v58  ;;  %v8621_v15 = vmul.f32 %v8619_v51, %v8454_v27  ;;  %v8929_v27 = vld [vmem:[%s17429_s18] sm:$0xf] }
0x1d69   :  { %v8691_v55 = vpop.f32.mrb[162].mxu0 }
0x1d6a   :  { %v8698_v63 = vrot.slane %v8691_v55, %v17734_v39  ;;  %v12194_v59 = vpop.f32.mrb[163].mxu0  ;;  %v13101_v55 = vpop.permute.xlu1 %13100 }
0x1d6b   :  { %v13102_v59 = vunpack.i.l.bf16 %v13101_v55 }
0x1d6c   :  { %v8699_v4 = vadd.f32 %v8698_v63, %v8620_v33  ;;  %v8700_v32 = vadd.f32 %v8698_v63, %v8621_v15  ;;  %v13098_v33 = vunpack.i.h.bf16 %v13096_v57  ;;  %v13097_v15 = vunpack.i.l.bf16 %v13096_v57  ;;  %v13705_v57 = vld [vmem:[%s17429_s18 + $0x8] ss:$0 sps:$4 sm:$0xcc]  }
0x1d6d   :  { %v13103_v63 = vunpack.i.h.bf16 %v13101_v55 }
0x1d6e   :  { %v8701_v48 = vmax.f32 %v8699_v4, 0.0  ;;  %v8702_v22 = vmax.f32 %v8700_v32, 0.0  ;;  %v12680_v4 = vpack.c.bf16 %v13098_v33, %v13097_v15 }
0x1d6f   :  { %v12683_v32 = vpack.c.bf16 %v13103_v63, %v13102_v59 }
0x1d70   :  { %v8703_v19 = vpack.c.bf16 %v8702_v22, %v8701_v48 }
0x1d72   :  { %12204 = vmatmul.mubr.msk.bf16.vlgmr.msra.gmra.mrb[208].mxu1 %vm852_vm0, %v8703_v19  ;;  %12216 = vmatmul.mubr.msk.bf16.vlgmr.msra.gmra.mrb[164].mxu0 %vm852_vm0, %v8703_v19 }
0x1d73   :  { %12221 = vmatprep.mubr.msk.bf16.mxu1 %vm13758_vm3, %v17733_v53  ;;  %12227 = vmatprep.mubr.msk.bf16.mxu0 %vm13758_vm3, %v17733_v53 }
0x1e45   :  { %v8765_v30 = vpop.f32.mrb[208].mxu1  ;;  %v8818_v24 = vpop.f32.mrb[164].mxu0 }
0x1e46   :  { %v8825_v44 = vmax.f32 %v8765_v30, %v8818_v24  ;;  %v12205_v25 = vpop.f32.mrb[209].mxu1  ;;  %v12217_v31 = vpop.f32.mrb[165].mxu0 }
0x1e47   :  { %v8768_v38 = vpop.f32.mrb[210].mxu1  ;;  %v8821_v17 = vpop.f32.mrb[166].mxu0 }
0x1e48   :  { %v8826_v47 = vmax.f32 %v8768_v38, %v8821_v17  ;;  %v12206_v42 = vpop.f32.mrb[211].mxu1  ;;  %v12218_v5 = vpop.f32.mrb[167].mxu0 }
0x1e49   :  { %v8927_v42 = vld [vmem:[%s17428_s17 + $0x30] sm:$0xf]  ;;  %s13761_s17 = smov 112  }
0x1e4a   :  { %v8827_v61 = vpack.c.bf16 %v8826_v47, %v8825_v44  ;;  %v8928_v5 = vunpack.c.l.bf16 %v8927_v42  ;;  %9674 = vrot.lane.b32.xlu0 %v17197_v0, %s13761_s17  ;;  %9676 = vrot.lane.b32.xlu1 %v17202_v16, %s13761_s17 }
0x1e4c   :  { %12220 = vmatpush3.bf16.msra.mxu1 %v8827_v61  ;;  %12226 = vmatpush3.bf16.msra.mxu0 %v8827_v61 }
0x1e4d   :  { %12231 = vmatprep.subr.bf16.mxu1 %v17733_v53  ;;  %12237 = vmatprep.subr.bf16.mxu0 %v17733_v53 }
0x1e4f   :  { %12222 = vmatmul.mubr.msk.bf16.vlgmr.msra.gmra.mrb[212].mxu1 %vm7959_vm4, %v7933_v62  ;;  %12228 = vmatmul.mubr.msk.bf16.vlgmr.msra.gmra.mrb[168].mxu0 %vm7959_vm4, %v7934_v3 }
0x1e50   :  { %12233 = vmatprep.mubr.msk.bf16.mxu1 %vm13758_vm3, %v17733_v53  ;;  %12239 = vmatprep.mubr.msk.bf16.mxu0 %vm13758_vm3, %v17733_v53 }
0x1ebc   :  { %v9677_v26 = vpop.permute.xlu1 %9676 }
0x1f22   :  { %v8865_v1 = vpop.f32.mrb[212].mxu1  ;;  %v8908_v56 = vpop.f32.mrb[168].mxu0 }
0x1f23   :  { %v8914_v49 = vmax.f32 %v8865_v1, %v8908_v56  ;;  %v12223_v54 = vpop.f32.mrb[213].mxu1  ;;  %v12229_v50 = vpop.f32.mrb[169].mxu0 }
0x1f24   :  { %v8868_v11 = vpop.f32.mrb[214].mxu1  ;;  %v8911_v37 = vpop.f32.mrb[170].mxu0 }
0x1f25   :  { %v8943_v9 = vpack.c.bf16 %v8914_v49, %v8914_v49  ;;  %v12224_v6 = vpop.f32.mrb[215].mxu1  ;;  %v12230_v52 = vpop.f32.mrb[171].mxu0 }
0x1f27   :  { %v8949_v58 = vsel %vm8947_vm5, %v8943_v9, 0 }
0x1f28   :  { %12232 = vmatpush3.bf16.msra.mxu1 %v8949_v58  ;;  %12238 = vmatpush3.bf16.msra.mxu0 %v8949_v58 }
0x1f29   :  { %12243 = vmatprep.subr.bf16.mxu1 %v17733_v53  ;;  %12679 = vmatprep.subr.bf16.mxu0 %v13757_v10 }
0x1f2b   :  { %12234 = vmatmul.mubr.msk.bf16.vlgmr.msra.gmra.mrb[216].mxu1 %vm2052_vm1, %v8929_v27  ;;  %12240 = vmatmul.mubr.msk.bf16.vlgmr.msra.gmra.mrb[172].mxu0 %vm2052_vm1, %v8930_v46 }
0x1f2c   :  { %12244 = vmatpush3.bf16.msra.mxu1 %v13697_v23  ;;  %12247 = vmatprep.mubr.msk.bf16.mxu1 %vm13758_vm3, %v17733_v53 }
0x1f2d   :  { %12245 = vmatprep.subr.bf16.mxu1 %v17733_v53  ;;  %12275 = vmatprep.mubr.msk.f32.mxu0 %vm13758_vm3, %v17733_v53 }
0x1f2e   :  { %12681 = vmatpush3.bf16.msra.mxu0 %v12680_v4 }
0x1f2f   :  { %12682 = vmatprep.subr.bf16.mxu0 %v13757_v10 }
0x1f30   :  { %12246 = vmatpush3.bf16.msra.mxu1 %v13698_v12 }
0x1f31   :  { %12251 = vmatprep.subr.bf16.mxu1 %v17733_v53 }
0x1f32   :  { %12684 = vmatpush3.bf16.msra.mxu0 %v12683_v32 }
0x1f33   :  { %12278 = vmatprep.subr.mxu0 %v17733_v53 }
0x1ffe   :  { %v8985_v18 = vpop.f32.mrb[216].mxu1  ;;  %v9029_v41 = vpop.f32.mrb[172].mxu0 }
0x1fff   :  { %v8991_v2 = vpack.c.bf16 %v8985_v18, %v8985_v18  ;;  %v12235_v29 = vpop.f32.mrb[217].mxu1  ;;  %v12241_v34 = vpop.f32.mrb[173].mxu0  ;;  %v9035_v51 = vpack.c.bf16 %v9029_v41, %v9029_v41 }
0x2000   :  { %v8988_v7 = vpop.f32.mrb[218].mxu1  ;;  %v9032_v20 = vpop.f32.mrb[174].mxu0 }
0x2001   :  { %v12236_v40 = vpop.f32.mrb[219].mxu1  ;;  %12248 = vmatmul.mubr.msk.bf16.vlgmr.msra.gmra.mrb[220].mxu1 %vm6791_vm2, %v8991_v2  ;;  %v12242_v14 = vpop.f32.mrb[175].mxu0 }
0x2002   :  { %12252 = vmatpush3.bf16.msra.mxu1 %v13699_v35  ;;  %12255 = vmatprep.mubr.msk.bf16.mxu1 %vm13758_vm3, %v17733_v53 }
0x2003   :  { %12253 = vmatprep.subr.bf16.mxu1 %v17733_v53 }
0x2006   :  { %12254 = vmatpush3.bf16.msra.mxu1 %v13700_v36 }
0x2007   :  { %12259 = vmatprep.subr.bf16.mxu1 %v17733_v53 }
0x200d   :  { %12256 = vmatmul.mubr.msk.bf16.vlgmr.msra.gmra.mrb[220].mxu1 %vm6791_vm2, %v8943_v9 }
0x200e   :  { %12260 = vmatpush3.bf16.msra.mxu1 %v13701_v13  ;;  %12263 = vmatprep.mubr.msk.bf16.mxu1 %vm13758_vm3, %v17733_v53 }
0x200f   :  { %12261 = vmatprep.subr.bf16.mxu1 %v17733_v53 }
0x2012   :  { %12262 = vmatpush3.bf16.msra.mxu1 %v13702_v60 }
0x2013   :  { %12304 = vmatprep.subr.bf16.mxu1 %v17733_v53 }
0x2019   :  { %12264 = vmatmul.mubr.msk.bf16.vlgmr.msra.gmra.mrb[220].mxu1 %vm6791_vm2, %v9035_v51 }
0x201a   :  { %12308 = vmatprep.mubr.msk.bf16.mxu1 %vm13758_vm3, %v17733_v53  ;;  %12305 = vmatpush3.bf16.msra.mxu1 %v17197_v0  ;;  %v8942_v0 = vld [vmem:[%s17431_s20 + $0x1] sm:$0x1]  ;;  %s13731_s20 = scalar_lea.vmem %s10687_s3, 32 }
0x201b   :  { %12306 = vmatprep.subr.bf16.mxu1 %v17733_v53  ;;  %p13732_p0 = scmp.ne.s32.totalorder %s10687_s3, %s13731_s20  ;;  %p13737_p2 = scmp.lt.s32.totalorder %s13731_s20, %s13731_s20 }
0x201d   :  { %p13738_p3 = por %p13737_p2, %p13736_p1 }
0x201e   :  { %12307 = vmatpush3.bf16.msra.mxu1 %v17202_v16  ;;  %v9675_v16 = vpop.permute.xlu0 %9674 }
0x201f   :  { %12320 = vmatprep.subr.bf16.mxu1 %v17733_v53  ;;  %p13739_p4 = pnand %p13738_p3, %p13732_p0 }
0x20ec   :  { %v9194_v48 = vpop.f32.mrb[220].mxu1 }
0x20ed   :  { %v9201_v22 = vsel %vm6791_vm2, %v9194_v48, 0.0  ;;  %v12265_v19 = vpop.f32.mrb[221].mxu1 }
0x20ee   :  { %v9202_v30 = vrot.slane %v9201_v22, 4  ;;  %v9197_v24 = vpop.f32.mrb[222].mxu1 }
0x20ef   :  { %v12266_v44 = vpop.f32.mrb[223].mxu1 }
0x20f0   :  { %v9203_v25 = vadd.f32 %v9202_v30, %v9201_v22 }
0x20f2   :  { %v9204_v31 = vrot.slane %v9203_v25, 2 }
0x20f4   :  { %v9205_v38 = vadd.f32 %v9204_v31, %v9203_v25  ;;  %v13706_v25 = vld [vmem:[%s17433_s22] ss:$0 sps:$4 sm:$0xcc]  }
0x20f6   :  { %v9206_v17 = vrot.slane %v9205_v38, 1 }
0x20f8   :  { %v9207_v47 = vadd.f32 %v9206_v17, %v9205_v38 }
0x20fa   :  { %12276 = vmatmul.mubr.msk.f32.vlgmr.msra.gmra.mrb[176].mxu0 %vm6791_vm2, %v9207_v47 }
0x20fb   :  { %12280 = vmatprep.mubr.msk.f32.mxu0 %vm13758_vm3, %v17733_v53  ;;  %12279 = vmatpush3.msra.mxu0 %v8928_v5 }
0x20fc   :  { %12685 = vmatprep.subr.bf16.mxu0 %v13757_v10 }
0x21cd   :  { %v9293_v61 = vpop.f32.mrb[176].mxu0 }
0x21ce   :  { %v9297_v62 = vmul.f32 0.03125, %v9293_v61  ;;  %v12277_v3 = vpop.f32.mrb[177].mxu0  ;;  %v9887_v61 = vrot.slane %v13706_v25, 2  ;;  %v9832_v25 = vld [vmem:[%s17435_s24] sm:$0x1] }
0x21cf   :  { %v13707_v3 = vld [vmem:[%s17432_s21] sm:$0xff]  }
0x21d0   :  { %12281 = vmatmul.mubr.msk.f32.vlgmr.msra.gmra.mrb[178].mxu0 %vm2052_vm1, %v9297_v62  ;;  %v9824_v62 = vld [vmem:[%s17433_s22] sm:$0x3] }
0x21d1   :  { %12687 = vmatpush3.bf16.msra.mxu0 %v12680_v4  ;;  %12291 = vmatprep.mubr.msk.f32.mxu0 %vm13758_vm3, %v17733_v53 }
0x21d2   :  { %12688 = vmatprep.subr.bf16.mxu0 %v13757_v10 }
0x21d5   :  { %12690 = vmatpush3.bf16.msra.mxu0 %v12683_v32  ;;  %v9771_v32 = vrot.slane %v13705_v57, 2 }
0x21d6   :  { %12294 = vmatprep.subr.mxu0 %v17733_v53 }
0x22a3   :  { %v9367_v1 = vpop.f32.mrb[178].mxu0 }
0x22a4   :  { %v9374_v56 = vrot.slane %v9367_v1, %v17734_v39  ;;  %v12282_v49 = vpop.f32.mrb[179].mxu0  ;;  %v17324_v1 = vld [vmem:[%s17434_s23] sm:$0xff]  }
0x22a5   :  { %v9831_v49 = vunpack.c.h.bf16 %v17324_v1 }
0x22a6   :  { %v9375_v54 = vsub.f32 %v9194_v48, %v9374_v56  ;;  %v8931_v48 = vld [vmem:[%s17429_s18 + $0x8] sm:$0x3]  ;;  %v9830_v56 = vunpack.c.l.bf16 %v17324_v1 }
0x22a8   :  { %v9376_v50 = vmul.f32 %v9375_v54, %v9375_v54 }
0x22aa   :  { %v9377_v11 = vsel %vm6791_vm2, %v9376_v50, 0.0 }
0x22ab   :  { %v9378_v37 = vrot.slane %v9377_v11, 4 }
0x22ad   :  { %v9379_v9 = vadd.f32 %v9378_v37, %v9377_v11  ;;  %v13708_v11 = vld [vmem:[%s17432_s21 + $0x8] sm:$0xff]  }
0x22af   :  { %v9380_v6 = vrot.slane %v9379_v9, 2 }
0x22b1   :  { %v9381_v52 = vadd.f32 %v9380_v6, %v9379_v9 }
0x22b3   :  { %v9382_v58 = vrot.slane %v9381_v52, 1 }
0x22b5   :  { %v9383_v27 = vadd.f32 %v9382_v58, %v9381_v52 }
0x22b7   :  { %12292 = vmatmul.mubr.msk.f32.vlgmr.msra.gmra.mrb[180].mxu0 %vm6791_vm2, %v9383_v27 }
0x22b8   :  { %12295 = vmatpush3.msra.mxu0 %v8928_v5  ;;  %12296 = vmatprep.mubr.msk.f32.mxu0 %vm13758_vm3, %v17733_v53 }
0x22b9   :  { %12299 = vmatprep.subr.mxu0 %v17733_v53 }
0x238a   :  { %v9453_v46 = vpop.f32.mrb[180].mxu0 }
0x238b   :  { %v9457_v23 = vmul.f32 0.03125, %v9453_v46  ;;  %v12293_v12 = vpop.f32.mrb[181].mxu0 }
0x238c   :  { %v13709_v12 = vld [vmem:[%s17432_s21 + $0x10] sm:$0xff]  }
0x238d   :  { %v9458_v8 = vadd.f32 1e-05, %v9457_v23 }
0x238f   :  { %13727 = vrsqrt.f32 %v9458_v8 }
0x2399   :  { %v13728_v45 = vpop.eup %13727 }
0x239a   :  { %v9460_v28 = vmul.f32 %v13728_v45, %v8941_v43 }
0x239c   :  { %12297 = vmatmul.mubr.msk.f32.vlgmr.msra.gmra.mrb[182].mxu0 %vm2052_vm1, %v9460_v28 }
0x239d   :  { %12300 = vmatpush3.msra.mxu0 %v8928_v5  ;;  %12301 = vmatprep.mubr.msk.f32.mxu0 %vm13758_vm3, %v17733_v53 }
0x239e   :  { %12312 = vmatprep.subr.bf16.mxu0 %v17733_v53 }
0x23a0   :  { %12302 = vmatmul.mubr.msk.f32.vlgmr.msra.gmra.mrb[184].mxu0 %vm2052_vm1, %v8942_v0 }
0x23a1   :  { %12316 = vmatprep.mubr.msk.bf16.mxu0 %vm13758_vm3, %v17733_v53  ;;  %12313 = vmatpush3.bf16.msra.mxu0 %v9675_v16 }
0x23a2   :  { %12314 = vmatprep.subr.bf16.mxu0 %v17733_v53 }
0x23a5   :  { %12315 = vmatpush3.bf16.msra.mxu0 %v9677_v26 }
0x23a6   :  { %12326 = vmatprep.subr.bf16.mxu0 %v17733_v53 }
0x246f   :  { %v9530_v21 = vpop.f32.mrb[182].mxu0 }
0x2470   :  { %v9537_v18 = vrot.slane %v9530_v21, %v17734_v39  ;;  %v12298_v35 = vpop.f32.mrb[183].mxu0 }
0x2472   :  { %v9538_v2 = vmul.f32 %v9537_v18, %v9375_v54  ;;  %v13104_v54 = vpack.i.bf16 %v9831_v49, %v9830_v56 }
0x2473   :  { %v9608_v41 = vpop.f32.mrb[184].mxu0 }
0x2474   :  { %v9615_v29 = vrot.slane %v9608_v41, %v17734_v39  ;;  %v12303_v34 = vpop.f32.mrb[185].mxu0  ;;  %13105 = vrot.lane.b32.xlu0 %v13104_v54, %s13761_s17 }
0x2476   :  { %v9616_v7 = vadd.f32 %v9615_v29, %v9538_v2 }
0x2478   :  { %v9617_v20 = vmax.f32 %v9616_v7, 0.0 }
0x247a   :  { %v9618_v40 = vpack.c.bf16 %v9617_v20, %v9617_v20 }
0x247c   :  { %12309 = vmatmul.mubr.msk.bf16.vlgmr.msra.gmra.mrb[224].mxu1 %vm6791_vm2, %v9618_v40  ;;  %12317 = vmatmul.mubr.msk.bf16.vlgmr.msra.gmra.mrb[188].mxu0 %vm6791_vm2, %v9618_v40  ;;  %v9822_v40 = vld [vmem:[%s17432_s21 + $0x18] sm:$0xf]  ;;  %s13762_s21 = smov 120  }
0x247d   :  { %12322 = vmatprep.mubr.msk.bf16.mxu1 %vm13758_vm3, %v17733_v53  ;;  %12328 = vmatprep.mubr.msk.bf16.mxu0 %vm13758_vm3, %v17733_v53 }
0x247e   :  { %10539 = vrot.lane.b32.xlu1 %v17324_v1, %s13762_s21 }
0x24e6   :  { %v13106_v43 = vpop.permute.xlu0 %13105 }
0x24e7   :  { %v13108_v45 = vunpack.i.h.bf16 %v13106_v43  ;;  %v13107_v28 = vunpack.i.l.bf16 %v13106_v43 }
0x24e9   :  { %v12692_v0 = vpack.c.bf16 %v13108_v45, %v13107_v28 }
0x254f   :  { %v9668_v14 = vpop.f32.mrb[224].mxu1  ;;  %v9714_v36 = vpop.f32.mrb[188].mxu0 }
0x2550   :  { %v9720_v13 = vmax.f32 %v9668_v14, %v9714_v36  ;;  %v12310_v60 = vpop.f32.mrb[225].mxu1  ;;  %v12318_v51 = vpop.f32.mrb[189].mxu0  ;;  %v9823_v14 = vunpack.c.l.bf16 %v9822_v40 }
0x2551   :  { %v9671_v55 = vpop.f32.mrb[226].mxu1  ;;  %v9717_v33 = vpop.f32.mrb[190].mxu0 }
0x2552   :  { %v9721_v15 = vpack.c.bf16 %v9720_v13, %v9720_v13  ;;  %v12311_v63 = vpop.f32.mrb[227].mxu1  ;;  %v12319_v59 = vpop.f32.mrb[191].mxu0 }
0x2554   :  { %v9726_v4 = vsel %vm8947_vm5, %v9721_v15, 0 }
0x2555   :  { %12321 = vmatpush3.bf16.msra.mxu1 %v9726_v4  ;;  %12327 = vmatpush3.bf16.msra.mxu0 %v9726_v4 }
0x2556   :  { %12332 = vmatprep.subr.bf16.mxu1 %v17733_v53  ;;  %12338 = vmatprep.subr.bf16.mxu0 %v17733_v53 }
0x2558   :  { %12323 = vmatmul.mubr.msk.bf16.vlgmr.msra.gmra.mrb[228].mxu1 %vm2052_vm1, %v8931_v48  ;;  %12329 = vmatmul.mubr.msk.bf16.vlgmr.msra.gmra.mrb[192].mxu0 %vm2052_vm1, %v9771_v32 }
0x2559   :  { %12334 = vmatprep.mubr.msk.bf16.mxu1 %vm13758_vm3, %v17733_v53  ;;  %12340 = vmatprep.mubr.msk.bf16.mxu0 %vm13758_vm3, %v17733_v53 }
0x262b   :  { %v9762_v22 = vpop.f32.mrb[228].mxu1  ;;  %v9809_v19 = vpop.f32.mrb[192].mxu0 }
0x262c   :  { %v9815_v30 = vmax.f32 %v9762_v22, %v9809_v19  ;;  %v12324_v24 = vpop.f32.mrb[229].mxu1  ;;  %v12330_v44 = vpop.f32.mrb[193].mxu0 }
0x262d   :  { %v9765_v31 = vpop.f32.mrb[230].mxu1  ;;  %v9812_v38 = vpop.f32.mrb[194].mxu0 }
0x262e   :  { %v9834_v17 = vpack.c.bf16 %v9815_v30, %v9815_v30  ;;  %v12325_v47 = vpop.f32.mrb[231].mxu1  ;;  %v12331_v42 = vpop.f32.mrb[195].mxu0 }
0x262f   :  { %v10540_v47 = vpop.permute.xlu1 %10539 }
0x2630   :  { %v9841_v5 = vsel %vm9839_vm6, %v9834_v17, 0 }
0x2631   :  { %12333 = vmatpush3.bf16.msra.mxu1 %v9841_v5  ;;  %12339 = vmatpush3.bf16.msra.mxu0 %v9841_v5 }
0x2632   :  { %12344 = vmatprep.subr.bf16.mxu1 %v17733_v53  ;;  %12691 = vmatprep.subr.bf16.mxu0 %v13757_v10 }
0x2634   :  { %12335 = vmatmul.mubr.msk.bf16.vlgmr.msra.gmra.mrb[232].mxu1 %vm9835_vm7, %v9824_v62  ;;  %12341 = vmatmul.mubr.msk.bf16.vlgmr.msra.gmra.mrb[196].mxu0 %vm9835_vm7, %v9887_v61 }
0x2635   :  { %12346 = vmatprep.mubr.msk.bf16.mxu1 %vm13758_vm3, %v17733_v53  ;;  %12366 = vmatprep.mubr.msk.f32.mxu0 %vm13758_vm3, %v17733_v53 }
0x2636   :  { %12345 = vmatpush3.bf16.msra.mxu1 %v13707_v3  ;;  %12693 = vmatpush3.bf16.msra.mxu0 %v12692_v0 }
0x2637   :  { %12350 = vmatprep.subr.bf16.mxu1 %v17733_v53  ;;  %12369 = vmatprep.subr.mxu0 %v17733_v53 }
0x2707   :  { %v9877_v50 = vpop.f32.mrb[232].mxu1  ;;  %v9925_v37 = vpop.f32.mrb[196].mxu0 }
0x2708   :  { %v9883_v9 = vpack.c.bf16 %v9877_v50, %v9877_v50  ;;  %v12336_v6 = vpop.f32.mrb[233].mxu1  ;;  %v12342_v52 = vpop.f32.mrb[197].mxu0  ;;  %v9931_v8 = vpack.c.bf16 %v9925_v37, %v9925_v37 }
0x2709   :  { %v9880_v58 = vpop.f32.mrb[234].mxu1  ;;  %v9928_v27 = vpop.f32.mrb[198].mxu0 }
0x270a   :  { %v12337_v46 = vpop.f32.mrb[235].mxu1  ;;  %12347 = vmatmul.mubr.msk.bf16.vlgmr.msra.gmra.mrb[236].mxu1 %vm7959_vm4, %v9883_v9  ;;  %v12343_v23 = vpop.f32.mrb[199].mxu0 }
0x270b   :  { %12351 = vmatpush3.bf16.msra.mxu1 %v13708_v11  ;;  %12352 = vmatprep.mubr.msk.bf16.mxu1 %vm13758_vm3, %v17733_v53 }
0x270c   :  { %12356 = vmatprep.subr.bf16.mxu1 %v17733_v53 }
0x2716   :  { %12353 = vmatmul.mubr.msk.bf16.vlgmr.msra.gmra.mrb[236].mxu1 %vm7959_vm4, %v9834_v17  ;;  %v9833_v17 = vld [vmem:[%s17435_s24 + $0x1] sm:$0x1] }
0x2717   :  { %12357 = vmatpush3.bf16.msra.mxu1 %v13709_v12  ;;  %12358 = vmatprep.mubr.msk.bf16.mxu1 %vm13758_vm3, %v17733_v53 }
0x2718   :  { %12391 = vmatprep.subr.bf16.mxu1 %v17733_v53 }
0x2722   :  { %12359 = vmatmul.mubr.msk.bf16.vlgmr.msra.gmra.mrb[236].mxu1 %vm7959_vm4, %v9931_v8 }
0x2723   :  { %12393 = vmatprep.mubr.msk.bf16.mxu1 %vm13758_vm3, %v17733_v53  ;;  %12392 = vmatpush3.bf16.msra.mxu1 %v17324_v1 }
0x2724   :  { %12403 = vmatprep.subr.bf16.mxu1 %v17733_v53 }
0x27f5   :  { %v10072_v16 = vpop.f32.mrb[236].mxu1 }
0x27f6   :  { %v10080_v26 = vsel %vm10079_vm8, %v10072_v16, 0.0  ;;  %v12360_v21 = vpop.f32.mrb[237].mxu1 }
0x27f7   :  { %v10081_v18 = vrot.slane %v10080_v26, 4  ;;  %v10075_v35 = vpop.f32.mrb[238].mxu1 }
0x27f8   :  { %v12361_v41 = vpop.f32.mrb[239].mxu1 }
0x27f9   :  { %v10082_v2 = vadd.f32 %v10081_v18, %v10080_v26 }
0x27fb   :  { %v10083_v29 = vrot.slane %v10082_v2, 2 }
0x27fd   :  { %v10084_v34 = vadd.f32 %v10083_v29, %v10082_v2 }
0x27ff   :  { %v10085_v7 = vrot.slane %v10084_v34, 1 }
0x2801   :  { %v10086_v20 = vadd.f32 %v10085_v7, %v10084_v34 }
0x2803   :  { %12367 = vmatmul.mubr.msk.f32.vlgmr.msra.gmra.mrb[186].mxu0 %vm7959_vm4, %v10086_v20 }
0x2804   :  { %12371 = vmatprep.mubr.msk.f32.mxu0 %vm13758_vm3, %v17733_v53  ;;  %12370 = vmatpush3.msra.mxu0 %v9823_v14 }
0x2805   :  { %12694 = vmatprep.subr.bf16.mxu0 %v13757_v10 }
0x28d6   :  { %v10164_v36 = vpop.f32.mrb[186].mxu0 }
0x28d7   :  { %v10168_v13 = vmul.f32 0.125, %v10164_v36  ;;  %v12368_v60 = vpop.f32.mrb[187].mxu0 }
0x28d9   :  { %12372 = vmatmul.mubr.msk.f32.vlgmr.msra.gmra.mrb[200].mxu0 %vm2052_vm1, %v10168_v13 }
0x28da   :  { %12696 = vmatpush3.bf16.msra.mxu0 %v12692_v0  ;;  %12378 = vmatprep.mubr.msk.f32.mxu0 %vm13758_vm3, %v17733_v53 }
0x28db   :  { %12381 = vmatprep.subr.mxu0 %v17733_v53 }
0x29ac   :  { %v10238_v51 = vpop.f32.mrb[200].mxu0 }
0x29ad   :  { %v10245_v57 = vrot.slane %v10238_v51, %v17734_v39  ;;  %v12373_v55 = vpop.f32.mrb[201].mxu0 }
0x29af   :  { %v10246_v33 = vsub.f32 %v10072_v16, %v10245_v57 }
0x29b1   :  { %v10247_v15 = vmul.f32 %v10246_v33, %v10246_v33 }
0x29b3   :  { %v10248_v63 = vsel %vm10079_vm8, %v10247_v15, 0.0 }
0x29b4   :  { %v10249_v10 = vrot.slane %v10248_v63, 4 }
0x29b6   :  { %v10250_v59 = vadd.f32 %v10249_v10, %v10248_v63 }
0x29b8   :  { %v10251_v4 = vrot.slane %v10250_v59, 2 }
0x29ba   :  { %v10252_v32 = vadd.f32 %v10251_v4, %v10250_v59 }
0x29bc   :  { %v10253_v48 = vrot.slane %v10252_v32, 1 }
0x29be   :  { %v10254_v22 = vadd.f32 %v10253_v48, %v10252_v32 }
0x29c0   :  { %12379 = vmatmul.mubr.msk.f32.vlgmr.msra.gmra.mrb[202].mxu0 %vm7959_vm4, %v10254_v22 }
0x29c1   :  { %12382 = vmatpush3.msra.mxu0 %v9823_v14  ;;  %12383 = vmatprep.mubr.msk.f32.mxu0 %vm13758_vm3, %v17733_v53 }
0x29c2   :  { %12386 = vmatprep.subr.mxu0 %v17733_v53 }
0x2a93   :  { %v10324_v19 = vpop.f32.mrb[202].mxu0 }
0x2a94   :  { %v10328_v30 = vmul.f32 0.125, %v10324_v19  ;;  %v12380_v24 = vpop.f32.mrb[203].mxu0 }
0x2a96   :  { %v10329_v44 = vadd.f32 1e-05, %v10328_v30 }
0x2a98   :  { %13729 = vrsqrt.f32 %v10329_v44 }
0x2aa2   :  { %v13730_v31 = vpop.eup %13729 }
0x2aa3   :  { %v10331_v38 = vmul.f32 %v13730_v31, %v9832_v25 }
0x2aa5   :  { %12384 = vmatmul.mubr.msk.f32.vlgmr.msra.gmra.mrb[204].mxu0 %vm2052_vm1, %v10331_v38 }
0x2aa6   :  { %12387 = vmatpush3.msra.mxu0 %v9823_v14  ;;  %12388 = vmatprep.mubr.msk.f32.mxu0 %vm13758_vm3, %v17733_v53 }
0x2aa7   :  { %12397 = vmatprep.subr.bf16.mxu0 %v17733_v53 }
0x2aa9   :  { %12389 = vmatmul.mubr.msk.f32.vlgmr.msra.gmra.mrb[206].mxu0 %vm2052_vm1, %v9833_v17 }
0x2aaa   :  { %12399 = vmatprep.mubr.msk.bf16.mxu0 %vm13758_vm3, %v17733_v53  ;;  %12398 = vmatpush3.bf16.msra.mxu0 %v10540_v47 }
0x2aab   :  { %12409 = vmatprep.subr.bf16.mxu0 %v17733_v53 }
0x2b78   :  { %v10401_v42 = vpop.f32.mrb[204].mxu0 }
0x2b79   :  { %v10408_v5 = vrot.slane %v10401_v42, %v17734_v39  ;;  %v12385_v61 = vpop.f32.mrb[205].mxu0 }
0x2b7b   :  { %v10409_v3 = vmul.f32 %v10408_v5, %v10246_v33 }
0x2b7c   :  { %v10479_v62 = vpop.f32.mrb[206].mxu0 }
0x2b7d   :  { %v10486_v1 = vrot.slane %v10479_v62, %v17734_v39  ;;  %v12390_v56 = vpop.f32.mrb[207].mxu0  ;;  %v13711_v39 = vld [vmem:[%s17433_s22 + $0x4] ss:$0 sps:$4 sm:$0x22]  }
0x2b7e   :  { %v10633_v43 = vrot.slane %v13711_v39, 1 }
0x2b7f   :  { %v10487_v49 = vadd.f32 %v10486_v1, %v10409_v3 }
0x2b81   :  { %v10488_v54 = vmax.f32 %v10487_v49, 0.0 }
0x2b83   :  { %v10489_v50 = vpack.c.bf16 %v10488_v54, %v10488_v54 }
0x2b85   :  { %12394 = vmatmul.mubr.msk.bf16.vlgmr.msra.gmra.mrb[240].mxu1 %vm7959_vm4, %v10489_v50  ;;  %12400 = vmatmul.mubr.msk.bf16.vlgmr.msra.gmra.mrb[208].mxu0 %vm7959_vm4, %v10489_v50 }
0x2b86   :  { %12405 = vmatprep.mubr.msk.bf16.mxu1 %vm13758_vm3, %v17733_v53  ;;  %12411 = vmatprep.mubr.msk.bf16.mxu0 %vm13758_vm3, %v17733_v53  ;;  %v9826_v53 = vld [vmem:[%s17433_s22 + $0x4] sm:$0x1] }
0x2c58   :  { %v10533_v11 = vpop.f32.mrb[240].mxu1  ;;  %v10576_v37 = vpop.f32.mrb[208].mxu0 }
0x2c59   :  { %v10582_v9 = vmax.f32 %v10533_v11, %v10576_v37  ;;  %v12395_v6 = vpop.f32.mrb[241].mxu1  ;;  %v12401_v52 = vpop.f32.mrb[209].mxu0 }
0x2c5a   :  { %v10536_v58 = vpop.f32.mrb[242].mxu1  ;;  %v10579_v27 = vpop.f32.mrb[210].mxu0 }
0x2c5b   :  { %v10583_v46 = vpack.c.bf16 %v10582_v9, %v10582_v9  ;;  %v12396_v23 = vpop.f32.mrb[243].mxu1  ;;  %v12402_v12 = vpop.f32.mrb[211].mxu0 }
0x2c5d   :  { %v10588_v8 = vsel %vm9839_vm6, %v10583_v46, 0 }
0x2c5e   :  { %12404 = vmatpush3.bf16.msra.mxu1 %v10588_v8  ;;  %12410 = vmatpush3.bf16.msra.mxu0 %v10588_v8 }
0x2c61   :  { %12406 = vmatmul.mubr.msk.bf16.vlgmr.msra.gmra.mrb[244].mxu1 %vm9835_vm7, %v9826_v53  ;;  %12412 = vmatmul.mubr.msk.bf16.vlgmr.msra.gmra.mrb[212].mxu0 %vm9835_vm7, %v10633_v43 }
0x2d34   :  { %v10624_v45 = vpop.f32.mrb[244].mxu1  ;;  %v10671_v28 = vpop.f32.mrb[212].mxu0 }
0x2d35   :  { %v10677_v0 = vmax.f32 %v10624_v45, %v10671_v28  ;;  %v12407_v16 = vpop.f32.mrb[245].mxu1  ;;  %v12413_v26 = vpop.f32.mrb[213].mxu0 }
0x2d36   :  { %v10627_v21 = vpop.f32.mrb[246].mxu1  ;;  %v10674_v18 = vpop.f32.mrb[214].mxu0 }
0x2d37   :  { %v12408_v35 = vpop.f32.mrb[247].mxu1  ;;  %v12414_v41 = vpop.f32.mrb[215].mxu0  ;;  %10679 = vst.msk [vmem:[#allocation2] sm:$0x3] %vm10678_vm9, %v10677_v0 }
0x2d38   :  { %13742 = shalt.err (!%p13739_p4)
}
0x2d39   :  { %s13743_s26 = scalar_lea.hbm %s17436_s25, 32 }
0x2d3a   :  { %p13744_p5 = scmp.ne.s32.totalorder %s17436_s25, %s13743_s26  ;;  %p13747_p6 = scmp.lt.u32.totalorder %s13743_s26, %s17436_s25 }
0x2d3c   :  { %p13749_p7 = pnand %p13747_p6, %p13744_p5 }
0x2d3e   :  { %13752 = shalt.err (!%p13749_p7)
}
0x2d3f   :  { %10689 = dma.vmem_to_hbm [thread:$0]  %s10687_s3, 32, %s17436_s25, [#allocation3]  }
0x2d40   :  { %13753 = dma.done.wait [#allocation3], 32  }
0x2d41   :  { %13754 = vsyncadd [#allocation3], 4294967264 }
0x2d42   :  { %10693 = vsyncpa [#allocation3], 1 }

</bundles_post_ra>
